<compile_context>
chip_gen: v5e
topology: v5e:2x2
jax: 0.10.0
libtpu: 0.0.40
codegen_flags: <defaults>
</compile_context>

<pallas_src>
import functools

import jax
import jax.numpy as jnp
from jax.experimental import pallas as pl
from jax.experimental.pallas import tpu as pltpu

EPS = 1e-30


def _silu(v):
    return v * jax.nn.sigmoid(v)


def egnn_kernel(
    h_ref, xp_ref, hws_ref, hwd_ref,                   # node feats + pre-folded h@We1{src,dst}
    a_ref, idx_ref, dstr_ref, u_ref,                   # per-edge streams + global feature
    we1r_ref, we1a_ref, be1_ref, we2_ref, be2_ref,     # edge_mlp (h terms pre-folded away)
    wc1_ref, bc1_ref, wc2_ref,                         # coord_mlp
    wn1h_ref, wn1n_ref, wn1u_ref, bn1_ref, wn2_ref, bn2_ref,   # node_mlp
    wg1u_ref, wg1h_ref, bg1_ref, wg2_ref,              # graph_mlp
    h_out, x_out, u_out,
    acc_hx,
):
    f32 = jnp.float32
    bf16 = jnp.bfloat16
    k = pl.program_id(0)
    n_nodes = h_ref.shape[0]
    tm = idx_ref.shape[0]
    H = hws_ref.shape[1]
    XP = xp_ref.shape[1]

    @pl.when(k == 0)
    def _init():
        acc_hx[...] = jnp.zeros_like(acc_hx)

    # --- one-hot gather / scatter masks, built once each, in the dtype consumed ------
    idx = idx_ref[...]                                   # (TM, 8) i32: col0 = src, col1 = dst
    src_col = idx[:, 0:1]
    dst_col = idx[:, 1:2]
    lane_node = jax.lax.broadcasted_iota(jnp.int32, (tm, n_nodes), 1)   # edge-major
    eq_src = lane_node == src_col
    eq_dst = lane_node == dst_col
    g_src = eq_src.astype(bf16)                          # (TM, N) bf16 gather operator
    g_dst = eq_dst.astype(bf16)
    diff_f = eq_src.astype(f32) - eq_dst.astype(f32)     # (TM, N) exact +/-1 mask (f32)

    sub_node = jax.lax.broadcasted_iota(jnp.int32, (n_nodes, tm), 0)    # node-major
    s_dst = (sub_node == dstr_ref[...]).astype(bf16)     # (N, TM) bf16 scatter operator

    x_all = xp_ref[...]                                  # (N, XP) f32 lane-padded coords

    # --- per-edge geometry: one +/-1 mask matmul --------------------------------------
    # TODO(synk): periodic_difference_torch not provided by the spec; plain src - dst used.
    x_diff = jnp.dot(diff_f, x_all, preferred_element_type=f32)        # (TM, XP)
    radial = jnp.sum(x_diff * x_diff, axis=-1, keepdims=True)          # (TM, 1)
    inv_norm = jax.lax.rsqrt(radial + EPS)
    x_dir = x_diff * inv_norm

    # --- edge MLP (phi_e): h terms pre-folded so both gathers hit an H-wide RHS -------
    pre1 = (jnp.dot(g_src, hws_ref[...], preferred_element_type=f32)
            + jnp.dot(g_dst, hwd_ref[...], preferred_element_type=f32)
            + jnp.dot(a_ref[...], we1a_ref[...], preferred_element_type=f32)
            + radial * we1r_ref[...]            # 1-wide radial input handled on the VPU
            + be1_ref[...])
    m1 = _silu(pre1)
    msg_h = _silu(jnp.dot(m1.astype(bf16), we2_ref[...],
                          preferred_element_type=f32) + be2_ref[...])  # (TM, H)

    # --- coord MLP (phi_x): hidden->1 head on VPU + lane reduction --------------------
    c1 = _silu(jnp.dot(msg_h.astype(bf16), wc1_ref[...],
                       preferred_element_type=f32) + bc1_ref[...])
    coord_w = jnp.sum(c1 * wc2_ref[...], axis=-1, keepdims=True)       # (TM, 1)
    deg_row = (jax.lax.broadcasted_iota(jnp.int32, (1, XP), 1) == XP - 1).astype(f32)
    msg_x = coord_w * x_dir + deg_row        # degree counter rides in reserved lane XP-1

    # --- fused scatter: ONE 256-lane-wide MXU pass for h-sum, x-sum and degree --------
    fused = jnp.concatenate([msg_h.astype(bf16), msg_x.astype(bf16)], axis=-1)  # (TM, H+XP)
    acc_hx[...] += jnp.dot(s_dst, fused, preferred_element_type=f32)

    # --- finalize on the last edge tile ------------------------------------------------
    @pl.when(k == pl.num_programs(0) - 1)
    def _finalize():
        acc = acc_hx[...]
        h_neigh = acc[:, :H]                                           # (N, H) message sum
        x_blk = acc[:, H:]                                             # (N, XP) coord sum (+deg)
        deg = jnp.sum(x_blk * deg_row, axis=-1, keepdims=True)         # (N, 1) in-degree
        x_neigh = x_blk * (1.0 / jnp.maximum(deg, 1.0))                # mean (exact division)

        u_bf = u_ref[...].astype(bf16)                                 # (1, GF)

        # node MLP (phi_h), concat-free split-weight partial matmuls
        npre = (jnp.dot(h_ref[...], wn1h_ref[...], preferred_element_type=f32)
                + jnp.dot(h_neigh.astype(bf16), wn1n_ref[...], preferred_element_type=f32)
                + jnp.dot(u_bf, wn1u_ref[...], preferred_element_type=f32)
                + bn1_ref[...])
        h_new = jnp.dot(_silu(npre).astype(bf16), wn2_ref[...],
                        preferred_element_type=f32) + bn2_ref[...]     # (N, out)

        h_out[...] = h_new
        x_out[...] = x_all + x_neigh      # reserved degree lane is sliced off by the wrapper

        # graph MLP (updates global feature u), runs exactly once
        h_mean = jnp.mean(h_new, axis=0, keepdims=True)                # (1, out)
        gpre = (jnp.dot(u_bf, wg1u_ref[...], preferred_element_type=f32)
                + jnp.dot(h_mean.astype(bf16), wg1h_ref[...], preferred_element_type=f32)
                + bg1_ref[...])
        u_out[...] = jnp.dot(_silu(gpre).astype(bf16), wg2_ref[...],
                             preferred_element_type=f32)


def egnn_conv(node_feat, coord_feat, edge_feat, graph_feat, src, dst, params,
              *, edge_tile=256):
    """Returns (h_out, x_out, u_out) matching EGNNConv.forward with graph_feat given."""
    (We1, be1, We2, be2, Wc1, bc1, Wc2, Wn1, bn1, Wn2, bn2, Wg1, bg1, Wg2) = params
    f32, bf16, i32 = jnp.float32, jnp.bfloat16, jnp.int32
    hi = jax.lax.Precision.HIGHEST

    N, in_size = node_feat.shape
    hx = coord_feat.shape[1]
    M = src.shape[0]
    ef = edge_feat.shape[1]
    gf = graph_feat.shape[0]
    H = We2.shape[1]
    out_size = Wn2.shape[1]

    TM = edge_tile
    num_tiles = pl.cdiv(M, TM)
    M_pad = num_tiles * TM
    pad = M_pad - M
    XP = max(128, -(-(hx + 1) // 128) * 128)   # lane-dense coords + 1 reserved degree lane

    # --- glue (one-time, cheap): pad edges, pre-fold h gathers into We1, cast ----------
    src_p = jnp.concatenate([src.astype(i32), jnp.zeros((pad,), i32)])
    # padded edges point at node id == N (out of range) -> all-zero one-hot rows/cols -> no-op
    dst_p = jnp.concatenate([dst.astype(i32), jnp.full((pad,), N, i32)])
    a_p = jnp.concatenate([edge_feat.astype(f32), jnp.zeros((pad, ef), f32)],
                          axis=0).astype(bf16)
    idx_ed = jnp.zeros((M_pad, 8), i32).at[:, 0].set(src_p).at[:, 1].set(dst_p)
    dst_row = dst_p.reshape(1, M_pad)

    h_bf = node_feat.astype(bf16)
    x_pad = jnp.zeros((N, XP), f32).at[:, :hx].set(coord_feat.astype(f32))
    u2 = graph_feat.reshape(1, gf).astype(f32)

    # fold node-feature gathers into the edge-MLP first layer (exact by associativity)
    hws = jnp.dot(node_feat, We1[:in_size], precision=hi).astype(bf16)              # (N, H)
    hwd = jnp.dot(node_feat, We1[in_size:2 * in_size], precision=hi).astype(bf16)   # (N, H)
    we1_r = We1[2 * in_size:2 * in_size + 1].astype(f32)    # (1, H) radial row (VPU)
    we1_a = We1[2 * in_size + 1:].astype(bf16)
    wn1_h = Wn1[:in_size].astype(bf16)
    wn1_n = Wn1[in_size:in_size + H].astype(bf16)
    wn1_u = Wn1[in_size + H:].astype(bf16)
    wg1_u = Wg1[:gf].astype(bf16)
    wg1_h = Wg1[gf:].astype(bf16)
    wc2_row = Wc2.reshape(1, H).astype(f32)                 # coord head as row (VPU)

    items = []

    def add(arr, spec=None):
        if spec is None:
            spec = pl.BlockSpec(arr.shape, lambda k: (0, 0))   # VMEM-resident across edge tiles
        items.append((arr, spec))

    add(h_bf)
    add(x_pad)
    add(hws)
    add(hwd)
    add(a_p, pl.BlockSpec((TM, ef), lambda k: (k, 0)))
    add(idx_ed, pl.BlockSpec((TM, 8), lambda k: (k, 0)))
    add(dst_row, pl.BlockSpec((1, TM), lambda k: (0, k)))
    add(u2)
    for w in (we1_r, we1_a, be1.astype(f32), We2.astype(bf16), be2.astype(f32),
              Wc1.astype(bf16), bc1.astype(f32), wc2_row,
              wn1_h, wn1_n, wn1_u, bn1.astype(f32), Wn2.astype(bf16), bn2.astype(f32),
              wg1_u, wg1_h, bg1.astype(f32), Wg2.astype(bf16)):
        add(w)

    inputs, in_specs = zip(*items)

    out_shape = (
        jax.ShapeDtypeStruct((N, out_size), f32),
        jax.ShapeDtypeStruct((N, XP), f32),
        jax.ShapeDtypeStruct((1, H), f32),
    )
    out_specs = (
        pl.BlockSpec((N, out_size), lambda k: (0, 0)),
        pl.BlockSpec((N, XP), lambda k: (0, 0)),
        pl.BlockSpec((1, H), lambda k: (0, 0)),
    )

    fn = pl.pallas_call(
        egnn_kernel,
        out_shape=out_shape,
        grid=(num_tiles,),
        in_specs=list(in_specs),
        out_specs=out_specs,
        scratch_shapes=[
            pltpu.VMEM((N, H + XP), f32),   # fused h-sum | x-sum | degree accumulator
        ],
        compiler_params=pltpu.CompilerParams(
            # the edge-tile axis is a reduction (accumulator carried across it)
            dimension_semantics=("arbitrary",),
            vmem_limit_bytes=64 * 1024 * 1024,
        ),
    )
    h_out, x_out_pad, u_out = fn(*inputs)
    return h_out, x_out_pad[:, :hx], u_out


def reference(node_feat, coord_feat, edge_feat, graph_feat, src, dst, params):
    """Pure-JAX reference mirroring the PyTorch forward."""
    (We1, be1, We2, be2, Wc1, bc1, Wc2, Wn1, bn1, Wn2, bn2, Wg1, bg1, Wg2) = params
    dot = functools.partial(jnp.dot, precision=jax.lax.Precision.HIGHEST)
    N, M = node_feat.shape[0], src.shape[0]

    x_diff = coord_feat[src] - coord_feat[dst]
    radial = jnp.sum(x_diff ** 2, axis=1, keepdims=True)
    x_diff = x_diff / (jnp.sqrt(radial + EPS) + EPS)
    f = jnp.concatenate([node_feat[src], node_feat[dst], radial, edge_feat], axis=-1)
    msg_h = _silu(dot(_silu(dot(f, We1) + be1), We2) + be2)
    msg_x = dot(_silu(dot(msg_h, Wc1) + bc1), Wc2) * x_diff

    h_neigh = jax.ops.segment_sum(msg_h, dst, N)
    deg = jax.ops.segment_sum(jnp.ones((M,), jnp.float32), dst, N)[:, None]
    x_neigh = jax.ops.segment_sum(msg_x, dst, N) / jnp.maximum(deg, 1.0)

    u = graph_feat.reshape(1, -1)
    nf = jnp.concatenate([node_feat, h_neigh, jnp.broadcast_to(u, (N, u.shape[1]))], axis=-1)
    h = dot(_silu(dot(nf, Wn1) + bn1), Wn2) + bn2
    x = coord_feat + x_neigh
    gin = jnp.concatenate([u, jnp.mean(h, axis=0, keepdims=True)], axis=-1)
    u_out = dot(_silu(dot(gin, Wg1) + bg1), Wg2)
    return h, x, u_out


def _init_linear(key, fan_in, fan_out, bias=True):
    kw, kb = jax.random.split(key)
    bound = 1.0 / (fan_in ** 0.5)
    W = jax.random.uniform(kw, (fan_in, fan_out), jnp.float32, -bound, bound)
    if bias:
        b = jax.random.uniform(kb, (1, fan_out), jnp.float32, -bound, bound)
        return W, b
    return (W,)


if __name__ == "__main__":
    # Lane-friendly small sizes: hidden/out = 128, N small, M = 2 edge tiles of 256.
    # (out_size == hidden_size, as the module's graph_mlp input dim assumes.)
    in_size, hidden, out_size = 16, 128, 128
    ef_size, gf_size, coord_dim = 4, 8, 3
    N, M = 64, 512

    key = jax.random.PRNGKey(0)
    keys = jax.random.split(key, 12)

    We1, be1 = _init_linear(keys[0], 2 * in_size + ef_size + 1, hidden)
    We2, be2 = _init_linear(keys[1], hidden, hidden)
    Wc1, bc1 = _init_linear(keys[2], hidden, hidden)
    (Wc2,) = _init_linear(keys[3], hidden, 1, bias=False)
    Wn1, bn1 = _init_linear(keys[4], in_size + hidden + gf_size, hidden)
    Wn2, bn2 = _init_linear(keys[5], hidden, out_size)
    Wg1, bg1 = _init_linear(keys[6], gf_size + hidden, hidden)
    (Wg2,) = _init_linear(keys[7], hidden, hidden, bias=False)
    params = (We1, be1, We2, be2, Wc1, bc1, Wc2, Wn1, bn1, Wn2, bn2, Wg1, bg1, Wg2)

    node_feat = jax.random.normal(keys[8], (N, in_size), jnp.float32)
    coord_feat = jax.random.normal(keys[9], (N, coord_dim), jnp.float32)
    edge_feat = jax.random.normal(keys[10], (M, ef_size), jnp.float32)
    graph_feat = jax.random.normal(keys[11], (gf_size,), jnp.float32)

    # Deterministic edge list (every node receives exactly 8 edges).
    src = jnp.arange(M, dtype=jnp.int32) % N
    dst = (jnp.arange(M, dtype=jnp.int32) * 3 + 1) % N

    h, x, u = egnn_conv(node_feat, coord_feat, edge_feat, graph_feat, src, dst,
                        params, edge_tile=256)
    jax.block_until_ready((h, x, u))

    h_r, x_r, u_r = reference(node_feat, coord_feat, edge_feat, graph_feat, src, dst, params)
    assert h.shape == (N, out_size) and x.shape == (N, coord_dim) and u.shape == (1, hidden)
    assert jnp.allclose(h, h_r, atol=5e-2, rtol=5e-2), float(jnp.max(jnp.abs(h - h_r)))
    assert jnp.allclose(x, x_r, atol=5e-2, rtol=5e-2), float(jnp.max(jnp.abs(x - x_r)))
    assert jnp.allclose(u, u_r, atol=5e-2, rtol=5e-2), float(jnp.max(jnp.abs(u - u_r)))

    print("KERNEL_OK")
</pallas_src>

<mosaic_0001>
module attributes {stable_mosaic.version = 11 : i64} {
  func.func @egnn_kernel(%arg0: i32, %arg1: memref<64x16xbf16, #tpu.memory_space<vmem>>, %arg2: memref<64x128xf32, #tpu.memory_space<vmem>>, %arg3: memref<64x128xbf16, #tpu.memory_space<vmem>>, %arg4: memref<64x128xbf16, #tpu.memory_space<vmem>>, %arg5: memref<256x4xbf16, #tpu.memory_space<vmem>>, %arg6: memref<256x8xi32, #tpu.memory_space<vmem>>, %arg7: memref<1x256xi32, #tpu.memory_space<vmem>>, %arg8: memref<1x8xf32, #tpu.memory_space<vmem>>, %arg9: memref<1x128xf32, #tpu.memory_space<vmem>>, %arg10: memref<4x128xbf16, #tpu.memory_space<vmem>>, %arg11: memref<1x128xf32, #tpu.memory_space<vmem>>, %arg12: memref<128x128xbf16, #tpu.memory_space<vmem>>, %arg13: memref<1x128xf32, #tpu.memory_space<vmem>>, %arg14: memref<128x128xbf16, #tpu.memory_space<vmem>>, %arg15: memref<1x128xf32, #tpu.memory_space<vmem>>, %arg16: memref<1x128xf32, #tpu.memory_space<vmem>>, %arg17: memref<16x128xbf16, #tpu.memory_space<vmem>>, %arg18: memref<128x128xbf16, #tpu.memory_space<vmem>>, %arg19: memref<8x128xbf16, #tpu.memory_space<vmem>>, %arg20: memref<1x128xf32, #tpu.memory_space<vmem>>, %arg21: memref<128x128xbf16, #tpu.memory_space<vmem>>, %arg22: memref<1x128xf32, #tpu.memory_space<vmem>>, %arg23: memref<8x128xbf16, #tpu.memory_space<vmem>>, %arg24: memref<128x128xbf16, #tpu.memory_space<vmem>>, %arg25: memref<1x128xf32, #tpu.memory_space<vmem>>, %arg26: memref<128x128xbf16, #tpu.memory_space<vmem>>, %arg27: memref<64x128xf32, #tpu.memory_space<vmem>>, %arg28: memref<64x128xf32, #tpu.memory_space<vmem>>, %arg29: memref<1x128xf32, #tpu.memory_space<vmem>>, %arg30: memref<64x256xf32, #tpu.memory_space<vmem>>) attributes {dimension_semantics = [#tpu.dimension_semantics<arbitrary>], iteration_bounds = array<i64: 2>, scalar_prefetch = 0 : i64, scratch_operands = 1 : i64, tpu.core_type = #tpu.core_type<tc>, window_params = [{pipeline_mode = #tpu.pipeline_mode<synchronous>, transform_indices = @transform_0, window_bounds = array<i64: 64, 16>}, {pipeline_mode = #tpu.pipeline_mode<synchronous>, transform_indices = @transform_1, window_bounds = array<i64: 64, 128>}, {pipeline_mode = #tpu.pipeline_mode<synchronous>, transform_indices = @transform_2, window_bounds = array<i64: 64, 128>}, {pipeline_mode = #tpu.pipeline_mode<synchronous>, transform_indices = @transform_3, window_bounds = array<i64: 64, 128>}, {transform_indices = @transform_4, window_bounds = array<i64: 256, 4>}, {transform_indices = @transform_5, window_bounds = array<i64: 256, 8>}, {transform_indices = @transform_6, window_bounds = array<i64: 1, 256>}, {pipeline_mode = #tpu.pipeline_mode<synchronous>, transform_indices = @transform_7, window_bounds = array<i64: 1, 8>}, {pipeline_mode = #tpu.pipeline_mode<synchronous>, transform_indices = @transform_8, window_bounds = array<i64: 1, 128>}, {pipeline_mode = #tpu.pipeline_mode<synchronous>, transform_indices = @transform_9, window_bounds = array<i64: 4, 128>}, {pipeline_mode = #tpu.pipeline_mode<synchronous>, transform_indices = @transform_10, window_bounds = array<i64: 1, 128>}, {pipeline_mode = #tpu.pipeline_mode<synchronous>, transform_indices = @transform_11, window_bounds = array<i64: 128, 128>}, {pipeline_mode = #tpu.pipeline_mode<synchronous>, transform_indices = @transform_12, window_bounds = array<i64: 1, 128>}, {pipeline_mode = #tpu.pipeline_mode<synchronous>, transform_indices = @transform_13, window_bounds = array<i64: 128, 128>}, {pipeline_mode = #tpu.pipeline_mode<synchronous>, transform_indices = @transform_14, window_bounds = array<i64: 1, 128>}, {pipeline_mode = #tpu.pipeline_mode<synchronous>, transform_indices = @transform_15, window_bounds = array<i64: 1, 128>}, {pipeline_mode = #tpu.pipeline_mode<synchronous>, transform_indices = @transform_16, window_bounds = array<i64: 16, 128>}, {pipeline_mode = #tpu.pipeline_mode<synchronous>, transform_indices = @transform_17, window_bounds = array<i64: 128, 128>}, {pipeline_mode = #tpu.pipeline_mode<synchronous>, transform_indices = @transform_18, window_bounds = array<i64: 8, 128>}, {pipeline_mode = #tpu.pipeline_mode<synchronous>, transform_indices = @transform_19, window_bounds = array<i64: 1, 128>}, {pipeline_mode = #tpu.pipeline_mode<synchronous>, transform_indices = @transform_20, window_bounds = array<i64: 128, 128>}, {pipeline_mode = #tpu.pipeline_mode<synchronous>, transform_indices = @transform_21, window_bounds = array<i64: 1, 128>}, {pipeline_mode = #tpu.pipeline_mode<synchronous>, transform_indices = @transform_22, window_bounds = array<i64: 8, 128>}, {pipeline_mode = #tpu.pipeline_mode<synchronous>, transform_indices = @transform_23, window_bounds = array<i64: 128, 128>}, {pipeline_mode = #tpu.pipeline_mode<synchronous>, transform_indices = @transform_24, window_bounds = array<i64: 1, 128>}, {pipeline_mode = #tpu.pipeline_mode<synchronous>, transform_indices = @transform_25, window_bounds = array<i64: 128, 128>}, {pipeline_mode = #tpu.pipeline_mode<synchronous>, transform_indices = @transform_26, window_bounds = array<i64: 64, 128>}, {pipeline_mode = #tpu.pipeline_mode<synchronous>, transform_indices = @transform_27, window_bounds = array<i64: 64, 128>}, {pipeline_mode = #tpu.pipeline_mode<synchronous>, transform_indices = @transform_28, window_bounds = array<i64: 1, 128>}]} {
    %c0_i32 = arith.constant 0 : i32
    %0 = arith.cmpi eq, %arg0, %c0_i32 : i32
    %1 = arith.extui %0 : i1 to i32
    %c0_i32_0 = arith.constant 0 : i32
    %2 = arith.cmpi ne, %1, %c0_i32_0 : i32
    scf.if %2 {
      %cst_45 = arith.constant 0.000000e+00 : f32
      %110 = vector.broadcast %cst_45 : f32 to vector<64x256xf32>
      %c0_46 = arith.constant 0 : index
      %c0_47 = arith.constant 0 : index
      %111 = vector.load %arg30[%c0_46, %c0_47] : memref<64x256xf32, #tpu.memory_space<vmem>>, vector<64x256xf32>
      tpu.vector_store %arg30[%c0_46, %c0_47], %110 {strides = array<i32>} : memref<64x256xf32, #tpu.memory_space<vmem>>, vector<64x256xf32>,
    } else {
    }
    %c0 = arith.constant 0 : index
    %c0_1 = arith.constant 0 : index
    %3 = vector.load %arg6[%c0, %c0_1] : memref<256x8xi32, #tpu.memory_space<vmem>>, vector<256x8xi32>
    %4 = vector.extract_strided_slice %3 {offsets = [0, 0], sizes = [256, 1], strides = [1, 1]} : vector<256x8xi32> to vector<256x1xi32>
    %5 = vector.extract_strided_slice %3 {offsets = [0, 1], sizes = [256, 1], strides = [1, 1]} : vector<256x8xi32> to vector<256x1xi32>
    %6 = tpu.iota {dimensions = array<i32: 1>} : vector<256x64xi32>
    %7 = vector.broadcast %4 : vector<256x1xi32> to vector<256x64xi32>
    %8 = arith.cmpi eq, %6, %7 : vector<256x64xi32>
    %9 = vector.broadcast %5 : vector<256x1xi32> to vector<256x64xi32>
    %10 = arith.cmpi eq, %6, %9 : vector<256x64xi32>
    %11 = arith.extui %8 : vector<256x64xi1> to vector<256x64xi32>
    %12 = arith.sitofp %11 : vector<256x64xi32> to vector<256x64xf32>
    %13 = arith.truncf %12 : vector<256x64xf32> to vector<256x64xbf16>
    %14 = arith.extui %10 : vector<256x64xi1> to vector<256x64xi32>
    %15 = arith.sitofp %14 : vector<256x64xi32> to vector<256x64xf32>
    %16 = arith.truncf %15 : vector<256x64xf32> to vector<256x64xbf16>
    %17 = arith.extui %8 : vector<256x64xi1> to vector<256x64xi32>
    %18 = arith.sitofp %17 : vector<256x64xi32> to vector<256x64xf32>
    %19 = arith.extui %10 : vector<256x64xi1> to vector<256x64xi32>
    %20 = arith.sitofp %19 : vector<256x64xi32> to vector<256x64xf32>
    %21 = arith.subf %18, %20 : vector<256x64xf32>
    %22 = tpu.iota {dimensions = array<i32: 0>} : vector<64x256xi32>
    %c0_2 = arith.constant 0 : index
    %c0_3 = arith.constant 0 : index
    %23 = vector.load %arg7[%c0_2, %c0_3] : memref<1x256xi32, #tpu.memory_space<vmem>>, vector<1x256xi32>
    %24 = vector.broadcast %23 : vector<1x256xi32> to vector<64x256xi32>
    %25 = arith.cmpi eq, %22, %24 : vector<64x256xi32>
    %26 = arith.extui %25 : vector<64x256xi1> to vector<64x256xi32>
    %27 = arith.sitofp %26 : vector<64x256xi32> to vector<64x256xf32>
    %28 = arith.truncf %27 : vector<64x256xf32> to vector<64x256xbf16>
    %c0_4 = arith.constant 0 : index
    %c0_5 = arith.constant 0 : index
    %29 = vector.load %arg2[%c0_4, %c0_5] : memref<64x128xf32, #tpu.memory_space<vmem>>, vector<64x128xf32>
    %cst = arith.constant dense<0.000000e+00> : vector<256x128xf32>
    %30 = tpu.matmul %21, %29, %cst {dimension_numbers = #tpu.dot_dimension_numbers<[1], [0], [0], [1], [0, 0, 1, 1], [], []>} : vector<256x64xf32>, vector<64x128xf32>, vector<256x128xf32> -> vector<256x128xf32>
    %31 = arith.mulf %30, %30 : vector<256x128xf32>
    %cst_6 = arith.constant dense<0.000000e+00> : vector<256xf32>
    %32 = vector.multi_reduction <add>, %31, %cst_6 [1] : vector<256x128xf32> to vector<256xf32>
    %33 = vector.shape_cast %32 : vector<256xf32> to vector<256x1xf32>
    %cst_7 = arith.constant 1.000000e-30 : f32
    %34 = vector.broadcast %cst_7 : f32 to vector<256x1xf32>
    %35 = arith.addf %33, %34 : vector<256x1xf32>
    %36 = math.rsqrt %35 : vector<256x1xf32>
    %37 = vector.broadcast %36 : vector<256x1xf32> to vector<256x128xf32>
    %38 = arith.mulf %30, %37 : vector<256x128xf32>
    %c0_8 = arith.constant 0 : index
    %c0_9 = arith.constant 0 : index
    %39 = vector.load %arg3[%c0_8, %c0_9] : memref<64x128xbf16, #tpu.memory_space<vmem>>, vector<64x128xbf16>
    %cst_10 = arith.constant dense<0.000000e+00> : vector<256x128xf32>
    %40 = tpu.matmul %13, %39, %cst_10 {dimension_numbers = #tpu.dot_dimension_numbers<[1], [0], [0], [1], [0, 0, 1, 1], [], []>} : vector<256x64xbf16>, vector<64x128xbf16>, vector<256x128xf32> -> vector<256x128xf32>
    %c0_11 = arith.constant 0 : index
    %c0_12 = arith.constant 0 : index
    %41 = vector.load %arg4[%c0_11, %c0_12] : memref<64x128xbf16, #tpu.memory_space<vmem>>, vector<64x128xbf16>
    %cst_13 = arith.constant dense<0.000000e+00> : vector<256x128xf32>
    %42 = tpu.matmul %16, %41, %cst_13 {dimension_numbers = #tpu.dot_dimension_numbers<[1], [0], [0], [1], [0, 0, 1, 1], [], []>} : vector<256x64xbf16>, vector<64x128xbf16>, vector<256x128xf32> -> vector<256x128xf32>
    %43 = arith.addf %40, %42 : vector<256x128xf32>
    %c0_14 = arith.constant 0 : index
    %c0_15 = arith.constant 0 : index
    %44 = vector.load %arg5[%c0_14, %c0_15] : memref<256x4xbf16, #tpu.memory_space<vmem>>, vector<256x4xbf16>
    %c0_16 = arith.constant 0 : index
    %c0_17 = arith.constant 0 : index
    %45 = vector.load %arg10[%c0_16, %c0_17] : memref<4x128xbf16, #tpu.memory_space<vmem>>, vector<4x128xbf16>
    %cst_18 = arith.constant dense<0.000000e+00> : vector<256x128xf32>
    %46 = tpu.matmul %44, %45, %cst_18 {dimension_numbers = #tpu.dot_dimension_numbers<[1], [0], [0], [1], [0, 0, 1, 1], [], []>} : vector<256x4xbf16>, vector<4x128xbf16>, vector<256x128xf32> -> vector<256x128xf32>
    %47 = arith.addf %43, %46 : vector<256x128xf32>
    %c0_19 = arith.constant 0 : index
    %c0_20 = arith.constant 0 : index
    %48 = vector.load %arg9[%c0_19, %c0_20] : memref<1x128xf32, #tpu.memory_space<vmem>>, vector<1x128xf32>
    %49 = vector.broadcast %33 : vector<256x1xf32> to vector<256x128xf32>
    %50 = vector.broadcast %48 : vector<1x128xf32> to vector<256x128xf32>
    %51 = arith.mulf %49, %50 : vector<256x128xf32>
    %52 = arith.addf %47, %51 : vector<256x128xf32>
    %c0_21 = arith.constant 0 : index
    %c0_22 = arith.constant 0 : index
    %53 = vector.load %arg11[%c0_21, %c0_22] : memref<1x128xf32, #tpu.memory_space<vmem>>, vector<1x128xf32>
    %54 = vector.broadcast %53 : vector<1x128xf32> to vector<256x128xf32>
    %55 = arith.addf %52, %54 : vector<256x128xf32>
    %56 = arith.negf %55 : vector<256x128xf32>
    %57 = math.exp %56 : vector<256x128xf32>
    %cst_23 = arith.constant 1.000000e+00 : f32
    %58 = vector.broadcast %cst_23 : f32 to vector<256x128xf32>
    %59 = arith.addf %58, %57 : vector<256x128xf32>
    %60 = arith.divf %58, %59 : vector<256x128xf32>
    %61 = arith.mulf %55, %60 : vector<256x128xf32>
    %62 = arith.truncf %61 : vector<256x128xf32> to vector<256x128xbf16>
    %c0_24 = arith.constant 0 : index
    %c0_25 = arith.constant 0 : index
    %63 = vector.load %arg12[%c0_24, %c0_25] : memref<128x128xbf16, #tpu.memory_space<vmem>>, vector<128x128xbf16>
    %cst_26 = arith.constant dense<0.000000e+00> : vector<256x128xf32>
    %64 = tpu.matmul %62, %63, %cst_26 {dimension_numbers = #tpu.dot_dimension_numbers<[1], [0], [0], [1], [0, 0, 1, 1], [], []>} : vector<256x128xbf16>, vector<128x128xbf16>, vector<256x128xf32> -> vector<256x128xf32>
    %c0_27 = arith.constant 0 : index
    %c0_28 = arith.constant 0 : index
    %65 = vector.load %arg13[%c0_27, %c0_28] : memref<1x128xf32, #tpu.memory_space<vmem>>, vector<1x128xf32>
    %66 = vector.broadcast %65 : vector<1x128xf32> to vector<256x128xf32>
    %67 = arith.addf %64, %66 : vector<256x128xf32>
    %68 = arith.negf %67 : vector<256x128xf32>
    %69 = math.exp %68 : vector<256x128xf32>
    %cst_29 = arith.constant 1.000000e+00 : f32
    %70 = vector.broadcast %cst_29 : f32 to vector<256x128xf32>
    %71 = arith.addf %70, %69 : vector<256x128xf32>
    %72 = arith.divf %70, %71 : vector<256x128xf32>
    %73 = arith.mulf %67, %72 : vector<256x128xf32>
    %74 = arith.truncf %73 : vector<256x128xf32> to vector<256x128xbf16>
    %c0_30 = arith.constant 0 : index
    %c0_31 = arith.constant 0 : index
    %75 = vector.load %arg14[%c0_30, %c0_31] : memref<128x128xbf16, #tpu.memory_space<vmem>>, vector<128x128xbf16>
    %cst_32 = arith.constant dense<0.000000e+00> : vector<256x128xf32>
    %76 = tpu.matmul %74, %75, %cst_32 {dimension_numbers = #tpu.dot_dimension_numbers<[1], [0], [0], [1], [0, 0, 1, 1], [], []>} : vector<256x128xbf16>, vector<128x128xbf16>, vector<256x128xf32> -> vector<256x128xf32>
    %c0_33 = arith.constant 0 : index
    %c0_34 = arith.constant 0 : index
    %77 = vector.load %arg15[%c0_33, %c0_34] : memref<1x128xf32, #tpu.memory_space<vmem>>, vector<1x128xf32>
    %78 = vector.broadcast %77 : vector<1x128xf32> to vector<256x128xf32>
    %79 = arith.addf %76, %78 : vector<256x128xf32>
    %80 = arith.negf %79 : vector<256x128xf32>
    %81 = math.exp %80 : vector<256x128xf32>
    %cst_35 = arith.constant 1.000000e+00 : f32
    %82 = vector.broadcast %cst_35 : f32 to vector<256x128xf32>
    %83 = arith.addf %82, %81 : vector<256x128xf32>
    %84 = arith.divf %82, %83 : vector<256x128xf32>
    %85 = arith.mulf %79, %84 : vector<256x128xf32>
    %c0_36 = arith.constant 0 : index
    %c0_37 = arith.constant 0 : index
    %86 = vector.load %arg16[%c0_36, %c0_37] : memref<1x128xf32, #tpu.memory_space<vmem>>, vector<1x128xf32>
    %87 = vector.broadcast %86 : vector<1x128xf32> to vector<256x128xf32>
    %88 = arith.mulf %85, %87 : vector<256x128xf32>
    %cst_38 = arith.constant dense<0.000000e+00> : vector<256xf32>
    %89 = vector.multi_reduction <add>, %88, %cst_38 [1] : vector<256x128xf32> to vector<256xf32>
    %90 = vector.shape_cast %89 : vector<256xf32> to vector<256x1xf32>
    %91 = tpu.iota {dimensions = array<i32: 1>} : vector<1x128xi32>
    %c127_i32 = arith.constant 127 : i32
    %92 = vector.broadcast %c127_i32 : i32 to vector<1x128xi32>
    %93 = arith.cmpi eq, %91, %92 : vector<1x128xi32>
    %94 = arith.extui %93 : vector<1x128xi1> to vector<1x128xi32>
    %95 = arith.sitofp %94 : vector<1x128xi32> to vector<1x128xf32>
    %96 = vector.broadcast %90 : vector<256x1xf32> to vector<256x128xf32>
    %97 = arith.mulf %96, %38 : vector<256x128xf32>
    %98 = vector.broadcast %95 : vector<1x128xf32> to vector<256x128xf32>
    %99 = arith.addf %97, %98 : vector<256x128xf32>
    %100 = arith.truncf %73 : vector<256x128xf32> to vector<256x128xbf16>
    %101 = arith.truncf %99 : vector<256x128xf32> to vector<256x128xbf16>
    %102 = tpu.concatenate %100, %101 in 1 : vector<256x128xbf16>, vector<256x128xbf16> -> vector<256x256xbf16>
    %c0_39 = arith.constant 0 : index
    %c0_40 = arith.constant 0 : index
    %103 = vector.load %arg30[%c0_39, %c0_40] : memref<64x256xf32, #tpu.memory_space<vmem>>, vector<64x256xf32>
    %cst_41 = arith.constant dense<0.000000e+00> : vector<64x256xf32>
    %104 = tpu.matmul %28, %102, %cst_41 {dimension_numbers = #tpu.dot_dimension_numbers<[1], [0], [0], [1], [0, 0, 1, 1], [], []>} : vector<64x256xbf16>, vector<256x256xbf16>, vector<64x256xf32> -> vector<64x256xf32>
    %105 = arith.addf %103, %104 : vector<64x256xf32>
    %c0_42 = arith.constant 0 : index
    %c0_43 = arith.constant 0 : index
    %106 = vector.load %arg30[%c0_42, %c0_43] : memref<64x256xf32, #tpu.memory_space<vmem>>, vector<64x256xf32>
    tpu.vector_store %arg30[%c0_42, %c0_43], %105 {strides = array<i32>} : memref<64x256xf32, #tpu.memory_space<vmem>>, vector<64x256xf32>,
    %c1_i32 = arith.constant 1 : i32
    %107 = arith.cmpi eq, %arg0, %c1_i32 : i32
    %108 = arith.extui %107 : i1 to i32
    %c0_i32_44 = arith.constant 0 : i32
    %109 = arith.cmpi ne, %108, %c0_i32_44 : i32
    scf.if %109 {
      %c0_45 = arith.constant 0 : index
      %c0_46 = arith.constant 0 : index
      %110 = vector.load %arg30[%c0_45, %c0_46] : memref<64x256xf32, #tpu.memory_space<vmem>>, vector<64x256xf32>
      %111 = vector.extract_strided_slice %110 {offsets = [0, 0], sizes = [64, 128], strides = [1, 1]} : vector<64x256xf32> to vector<64x128xf32>
      %112 = vector.extract_strided_slice %110 {offsets = [0, 128], sizes = [64, 128], strides = [1, 1]} : vector<64x256xf32> to vector<64x128xf32>
      %113 = vector.broadcast %95 : vector<1x128xf32> to vector<64x128xf32>
      %114 = arith.mulf %112, %113 : vector<64x128xf32>
      %cst_47 = arith.constant dense<0.000000e+00> : vector<64xf32>
      %115 = vector.multi_reduction <add>, %114, %cst_47 [1] : vector<64x128xf32> to vector<64xf32>
      %116 = vector.shape_cast %115 : vector<64xf32> to vector<64x1xf32>
      %cst_48 = arith.constant 1.000000e+00 : f32
      %117 = vector.broadcast %cst_48 : f32 to vector<64x1xf32>
      %118 = arith.maximumf %116, %117 : vector<64x1xf32>
      %cst_49 = arith.constant 1.000000e+00 : f32
      %119 = vector.broadcast %cst_49 : f32 to vector<64x1xf32>
      %120 = arith.divf %119, %118 : vector<64x1xf32>
      %121 = vector.broadcast %120 : vector<64x1xf32> to vector<64x128xf32>
      %122 = arith.mulf %112, %121 : vector<64x128xf32>
      %c0_50 = arith.constant 0 : index
      %c0_51 = arith.constant 0 : index
      %123 = vector.load %arg8[%c0_50, %c0_51] : memref<1x8xf32, #tpu.memory_space<vmem>>, vector<1x8xf32>
      %124 = arith.truncf %123 : vector<1x8xf32> to vector<1x8xbf16>
      %c0_52 = arith.constant 0 : index
      %c0_53 = arith.constant 0 : index
      %125 = vector.load %arg1[%c0_52, %c0_53] : memref<64x16xbf16, #tpu.memory_space<vmem>>, vector<64x16xbf16>
      %c0_54 = arith.constant 0 : index
      %c0_55 = arith.constant 0 : index
      %126 = vector.load %arg17[%c0_54, %c0_55] : memref<16x128xbf16, #tpu.memory_space<vmem>>, vector<16x128xbf16>
      %cst_56 = arith.constant dense<0.000000e+00> : vector<64x128xf32>
      %127 = tpu.matmul %125, %126, %cst_56 {dimension_numbers = #tpu.dot_dimension_numbers<[1], [0], [0], [1], [0, 0, 1, 1], [], []>} : vector<64x16xbf16>, vector<16x128xbf16>, vector<64x128xf32> -> vector<64x128xf32>
      %128 = arith.truncf %111 : vector<64x128xf32> to vector<64x128xbf16>
      %c0_57 = arith.constant 0 : index
      %c0_58 = arith.constant 0 : index
      %129 = vector.load %arg18[%c0_57, %c0_58] : memref<128x128xbf16, #tpu.memory_space<vmem>>, vector<128x128xbf16>
      %cst_59 = arith.constant dense<0.000000e+00> : vector<64x128xf32>
      %130 = tpu.matmul %128, %129, %cst_59 {dimension_numbers = #tpu.dot_dimension_numbers<[1], [0], [0], [1], [0, 0, 1, 1], [], []>} : vector<64x128xbf16>, vector<128x128xbf16>, vector<64x128xf32> -> vector<64x128xf32>
      %131 = arith.addf %127, %130 : vector<64x128xf32>
      %c0_60 = arith.constant 0 : index
      %c0_61 = arith.constant 0 : index
      %132 = vector.load %arg19[%c0_60, %c0_61] : memref<8x128xbf16, #tpu.memory_space<vmem>>, vector<8x128xbf16>
      %cst_62 = arith.constant dense<0.000000e+00> : vector<1x128xf32>
      %133 = tpu.matmul %124, %132, %cst_62 {dimension_numbers = #tpu.dot_dimension_numbers<[1], [0], [0], [1], [0, 0, 1, 1], [], []>} : vector<1x8xbf16>, vector<8x128xbf16>, vector<1x128xf32> -> vector<1x128xf32>
      %134 = vector.broadcast %133 : vector<1x128xf32> to vector<64x128xf32>
      %135 = arith.addf %131, %134 : vector<64x128xf32>
      %c0_63 = arith.constant 0 : index
      %c0_64 = arith.constant 0 : index
      %136 = vector.load %arg20[%c0_63, %c0_64] : memref<1x128xf32, #tpu.memory_space<vmem>>, vector<1x128xf32>
      %137 = vector.broadcast %136 : vector<1x128xf32> to vector<64x128xf32>
      %138 = arith.addf %135, %137 : vector<64x128xf32>
      %139 = arith.negf %138 : vector<64x128xf32>
      %140 = math.exp %139 : vector<64x128xf32>
      %cst_65 = arith.constant 1.000000e+00 : f32
      %141 = vector.broadcast %cst_65 : f32 to vector<64x128xf32>
      %142 = arith.addf %141, %140 : vector<64x128xf32>
      %143 = arith.divf %141, %142 : vector<64x128xf32>
      %144 = arith.mulf %138, %143 : vector<64x128xf32>
      %145 = arith.truncf %144 : vector<64x128xf32> to vector<64x128xbf16>
      %c0_66 = arith.constant 0 : index
      %c0_67 = arith.constant 0 : index
      %146 = vector.load %arg21[%c0_66, %c0_67] : memref<128x128xbf16, #tpu.memory_space<vmem>>, vector<128x128xbf16>
      %cst_68 = arith.constant dense<0.000000e+00> : vector<64x128xf32>
      %147 = tpu.matmul %145, %146, %cst_68 {dimension_numbers = #tpu.dot_dimension_numbers<[1], [0], [0], [1], [0, 0, 1, 1], [], []>} : vector<64x128xbf16>, vector<128x128xbf16>, vector<64x128xf32> -> vector<64x128xf32>
      %c0_69 = arith.constant 0 : index
      %c0_70 = arith.constant 0 : index
      %148 = vector.load %arg22[%c0_69, %c0_70] : memref<1x128xf32, #tpu.memory_space<vmem>>, vector<1x128xf32>
      %149 = vector.broadcast %148 : vector<1x128xf32> to vector<64x128xf32>
      %150 = arith.addf %147, %149 : vector<64x128xf32>
      %c0_71 = arith.constant 0 : index
      %c0_72 = arith.constant 0 : index
      %151 = vector.load %arg27[%c0_71, %c0_72] : memref<64x128xf32, #tpu.memory_space<vmem>>, vector<64x128xf32>
      tpu.vector_store %arg27[%c0_71, %c0_72], %150 {strides = array<i32>} : memref<64x128xf32, #tpu.memory_space<vmem>>, vector<64x128xf32>,
      %152 = arith.addf %29, %122 : vector<64x128xf32>
      %c0_73 = arith.constant 0 : index
      %c0_74 = arith.constant 0 : index
      %153 = vector.load %arg28[%c0_73, %c0_74] : memref<64x128xf32, #tpu.memory_space<vmem>>, vector<64x128xf32>
      tpu.vector_store %arg28[%c0_73, %c0_74], %152 {strides = array<i32>} : memref<64x128xf32, #tpu.memory_space<vmem>>, vector<64x128xf32>,
      %cst_75 = arith.constant dense<0.000000e+00> : vector<128xf32>
      %154 = vector.multi_reduction <add>, %150, %cst_75 [0] : vector<64x128xf32> to vector<128xf32>
      %155 = vector.shape_cast %154 : vector<128xf32> to vector<1x128xf32>
      %cst_76 = arith.constant 6.400000e+01 : f32
      %156 = vector.broadcast %cst_76 : f32 to vector<1x128xf32>
      %157 = arith.divf %155, %156 : vector<1x128xf32>
      %c0_77 = arith.constant 0 : index
      %c0_78 = arith.constant 0 : index
      %158 = vector.load %arg23[%c0_77, %c0_78] : memref<8x128xbf16, #tpu.memory_space<vmem>>, vector<8x128xbf16>
      %cst_79 = arith.constant dense<0.000000e+00> : vector<1x128xf32>
      %159 = tpu.matmul %124, %158, %cst_79 {dimension_numbers = #tpu.dot_dimension_numbers<[1], [0], [0], [1], [0, 0, 1, 1], [], []>} : vector<1x8xbf16>, vector<8x128xbf16>, vector<1x128xf32> -> vector<1x128xf32>
      %160 = arith.truncf %157 : vector<1x128xf32> to vector<1x128xbf16>
      %c0_80 = arith.constant 0 : index
      %c0_81 = arith.constant 0 : index
      %161 = vector.load %arg24[%c0_80, %c0_81] : memref<128x128xbf16, #tpu.memory_space<vmem>>, vector<128x128xbf16>
      %cst_82 = arith.constant dense<0.000000e+00> : vector<1x128xf32>
      %162 = tpu.matmul %160, %161, %cst_82 {dimension_numbers = #tpu.dot_dimension_numbers<[1], [0], [0], [1], [0, 0, 1, 1], [], []>} : vector<1x128xbf16>, vector<128x128xbf16>, vector<1x128xf32> -> vector<1x128xf32>
      %163 = arith.addf %159, %162 : vector<1x128xf32>
      %c0_83 = arith.constant 0 : index
      %c0_84 = arith.constant 0 : index
      %164 = vector.load %arg25[%c0_83, %c0_84] : memref<1x128xf32, #tpu.memory_space<vmem>>, vector<1x128xf32>
      %165 = arith.addf %163, %164 : vector<1x128xf32>
      %166 = arith.negf %165 : vector<1x128xf32>
      %167 = math.exp %166 : vector<1x128xf32>
      %cst_85 = arith.constant 1.000000e+00 : f32
      %168 = vector.broadcast %cst_85 : f32 to vector<1x128xf32>
      %169 = arith.addf %168, %167 : vector<1x128xf32>
      %170 = arith.divf %168, %169 : vector<1x128xf32>
      %171 = arith.mulf %165, %170 : vector<1x128xf32>
      %172 = arith.truncf %171 : vector<1x128xf32> to vector<1x128xbf16>
      %c0_86 = arith.constant 0 : index
      %c0_87 = arith.constant 0 : index
      %173 = vector.load %arg26[%c0_86, %c0_87] : memref<128x128xbf16, #tpu.memory_space<vmem>>, vector<128x128xbf16>
      %cst_88 = arith.constant dense<0.000000e+00> : vector<1x128xf32>
      %174 = tpu.matmul %172, %173, %cst_88 {dimension_numbers = #tpu.dot_dimension_numbers<[1], [0], [0], [1], [0, 0, 1, 1], [], []>} : vector<1x128xbf16>, vector<128x128xbf16>, vector<1x128xf32> -> vector<1x128xf32>
      %c0_89 = arith.constant 0 : index
      %c0_90 = arith.constant 0 : index
      %175 = vector.load %arg29[%c0_89, %c0_90] : memref<1x128xf32, #tpu.memory_space<vmem>>, vector<1x128xf32>
      tpu.vector_store %arg29[%c0_89, %c0_90], %174 {strides = array<i32>} : memref<1x128xf32, #tpu.memory_space<vmem>>, vector<1x128xf32>,
    } else {
    }
    return
  }
  func.func @transform_0(%arg0: i32) -> (i32, i32) {
    %c0_i32 = arith.constant 0 : i32
    %c0_i32_0 = arith.constant 0 : i32
    %c0_i32_1 = arith.constant 0 : i32
    return %c0_i32, %c0_i32_0 : i32, i32
  }
  func.func @transform_1(%arg0: i32) -> (i32, i32) {
    %c0_i32 = arith.constant 0 : i32
    %c0_i32_0 = arith.constant 0 : i32
    %c0_i32_1 = arith.constant 0 : i32
    return %c0_i32, %c0_i32_0 : i32, i32
  }
  func.func @transform_2(%arg0: i32) -> (i32, i32) {
    %c0_i32 = arith.constant 0 : i32
    %c0_i32_0 = arith.constant 0 : i32
    %c0_i32_1 = arith.constant 0 : i32
    return %c0_i32, %c0_i32_0 : i32, i32
  }
  func.func @transform_3(%arg0: i32) -> (i32, i32) {
    %c0_i32 = arith.constant 0 : i32
    %c0_i32_0 = arith.constant 0 : i32
    %c0_i32_1 = arith.constant 0 : i32
    return %c0_i32, %c0_i32_0 : i32, i32
  }
  func.func @transform_4(%arg0: i32) -> (i32, i32) {
    %c0_i32 = arith.constant 0 : i32
    %c0_i32_0 = arith.constant 0 : i32
    return %arg0, %c0_i32 : i32, i32
  }
  func.func @transform_5(%arg0: i32) -> (i32, i32) {
    %c0_i32 = arith.constant 0 : i32
    %c0_i32_0 = arith.constant 0 : i32
    return %arg0, %c0_i32 : i32, i32
  }
  func.func @transform_6(%arg0: i32) -> (i32, i32) {
    %c0_i32 = arith.constant 0 : i32
    %c0_i32_0 = arith.constant 0 : i32
    return %c0_i32, %arg0 : i32, i32
  }
  func.func @transform_7(%arg0: i32) -> (i32, i32) {
    %c0_i32 = arith.constant 0 : i32
    %c0_i32_0 = arith.constant 0 : i32
    %c0_i32_1 = arith.constant 0 : i32
    return %c0_i32, %c0_i32_0 : i32, i32
  }
  func.func @transform_8(%arg0: i32) -> (i32, i32) {
    %c0_i32 = arith.constant 0 : i32
    %c0_i32_0 = arith.constant 0 : i32
    %c0_i32_1 = arith.constant 0 : i32
    return %c0_i32, %c0_i32_0 : i32, i32
  }
  func.func @transform_9(%arg0: i32) -> (i32, i32) {
    %c0_i32 = arith.constant 0 : i32
    %c0_i32_0 = arith.constant 0 : i32
    %c0_i32_1 = arith.constant 0 : i32
    return %c0_i32, %c0_i32_0 : i32, i32
  }
  func.func @transform_10(%arg0: i32) -> (i32, i32) {
    %c0_i32 = arith.constant 0 : i32
    %c0_i32_0 = arith.constant 0 : i32
    %c0_i32_1 = arith.constant 0 : i32
    return %c0_i32, %c0_i32_0 : i32, i32
  }
  func.func @transform_11(%arg0: i32) -> (i32, i32) {
    %c0_i32 = arith.constant 0 : i32
    %c0_i32_0 = arith.constant 0 : i32
    %c0_i32_1 = arith.constant 0 : i32
    return %c0_i32, %c0_i32_0 : i32, i32
  }
  func.func @transform_12(%arg0: i32) -> (i32, i32) {
    %c0_i32 = arith.constant 0 : i32
    %c0_i32_0 = arith.constant 0 : i32
    %c0_i32_1 = arith.constant 0 : i32
    return %c0_i32, %c0_i32_0 : i32, i32
  }
  func.func @transform_13(%arg0: i32) -> (i32, i32) {
    %c0_i32 = arith.constant 0 : i32
    %c0_i32_0 = arith.constant 0 : i32
    %c0_i32_1 = arith.constant 0 : i32
    return %c0_i32, %c0_i32_0 : i32, i32
  }
  func.func @transform_14(%arg0: i32) -> (i32, i32) {
    %c0_i32 = arith.constant 0 : i32
    %c0_i32_0 = arith.constant 0 : i32
    %c0_i32_1 = arith.constant 0 : i32
    return %c0_i32, %c0_i32_0 : i32, i32
  }
  func.func @transform_15(%arg0: i32) -> (i32, i32) {
    %c0_i32 = arith.constant 0 : i32
    %c0_i32_0 = arith.constant 0 : i32
    %c0_i32_1 = arith.constant 0 : i32
    return %c0_i32, %c0_i32_0 : i32, i32
  }
  func.func @transform_16(%arg0: i32) -> (i32, i32) {
    %c0_i32 = arith.constant 0 : i32
    %c0_i32_0 = arith.constant 0 : i32
    %c0_i32_1 = arith.constant 0 : i32
    return %c0_i32, %c0_i32_0 : i32, i32
  }
  func.func @transform_17(%arg0: i32) -> (i32, i32) {
    %c0_i32 = arith.constant 0 : i32
    %c0_i32_0 = arith.constant 0 : i32
    %c0_i32_1 = arith.constant 0 : i32
    return %c0_i32, %c0_i32_0 : i32, i32
  }
  func.func @transform_18(%arg0: i32) -> (i32, i32) {
    %c0_i32 = arith.constant 0 : i32
    %c0_i32_0 = arith.constant 0 : i32
    %c0_i32_1 = arith.constant 0 : i32
    return %c0_i32, %c0_i32_0 : i32, i32
  }
  func.func @transform_19(%arg0: i32) -> (i32, i32) {
    %c0_i32 = arith.constant 0 : i32
    %c0_i32_0 = arith.constant 0 : i32
    %c0_i32_1 = arith.constant 0 : i32
    return %c0_i32, %c0_i32_0 : i32, i32
  }
  func.func @transform_20(%arg0: i32) -> (i32, i32) {
    %c0_i32 = arith.constant 0 : i32
    %c0_i32_0 = arith.constant 0 : i32
    %c0_i32_1 = arith.constant 0 : i32
    return %c0_i32, %c0_i32_0 : i32, i32
  }
  func.func @transform_21(%arg0: i32) -> (i32, i32) {
    %c0_i32 = arith.constant 0 : i32
    %c0_i32_0 = arith.constant 0 : i32
    %c0_i32_1 = arith.constant 0 : i32
    return %c0_i32, %c0_i32_0 : i32, i32
  }
  func.func @transform_22(%arg0: i32) -> (i32, i32) {
    %c0_i32 = arith.constant 0 : i32
    %c0_i32_0 = arith.constant 0 : i32
    %c0_i32_1 = arith.constant 0 : i32
    return %c0_i32, %c0_i32_0 : i32, i32
  }
  func.func @transform_23(%arg0: i32) -> (i32, i32) {
    %c0_i32 = arith.constant 0 : i32
    %c0_i32_0 = arith.constant 0 : i32
    %c0_i32_1 = arith.constant 0 : i32
    return %c0_i32, %c0_i32_0 : i32, i32
  }
  func.func @transform_24(%arg0: i32) -> (i32, i32) {
    %c0_i32 = arith.constant 0 : i32
    %c0_i32_0 = arith.constant 0 : i32
    %c0_i32_1 = arith.constant 0 : i32
    return %c0_i32, %c0_i32_0 : i32, i32
  }
  func.func @transform_25(%arg0: i32) -> (i32, i32) {
    %c0_i32 = arith.constant 0 : i32
    %c0_i32_0 = arith.constant 0 : i32
    %c0_i32_1 = arith.constant 0 : i32
    return %c0_i32, %c0_i32_0 : i32, i32
  }
  func.func @transform_26(%arg0: i32) -> (i32, i32) {
    %c0_i32 = arith.constant 0 : i32
    %c0_i32_0 = arith.constant 0 : i32
    %c0_i32_1 = arith.constant 0 : i32
    return %c0_i32, %c0_i32_0 : i32, i32
  }
  func.func @transform_27(%arg0: i32) -> (i32, i32) {
    %c0_i32 = arith.constant 0 : i32
    %c0_i32_0 = arith.constant 0 : i32
    %c0_i32_1 = arith.constant 0 : i32
    return %c0_i32, %c0_i32_0 : i32, i32
  }
  func.func @transform_28(%arg0: i32) -> (i32, i32) {
    %c0_i32 = arith.constant 0 : i32
    %c0_i32_0 = arith.constant 0 : i32
    %c0_i32_1 = arith.constant 0 : i32
    return %c0_i32, %c0_i32_0 : i32, i32
  }
}

</mosaic_0001>

<bundles_post_ra>
// kernel: tpu_custom_call.1
= control target key start
LH: loop header
LB: loop body
LE: loop exit
PB: predicated region body
PF: predicated region fallthrough
CT: control target
= control target key end

     0   :  { %s13180_s0 = inlined_call_operand.vmem [shape: bf16[64,16], index: 0, kind: input, shape index: {}]   ;;  %s13181_s1 = inlined_call_operand.vmem [shape: f32[64,128], index: 1, kind: input, shape index: {}]   ;;  %s13182_s2 = inlined_call_operand.vmem [shape: bf16[64,128], index: 2, kind: input, shape index: {}]   ;;  %s13183_s3 = inlined_call_operand.vmem [shape: bf16[64,128], index: 3, kind: input, shape index: {}]   ;;  %s13184_s4 = inlined_call_operand.vmem [shape: bf16[512,4], index: 4, kind: input, shape index: {}]   ;;  %s13185_s5 = inlined_call_operand.vmem [shape: s32[512,8], index: 5, kind: input, shape index: {}]   ;;  %s13186_s6 = inlined_call_operand.vmem [shape: s32[1,512], index: 6, kind: input, shape index: {}]   ;;  %s13187_s7 = inlined_call_operand.vmem [shape: f32[1,8], index: 7, kind: input, shape index: {}]   ;;  %s13188_s8 = inlined_call_operand.vmem [shape: f32[1,128], index: 8, kind: input, shape index: {}]   ;;  %s13189_s9 = inlined_call_operand.vmem [shape: bf16[4,128], index: 9, kind: input, shape index: {}]   ;;  %s13190_s10 = inlined_call_operand.vmem [shape: f32[1,128], index: 10, kind: input, shape index: {}]   ;;  %s13191_s11 = inlined_call_operand.vmem [shape: bf16[128,128], index: 11, kind: input, shape index: {}]   ;;  %s13192_s12 = inlined_call_operand.vmem [shape: f32[1,128], index: 12, kind: input, shape index: {}]   ;;  %s13193_s13 = inlined_call_operand.vmem [shape: bf16[128,128], index: 13, kind: input, shape index: {}]   ;;  %s13194_s14 = inlined_call_operand.vmem [shape: f32[1,128], index: 14, kind: input, shape index: {}]   ;;  %s13195_s15 = inlined_call_operand.vmem [shape: f32[1,128], index: 15, kind: input, shape index: {}]   ;;  %s13196_s16 = inlined_call_operand.vmem [shape: bf16[16,128], index: 16, kind: input, shape index: {}]   ;;  %s13197_s17 = inlined_call_operand.vmem [shape: bf16[128,128], index: 17, kind: input, shape index: {}]   ;;  %s13198_s18 = inlined_call_operand.vmem [shape: bf16[8,128], index: 18, kind: input, shape index: {}]   ;;  %s13199_s19 = inlined_call_operand.vmem [shape: f32[1,128], index: 19, kind: input, shape index: {}]   ;;  %s13200_s20 = inlined_call_operand.vmem [shape: bf16[128,128], index: 20, kind: input, shape index: {}]   ;;  %s13201_s21 = inlined_call_operand.vmem [shape: f32[1,128], index: 21, kind: input, shape index: {}]   ;;  %s13202_s22 = inlined_call_operand.vmem [shape: bf16[8,128], index: 22, kind: input, shape index: {}]   ;;  %s13203_s23 = inlined_call_operand.vmem [shape: bf16[128,128], index: 23, kind: input, shape index: {}]   ;;  %s13204_s24 = inlined_call_operand.vmem [shape: f32[1,128], index: 24, kind: input, shape index: {}]   ;;  %s13205_s25 = inlined_call_operand.vmem [shape: bf16[128,128], index: 25, kind: input, shape index: {}]   ;;  %s13206_s26 = inlined_call_operand.hbm [shape: f32[64,128], index: 26, kind: output, shape index: {0}]   ;;  %s13207_s27 = inlined_call_operand.hbm [shape: f32[64,128], index: 27, kind: output, shape index: {1}]   ;;  %s13208_s28 = inlined_call_operand.hbm [shape: f32[1,128], index: 28, kind: output, shape index: {2}]  }
   0x1   :  { %13348 = sst [smem:[#allocation85_spill]] %s13180_s0 }
   0x2   :  { %13349 = sst [smem:[#allocation86_spill]] %s13181_s1 }
   0x3   :  { %13350 = sst [smem:[#allocation87_spill]] %s13182_s2 }
   0x4   :  { %13351 = sst [smem:[#allocation88_spill]] %s13183_s3 }
   0x5   :  { %13352 = sst [smem:[#allocation89_spill]] %s13184_s4 }
   0x6   :  { %13353 = sst [smem:[#allocation90_spill]] %s13185_s5 }
   0x7   :  { %13354 = sst [smem:[#allocation91_spill]] %s13186_s6 }
   0x8   :  { %13355 = sst [smem:[#allocation92_spill]] %s13187_s7 }
   0x9   :  { %13356 = sst [smem:[#allocation93_spill]] %s13188_s8 }
   0xa   :  { %13357 = sst [smem:[#allocation94_spill]] %s13189_s9 }
   0xb   :  { %13358 = sst [smem:[#allocation95_spill]] %s13190_s10 }
   0xc   :  { %13359 = sst [smem:[#allocation96_spill]] %s13191_s11 }
   0xd   :  { %13360 = sst [smem:[#allocation97_spill]] %s13192_s12 }
   0xe   :  { %13361 = sst [smem:[#allocation98_spill]] %s13193_s13 }
   0xf   :  { %13362 = sst [smem:[#allocation99_spill]] %s13206_s26 }
  0x10   :  { %13363 = sst [smem:[#allocation100_spill]] %s13208_s28 }
  0x11   :  { %34 = vsyncpa [#allocation4], 0 }
  0x12   :  { %35 = vsyncpa [#allocation6], 0  ;;  %s8268_s8 = smov 0  }
  0x13 LB: > { %13364 = sst [smem:[#allocation10_spill]] %s8110_s8  ;;  %s8274_s5 = sadd.s32 4294967295, %s8110_s8   ;;  %s8110_s8 = sphi %s8268_s8, %s41_s8  }
  0x14   : > { %p6731_p0 = scmp.ge.s32.totalorder %s8110_s8, 1  ;;  %p776_p1 = scmp.lt.s32.totalorder %s8110_s8, 3 }
  0x16   : > { %p777_p2 = pnand %p6731_p0, %p776_p1 }
  0x18   : > { %780 = sbr.rel (%p777_p2) target bundleno = 2322 (0x912), region = 124 }
  0x1d   : > { %s6732_s9 = sshll.u32 %s8274_s5, 5  ;;  %s6736_s30 = sshll.u32 %s8274_s5, 1 }
  0x1e   : > { %p855_p3 = scmp.lt.s32.totalorder %s6732_s9, 63  ;;  %p867_p4 = scmp.lt.s32.totalorder %s6736_s30, 3 }
  0x1f   : > { %s13365_s11 = sld [smem:[#allocation89_spill]]  ;;  %p6737_p5 = scmp.ne.s32.totalorder %s8274_s5, 0 }
  0x20   : > { %s13873_s9 = smov (!%p855_p3, %s6732_s9), 63  ;;  %s13875_s30 = smov (!%p867_p4, %s6736_s30), 3 }
  0x21   : > { %s6733_s3 = sshll.u32 %s13873_s9, 2  ;;  %s6735_s6 = sshll.u32 %s13873_s9, 3 }
  0x22   : > { %s13366_s12 = sld [smem:[#allocation90_spill]] }
  0x23   : > { %s13367_s28 = sld [smem:[#allocation91_spill]] }
  0x25   : > { %s8285_s29 = scalar_lea.vmem %s13365_s11, %s6733_s3  ;;  %875 = sbr.rel (%p6737_p5) target bundleno = 59 (0x3b), region = 128 }
  0x28   : > { %s8290_s1 = scalar_lea.vmem %s13366_s12, %s6735_s6 }
  0x29   : > { %s869_s26 = scalar_lea.vmem %s13367_s28, %s13875_s30 }
  0x2a   : > { %v8112_v0 = vmov 0.0  }
  0x2b   : > { %876 = vst [vmem:[#allocation2 + $0x30] sm:$0xff] %v8112_v0 }
  0x2c   : > { %877 = vst [vmem:[#allocation2] sm:$0xff] %v8112_v0 }
  0x2d   : > { %878 = vst [vmem:[#allocation2 + $0x58] sm:$0xff] %v8112_v0 }
  0x2e   : > { %879 = vst [vmem:[#allocation2 + $0x18] sm:$0xff] %v8112_v0 }
  0x2f   : > { %880 = vst [vmem:[#allocation2 + $0x50] sm:$0xff] %v8112_v0 }
  0x30   : > { %881 = vst [vmem:[#allocation2 + $0x68] sm:$0xff] %v8112_v0 }
  0x31   : > { %882 = vst [vmem:[#allocation2 + $0x8] sm:$0xff] %v8112_v0 }
  0x32   : > { %883 = vst [vmem:[#allocation2 + $0x48] sm:$0xff] %v8112_v0 }
  0x33   : > { %884 = vst [vmem:[#allocation2 + $0x40] sm:$0xff] %v8112_v0 }
  0x34   : > { %885 = vst [vmem:[#allocation2 + $0x20] sm:$0xff] %v8112_v0 }
  0x35   : > { %886 = vst [vmem:[#allocation2 + $0x10] sm:$0xff] %v8112_v0 }
  0x36   : > { %887 = vst [vmem:[#allocation2 + $0x38] sm:$0xff] %v8112_v0 }
  0x37   : > { %888 = vst [vmem:[#allocation2 + $0x60] sm:$0xff] %v8112_v0 }
  0x38   : > { %889 = vst [vmem:[#allocation2 + $0x70] sm:$0xff] %v8112_v0 }
  0x39   : > { %890 = vst [vmem:[#allocation2 + $0x78] sm:$0xff] %v8112_v0 }
  0x3a   : > { %891 = vst [vmem:[#allocation2 + $0x28] sm:$0xff] %v8112_v0 }
  0x3b PF: > { %v8298_v1 = vld [vmem:[%s8290_s1 + $0x20] sm:$0xff]  ;;  %v8301_v2 = vld [vmem:[%s8290_s1 + $0x10] sm:$0xff]  ;;  %v8113_v4 = vmov 0   ;;  %v8313_v5 = vld [vmem:[%s8290_s1 + $0x28] sm:$0xff]  ;;  %v8114_v28 = vmov 1   ;;  %s13368_s9 = sld [smem:[#allocation87_spill]]  ;;  %v13218_v42 = vlaneseq }
  0x3c   : > { %v8304_v3 = vld [vmem:[%s8290_s1] sm:$0xff]  ;;  %7484 = vset.pattern.permute.xlu2 %v8113_v4  ;;  %7483 = vset.pattern.permute.xlu1 %v8113_v4  ;;  %v8316_v6 = vld [vmem:[%s8290_s1 + $0x18] sm:$0xff]  ;;  %v8319_v7 = vld [vmem:[%s8290_s1 + $0x8] sm:$0xff]  ;;  %vm2640_vm1 = vcmask 1041408   ;;  %v13219_v52 = vmov 0.0   ;;  %vm1450_vm3 = vcmask 523264  }
  0x3d   : > { %7482 = vset.pattern.permute.xlu0 %v8113_v4  ;;  %939 = vperm.xlu2 %7484, %v8298_v1   ;;  %v8325_v8 = vld [vmem:[%s8290_s1 + $0x40] sm:$0xff]  ;;  %v8328_v9 = vld [vmem:[%s8290_s1 + $0x38] sm:$0xff]  ;;  %v8331_v10 = vld [vmem:[%s8290_s1 + $0x30] sm:$0xff]  ;;  %v8434_v46 = vand.u32 127, %v13218_v42  ;;  %s13371_s8 = sld [smem:[#allocation86_spill]]  ;;  %p7187_p6 = scmp.ne.s32.totalorder %s8274_s5, 1 }
  0x3e   : > { %933 = vperm.xlu1 %7483, %v8301_v2   ;;  %927 = vperm.xlu0 %7482, %v8304_v3   ;;  %v8337_v11 = vld [vmem:[%s8290_s1 + $0x58] sm:$0xff]  ;;  %v8340_v12 = vld [vmem:[%s8290_s1 + $0x50] sm:$0xff]  ;;  %v8343_v13 = vld [vmem:[%s8290_s1 + $0x48] sm:$0xff]  ;;  %s13381_s7 = sld [smem:[#allocation88_spill]] }
  0x3f   : > { %v8349_v14 = vld [vmem:[%s8290_s1 + $0x70] sm:$0xff]  ;;  %v8352_v15 = vld [vmem:[%s8290_s1 + $0x68] sm:$0xff]  ;;  %v8355_v16 = vld [vmem:[%s8290_s1 + $0x60] sm:$0xff]  ;;  %13369 = vst [vmem:[#allocation11_spill] sm:$0xff] %v8434_v46  ;;  %s13390_s11 = sld [smem:[#allocation96_spill]] }
  0x40   : > { %v8361_v17 = vld [vmem:[%s8290_s1 + $0x88] sm:$0xff]  ;;  %v8364_v18 = vld [vmem:[%s8290_s1 + $0x80] sm:$0xff]  ;;  %v8367_v19 = vld [vmem:[%s8290_s1 + $0x78] sm:$0xff]  ;;  %s13448_s13 = sld [smem:[#allocation98_spill]] }
  0x41   : > { %v8373_v20 = vld [vmem:[%s8290_s1 + $0xa0] sm:$0xff]  ;;  %v8376_v21 = vld [vmem:[%s8290_s1 + $0x98] sm:$0xff]  ;;  %v8379_v22 = vld [vmem:[%s8290_s1 + $0x90] sm:$0xff]  ;;  %s13515_s12 = sld [smem:[#allocation97_spill]] }
  0x42   : > { %v8385_v23 = vld [vmem:[%s8290_s1 + $0xb8] sm:$0xff]  ;;  %v8388_v24 = vld [vmem:[%s8290_s1 + $0xb0] sm:$0xff]  ;;  %v8391_v25 = vld [vmem:[%s8290_s1 + $0xa8] sm:$0xff] }
  0x43   : > { %v917_v26 = vld [vmem:[%s8290_s1 + $0xc8] sm:$0xff]  ;;  %v916_v27 = vld [vmem:[%s8290_s1 + $0xc0] sm:$0xff]  ;;  %v918_v29 = vld [vmem:[%s8290_s1 + $0xd0] sm:$0xff]  ;;  %s13372_s3 = smov %s13371_s8 }
  0x44   : > { %v919_v30 = vld [vmem:[%s8290_s1 + $0xd8] sm:$0xff]  ;;  %v7361_v32 = vld [vmem:[%s13368_s9 + $0x10] sm:$0xff]  ;;  %v7360_v33 = vld [vmem:[%s13368_s9 + $0x8] sm:$0xff] }
  0x45   : > { %942 = vperm.xlu2 %7484, %v8313_v5   ;;  %v7362_v31 = vld [vmem:[%s13368_s9 + $0x18] sm:$0xff]  ;;  %v920_v34 = vld [vmem:[%s8290_s1 + $0xe0] sm:$0xff]  ;;  %v921_v36 = vld [vmem:[%s8290_s1 + $0xe8] sm:$0xff] }
  0x46   : > { %936 = vperm.xlu1 %7483, %v8316_v6   ;;  %930 = vperm.xlu0 %7482, %v8319_v7   ;;  %v7359_v37 = vld [vmem:[%s13368_s9] sm:$0xff]  ;;  %v922_v40 = vld [vmem:[%s8290_s1 + $0xf0] sm:$0xff]  ;;  %v923_v41 = vld [vmem:[%s8290_s1 + $0xf8] sm:$0xff]  ;;  %s13370_s1 = sld [smem:[#allocation94_spill]] }
  0x47   : > { %2393 = vmatpush.bf16.msra.mxu2 %v7362_v31  ;;  %v8466_v59 = vld [vmem:[%s13371_s8 + $0x38] sm:$0xff]  ;;  %v8473_v60 = vld [vmem:[%s13372_s3 + $0x30] sm:$0xff]  ;;  %v8480_v61 = vld [vmem:[%s13372_s3 + $0x28] sm:$0xff]  ;;  %s13438_s8 = sld [smem:[#allocation95_spill]] }
  0x48   : > { %13373 = vst [vmem:[#allocation12_spill] sm:$0xff] %v8466_v59  ;;  %1555 = vmatpush.msra.mxu0 %v8466_v59  ;;  %7436 = vmatpush.msra.mxu1 %v8466_v59  ;;  %v8490_v62 = vld [vmem:[%s13372_s3 + $0x20] sm:$0xff] }
  0x49   : > { %13374 = vst [vmem:[#allocation13_spill] sm:$0xff] %v8473_v60 }
  0x4a   : > { %1556 = vmatpush.msra.mxu0 %v8473_v60  ;;  %13375 = vst [vmem:[#allocation14_spill] sm:$0xff] %v8480_v61  ;;  %7437 = vmatpush.msra.mxu1 %v8473_v60 }
  0x4b   : > { %2394 = vmatpush.bf16.msra.mxu2 %v7361_v32  ;;  %13376 = vst [vmem:[#allocation15_spill] sm:$0xff] %v8490_v62 }
  0x4c   : > { %v2510_v48 = vld [vmem:[%s13370_s1] sm:$0x3]  ;;  %1557 = vmatpush.msra.mxu0 %v8480_v61  ;;  %7438 = vmatpush.msra.mxu1 %v8480_v61  ;;  %s13434_s1 = sld [smem:[#allocation93_spill]] }
  0x4d   : > { %951 = vperm.xlu2 %7484, %v8325_v8   ;;  %v2642_v51 = vsel %vm2640_vm1, %v2510_v48, 0  ;;  %s13439_s6 = smov %s13438_s8 }
  0x4e   : > { %948 = vperm.xlu1 %7483, %v8328_v9   ;;  %945 = vperm.xlu0 %7482, %v8331_v10  }
  0x4f   : > { %2395 = vmatpush.bf16.msra.mxu2 %v7360_v33  ;;  %7444 = vmatpush.bf16.msra.mxu3 %v2642_v51 }
  0x50   : > { %1558 = vmatpush.msra.mxu0 %v8490_v62  ;;  %7439 = vmatpush.msra.mxu1 %v8490_v62 }
  0x53   : > { %2396 = vmatpush.bf16.msra.mxu2 %v7359_v37 }
  0x55   : > { %960 = vperm.xlu2 %7484, %v8337_v11  }
  0x56   : > { %957 = vperm.xlu1 %7483, %v8340_v12   ;;  %954 = vperm.xlu0 %7482, %v8343_v13  }
  0x57   : > { %2651 = vmatpush.bf16.msrb.mxu2 %v2642_v51 }
  0x5d   : > { %969 = vperm.xlu2 %7484, %v8349_v14  }
  0x5e   : > { %966 = vperm.xlu1 %7483, %v8352_v15   ;;  %963 = vperm.xlu0 %7482, %v8355_v16  }
  0x65   : > { %978 = vperm.xlu2 %7484, %v8361_v17  }
  0x66   : > { %975 = vperm.xlu1 %7483, %v8364_v18   ;;  %972 = vperm.xlu0 %7482, %v8367_v19  }
  0x6d   : > { %987 = vperm.xlu2 %7484, %v8373_v20  }
  0x6e   : > { %984 = vperm.xlu1 %7483, %v8376_v21   ;;  %981 = vperm.xlu0 %7482, %v8379_v22  }
  0x75   : > { %996 = vperm.xlu2 %7484, %v8385_v23  }
  0x76   : > { %993 = vperm.xlu1 %7483, %v8388_v24   ;;  %990 = vperm.xlu0 %7482, %v8391_v25  }
  0x7d   : > { %7485 = vset.pattern.permute.xlu2 %v8114_v28 }
  0x7e   : > { %1002 = vperm.xlu1 %7483, %v917_v26   ;;  %999 = vperm.xlu0 %7482, %v916_v27  }
  0x7f   : > { %1127 = vperm.xlu2 %7485, %v916_v27  }
  0x86   : > { %1005 = vperm.xlu1 %7483, %v918_v29   ;;  %7486 = vset.pattern.permute.xlu0 %v8114_v28 }
  0x87   : > { %7487 = vset.pattern.permute.xlu2 %v8113_v4  ;;  %1130 = vperm.xlu0 %7486, %v917_v26  }
  0x88   : > { %1008 = vperm.xlu2 %7487, %v919_v30  }
  0x8e   : > { %7488 = vset.pattern.permute.xlu1 %v8114_v28 }
  0x8f   : > { %1133 = vperm.xlu1 %7488, %v918_v29   ;;  %1136 = vperm.xlu0 %7486, %v919_v30  }
  0x90   : > { %7489 = vset.pattern.permute.xlu2 %v8114_v28 }
  0x91   : > { %1055 = vperm.xlu2 %7489, %v8304_v3  }
  0x97   : > { %7490 = vset.pattern.permute.xlu1 %v8113_v4  ;;  %1058 = vperm.xlu0 %7486, %v8319_v7   ;;  %v8414_v35 = vpop.permute.xlu2 %939  ;;  %v8527_v7 = vld [vmem:[%s13372_s3 + $0x8] sm:$0xff] }
  0x98   : > { %1011 = vperm.xlu1 %7490, %v920_v34   ;;  %13379 = vst [vmem:[#allocation18_spill] sm:$0xff] %v8527_v7  ;;  %vm1026_vm6 = vcmp.eq.s32.totalorder %v8434_v46, %v8414_v35 }
  0x99   : > { %7491 = vset.pattern.permute.xlu2 %v8113_v4 }
  0x9a   : > { %1014 = vperm.xlu2 %7491, %v921_v36  }
  0x9f   : > { %1142 = vperm.xlu0 %7486, %v921_v36   ;;  %v8421_v38 = vpop.permute.xlu2 %942 }
  0xa0   : > { %7492 = vset.pattern.permute.xlu1 %v8114_v28  ;;  %vm1027_vm7 = vcmp.eq.s32.totalorder %v8434_v46, %v8421_v38 }
  0xa1   : > { %1139 = vperm.xlu1 %7492, %v920_v34  }
  0xa2   : > { %7493 = vset.pattern.permute.xlu2 %v8114_v28 }
  0xa3   : > { %1061 = vperm.xlu2 %7493, %v8301_v2  }
  0xa7   : > { %1064 = vperm.xlu0 %7486, %v8316_v6   ;;  %v8425_v39 = vpop.permute.xlu2 %951 }
  0xa8   : > { %vm1030_vm14 = vcmp.eq.s32.totalorder %v8434_v46, %v8425_v39 }
  0xa9   : > { %7494 = vset.pattern.permute.xlu1 %v8113_v4  ;;  %v8625_v36 = vsel %vm1030_vm14, 1.0, %v13219_v52 }
  0xaa   : > { %1017 = vperm.xlu1 %7494, %v922_v40  }
  0xab   : > { %7495 = vset.pattern.permute.xlu2 %v8113_v4  ;;  %v8510_v4 = vld [vmem:[%s13372_s3 + $0x18] sm:$0xff] }
  0xac   : > { %1020 = vperm.xlu2 %7495, %v923_v41   ;;  %13377 = vst [vmem:[#allocation16_spill] sm:$0xff] %v8510_v4  ;;  %1559 = vmatpush.msra.mxu0 %v8510_v4 }
  0xad   : > { %7440 = vmatpush.msra.mxu1 %v8510_v4 }
  0xaf   : > { %1148 = vperm.xlu0 %7486, %v923_v41   ;;  %v8431_v43 = vpop.permute.xlu2 %960 }
  0xb0   : > { %v934_v44 = vpop.permute.xlu1 %933  ;;  %v928_v45 = vpop.permute.xlu0 %927 }
  0xb1   : > { %vm1022_vm0 = vcmp.eq.s32.totalorder %v8434_v46, %v928_v45  ;;  %vm1024_vm4 = vcmp.eq.s32.totalorder %v8434_v46, %v934_v44 }
  0xb2   : > { %7496 = vset.pattern.permute.xlu1 %v8114_v28  ;;  %v8446_v53 = vsel %vm1022_vm0, 1.0, %v13219_v52  ;;  %v8498_v0 = vsel %vm1024_vm4, 1.0, %v13219_v52 }
  0xb3   : > { %1145 = vperm.xlu1 %7496, %v922_v40  }
  0xb4   : > { %7497 = vset.pattern.permute.xlu2 %v8114_v28 }
  0xb5   : > { %1067 = vperm.xlu2 %7497, %v8298_v1  }
  0xb7   : > { %1076 = vperm.xlu0 %7486, %v8328_v9   ;;  %v8439_v47 = vpop.permute.xlu2 %969 }
  0xb8   : > { %v937_v49 = vpop.permute.xlu1 %936  ;;  %v931_v50 = vpop.permute.xlu0 %930 }
  0xb9   : > { %vm1023_vm2 = vcmp.eq.s32.totalorder %v8434_v46, %v931_v50  ;;  %vm1025_vm5 = vcmp.eq.s32.totalorder %v8434_v46, %v937_v49 }
  0xba   : > { %v8449_v54 = vsel %vm1023_vm2, 1.0, %v13219_v52  ;;  %v8501_v1 = vsel %vm1025_vm5, 1.0, %v13219_v52 }
  0xbb   : > { %v1246_v55 = vpack.c.bf16 %v8449_v54, %v8446_v53  ;;  %1070 = vperm.xlu1 %7496, %v8313_v5   ;;  %v8517_v5 = vld [vmem:[%s13372_s3 + $0x10] sm:$0xff]  ;;  %v1247_v6 = vpack.c.bf16 %v8501_v1, %v8498_v0 }
  0xbc   : > { %13378 = vst [vmem:[#allocation17_spill] sm:$0xff] %v8517_v5  ;;  %1560 = vmatpush.msra.mxu0 %v8517_v5  ;;  %7441 = vmatpush.msra.mxu1 %v8517_v5 }
  0xbd   : > { %1073 = vperm.xlu2 %7497, %v8331_v10   ;;  %6898 = vmatmul.msk.bf16.vlgmr.msra.gmra.mxu2 %vm1450_vm3, %v1246_v55 }
  0xbe   : > { %1561 = vmatpush.msra.mxu0 %v8527_v7  ;;  %7442 = vmatpush.msra.mxu1 %v8527_v7  ;;  %v7368_v7 = vld [vmem:[%s8285_s29 + $0x8] sm:$0xff] }
  0xbf   : > { %1085 = vperm.xlu0 %7486, %v8340_v12   ;;  %v8457_v56 = vpop.permute.xlu2 %978  ;;  %v8556_v12 = vsel %vm1026_vm6, 1.0, %v13219_v52  ;;  %vm1033_vm6 = vcmp.eq.s32.totalorder %v8434_v46, %v8431_v43 }
  0xc0   : > { %v8459_v57 = vpop.permute.xlu1 %948  ;;  %v8461_v58 = vpop.permute.xlu0 %945 }
  0xc1   : > { %vm1029_vm8 = vcmp.eq.s32.totalorder %v8434_v46, %v8459_v57  ;;  %vm1028_vm9 = vcmp.eq.s32.totalorder %v8434_v46, %v8461_v58 }
  0xc3   : > { %1079 = vperm.xlu1 %7496, %v8325_v8   ;;  %v8536_v8 = vld [vmem:[%s13372_s3] sm:$0xff] }
  0xc4   : > { %13380 = vst [vmem:[#allocation19_spill] sm:$0xff] %v8536_v8  ;;  %1562 = vmatpush.msra.mxu0 %v8536_v8  ;;  %7443 = vmatpush.msra.mxu1 %v8536_v8  ;;  %v7369_v8 = vld [vmem:[%s8285_s29 + $0x10] sm:$0xff] }
  0xc5   : > { %1082 = vperm.xlu2 %7497, %v8343_v13   ;;  %v8559_v13 = vsel %vm1027_vm7, 1.0, %v13219_v52 }
  0xc7   : > { %1094 = vperm.xlu0 %7486, %v8352_v15   ;;  %v8494_v63 = vpop.permute.xlu2 %987 }
  0xc8   : > { %v8503_v2 = vpop.permute.xlu1 %957  ;;  %v8505_v3 = vpop.permute.xlu0 %954 }
  0xc9   : > { %vm1031_vm15 = vcmp.eq.s32.totalorder %v8434_v46, %v8505_v3  ;;  %vm1032_vm7 = vcmp.eq.s32.totalorder %v8434_v46, %v8503_v2 }
  0xca   : > { %v8628_v37 = vsel %vm1031_vm15, 1.0, %v13219_v52 }
  0xcb   : > { %1088 = vperm.xlu1 %7496, %v8337_v11   ;;  %v1250_v44 = vpack.c.bf16 %v8628_v37, %v8625_v36 }
  0xcd   : > { %1091 = vperm.xlu2 %7497, %v8355_v16   ;;  %6899 = vmatmul.msk.bf16.gmra.mxu2 %vm1450_vm3, %v1247_v6 }
  0xcf   : > { %1103 = vperm.xlu0 %7486, %v8364_v18   ;;  %v8546_v11 = vpop.permute.xlu2 %996  ;;  %v1248_v18 = vpack.c.bf16 %v8559_v13, %v8556_v12 }
  0xd0   : > { %v8540_v9 = vpop.permute.xlu1 %966  ;;  %v8542_v10 = vpop.permute.xlu0 %963 }
  0xd1   : > { %vm1035_vm14 = vcmp.eq.s32.totalorder %v8434_v46, %v8540_v9  ;;  %vm1034_vm15 = vcmp.eq.s32.totalorder %v8434_v46, %v8542_v10 }
  0xd2   : > { %v8733_v9 = vsel %vm1035_vm14, 1.0, %v13219_v52  ;;  %v8736_v10 = vsel %vm1034_vm15, 1.0, %v13219_v52  ;;  %vm2591_vm15 = vcmask 31744  }
  0xd3   : > { %1097 = vperm.xlu1 %7496, %v8349_v14  }
  0xd5   : > { %1100 = vperm.xlu2 %7497, %v8367_v19  }
  0xd7   : > { %1112 = vperm.xlu0 %7486, %v8376_v21  }
  0xd8   : > { %v8561_v15 = vpop.permute.xlu1 %975  ;;  %v8563_v16 = vpop.permute.xlu0 %972 }
  0xd9   : > { %v1128_v14 = vpop.permute.xlu2 %1127 }
  0xda   : > { %vm1174_vm11 = vcmp.eq.s32.totalorder %v8434_v46, %v1128_v14  ;;  %v8669_v14 = vsel %vm1033_vm6, 1.0, %v13219_v52  ;;  %vm1037_vm6 = vcmp.eq.s32.totalorder %v8434_v46, %v8563_v16 }
  0xdb   : > { %1106 = vperm.xlu1 %7496, %v8361_v17   ;;  %v8583_v17 = vsel %vm1029_vm8, 1.0, %v13219_v52  ;;  %v8603_v29 = vsel %vm1174_vm11, 1.0, %v13219_v52 }
  0xdd   : > { %1109 = vperm.xlu2 %7497, %v8379_v22   ;;  %6900 = vmatmul.msk.bf16.gmra.mxu2 %vm1450_vm3, %v1248_v18  ;;  %v8586_v22 = vsel %vm1028_vm9, 1.0, %v13219_v52  ;;  %v8672_v18 = vsel %vm1032_vm7, 1.0, %v13219_v52 }
  0xdf   : > { %1121 = vperm.xlu0 %7486, %v8388_v24  }
  0xe0   : > { %v8571_v19 = vpop.permute.xlu1 %984  ;;  %v8573_v21 = vpop.permute.xlu0 %981 }
  0xe2   : > { %v1009_v26 = vpop.permute.xlu2 %1008 }
  0xe3   : > { %1115 = vperm.xlu1 %7496, %v8373_v20   ;;  %v1249_v20 = vpack.c.bf16 %v8583_v17, %v8586_v22  ;;  %vm1049_vm0 = vcmp.eq.s32.totalorder %v8434_v46, %v1009_v26 }
  0xe4   : > { %v8631_v38 = vsel %vm1049_vm0, 1.0, %v13219_v52 }
  0xe5   : > { %1118 = vperm.xlu2 %7497, %v8391_v25  }
  0xe7   : > { %1124 = vperm.xlu0 %7486, %v8385_v23  }
  0xe8   : > { %v8588_v24 = vpop.permute.xlu1 %993  ;;  %v8590_v27 = vpop.permute.xlu0 %990 }
  0xeb   : > { %v1056_v28 = vpop.permute.xlu2 %1055 }
  0xec   : > { %vm1150_vm10 = vcmp.eq.s32.totalorder %v8434_v46, %v1056_v28  ;;  %v7366_v28 = vld [vmem:[%s13381_s7 + $0x18] sm:$0xff] }
  0xed   : > { %v8597_v23 = vsel %vm1150_vm10, 1.0, %v13219_v52  ;;  %6901 = vmatmul.msk.bf16.gmra.mxu2 %vm1450_vm3, %v1249_v20  ;;  %2232 = vmatpush.bf16.msrb.mxu1 %v7366_v28  ;;  %v7363_v28 = vld [vmem:[%s13381_s7] sm:$0xff] }
  0xee   : > { %v1342_v25 = vsub.f32 %v8446_v53, %v8597_v23 }
  0xf0   : > { %v1003_v30 = vpop.permute.xlu1 %1002  ;;  %6818 = vmatmul.msk.f32.vlgmr.msra.gmra.mxu0 %vm1450_vm3, %v1342_v25  ;;  %v1000_v31 = vpop.permute.xlu0 %999  ;;  %v1251_v25 = vpack.c.bf16 %v8669_v14, %v8672_v18 }
  0xf1   : > { %vm1047_vm12 = vcmp.eq.s32.totalorder %v8434_v46, %v1003_v30  ;;  %vm1046_vm13 = vcmp.eq.s32.totalorder %v8434_v46, %v1000_v31 }
  0xf2   : > { %v8609_v32 = vsel %vm1047_vm12, 1.0, %v13219_v52  ;;  %v8612_v33 = vsel %vm1046_vm13, 1.0, %v13219_v52 }
  0xf3   : > { %v1258_v34 = vpack.c.bf16 %v8609_v32, %v8612_v33  ;;  %v1366_v35 = vsub.f32 %v8612_v33, %v8603_v29 }
  0xf4   : > { %v1015_v51 = vpop.permute.xlu2 %1014 }
  0xf5   : > { %6842 = vmatmul.msk.f32.vlgmr.msra.gmra.mxu1 %vm1450_vm3, %v1366_v35  ;;  %vm1051_vm8 = vcmp.eq.s32.totalorder %v8434_v46, %v1015_v51 }
  0xf6   : > { %v8688_v31 = vsel %vm1051_vm8, 1.0, %v13219_v52  ;;  %vm1036_vm8 = vcmp.eq.s32.totalorder %v8434_v46, %v8439_v47 }
  0xf8   : > { %v1006_v40 = vpop.permute.xlu1 %1005 }
  0xf9   : > { %vm1048_vm1 = vcmp.eq.s32.totalorder %v8434_v46, %v1006_v40  ;;  %v1131_v39 = vpop.permute.xlu0 %1130 }
  0xfa   : > { %v8635_v41 = vsel %vm1048_vm1, 1.0, %v13219_v52  ;;  %vm1175_vm2 = vcmp.eq.s32.totalorder %v8434_v46, %v1131_v39 }
  0xfb   : > { %v1259_v45 = vpack.c.bf16 %v8631_v38, %v8635_v41  ;;  %v8643_v48 = vsel %vm1175_vm2, 1.0, %v13219_v52 }
  0xfc   : > { %v1367_v50 = vsub.f32 %v8609_v32, %v8643_v48 }
  0xfd   : > { %6902 = vmatmul.msk.bf16.gmra.mxu2 %vm1450_vm3, %v1250_v44  ;;  %v1062_v26 = vpop.permute.xlu2 %1061  ;;  %v7365_v44 = vld [vmem:[%s13381_s7 + $0x10] sm:$0xff] }
  0xfe   : > { %6843 = vmatmul.msk.f32.gmra.mxu1 %vm1450_vm3, %v1367_v50  ;;  %vm1152_vm11 = vcmp.eq.s32.totalorder %v8434_v46, %v1062_v26 }
  0xff   : > { %2233 = vmatpush.bf16.msrb.mxu1 %v7365_v44 }
 0x101   : > { %v1134_v53 = vpop.permute.xlu1 %1133  ;;  %v1137_v55 = vpop.permute.xlu0 %1136 }
 0x102   : > { %vm1176_vm4 = vcmp.eq.s32.totalorder %v8434_v46, %v1134_v53  ;;  %vm1177_vm5 = vcmp.eq.s32.totalorder %v8434_v46, %v1137_v55  ;;  %v7364_v53 = vld [vmem:[%s13381_s7 + $0x8] sm:$0xff] }
 0x103   : > { %v8654_v57 = vsel %vm1176_vm4, 1.0, %v13219_v52  ;;  %v8657_v58 = vsel %vm1177_vm5, 1.0, %v13219_v52  ;;  %2234 = vmatpush.bf16.msrb.mxu1 %v7364_v53 }
 0x104   : > { %v1368_v3 = vsub.f32 %v8635_v41, %v8654_v57  ;;  %v1369_v43 = vsub.f32 %v8631_v38, %v8657_v58 }
 0x106   : > { %6844 = vmatmul.msk.f32.gmra.mxu1 %vm1450_vm3, %v1368_v3  ;;  %v1021_v50 = vpop.permute.xlu2 %1020 }
 0x107   : > { %2235 = vmatpush.bf16.msrb.mxu1 %v7363_v28  ;;  %vm1053_vm1 = vcmp.eq.s32.totalorder %v8434_v46, %v1021_v50 }
 0x109   : > { %v1059_v20 = vpop.permute.xlu0 %1058 }
 0x10a   : > { %vm1151_vm9 = vcmp.eq.s32.totalorder %v8434_v46, %v1059_v20  ;;  %v1012_v2 = vpop.permute.xlu1 %1011 }
 0x10b   : > { %v8684_v30 = vsel %vm1151_vm9, 1.0, %v13219_v52  ;;  %vm1050_vm10 = vcmp.eq.s32.totalorder %v8434_v46, %v1012_v2 }
 0x10c   : > { %v1343_v35 = vsub.f32 %v8449_v54, %v8684_v30  ;;  %v8693_v40 = vsel %vm1050_vm10, 1.0, %v13219_v52  ;;  %v8705_v54 = vsel %vm1152_vm11, 1.0, %v13219_v52  ;;  %vm1038_vm11 = vcmp.eq.s32.totalorder %v8434_v46, %v8561_v15 }
 0x10d   : > { %v1260_v39 = vpack.c.bf16 %v8688_v31, %v8693_v40  ;;  %6903 = vmatmul.msk.bf16.gmra.mxu2 %vm1450_vm3, %v1251_v25  ;;  %v1344_v3 = vsub.f32 %v8498_v0, %v8705_v54  ;;  %v1252_v25 = vpack.c.bf16 %v8733_v9, %v8736_v10 }
 0x10e   : > { %6819 = vmatmul.msk.f32.gmra.mxu0 %vm1450_vm3, %v1343_v35  ;;  %6845 = vmatmul.msk.f32.gmra.mxu1 %vm1450_vm3, %v1369_v43 }
 0x10f   : > { %v1068_v35 = vpop.permute.xlu2 %1067 }
 0x110   : > { %vm1154_vm4 = vcmp.eq.s32.totalorder %v8434_v46, %v1068_v35 }
 0x111   : > { %v1143_v51 = vpop.permute.xlu0 %1142 }
 0x112   : > { %vm1179_vm12 = vcmp.eq.s32.totalorder %v8434_v46, %v1143_v51 }
 0x113   : > { %v1140_v55 = vpop.permute.xlu1 %1139  ;;  %v8719_v26 = vsel %vm1179_vm12, 1.0, %v13219_v52  ;;  %vm1039_vm12 = vcmp.eq.s32.totalorder %v8434_v46, %v8457_v56 }
 0x114   : > { %vm1178_vm13 = vcmp.eq.s32.totalorder %v8434_v46, %v1140_v55  ;;  %v1371_v51 = vsub.f32 %v8688_v31, %v8719_v26 }
 0x115   : > { %v8722_v20 = vsel %vm1178_vm13, 1.0, %v13219_v52 }
 0x116   : > { %v1370_v43 = vsub.f32 %v8693_v40, %v8722_v20  ;;  %6820 = vmatmul.msk.f32.gmra.mxu0 %vm1450_vm3, %v1344_v3  ;;  %v8753_v3 = vsel %vm1053_vm1, 1.0, %v13219_v52  ;;  %vm1040_vm1 = vcmp.eq.s32.totalorder %v8434_v46, %v8573_v21 }
 0x118   : > { %6846 = vmatmul.msk.f32.gmra.mxu1 %vm1450_vm3, %v1370_v43 }
 0x119   : > { %v1065_v2 = vpop.permute.xlu0 %1064 }
 0x11a   : > { %vm1153_vm0 = vcmp.eq.s32.totalorder %v8434_v46, %v1065_v2 }
 0x11b   : > { %v8744_v44 = vsel %vm1153_vm0, 1.0, %v13219_v52  ;;  %vm1041_vm0 = vcmp.eq.s32.totalorder %v8434_v46, %v8571_v19 }
 0x11c   : > { %v1345_v53 = vsub.f32 %v8501_v1, %v8744_v44  ;;  %v1018_v55 = vpop.permute.xlu1 %1017  ;;  %v8764_v1 = vsel %vm1154_vm4, 1.0, %v13219_v52 }
 0x11d   : > { %vm1052_vm2 = vcmp.eq.s32.totalorder %v8434_v46, %v1018_v55  ;;  %6904 = vmatmul.msk.bf16.gmra.mxu2 %vm1450_vm3, %v1252_v25  ;;  %v1346_v2 = vsub.f32 %v8556_v12, %v8764_v1  ;;  %v8782_v12 = vsel %vm1037_vm6, 1.0, %v13219_v52  ;;  %v8789_v55 = vsel %vm1036_vm8, 1.0, %v13219_v52 }
 0x11e   : > { %v8757_v50 = vsel %vm1052_vm2, 1.0, %v13219_v52  ;;  %6821 = vmatmul.msk.f32.gmra.mxu0 %vm1450_vm3, %v1345_v53  ;;  %v1253_v47 = vpack.c.bf16 %v8782_v12, %v8789_v55  ;;  %vm1042_vm6 = vcmp.eq.s32.totalorder %v8434_v46, %v8494_v63 }
 0x11f   : > { %v1261_v28 = vpack.c.bf16 %v8753_v3, %v8757_v50 }
 0x120   : > { %6847 = vmatmul.msk.f32.gmra.mxu1 %vm1450_vm3, %v1371_v51 }
 0x121   : > { %v1149_v43 = vpop.permute.xlu0 %1148 }
 0x122   : > { %vm1181_vm5 = vcmp.eq.s32.totalorder %v8434_v46, %v1149_v43 }
 0x123   : > { %v8776_v35 = vsel %vm1181_vm5, 1.0, %v13219_v52  ;;  %vm1043_vm5 = vcmp.eq.s32.totalorder %v8434_v46, %v8590_v27  ;;  %v8889_v27 = vsel %vm1042_vm6, 1.0, %v13219_v52 }
 0x125   : > { %v1146_v25 = vpop.permute.xlu1 %1145 }
 0x126   : > { %vm1180_vm7 = vcmp.eq.s32.totalorder %v8434_v46, %v1146_v25  ;;  %6822 = vmatmul.msk.f32.gmra.mxu0 %vm1450_vm3, %v1346_v2  ;;  %v1373_v2 = vsub.f32 %v8753_v3, %v8776_v35  ;;  %v1074_v25 = vpop.permute.xlu2 %1073  ;;  %v7389_v3 = vld [vmem:[%s13390_s11 + $0x30] sm:$0xff] }
 0x127   : > { %v8779_v51 = vsel %vm1180_vm7, 1.0, %v13219_v52  ;;  %vm1156_vm10 = vcmp.eq.s32.totalorder %v8434_v46, %v1074_v25  ;;  %v7370_v25 = vld [vmem:[%s8285_s29 + $0x18] sm:$0xff] }
 0x128   : > { %v1372_v53 = vsub.f32 %v8757_v50, %v8779_v51  ;;  %6981 = vmatmul.msk.bf16.vlgmr.msra.gmra.mxu3 %vm2591_vm15, %v7370_v25  ;;  %v7371_v25 = vld [vmem:[%s8285_s29 + $0x20] sm:$0xff]  ;;  %v7377_v50 = vld [vmem:[%s8285_s29 + $0x50] sm:$0xff] }
 0x12a   : > { %6848 = vmatmul.msk.f32.gmra.mxu1 %vm1450_vm3, %v1372_v53  ;;  %v8806_v53 = vsel %vm1156_vm10, 1.0, %v13219_v52  ;;  %vm1045_vm10 = vcmp.eq.s32.totalorder %v8434_v46, %v8546_v11 }
 0x12d   : > { %v1071_v43 = vpop.permute.xlu1 %1070  ;;  %6905 = vmatmul.msk.bf16.gmra.mxu2 %vm1450_vm3, %v1253_v47  ;;  %v1326_v47 = vpack.c.bf16 %v8684_v30, %v8597_v23 }
 0x12e   : > { %vm1155_vm9 = vcmp.eq.s32.totalorder %v8434_v46, %v1071_v43  ;;  %v8813_v43 = vsel %vm1038_vm11, 1.0, %v13219_v52 }
 0x12f   : > { %v6775_v42 = vsel %vm1155_vm9, 1.0, %v13219_v52  ;;  %vm1044_vm9 = vcmp.eq.s32.totalorder %v8434_v46, %v8588_v24  ;;  %v8922_v24 = vsel %vm1045_vm10, 1.0, %v13219_v52 }
 0x130   : > { %v1347_v16 = vsub.f32 %v8559_v13, %v6775_v42  ;;  %v1077_v13 = vpop.permute.xlu0 %1076 }
 0x131   : > { %vm1157_vm13 = vcmp.eq.s32.totalorder %v8434_v46, %v1077_v13  ;;  %v8845_v13 = vsel %vm1041_vm0, 1.0, %v13219_v52 }
 0x132   : > { %6823 = vmatmul.msk.f32.gmra.mxu0 %vm1450_vm3, %v1347_v16  ;;  %6849 = vmatmul.msk.f32.gmra.mxu1 %vm1450_vm3, %v1373_v2  ;;  %v1348_v16 = vsub.f32 %v8586_v22, %v8806_v53  ;;  %v8818_v2 = vsel %vm1039_vm12, 1.0, %v13219_v52  ;;  %v8826_v15 = vsel %vm1157_vm13, 1.0, %v13219_v52 }
 0x133   : > { %v1254_v56 = vpack.c.bf16 %v8818_v2, %v8813_v43  ;;  %v1349_v22 = vsub.f32 %v8583_v17, %v8826_v15  ;;  %v1083_v17 = vpop.permute.xlu2 %1082 }
 0x134   : > { %vm1159_vm2 = vcmp.eq.s32.totalorder %v8434_v46, %v1083_v17 }
 0x135   : > { %v1080_v23 = vpop.permute.xlu1 %1079 }
 0x136   : > { %vm1158_vm14 = vcmp.eq.s32.totalorder %v8434_v46, %v1080_v23 }
 0x138   : > { %6982 = vmatmul.msk.bf16.gmra.mxu3 %vm2591_vm15, %v7371_v25  ;;  %v7372_v25 = vld [vmem:[%s8285_s29 + $0x28] sm:$0xff] }
 0x13a   : > { %6824 = vmatmul.msk.f32.gmra.mxu0 %vm1450_vm3, %v1348_v16  ;;  %6866 = vmatmul.msk.bf16.vlgmr.msrb.gmra.mxu1 %vm1450_vm3, %v1326_v47  ;;  %v8842_v47 = vsel %vm1158_vm14, 1.0, %v13219_v52  ;;  %v8848_v16 = vsel %vm1040_vm1, 1.0, %v13219_v52 }
 0x13b   : > { %v1350_v19 = vsub.f32 %v8625_v36, %v8842_v47  ;;  %v1255_v21 = vpack.c.bf16 %v8845_v13, %v8848_v16 }
 0x13d   : > { %6906 = vmatmul.msk.bf16.gmra.mxu2 %vm1450_vm3, %v1254_v56  ;;  %v1327_v56 = vpack.c.bf16 %v8744_v44, %v8705_v54  ;;  %v1086_v54 = vpop.permute.xlu0 %1085 }
 0x13e   : > { %vm1160_vm4 = vcmp.eq.s32.totalorder %v8434_v46, %v1086_v54 }
 0x13f   : > { %v8876_v17 = vsel %vm1160_vm4, 1.0, %v13219_v52 }
 0x140   : > { %v8831_v30 = vpop.f32.mrf.mxu2 }
 0x142   : > { %6825 = vmatmul.msk.f32.gmra.mxu0 %vm1450_vm3, %v1349_v22  ;;  %v8862_v22 = vsel %vm1159_vm2, 1.0, %v13219_v52 }
 0x143   : > { %v1351_v36 = vsub.f32 %v8628_v37, %v8862_v22  ;;  %v1089_v37 = vpop.permute.xlu1 %1088 }
 0x144   : > { %vm1161_vm7 = vcmp.eq.s32.totalorder %v8434_v46, %v1089_v37 }
 0x145   : > { %v6781_v63 = vsel %vm1161_vm7, 1.0, %v13219_v52  ;;  %v1095_v37 = vpop.permute.xlu0 %1094 }
 0x146   : > { %vm1163_vm11 = vcmp.eq.s32.totalorder %v8434_v46, %v1095_v37  ;;  %v1331_v33 = vpack.c.bf16 %v6781_v63, %v8876_v17 }
 0x148   : > { %v8854_v23 = vpop.f32.mrf.mxu2  ;;  %6983 = vmatmul.msk.bf16.gmra.mxu3 %vm2591_vm15, %v7372_v25 }
 0x14a   : > { %6826 = vmatmul.msk.f32.gmra.mxu0 %vm1450_vm3, %v1350_v19  ;;  %6867 = vmatmul.msk.bf16.gmra.mxu1 %vm1450_vm3, %v1327_v56  ;;  %v1328_v56 = vpack.c.bf16 %v6775_v42, %v8764_v1  ;;  %v8882_v19 = vsel %vm1043_vm5, 1.0, %v13219_v52  ;;  %v1092_v1 = vpop.permute.xlu2 %1091 }
 0x14b   : > { %v1256_v42 = vpack.c.bf16 %v8882_v19, %v8889_v27  ;;  %vm1162_vm8 = vcmp.eq.s32.totalorder %v8434_v46, %v1092_v1 }
 0x14d   : > { %6907 = vmatmul.msk.bf16.gmra.mxu2 %vm1450_vm3, %v1255_v21  ;;  %v1352_v21 = vsub.f32 %v8672_v18, %v8876_v17  ;;  %v1353_v18 = vsub.f32 %v8669_v14, %v6781_v63  ;;  %v8913_v14 = vsel %vm1044_vm9, 1.0, %v13219_v52 }
 0x14e   : > { %v1257_v11 = vpack.c.bf16 %v8922_v24, %v8913_v14 }
 0x150   : > { %v8867_v44 = vpop.f32.mrf.mxu2 }
 0x152   : > { %6827 = vmatmul.msk.f32.gmra.mxu0 %vm1450_vm3, %v1351_v36 }
 0x158   : > { %v8886_v54 = vpop.f32.mrf.mxu2 }
 0x15a   : > { %6828 = vmatmul.msk.f32.gmra.mxu0 %vm1450_vm3, %v1352_v21  ;;  %6868 = vmatmul.msk.bf16.gmra.mxu1 %vm1450_vm3, %v1328_v56  ;;  %v8907_v56 = vsel %vm1162_vm8, 1.0, %v13219_v52 }
 0x15b   : > { %v1354_v21 = vsub.f32 %v8736_v10, %v8907_v56  ;;  %v8930_v10 = vsel %vm1163_vm11, 1.0, %v13219_v52 }
 0x15c   : > { %v1355_v25 = vsub.f32 %v8733_v9, %v8930_v10  ;;  %v1330_v9 = vpack.c.bf16 %v8862_v22, %v8842_v47  ;;  %v1104_v47 = vpop.permute.xlu0 %1103 }
 0x15d   : > { %6908 = vmatmul.msk.bf16.gmra.mxu2 %vm1450_vm3, %v1256_v42  ;;  %v1329_v42 = vpack.c.bf16 %v8826_v15, %v8806_v53  ;;  %v1098_v15 = vpop.permute.xlu1 %1097  ;;  %vm1166_vm14 = vcmp.eq.s32.totalorder %v8434_v46, %v1104_v47 }
 0x15e   : > { %vm1164_vm12 = vcmp.eq.s32.totalorder %v8434_v46, %v1098_v15 }
 0x15f   : > { %v8947_v0 = vsel %vm1164_vm12, 1.0, %v13219_v52 }
 0x160   : > { %v8899_v36 = vpop.f32.mrf.mxu2 }
 0x162   : > { %6829 = vmatmul.msk.f32.gmra.mxu0 %vm1450_vm3, %v1353_v18 }
 0x165   : > { %v1107_v32 = vpop.permute.xlu1 %1106 }
 0x166   : > { %vm1167_vm0 = vcmp.eq.s32.totalorder %v8434_v46, %v1107_v32  ;;  %v7375_v32 = vld [vmem:[%s8285_s29 + $0x40] sm:$0xff] }
 0x167   : > { %v8996_v17 = vsel %vm1167_vm0, 1.0, %v13219_v52 }
 0x168   : > { %v8919_v1 = vpop.f32.mrf.mxu2  ;;  %v1359_v63 = vsub.f32 %v8818_v2, %v8996_v17 }
 0x16a   : > { %6830 = vmatmul.msk.f32.gmra.mxu0 %vm1450_vm3, %v1354_v21  ;;  %6869 = vmatmul.msk.bf16.gmra.mxu1 %vm1450_vm3, %v1329_v42  ;;  %v7373_v42 = vld [vmem:[%s8285_s29 + $0x30] sm:$0xff] }
 0x16b   : > { %6984 = vmatmul.msk.bf16.gmra.mxu3 %vm2591_vm15, %v7373_v42 }
 0x16d   : > { %v8932_v18 = vpop.f32.mrf.mxu0  ;;  %6909 = vmatmul.msk.bf16.gmra.mxu2 %vm1450_vm3, %v1257_v11  ;;  %v1101_v11 = vpop.permute.xlu2 %1100 }
 0x16e   : > { %13382 = vst [vmem:[#allocation20_spill] sm:$0xff] %v8932_v18  ;;  %v1660_v53 = vmul.f32 %v8932_v18, %v8932_v18  ;;  %vm1165_vm13 = vcmp.eq.s32.totalorder %v8434_v46, %v1101_v11  ;;  %v7374_v11 = vld [vmem:[%s8285_s29 + $0x38] sm:$0xff] }
 0x170   : > { %1692 = vadd.xlane.f32.xlu1 %v1660_v53  ;;  %v8939_v37 = vpop.f32.mrf.mxu2  ;;  %v1356_v53 = vsub.f32 %v8789_v55, %v8947_v0 }
 0x172   : > { %6831 = vmatmul.msk.f32.gmra.mxu0 %vm1450_vm3, %v1355_v25  ;;  %v8943_v21 = vpop.f32.mrf.mxu1  ;;  %v8962_v25 = vsel %vm1165_vm13, 1.0, %v13219_v52 }
 0x173   : > { %13383 = vst [vmem:[#allocation21_spill] sm:$0xff] %v8943_v21  ;;  %v1357_v55 = vsub.f32 %v8782_v12, %v8962_v25 }
 0x178   : > { %v8954_v6 = vpop.f32.mrf.mxu2 }
 0x17a   : > { %6832 = vmatmul.msk.f32.gmra.mxu0 %vm1450_vm3, %v1356_v53  ;;  %6870 = vmatmul.msk.bf16.gmra.mxu1 %vm1450_vm3, %v1330_v9  ;;  %v8978_v9 = vsel %vm1166_vm14, 1.0, %v13219_v52 }
 0x17b   : > { %v8959_v15 = vpop.f32.mrf.mxu1  ;;  %6985 = vmatmul.msk.bf16.gmra.mxu3 %vm2591_vm15, %v7374_v11 }
 0x17c   : > { %13384 = vst [vmem:[#allocation22_spill] sm:$0xff] %v8959_v15 }
 0x17d   : > { %6910 = vmatmul.msk.bf16.gmra.mxu2 %vm1450_vm3, %v1258_v34  ;;  %v1358_v34 = vsub.f32 %v8813_v43, %v8978_v9  ;;  %v1110_v43 = vpop.permute.xlu2 %1109 }
 0x17e   : > { %vm1168_vm1 = vcmp.eq.s32.totalorder %v8434_v46, %v1110_v43 }
 0x17f   : > { %v9014_v38 = vsel %vm1168_vm1, 1.0, %v13219_v52 }
 0x180   : > { %v8970_v22 = vpop.f32.mrf.mxu2  ;;  %v1360_v2 = vsub.f32 %v8848_v16, %v9014_v38 }
 0x182   : > { %6833 = vmatmul.msk.f32.gmra.mxu0 %vm1450_vm3, %v1357_v55 }
 0x183   : > { %v8974_v42 = vpop.f32.mrf.mxu1 }
 0x184   : > { %13385 = vst [vmem:[#allocation23_spill] sm:$0xff] %v8974_v42 }
 0x188   : > { %v8984_v12 = vpop.f32.mrf.mxu2 }
 0x18a   : > { %6834 = vmatmul.msk.f32.gmra.mxu0 %vm1450_vm3, %v1358_v34  ;;  %6871 = vmatmul.msk.bf16.gmra.mxu1 %vm1450_vm3, %v1331_v33 }
 0x18b   : > { %v8989_v53 = vpop.f32.mrf.mxu0  ;;  %v8991_v47 = vpop.f32.mrf.mxu1  ;;  %6986 = vmatmul.msk.bf16.gmra.mxu3 %vm2591_vm15, %v7375_v32 }
 0x18c   : > { %13386 = vst [vmem:[#allocation24_spill] sm:$0xff] %v8989_v53  ;;  %v1661_v55 = vmul.f32 %v8989_v53, %v8989_v53 }
 0x18d   : > { %13387 = vst [vmem:[#allocation25_spill] sm:$0xff] %v8991_v47  ;;  %6911 = vmatmul.msk.bf16.gmra.mxu2 %vm1450_vm3, %v1259_v45  ;;  %v1113_v45 = vpop.permute.xlu0 %1112 }
 0x18e   : > { %1694 = vadd.xlane.f32.xlu2 %v1661_v55  ;;  %v1332_v55 = vpack.c.bf16 %v8930_v10, %v8907_v56  ;;  %vm1169_vm2 = vcmp.eq.s32.totalorder %v8434_v46, %v1113_v45 }
 0x18f   : > { %v9036_v56 = vsel %vm1169_vm2, 1.0, %v13219_v52 }
 0x190   : > { %v9004_v11 = vpop.f32.mrf.mxu2  ;;  %v1361_v45 = vsub.f32 %v8845_v13, %v9036_v56 }
 0x192   : > { %6835 = vmatmul.msk.f32.gmra.mxu0 %vm1450_vm3, %v1359_v63  ;;  %v7390_v63 = vld [vmem:[%s13390_s11 + $0x38] sm:$0xff] }
 0x193   : > { %v9009_v33 = vpop.f32.mrf.mxu0  ;;  %3593 = vmatpush.bf16.msrb.mxu3 %v7390_v63 }
 0x194   : > { %13388 = vst [vmem:[#allocation26_spill] sm:$0xff] %v9009_v33  ;;  %v1662_v34 = vmul.f32 %v9009_v33, %v9009_v33  ;;  %v7380_v33 = vld [vmem:[%s8285_s29 + $0x68] sm:$0xff] }
 0x195   : > { %v9016_v41 = vpop.f32.mrf.mxu1 }
 0x196   : > { %13389 = vst [vmem:[#allocation27_spill] sm:$0xff] %v9016_v41  ;;  %1696 = vadd.xlane.f32.xlu0 %v1662_v34  ;;  %v1116_v34 = vpop.permute.xlu1 %1115 }
 0x197   : > { %vm1170_vm4 = vcmp.eq.s32.totalorder %v8434_v46, %v1116_v34  ;;  %3594 = vmatpush.bf16.msrb.mxu3 %v7389_v3  ;;  %v1334_v3 = vpack.c.bf16 %v8996_v17, %v8978_v9 }
 0x198   : > { %v9023_v43 = vpop.f32.mrf.mxu2  ;;  %v9056_v40 = vsel %vm1170_vm4, 1.0, %v13219_v52 }
 0x199   : > { %v1362_v34 = vsub.f32 %v8889_v27, %v9056_v40 }
 0x19a   : > { %6836 = vmatmul.msk.f32.gmra.mxu0 %vm1450_vm3, %v1360_v2  ;;  %6872 = vmatmul.msk.bf16.gmra.mxu1 %vm1450_vm3, %v1332_v55  ;;  %v7376_v55 = vld [vmem:[%s8285_s29 + $0x48] sm:$0xff] }
 0x19b   : > { %v9031_v32 = vpop.f32.mrf.mxu0  ;;  %6987 = vmatmul.msk.bf16.gmra.mxu3 %vm2591_vm15, %v7376_v55  ;;  %v1122_v55 = vpop.permute.xlu0 %1121 }
 0x19c   : > { %13391 = vst [vmem:[#allocation28_spill] sm:$0xff] %v9031_v32  ;;  %v1663_v16 = vmul.f32 %v9031_v32, %v9031_v32  ;;  %vm1172_vm6 = vcmp.eq.s32.totalorder %v8434_v46, %v1122_v55 }
 0x19d   : > { %6912 = vmatmul.msk.bf16.gmra.mxu2 %vm1450_vm3, %v1260_v39  ;;  %v9042_v10 = vpop.f32.mrf.mxu1  ;;  %v1119_v39 = vpop.permute.xlu2 %1118 }
 0x19e   : > { %13392 = vst [vmem:[#allocation29_spill] sm:$0xff] %v9042_v10  ;;  %1698 = vadd.xlane.f32.xlu2 %v1663_v16  ;;  %v1333_v16 = vpack.c.bf16 %v8962_v25, %v8947_v0  ;;  %vm1171_vm5 = vcmp.eq.s32.totalorder %v8434_v46, %v1119_v39 }
 0x1a0   : > { %v9046_v2 = vpop.f32.mrf.mxu2 }
 0x1a2   : > { %6837 = vmatmul.msk.f32.gmra.mxu0 %vm1450_vm3, %v1361_v45 }
 0x1a3   : > { %v9051_v63 = vpop.f32.mrf.mxu0 }
 0x1a4   : > { %13393 = vst [vmem:[#allocation30_spill] sm:$0xff] %v9051_v63  ;;  %v1664_v31 = vmul.f32 %v9051_v63, %v9051_v63 }
 0x1a6   : > { %1700 = vadd.xlane.f32.xlu1 %v1664_v31  ;;  %v9071_v31 = vsel %vm1171_vm5, 1.0, %v13219_v52 }
 0x1a7   : > { %v9059_v13 = vpop.f32.mrf.mxu1  ;;  %v1363_v25 = vsub.f32 %v8882_v19, %v9071_v31  ;;  %v1125_v19 = vpop.permute.xlu0 %1124 }
 0x1a8   : > { %13394 = vst [vmem:[#allocation31_spill] sm:$0xff] %v9059_v13  ;;  %v9065_v45 = vpop.f32.mrf.mxu2  ;;  %vm1173_vm7 = vcmp.eq.s32.totalorder %v8434_v46, %v1125_v19  ;;  %v7378_v19 = vld [vmem:[%s8285_s29 + $0x58] sm:$0xff] }
 0x1aa   : > { %6838 = vmatmul.msk.f32.gmra.mxu0 %vm1450_vm3, %v1362_v34  ;;  %6873 = vmatmul.msk.bf16.gmra.mxu1 %vm1450_vm3, %v1333_v16 }
 0x1ab   : > { %6988 = vmatmul.msk.bf16.gmra.mxu3 %vm2591_vm15, %v7377_v50  ;;  %v13398_v50 = vmov 0.0   ;;  %v2668_v18 = vpop.f32.mrf.mxu3 }
 0x1ac   : > { %v6793_v60 = vsel %vm1173_vm7, 1.0, %v13398_v50 }
 0x1ad   : > { %6913 = vmatmul.msk.bf16.gmra.mxu2 %vm1450_vm3, %v1261_v28  ;;  %v9094_v28 = vsel %vm1172_vm6, 1.0, %v13219_v52  ;;  %v7367_v52 = vld [vmem:[%s8285_s29] sm:$0xff]  ;;  %v1365_v61 = vsub.f32 %v8922_v24, %v6793_v60 }
 0x1ae   : > { %v1364_v55 = vsub.f32 %v8913_v14, %v9094_v28 }
 0x1af   : > { %v9077_v0 = vpop.f32.mrf.mxu0  ;;  %v9079_v27 = vpop.f32.mrf.mxu1 }
 0x1b0   : > { %13395 = vst [vmem:[#allocation32_spill] sm:$0xff] %v9077_v0  ;;  %v9083_v39 = vpop.f32.mrf.mxu2  ;;  %v1665_v16 = vmul.f32 %v9077_v0, %v9077_v0 }
 0x1b1   : > { %13396 = vst [vmem:[#allocation33_spill] sm:$0xff] %v9079_v27 }
 0x1b2   : > { %1702 = vadd.xlane.f32.xlu2 %v1665_v16  ;;  %6839 = vmatmul.msk.f32.gmra.mxu0 %vm1450_vm3, %v1363_v25 }
 0x1b7   : > { %v9097_v34 = vpop.f32.mrf.mxu0  ;;  %v9099_v49 = vpop.f32.mrf.mxu1 }
 0x1b8   : > { %13397 = vst [vmem:[#allocation34_spill] sm:$0xff] %v9097_v34  ;;  %v9103_v25 = vpop.f32.mrf.mxu2  ;;  %v1666_v16 = vmul.f32 %v9097_v34, %v9097_v34 }
 0x1ba   : > { %1704 = vadd.xlane.f32.xlu1 %v1666_v16  ;;  %6840 = vmatmul.msk.f32.gmra.mxu0 %vm1450_vm3, %v1364_v55 }
 0x1bb   : > { %6874 = vmatmul.msk.bf16.gmra.mxu1 %vm1450_vm3, %v1334_v3  ;;  %6989 = vmatmul.msk.bf16.gmra.mxu3 %vm2591_vm15, %v7378_v19  ;;  %v1335_v3 = vpack.c.bf16 %v9036_v56, %v9014_v38  ;;  %v7388_v38 = vld [vmem:[%s13390_s11 + $0x28] sm:$0xff]  ;;  %v7379_v56 = vld [vmem:[%s8285_s29 + $0x60] sm:$0xff] }
 0x1bc   : > { %3595 = vmatpush.bf16.msrb.mxu3 %v7388_v38 }
 0x1bd   : > { %6978 = vmatmul.msk.bf16.vlgmr.msrb.gmra.mxu2 %vm2591_vm15, %v7367_v52 }
 0x1bf   : > { %v9115_v14 = vpop.f32.mrf.mxu0  ;;  %v9117_v59 = vpop.f32.mrf.mxu1 }
 0x1c0   : > { %13399 = vst [vmem:[#allocation35_spill] sm:$0xff] %v9115_v14  ;;  %v9120_v9 = vpop.f32.mrf.mxu2  ;;  %v1667_v17 = vmul.f32 %v9115_v14, %v9115_v14 }
 0x1c2   : > { %1706 = vadd.xlane.f32.xlu2 %v1667_v17  ;;  %6841 = vmatmul.msk.f32.gmra.mxu0 %vm1450_vm3, %v1365_v61 }
 0x1c7   : > { %v9126_v55 = vpop.f32.mrf.mxu0  ;;  %v9128_v16 = vpop.f32.mrf.mxu1 }
 0x1c8   : > { %13400 = vst [vmem:[#allocation36_spill] sm:$0xff] %v9126_v55  ;;  %v9131_v52 = vpop.f32.mrf.mxu2  ;;  %v1668_v24 = vmul.f32 %v9126_v55, %v9126_v55 }
 0x1ca   : > { %1708 = vadd.xlane.f32.xlu0 %v1668_v24 }
 0x1cb   : > { %6875 = vmatmul.msk.bf16.gmra.mxu1 %vm1450_vm3, %v1335_v3  ;;  %6990 = vmatmul.msk.bf16.gmra.mxu3 %vm2591_vm15, %v7379_v56 }
 0x1cd   : > { %6979 = vmatmul.msk.bf16.gmra.mxu2 %vm2591_vm15, %v7368_v7 }
 0x1cf   : > { %v9140_v61 = vpop.f32.mrf.mxu0  ;;  %v9142_v17 = vpop.f32.mrf.mxu1 }
 0x1d0   : > { %13401 = vst [vmem:[#allocation37_spill] sm:$0xff] %v9140_v61  ;;  %v9144_v19 = vpop.f32.mrf.mxu2  ;;  %v1669_v4 = vmul.f32 %v9140_v61, %v9140_v61 }
 0x1d1   : > { %13402 = vst [vmem:[#allocation38_spill] sm:$0xff] %v9144_v19 }
 0x1d2   : > { %1710 = vadd.xlane.f32.xlu1 %v1669_v4  ;;  %v1336_v4 = vpack.c.bf16 %v9071_v31, %v9056_v40 }
 0x1d7   : > { %v9152_v24 = vpop.f32.mrf.mxu0  ;;  %v9154_v7 = vpop.f32.mrf.mxu1 }
 0x1d8   : > { %13403 = vst [vmem:[#allocation39_spill] sm:$0xff] %v9152_v24  ;;  %v9157_v3 = vpop.f32.mrf.mxu2  ;;  %v1670_v62 = vmul.f32 %v9152_v24, %v9152_v24 }
 0x1d9   : > { %13404 = vst [vmem:[#allocation40_spill] sm:$0xff] %v9157_v3 }
 0x1da   : > { %1712 = vadd.xlane.f32.xlu2 %v1670_v62 }
 0x1db   : > { %6876 = vmatmul.msk.bf16.gmra.mxu1 %vm1450_vm3, %v1336_v4  ;;  %6991 = vmatmul.msk.bf16.gmra.mxu3 %vm2591_vm15, %v7380_v33  ;;  %v1337_v4 = vpack.c.bf16 %v6793_v60, %v9094_v28  ;;  %v7387_v60 = vld [vmem:[%s13390_s11 + $0x20] sm:$0xff]  ;;  %v7381_v28 = vld [vmem:[%s8285_s29 + $0x70] sm:$0xff] }
 0x1dc   : > { %3596 = vmatpush.bf16.msrb.mxu3 %v7387_v60 }
 0x1dd   : > { %6980 = vmatmul.msk.bf16.gmra.mxu2 %vm2591_vm15, %v7369_v8 }
 0x1df   : > { %v9166_v38 = vpop.f32.mrf.mxu0  ;;  %v9168_v5 = vpop.f32.mrf.mxu1 }
 0x1e0   : > { %13405 = vst [vmem:[#allocation41_spill] sm:$0xff] %v9166_v38  ;;  %v9170_v53 = vpop.f32.mrf.mxu2  ;;  %v1671_v56 = vmul.f32 %v9166_v38, %v9166_v38 }
 0x1e1   : > { %13406 = vst [vmem:[#allocation42_spill] sm:$0xff] %v9170_v53 }
 0x1e2   : > { %1714 = vadd.xlane.f32.xlu0 %v1671_v56  ;;  %v2670_v56 = vpop.f32.mrf.mxu3 }
 0x1e7   : > { %v9175_v32 = vpop.f32.mrf.mxu0  ;;  %v2252_v40 = vpop.f32.mrf.mxu1 }
 0x1e8   : > { %13407 = vst [vmem:[#allocation43_spill] sm:$0xff] %v9175_v32  ;;  %v2414_v62 = vadd.f32 %v8939_v37, %v2252_v40  ;;  %v9179_v8 = vpop.f32.mrf.mxu2  ;;  %v1672_v31 = vmul.f32 %v9175_v32, %v9175_v32 }
 0x1e9   : > { %13408 = vst [vmem:[#allocation44_spill] sm:$0xff] %v9179_v8 }
 0x1ea   : > { %v9184_v0 = vadd.f32 %v2668_v18, %v2414_v62  ;;  %1716 = vadd.xlane.f32.xlu1 %v1672_v31  ;;  %v13413_v31 = vpack.c.bf16 %v8643_v48, %v8603_v29  ;;  %v9219_v60 = vpop.f32.mrf.mxu3 }
 0x1eb   : > { %6877 = vmatmul.msk.bf16.gmra.mxu1 %vm1450_vm3, %v1337_v4  ;;  %6992 = vmatmul.msk.bf16.gmra.mxu3 %vm2591_vm15, %v7381_v28  ;;  %v7382_v28 = vld [vmem:[%s8285_s29 + $0x78] sm:$0xff] }
 0x1ef   : > { %v9187_v63 = vpop.f32.mrf.mxu0  ;;  %v2254_v14 = vpop.f32.mrf.mxu1 }
 0x1f0   : > { %13409 = vst [vmem:[#allocation45_spill] sm:$0xff] %v9187_v63  ;;  %v2416_v33 = vadd.f32 %v8954_v6, %v2254_v14  ;;  %v9190_v37 = vpop.f32.mrf.mxu2  ;;  %v1673_v40 = vmul.f32 %v9187_v63, %v9187_v63 }
 0x1f1   : > { %13410 = vst [vmem:[#allocation46_spill] sm:$0xff] %v9190_v37 }
 0x1f2   : > { %v9197_v18 = vadd.f32 %v2670_v56, %v2416_v33  ;;  %1718 = vadd.xlane.f32.xlu2 %v1673_v40  ;;  %v9238_v50 = vpop.f32.mrf.mxu3 }
 0x1f7   : > { %v9200_v62 = vpop.f32.mrf.mxu0  ;;  %v9217_v40 = vpop.f32.mrf.mxu1 }
 0x1f8   : > { %13411 = vst [vmem:[#allocation47_spill] sm:$0xff] %v9200_v62  ;;  %v9203_v6 = vpop.f32.mrf.mxu2  ;;  %v1674_v14 = vmul.f32 %v9200_v62, %v9200_v62 }
 0x1f9   : > { %13412 = vst [vmem:[#allocation48_spill] sm:$0xff] %v9203_v6 }
 0x1fa   : > { %1720 = vadd.xlane.f32.xlu0 %v1674_v14  ;;  %v7386_v14 = vld [vmem:[%s13390_s11 + $0x18] sm:$0xff] }
 0x1fb   : > { %6878 = vmatmul.msk.bf16.gmra.mxu1 %vm1450_vm3, %v13413_v31  ;;  %6993 = vmatmul.msk.bf16.gmra.mxu3 %vm2591_vm15, %v7382_v28  ;;  %v13418_v31 = vpack.c.bf16 %v8657_v58, %v8654_v57  ;;  %v9250_v57 = vpop.f32.mrf.mxu3 }
 0x1fc   : > { %3597 = vmatpush.bf16.msrb.mxu3 %v7386_v14 }
 0x1ff   : > { %v9211_v4 = vpop.f32.mrf.mxu0 }
 0x200   : > { %13414 = vst [vmem:[#allocation49_spill] sm:$0xff] %v9211_v4  ;;  %v9213_v56 = vpop.f32.mrf.mxu2  ;;  %v1675_v33 = vmul.f32 %v9211_v4, %v9211_v4 }
 0x201   : > { %13415 = vst [vmem:[#allocation50_spill] sm:$0xff] %v9213_v56 }
 0x202   : > { %1722 = vadd.xlane.f32.xlu1 %v1675_v33  ;;  %v9236_v33 = vpop.f32.mrf.mxu1 }
 0x203   : > { %v9268_v32 = vpop.f32.mrf.mxu3 }
 0x207   : > { %v9222_v34 = vpop.f32.mrf.mxu0 }
 0x208   : > { %13416 = vst [vmem:[#allocation51_spill] sm:$0xff] %v9222_v34  ;;  %v9225_v29 = vpop.f32.mrf.mxu2  ;;  %v1676_v48 = vmul.f32 %v9222_v34, %v9222_v34 }
 0x209   : > { %13417 = vst [vmem:[#allocation52_spill] sm:$0xff] %v9225_v29 }
 0x20a   : > { %1724 = vadd.xlane.f32.xlu2 %v1676_v48  ;;  %v9246_v4 = vpop.f32.mrf.mxu1 }
 0x20b   : > { %6879 = vmatmul.msk.bf16.gmra.mxu1 %vm1450_vm3, %v13418_v31  ;;  %v13423_v31 = vpack.c.bf16 %v8719_v26, %v8722_v20  ;;  %v7385_v26 = vld [vmem:[%s13390_s11 + $0x10] sm:$0xff] }
 0x20c   : > { %3598 = vmatpush.bf16.msrb.mxu3 %v7385_v26 }
 0x20f   : > { %v9240_v28 = vpop.f32.mrf.mxu0 }
 0x210   : > { %13419 = vst [vmem:[#allocation53_spill] sm:$0xff] %v9240_v28  ;;  %v9242_v46 = vpop.f32.mrf.mxu2  ;;  %v1677_v34 = vmul.f32 %v9240_v28, %v9240_v28 }
 0x211   : > { %13420 = vst [vmem:[#allocation54_spill] sm:$0xff] %v9242_v46 }
 0x212   : > { %1726 = vadd.xlane.f32.xlu0 %v1677_v34  ;;  %v9262_v34 = vpop.f32.mrf.mxu1 }
 0x217   : > { %v9248_v48 = vpop.f32.mrf.mxu0 }
 0x218   : > { %13421 = vst [vmem:[#allocation55_spill] sm:$0xff] %v9248_v48  ;;  %v9252_v58 = vpop.f32.mrf.mxu2  ;;  %v1678_v14 = vmul.f32 %v9248_v48, %v9248_v48  ;;  %v13428_v48 = vpack.c.bf16 %v8776_v35, %v8779_v51 }
 0x219   : > { %13422 = vst [vmem:[#allocation56_spill] sm:$0xff] %v9252_v58 }
 0x21a   : > { %1728 = vadd.xlane.f32.xlu1 %v1678_v14 }
 0x21b   : > { %6880 = vmatmul.msk.bf16.gmra.mxu1 %vm1450_vm3, %v13423_v31  ;;  %v9279_v31 = vpop.f32.mrf.mxu1 }
 0x21f   : > { %v9260_v62 = vpop.f32.mrf.mxu0 }
 0x220   : > { %13424 = vst [vmem:[#allocation57_spill] sm:$0xff] %v9260_v62  ;;  %v9264_v28 = vpop.f32.mrf.mxu2  ;;  %v1679_v63 = vmul.f32 %v9260_v62, %v9260_v62 }
 0x221   : > { %13425 = vst [vmem:[#allocation58_spill] sm:$0xff] %v9264_v28 }
 0x222   : > { %1730 = vadd.xlane.f32.xlu2 %v1679_v63  ;;  %v9285_v63 = vpop.f32.mrf.mxu3 }
 0x227   : > { %v9270_v38 = vpop.f32.mrf.mxu0 }
 0x228   : > { %13426 = vst [vmem:[#allocation59_spill] sm:$0xff] %v9270_v38  ;;  %v9275_v20 = vpop.f32.mrf.mxu2  ;;  %v1680_v14 = vmul.f32 %v9270_v38, %v9270_v38  ;;  %v9293_v38 = vpop.f32.mrf.mxu1 }
 0x229   : > { %13427 = vst [vmem:[#allocation60_spill] sm:$0xff] %v9275_v20 }
 0x22a   : > { %1732 = vadd.xlane.f32.xlu0 %v1680_v14  ;;  %v9295_v26 = vpop.f32.mrf.mxu3  ;;  %v9297_v14 = vpop.xlane.xlu2 %1694 }
 0x22b   : > { %6881 = vmatmul.msk.bf16.gmra.mxu1 %vm1450_vm3, %v13428_v48  ;;  %13431 = vst [vmem:[#allocation63_spill] sm:$0xff] %v9297_v14  ;;  %v1684_v48 = vmul.f32 %v8943_v21, %v8943_v21 }
 0x22f   : > { %v9287_v62 = vpop.f32.mrf.mxu0 }
 0x230   : > { %13429 = vst [vmem:[#allocation61_spill] sm:$0xff] %v9287_v62  ;;  %v9289_v24 = vpop.f32.mrf.mxu2  ;;  %v1681_v61 = vmul.f32 %v9287_v62, %v9287_v62  ;;  %v9312_v62 = vpop.xlane.xlu1 %1692 }
 0x231   : > { %13430 = vst [vmem:[#allocation62_spill] sm:$0xff] %v9289_v24  ;;  %v9314_v20 = vpop.f32.mrf.mxu1 }
 0x232   : > { %1734 = vadd.xlane.f32.xlu1 %v1681_v61  ;;  %v9310_v61 = vld [vmem:[%s13434_s1] ss:$0 sm:$0xff]  ;;  %13435 = vst [vmem:[#allocation66_spill] sm:$0xff] %v9312_v62  ;;  %v9318_v24 = vpop.xlane.xlu2 %1698  ;;  %v9322_v28 = vpop.f32.mrf.mxu3 }
 0x233   : > { %13436 = vst [vmem:[#allocation67_spill] sm:$0xff] %v9318_v24  ;;  %v2769_v46 = vmul.f32 %v9310_v61, %v9312_v62  ;;  %v1688_v62 = vmul.f32 %v9016_v41, %v9016_v41 }
 0x237   : > { %v9299_v55 = vpop.f32.mrf.mxu0 }
 0x238   : > { %13432 = vst [vmem:[#allocation64_spill] sm:$0xff] %v9299_v55  ;;  %v9301_v35 = vpop.f32.mrf.mxu2  ;;  %v1682_v51 = vmul.f32 %v9299_v55, %v9299_v55 }
 0x239   : > { %13433 = vst [vmem:[#allocation65_spill] sm:$0xff] %v9301_v35  ;;  %v2399_v35 = vadd.f32 %v8831_v30, %v9099_v49  ;;  %v1687_v49 = vmul.f32 %v8991_v47, %v8991_v47  ;;  %v9335_v30 = vld [vmem:[%s13438_s8] ss:$0 sm:$0xff] }
 0x23a   : > { %1736 = vadd.xlane.f32.xlu2 %v1682_v51  ;;  %1740 = vadd.xlane.f32.xlu1 %v1684_v48  ;;  %v1685_v48 = vmul.f32 %v8959_v15, %v8959_v15 }
 0x23f   : > { %v9320_v55 = vpop.f32.mrf.mxu0 }
 0x240   : > { %13437 = vst [vmem:[#allocation68_spill] sm:$0xff] %v9320_v55  ;;  %v2653_v51 = vpop.f32.mrf.mxu2  ;;  %v1683_v21 = vmul.f32 %v9320_v55, %v9320_v55  ;;  %v9340_v55 = vpop.xlane.xlu1 %1700 }
 0x241   : > { %v2733_v58 = vadd.f32 %v2653_v51, %v2399_v35  ;;  %13440 = vst [vmem:[#allocation69_spill] sm:$0xff] %v9340_v55  ;;  %v2401_v35 = vadd.f32 %v8854_v23, %v9117_v59  ;;  %v9344_v51 = vpop.xlane.xlu2 %1702  ;;  %v1690_v59 = vmul.f32 %v9059_v13, %v9059_v13  ;;  %v7384_v23 = vld [vmem:[%s13390_s11 + $0x8] sm:$0xff]  ;;  %v2404_v13 = vadd.f32 %v8867_v44, %v9128_v16 }
 0x242   : > { %1742 = vadd.xlane.f32.xlu2 %v1685_v48  ;;  %1738 = vadd.xlane.f32.xlu0 %v1683_v21  ;;  %13441 = vst [vmem:[#allocation70_spill] sm:$0xff] %v9344_v51  ;;  %v9347_v21 = vpop.f32.mrf.mxu1 }
 0x243   : > { %v2801_v29 = vadd.f32 %v2769_v46, %v2733_v58  ;;  %1746 = vadd.xlane.f32.xlu1 %v1687_v49  ;;  %v1686_v46 = vmul.f32 %v8974_v42, %v8974_v42  ;;  %v9360_v49 = vpop.f32.mrf.mxu3  ;;  %3599 = vmatpush.bf16.msrb.mxu3 %v7384_v23 }
 0x245   : > { %v9338_v15 = vadd.f32 %v9335_v30, %v2801_v29  ;;  %v2770_v29 = vmul.f32 %v9310_v61, %v9297_v14  ;;  %v9365_v14 = vpop.xlane.xlu0 %1696 }
 0x246   : > { %13442 = vst [vmem:[#allocation71_spill] sm:$0xff] %v9365_v14  ;;  %v2771_v23 = vmul.f32 %v9310_v61, %v9365_v14 }
 0x247   : > { %v6994_v48 = vmul.f32 -1.442695, %v9338_v15 }
 0x248   : > { %v2655_v47 = vpop.f32.mrf.mxu2 }
 0x249   : > { %7503 = vpow2.f32 %v6994_v48  ;;  %v2734_v58 = vadd.f32 %v2655_v47, %v2401_v35  ;;  %v9367_v47 = vpop.xlane.xlu1 %1704  ;;  %v7383_v35 = vld [vmem:[%s13390_s11] sm:$0xff] }
 0x24a   : > { %1748 = vadd.xlane.f32.xlu2 %v1688_v62  ;;  %1744 = vadd.xlane.f32.xlu0 %v1686_v46  ;;  %13443 = vst [vmem:[#allocation72_spill] sm:$0xff] %v9367_v47  ;;  %v9374_v62 = vpop.xlane.xlu2 %1706  ;;  %v2775_v44 = vmul.f32 %v9310_v61, %v9367_v47  ;;  %v9389_v6 = vpop.f32.mrf.mxu1 }
 0x24b   : > { %v2802_v41 = vadd.f32 %v2770_v29, %v2734_v58  ;;  %1752 = vadd.xlane.f32.xlu1 %v1690_v59  ;;  %13444 = vst [vmem:[#allocation73_spill] sm:$0xff] %v9374_v62  ;;  %v1691_v58 = vmul.f32 %v9079_v27, %v9079_v27  ;;  %v1689_v59 = vmul.f32 %v9042_v10, %v9042_v10  ;;  %v9392_v10 = vpop.f32.mrf.mxu3 }
 0x24c   : > { %3600 = vmatpush.bf16.msrb.mxu3 %v7383_v35  ;;  %v2807_v35 = vadd.f32 %v2775_v44, %v9184_v0  ;;  %v2406_v0 = vadd.f32 %v8886_v54, %v9142_v17 }
 0x24d   : > { %v9363_v42 = vadd.f32 %v9335_v30, %v2802_v41 }
 0x24e   : > { %v9401_v37 = vadd.f32 %v9335_v30, %v2807_v35 }
 0x24f   : > { %v7504_v48 = vpop.eup %7503  ;;  %v6995_v46 = vmul.f32 -1.442695, %v9363_v42 }
 0x250   : > { %v9377_v29 = vadd.f32 1.0, %v7504_v48  ;;  %v2658_v41 = vpop.f32.mrf.mxu2  ;;  %v2776_v48 = vmul.f32 %v9310_v61, %v9374_v62 }
 0x251   : > { %7505 = vpow2.f32 %v6995_v46  ;;  %v2735_v16 = vadd.f32 %v2658_v41, %v2404_v13 }
 0x252   : > { %7507 = vrcp.f32 %v9377_v29  ;;  %1754 = vadd.xlane.f32.xlu2 %v1691_v58  ;;  %1750 = vadd.xlane.f32.xlu0 %v1689_v59  ;;  %v2808_v46 = vadd.f32 %v2776_v48, %v9197_v18  ;;  %v2772_v59 = vmul.f32 %v9310_v61, %v9318_v24  ;;  %vm3002_vm15 = vweird.f32 %v9377_v29 }
 0x253   : > { %v2803_v27 = vadd.f32 %v2771_v23, %v2735_v16  ;;  %v9411_v23 = vpop.f32.mrf.mxu1  ;;  %v7000_v16 = vmul.f32 -1.442695, %v9401_v37 }
 0x255   : > { %v9396_v14 = vadd.f32 %v9335_v30, %v2803_v27  ;;  %v9407_v27 = vadd.f32 %v9335_v30, %v2808_v46 }
 0x257   : > { %v7506_v13 = vpop.eup %7505  ;;  %v6996_v41 = vmul.f32 -1.442695, %v9396_v14  ;;  %v7001_v35 = vmul.f32 -1.442695, %v9407_v27 }
 0x258   : > { %v7508_v62 = vpop.eup %7507  ;;  %v2966_v47 = vadd.f32 1.0, %v7506_v13  ;;  %v2660_v56 = vpop.f32.mrf.mxu2 }
 0x259   : > { %v2998_v58 = vmul.f32 %v7508_v62, %v9377_v29  ;;  %7509 = vpow2.f32 %v6996_v41  ;;  %v2736_v44 = vadd.f32 %v2660_v56, %v2406_v0  ;;  %v9415_v13 = vpop.f32.mrf.mxu3  ;;  %vm3003_vm3 = vweird.f32 %v7508_v62 }
 0x25a   : > { %7511 = vrcp.f32 %v2966_v47  ;;  %13445 = vst [vmem:[#allocation74_spill] sm:$0xff] %v9415_v13  ;;  %v2409_v0 = vadd.f32 %v8899_v36, %v9154_v7  ;;  %vm9431_vm8 = vmor %vm3002_vm15, %vm3003_vm3  ;;  %v3023_v36 = vand.u32 2147483648, %v2966_v47  ;;  %v3021_v53 = vand.u32 2147483647, %v2966_v47  ;;  %v7398_v13 = vld [vmem:[%s13448_s13 + $0x38] sm:$0xff] }
 0x25b   : > { %v2999_v18 = vsub.f32 1.0, %v2998_v58  ;;  %v2804_v41 = vadd.f32 %v2772_v59, %v2736_v44  ;;  %7513 = vpow2.f32 %v7000_v16  ;;  %v3006_v44 = vand.u32 2147483647, %v9377_v29  ;;  %4518 = vmatpush.bf16.msrb.mxu0 %v7398_v13 }
 0x25c   : > { %7515 = vpow2.f32 %v7001_v35  ;;  %v2773_v16 = vmul.f32 %v9310_v61, %v9340_v55  ;;  %vm3017_vm11 = vweird.f32 %v2966_v47  ;;  %vm3022_vm13 = vcmp.eq.f32.partialorder %v3021_v53, 8.507059e+37 }
 0x25d   : > { %v3000_v48 = vmul.f32 %v7508_v62, %v2999_v18  ;;  %v9420_v58 = vadd.f32 %v9335_v30, %v2804_v41  ;;  %v3008_v18 = vand.u32 2147483648, %v9377_v29  ;;  %vm3007_vm10 = vcmp.eq.f32.partialorder %v3006_v44, 8.507059e+37 }
 0x25f   : > { %v7510_v54 = vpop.eup %7509  ;;  %v3001_v24 = vadd.f32 %v7508_v62, %v3000_v48  ;;  %v6997_v59 = vmul.f32 -1.442695, %v9420_v58  ;;  %v3009_v29 = vor.u32 1.1754944e-38, %v3008_v18 }
 0x260   : > { %v7512_v17 = vpop.eup %7511  ;;  %v9417_v46 = vadd.f32 1.0, %v7510_v54  ;;  %v2663_v8 = vpop.f32.mrf.mxu2 }
 0x261   : > { %v3013_v56 = vmul.f32 %v7512_v17, %v2966_v47  ;;  %v2737_v7 = vadd.f32 %v2663_v8, %v2409_v0  ;;  %v3005_v35 = vsel %vm9431_vm8, %v7508_v62, %v3001_v24  ;;  %vm3018_vm9 = vweird.f32 %v7512_v17  ;;  %v7514_v19 = vpop.eup %7513  ;;  %v9442_v24 = vpop.f32.mrf.mxu3 }
 0x262   : > { %7517 = vrcp.f32 %v9417_v46  ;;  %v3010_v8 = vsel %vm3007_vm10, %v3009_v29, %v3005_v35  ;;  %vm3019_vm12 = vmor %vm3017_vm11, %vm3018_vm9  ;;  %v3024_v0 = vor.u32 1.1754944e-38, %v3023_v36  ;;  %v2774_v36 = vmul.f32 %v9310_v61, %v9344_v51  ;;  %v9465_v29 = vpop.xlane.xlu1 %1710 }
 0x263   : > { %v3014_v54 = vsub.f32 1.0, %v3013_v56  ;;  %7519 = vpow2.f32 %v6997_v59  ;;  %v9437_v56 = vpop.f32.mrf.mxu1  ;;  %v2805_v3 = vadd.f32 %v2773_v16, %v2737_v7  ;;  %v7516_v59 = vpop.eup %7515  ;;  %v2411_v16 = vadd.f32 %v8919_v1, %v9168_v5  ;;  %13449 = vst [vmem:[#allocation75_spill] sm:$0xff] %v9465_v29 }
 0x264   : > { %v3477_v35 = vmul.f32 %v3010_v8, %v9338_v15  ;;  %v9463_v1 = vadd.f32 1.0, %v7516_v59  ;;  %v2421_v15 = vadd.f32 %v8984_v12, %v9236_v33  ;;  %v9476_v59 = vpop.xlane.xlu0 %1708  ;;  %vm3032_vm0 = vweird.f32 %v9417_v46 }
 0x265   : > { %v3015_v41 = vmul.f32 %v7512_v17, %v3014_v54  ;;  %v9445_v62 = vadd.f32 %v9335_v30, %v2805_v3  ;;  %13450 = vst [vmem:[#allocation76_spill] sm:$0xff] %v9476_v59 }
 0x266   : > { %vm3107_vm10 = vweird.f32 %v9463_v1 }
 0x267   : > { %v3016_v55 = vadd.f32 %v7512_v17, %v3015_v41  ;;  %v6998_v7 = vmul.f32 -1.442695, %v9445_v62 }
 0x268   : > { %v9447_v18 = vpop.eup %7517  ;;  %v2665_v44 = vpop.f32.mrf.mxu2 }
 0x269   : > { %v3020_v54 = vsel %vm3019_vm12, %v7512_v17, %v3016_v55  ;;  %v7520_v47 = vpop.eup %7519  ;;  %v9458_v55 = vadd.f32 1.0, %v7514_v19  ;;  %7521 = vpow2.f32 %v6998_v7  ;;  %v2738_v53 = vadd.f32 %v2665_v44, %v2411_v16  ;;  %v9480_v44 = vpop.f32.mrf.mxu3 }
 0x26a   : > { %v3025_v48 = vsel %vm3022_vm13, %v3024_v0, %v3020_v54  ;;  %v9456_v41 = vadd.f32 1.0, %v7520_v47  ;;  %v3028_v13 = vmul.f32 %v9447_v18, %v9417_v46  ;;  %v2778_v54 = vmul.f32 %v9310_v61, %v9465_v29 }
 0x26b   : > { %v3478_v3 = vmul.f32 %v3025_v48, %v9363_v42  ;;  %v2806_v17 = vadd.f32 %v2774_v36, %v2738_v53  ;;  %v9470_v42 = vpop.f32.mrf.mxu1  ;;  %v2419_v47 = vadd.f32 %v8970_v22, %v9217_v40  ;;  %v2742_v48 = vadd.f32 %v9238_v50, %v2421_v15 }
 0x26c   : > { %7523 = vrcp.f32 %v9456_v41  ;;  %v3029_v8 = vsub.f32 1.0, %v3028_v13  ;;  %vm3033_vm14 = vweird.f32 %v9447_v18  ;;  %v3038_v15 = vand.u32 2147483648, %v9417_v46 }
 0x26d   : > { %v3509_v5 = vpack.c.bf16 %v3478_v3, %v3477_v35  ;;  %7525 = vrcp.f32 %v9458_v55  ;;  %v9473_v19 = vadd.f32 %v9335_v30, %v2806_v17  ;;  %v2777_v35 = vmul.f32 %v9310_v61, %v9476_v59  ;;  %vm9516_vm1 = vmor %vm3032_vm0, %vm3033_vm14 }
 0x26e   : > { %7527 = vrcp.f32 %v9463_v1  ;;  %v3030_v7 = vmul.f32 %v9447_v18, %v3029_v8  ;;  %v2810_v53 = vadd.f32 %v2778_v54, %v2742_v48  ;;  %v2741_v13 = vadd.f32 %v9219_v60, %v2419_v47 }
 0x26f   : > { %3601 = vmatmul.bf16.vlgmr.msrb.gmra.mxu3 %v3509_v5  ;;  %v7522_v0 = vpop.eup %7521  ;;  %v6999_v12 = vmul.f32 -1.442695, %v9473_v19  ;;  %v2424_v5 = vadd.f32 %v9004_v11, %v9246_v4  ;;  %vm3047_vm4 = vweird.f32 %v9456_v41  ;;  %v2426_v29 = vadd.f32 %v9023_v43, %v9262_v34 }
 0x270   : > { %v9485_v16 = vadd.f32 1.0, %v7522_v0  ;;  %v3031_v40 = vadd.f32 %v9447_v18, %v3030_v7  ;;  %v2809_v17 = vadd.f32 %v2777_v35, %v2741_v13  ;;  %v9506_v54 = vadd.f32 %v9335_v30, %v2810_v53 }
 0x271   : > { %7529 = vpow2.f32 %v6999_v12  ;;  %v3036_v12 = vand.u32 2147483647, %v9417_v46  ;;  %v3053_v7 = vand.u32 2147483648, %v9456_v41  ;;  %v9523_v35 = vpop.f32.mrf.mxu3  ;;  %v3051_v13 = vand.u32 2147483647, %v9456_v41 }
 0x272   : > { %v7524_v33 = vpop.eup %7523  ;;  %7531 = vrcp.f32 %v9485_v16  ;;  %13453 = vst [vmem:[#allocation77_spill] sm:$0xff] %v9523_v35  ;;  %v3035_v46 = vsel %vm9516_vm1, %v9447_v18, %v3031_v40  ;;  %v9536_v59 = vadd.f32 %v9335_v30, %v2809_v17  ;;  %v7003_v18 = vmul.f32 -1.442695, %v9506_v54 }
 0x273   : > { %v3043_v36 = vmul.f32 %v7524_v33, %v9456_v41  ;;  %v9493_v3 = vpop.eup %7525  ;;  %v9508_v60 = vpop.f32.mrf.mxu1  ;;  %vm3048_vm2 = vweird.f32 %v7524_v33  ;;  %vm3037_vm5 = vcmp.eq.f32.partialorder %v3036_v12, 8.507059e+37  ;;  %v3054_v4 = vor.u32 1.1754944e-38, %v3053_v7  ;;  %v7397_v41 = vld [vmem:[%s13448_s13 + $0x30] sm:$0xff] }
 0x274   : > { %v9496_v22 = vpop.eup %7527  ;;  %v3088_v8 = vmul.f32 %v9493_v3, %v9458_v55  ;;  %vm3049_vm6 = vmor %vm3047_vm4, %vm3048_vm2  ;;  %vm3052_vm7 = vcmp.eq.f32.partialorder %v3051_v13, 8.507059e+37  ;;  %4519 = vmatpush.bf16.msrb.mxu0 %v7397_v41  ;;  %v3096_v17 = vand.u32 2147483647, %v9458_v55  ;;  %v3098_v12 = vand.u32 2147483648, %v9458_v55 }
 0x275   : > { %v3044_v50 = vsub.f32 1.0, %v3043_v36  ;;  %v3103_v36 = vmul.f32 %v9496_v22, %v9463_v1  ;;  %vm3092_vm3 = vweird.f32 %v9458_v55  ;;  %vm3093_vm15 = vweird.f32 %v9493_v3 }
 0x276   : > { %v3089_v51 = vsub.f32 1.0, %v3088_v8  ;;  %v9543_v8 = vpop.xlane.xlu0 %1714  ;;  %vm9568_vm8 = vcmp.eq.f32.partialorder %v3096_v17, 8.507059e+37  ;;  %vm3108_vm11 = vweird.f32 %v9496_v22  ;;  %vm3062_vm12 = vweird.f32 %v9485_v16  ;;  %vm9587_vm13 = vmor %vm3092_vm3, %vm3093_vm15 }
 0x277   : > { %v7530_v0 = vpop.eup %7529  ;;  %v3045_v47 = vmul.f32 %v7524_v33, %v3044_v50  ;;  %vm9613_vm2 = vmor %vm3107_vm10, %vm3108_vm11 }
 0x278   : > { %v9512_v48 = vpop.eup %7531  ;;  %v9514_v11 = vadd.f32 1.0, %v7530_v0  ;;  %v3039_v0 = vor.u32 1.1754944e-38, %v3038_v15  ;;  %v3104_v15 = vsub.f32 1.0, %v3103_v36  ;;  %v3090_v34 = vmul.f32 %v9493_v3, %v3089_v51  ;;  %v9556_v51 = vpop.xlane.xlu2 %1712 }
 0x279   : > { %v3046_v53 = vadd.f32 %v7524_v33, %v3045_v47  ;;  %v3058_v50 = vmul.f32 %v9512_v48, %v9485_v16  ;;  %v2743_v36 = vadd.f32 %v9250_v57, %v2424_v5  ;;  %v2779_v5 = vmul.f32 %v9310_v61, %v9556_v51 }
 0x27a   : > { %7533 = vrcp.f32 %v9514_v11  ;;  %v3040_v40 = vsel %vm3037_vm5, %v3039_v0, %v3035_v46  ;;  %v2780_v0 = vmul.f32 %v9310_v61, %v9543_v8  ;;  %v3091_v57 = vadd.f32 %v9493_v3, %v3090_v34 }
 0x27b   : > { %v3050_v47 = vsel %vm3049_vm6, %v7524_v33, %v3046_v53  ;;  %v3059_v35 = vsub.f32 1.0, %v3058_v50  ;;  %v7002_v33 = vmul.f32 -1.442695, %v9536_v59  ;;  %v3479_v7 = vmul.f32 %v3040_v40, %v9396_v14 }
 0x27c   : > { %v3055_v43 = vsel %vm3052_vm7, %v3054_v4, %v3050_v47  ;;  %v2744_v50 = vadd.f32 %v9268_v32, %v2426_v29  ;;  %7535 = vpow2.f32 %v7003_v18  ;;  %v9561_v47 = vpop.f32.mrf.mxu1  ;;  %v3099_v29 = vor.u32 1.1754944e-38, %v3098_v12  ;;  %v9574_v18 = vpop.f32.mrf.mxu3 }
 0x27d   : > { %v3480_v46 = vmul.f32 %v3055_v43, %v9420_v58  ;;  %v3060_v53 = vmul.f32 %v9512_v48, %v3059_v35  ;;  %v3105_v35 = vmul.f32 %v9496_v22, %v3104_v15  ;;  %7537 = vpow2.f32 %v7002_v33 }
 0x27e   : > { %vm3063_vm9 = vweird.f32 %v9512_v48  ;;  %v3068_v4 = vand.u32 2147483648, %v9485_v16  ;;  %v2812_v15 = vadd.f32 %v2780_v0, %v2744_v50  ;;  %v3066_v43 = vand.u32 2147483647, %v9485_v16 }
 0x27f   : > { %v3510_v14 = vpack.c.bf16 %v3480_v46, %v3479_v7  ;;  %v3061_v40 = vadd.f32 %v9512_v48, %v3060_v53  ;;  %v3106_v17 = vadd.f32 %v9496_v22, %v3105_v35  ;;  %vm9592_vm14 = vmor %vm3062_vm12, %vm3063_vm9  ;;  %v3083_v16 = vand.u32 2147483648, %v9514_v11 }
 0x280   : > { %v9552_v13 = vpop.eup %7533  ;;  %v3095_v55 = vsel %vm9587_vm13, %v9493_v3, %v3091_v57  ;;  %v2811_v46 = vadd.f32 %v2779_v5, %v2743_v36  ;;  %v3081_v50 = vand.u32 2147483647, %v9514_v11  ;;  %v3111_v0 = vand.u32 2147483647, %v9463_v1 }
 0x281   : > { %v3073_v58 = vmul.f32 %v9552_v13, %v9514_v11  ;;  %3606 = vmatmul.bf16.gmra.mxu3 %v3510_v14  ;;  %vm3078_vm0 = vweird.f32 %v9552_v13  ;;  %v3065_v53 = vsel %vm9592_vm14, %v9512_v48, %v3061_v40  ;;  %v3069_v14 = vor.u32 1.1754944e-38, %v3068_v4 }
 0x282   : > { %v7536_v12 = vpop.eup %7535  ;;  %vm3077_vm1 = vweird.f32 %v9514_v11  ;;  %v3113_v36 = vand.u32 2147483648, %v9463_v1  ;;  %v9621_v57 = vadd.f32 %v9335_v30, %v2812_v15  ;;  %vm3067_vm4 = vcmp.eq.f32.partialorder %v3066_v43, 8.507059e+37 }
 0x283   : > { %v3074_v41 = vsub.f32 1.0, %v3073_v58  ;;  %v7538_v48 = vpop.eup %7537  ;;  %v9618_v35 = vadd.f32 1.0, %v7536_v12  ;;  %vm3079_vm5 = vmor %vm3077_vm1, %vm3078_vm0  ;;  %v3110_v11 = vsel %vm9613_vm2, %v9496_v22, %v3106_v17  ;;  %v3070_v5 = vsel %vm3067_vm4, %v3069_v14, %v3065_v53  ;;  %v9648_v53 = vpop.xlane.xlu1 %1716 }
 0x284   : > { %v3084_v4 = vor.u32 1.1754944e-38, %v3083_v16  ;;  %v9630_v1 = vadd.f32 %v9335_v30, %v2811_v46  ;;  %v9632_v34 = vpop.f32.mrf.mxu1  ;;  %vm3082_vm6 = vcmp.eq.f32.partialorder %v3081_v50, 8.507059e+37  ;;  %v3100_v15 = vsel %vm9568_vm8, %v3099_v29, %v3095_v55  ;;  %v9639_v17 = vpop.f32.mrf.mxu3  ;;  %13462 = vst [vmem:[#allocation78_spill] sm:$0xff] %v9648_v53 }
 0x285   : > { %v3075_v7 = vmul.f32 %v9552_v13, %v3074_v41  ;;  %v3114_v41 = vor.u32 1.1754944e-38, %v3113_v36  ;;  %vm3112_vm7 = vcmp.eq.f32.partialorder %v3111_v0, 8.507059e+37  ;;  %v9636_v43 = vadd.f32 1.0, %v7538_v48  ;;  %v9654_v50 = vpop.xlane.xlu2 %1718 }
 0x286   : > { %v7005_v22 = vmul.f32 -1.442695, %v9621_v57  ;;  %7539 = vrcp.f32 %v9618_v35  ;;  %v3483_v16 = vmul.f32 %v3100_v15, %v9401_v37  ;;  %v7004_v29 = vmul.f32 -1.442695, %v9630_v1  ;;  %13463 = vst [vmem:[#allocation79_spill] sm:$0xff] %v9654_v50 }
 0x287   : > { %v3076_v58 = vadd.f32 %v9552_v13, %v3075_v7  ;;  %v3115_v33 = vsel %vm3112_vm7, %v3114_v41, %v3110_v11  ;;  %7541 = vrcp.f32 %v9636_v43  ;;  %v2431_v0 = vadd.f32 %v9065_v45, %v9293_v38 }
 0x288   : > { %v3484_v32 = vmul.f32 %v3115_v33, %v9407_v27  ;;  %7543 = vpow2.f32 %v7005_v22  ;;  %v2781_v14 = vmul.f32 %v9310_v61, %v9648_v53  ;;  %v2782_v48 = vmul.f32 %v9310_v61, %v9654_v50 }
 0x289   : > { %v3080_v40 = vsel %vm3079_vm5, %v9552_v13, %v3076_v58  ;;  %v3481_v13 = vmul.f32 %v3070_v5, %v9445_v62  ;;  %7545 = vpow2.f32 %v7004_v29  ;;  %v7396_v58 = vld [vmem:[%s13448_s13 + $0x28] sm:$0xff]  ;;  %v2746_v11 = vadd.f32 %v9295_v26, %v2431_v0 }
 0x28a   : > { %v3085_v12 = vsel %vm3082_vm6, %v3084_v4, %v3080_v40  ;;  %v3512_v46 = vpack.c.bf16 %v3484_v32, %v3483_v16  ;;  %4520 = vmatpush.bf16.msrb.mxu0 %v7396_v58  ;;  %vm3137_vm8 = vweird.f32 %v9618_v35  ;;  %vm3122_vm10 = vweird.f32 %v9636_v43 }
 0x28b   : > { %v3482_v7 = vmul.f32 %v3085_v12, %v9473_v19  ;;  %v2429_v19 = vadd.f32 %v9046_v2, %v9279_v31  ;;  %v2814_v15 = vadd.f32 %v2782_v48, %v2746_v11 }
 0x28c   : > { %v9650_v62 = vpop.eup %7539  ;;  %v9656_v37 = vpop.f32.mrf.mxu1 }
 0x28d   : > { %v3511_v55 = vpack.c.bf16 %v3482_v7, %v3481_v13  ;;  %v9658_v27 = vpop.eup %7541  ;;  %v9667_v36 = vpop.f32.mrf.mxu3  ;;  %v3133_v2 = vmul.f32 %v9650_v62, %v9618_v35  ;;  %v2745_v31 = vadd.f32 %v9285_v63, %v2429_v19  ;;  %v9690_v26 = vadd.f32 %v9335_v30, %v2814_v15 }
 0x28e   : > { %v7544_v3 = vpop.eup %7543  ;;  %v3118_v38 = vmul.f32 %v9658_v27, %v9636_v43  ;;  %vm3138_vm3 = vweird.f32 %v9650_v62  ;;  %v3143_v19 = vand.u32 2147483648, %v9618_v35  ;;  %vm3123_vm15 = vweird.f32 %v9658_v27 }
 0x28f   : > { %v7546_v45 = vpop.eup %7545  ;;  %v9677_v5 = vadd.f32 1.0, %v7544_v3  ;;  %v2813_v40 = vadd.f32 %v2781_v14, %v2745_v31  ;;  %v3134_v4 = vsub.f32 1.0, %v3133_v2  ;;  %v3141_v14 = vand.u32 2147483647, %v9618_v35  ;;  %vm9709_vm9 = vmor %vm3137_vm8, %vm3138_vm3  ;;  %v9713_v2 = vpop.xlane.xlu0 %1720 }
 0x290   : > { %v9679_v41 = vadd.f32 1.0, %v7546_v45  ;;  %v3119_v12 = vsub.f32 1.0, %v3118_v38  ;;  %13466 = vst [vmem:[#allocation80_spill] sm:$0xff] %v9713_v2  ;;  %v3126_v31 = vand.u32 2147483647, %v9636_v43  ;;  %v2434_v45 = vadd.f32 %v9083_v39, %v9314_v20  ;;  %vm9724_vm11 = vmor %vm3122_vm10, %vm3123_vm15 }
 0x291   : > { %3611 = vmatmul.bf16.gmra.mxu3 %v3511_v55  ;;  %7547 = vrcp.f32 %v9677_v5  ;;  %v9683_v63 = vadd.f32 %v9335_v30, %v2813_v40  ;;  %v3135_v22 = vmul.f32 %v9650_v62, %v3134_v4  ;;  %v7007_v55 = vmul.f32 -1.442695, %v9690_v26  ;;  %v9728_v40 = vpop.xlane.xlu1 %1722 }
 0x292   : > { %7549 = vrcp.f32 %v9679_v41  ;;  %v3120_v7 = vmul.f32 %v9658_v27, %v3119_v12  ;;  %v3144_v11 = vor.u32 1.1754944e-38, %v3143_v19  ;;  %13469 = vst [vmem:[#allocation81_spill] sm:$0xff] %v9728_v40  ;;  %vm3142_vm12 = vcmp.eq.f32.partialorder %v3141_v14, 8.507059e+37  ;;  %v9746_v19 = vpop.xlane.xlu2 %1724 }
 0x293   : > { %v7006_v16 = vmul.f32 -1.442695, %v9683_v63  ;;  %v3136_v32 = vadd.f32 %v9650_v62, %v3135_v22  ;;  %v2436_v39 = vadd.f32 %v9103_v25, %v9347_v21  ;;  %v2783_v20 = vmul.f32 %v9310_v61, %v9713_v2  ;;  %13470 = vst [vmem:[#allocation82_spill] sm:$0xff] %v9746_v19 }
 0x294   : > { %v9685_v33 = vpop.f32.mrf.mxu1  ;;  %v3121_v0 = vadd.f32 %v9658_v27, %v3120_v7  ;;  %vm3127_vm13 = vcmp.eq.f32.partialorder %v3126_v31, 8.507059e+37  ;;  %v2439_v14 = vadd.f32 %v9120_v9, %v9389_v6  ;;  %v2441_v6 = vadd.f32 %v9131_v52, %v9411_v23 }
 0x295   : > { %v9692_v13 = vpop.f32.mrf.mxu3  ;;  %7551 = vpow2.f32 %v7006_v16  ;;  %v3140_v48 = vsel %vm9709_vm9, %v9650_v62, %v3136_v32  ;;  %v2747_v32 = vadd.f32 %v9322_v28, %v2434_v45  ;;  %v2785_v45 = vmul.f32 %v9310_v61, %v9746_v19 }
 0x296   : > { %7553 = vpow2.f32 %v7007_v55  ;;  %v3145_v12 = vsel %vm3142_vm12, %v3144_v11, %v3140_v48  ;;  %vm3167_vm1 = vweird.f32 %v9677_v5  ;;  %v3171_v23 = vand.u32 2147483647, %v9677_v5 }
 0x297   : > { %v9698_v29 = vpop.eup %7547  ;;  %v3486_v25 = vmul.f32 %v3145_v12, %v9506_v54  ;;  %vm3152_vm4 = vweird.f32 %v9679_v41 }
 0x298   : > { %v9706_v58 = vpop.eup %7549  ;;  %v3163_v35 = vmul.f32 %v9698_v29, %v9677_v5  ;;  %vm3168_vm14 = vweird.f32 %v9698_v29  ;;  %vm3172_vm6 = vcmp.eq.f32.partialorder %v3171_v23, 8.507059e+37 }
 0x299   : > { %v3148_v62 = vmul.f32 %v9706_v58, %v9679_v41  ;;  %vm3153_vm0 = vweird.f32 %v9706_v58  ;;  %vm9787_vm2 = vmor %vm3167_vm1, %vm3168_vm14 }
 0x29a   : > { %v3164_v7 = vsub.f32 1.0, %v3163_v35  ;;  %vm9806_vm5 = vmor %vm3152_vm4, %vm3153_vm0 }
 0x29b   : > { %v7552_v16 = vpop.eup %7551  ;;  %v3149_v21 = vsub.f32 1.0, %v3148_v62 }
 0x29c   : > { %v9730_v4 = vpop.f32.mrf.mxu1  ;;  %v7554_v3 = vpop.eup %7553  ;;  %v3165_v28 = vmul.f32 %v9698_v29, %v3164_v7  ;;  %v9754_v48 = vadd.f32 1.0, %v7552_v16  ;;  %v3158_v7 = vand.u32 2147483648, %v9679_v41 }
 0x29d   : > { %v9741_v22 = vpop.f32.mrf.mxu3  ;;  %v3150_v54 = vmul.f32 %v9706_v58, %v3149_v21  ;;  %v9760_v11 = vadd.f32 1.0, %v7554_v3  ;;  %v9804_v21 = vpop.xlane.xlu1 %1728 }
 0x29e   : > { %7555 = vrcp.f32 %v9754_v48  ;;  %13474 = vst [vmem:[#allocation84_spill] sm:$0xff] %v9804_v21  ;;  %vm3182_vm15 = vweird.f32 %v9754_v48 }
 0x29f   : > { %v3151_v52 = vadd.f32 %v9706_v58, %v3150_v54  ;;  %7557 = vrcp.f32 %v9760_v11  ;;  %vm3197_vm10 = vweird.f32 %v9760_v11 }
 0x2a1   : > { %3616 = vmatmul.bf16.gmra.mxu3 %v3512_v46  ;;  %v3128_v46 = vand.u32 2147483648, %v9636_v43  ;;  %v3125_v43 = vsel %vm9724_vm11, %v9658_v27, %v3121_v0  ;;  %v2784_v27 = vmul.f32 %v9310_v61, %v9728_v40  ;;  %v2748_v0 = vadd.f32 %v9360_v49, %v2436_v39  ;;  %v9775_v39 = vpop.xlane.xlu0 %1726 }
 0x2a2   : > { %v2749_v49 = vadd.f32 %v9392_v10, %v2439_v14  ;;  %13471 = vst [vmem:[#allocation83_spill] sm:$0xff] %v9775_v39 }
 0x2a3   : > { %v3129_v15 = vor.u32 1.1754944e-38, %v3128_v46  ;;  %v2815_v46 = vadd.f32 %v2783_v20, %v2747_v32  ;;  %v2816_v35 = vadd.f32 %v2784_v27, %v2748_v0  ;;  %v3173_v20 = vand.u32 2147483648, %v9677_v5  ;;  %v7395_v32 = vld [vmem:[%s13448_s13 + $0x20] sm:$0xff] }
 0x2a4   : > { %v2817_v10 = vadd.f32 %v2785_v45, %v2749_v49  ;;  %v2786_v27 = vmul.f32 %v9310_v61, %v9775_v39  ;;  %v3156_v5 = vand.u32 2147483647, %v9679_v41  ;;  %4521 = vmatpush.bf16.msrb.mxu0 %v7395_v32  ;;  %v3155_v41 = vsel %vm9806_vm5, %v9706_v58, %v3151_v52  ;;  %v7394_v58 = vld [vmem:[%s13448_s13 + $0x18] sm:$0xff] }
 0x2a5   : > { %v3130_v55 = vsel %vm3127_vm13, %v3129_v15, %v3125_v43  ;;  %v9763_v9 = vadd.f32 %v9335_v30, %v2815_v46  ;;  %v3166_v43 = vadd.f32 %v9698_v29, %v3165_v28  ;;  %v9773_v62 = vadd.f32 %v9335_v30, %v2816_v35  ;;  %v9778_v15 = vpop.f32.mrf.mxu3  ;;  %v13477_v46 = vld [vmem:[#allocation74_spill] sm:$0xff] }
 0x2a6   : > { %v3485_v31 = vmul.f32 %v3130_v55, %v9536_v59  ;;  %v9767_v59 = vpop.f32.mrf.mxu1  ;;  %v3174_v14 = vor.u32 1.1754944e-38, %v3173_v20  ;;  %v2750_v3 = vadd.f32 %v13477_v46, %v2441_v6  ;;  %v3159_v28 = vor.u32 1.1754944e-38, %v3158_v7  ;;  %v13478_v20 = vld [vmem:[#allocation38_spill] sm:$0xff]  ;;  %v9835_v7 = vpop.xlane.xlu2 %1730 }
 0x2a7   : > { %v7008_v12 = vmul.f32 -1.442695, %v9763_v9  ;;  %v3170_v55 = vsel %vm9787_vm2, %v9698_v29, %v3166_v43  ;;  %v9815_v29 = vpop.eup %7555  ;;  %vm3157_vm7 = vcmp.eq.f32.partialorder %v3156_v5, 8.507059e+37  ;;  %v2444_v52 = vadd.f32 %v13478_v20, %v9437_v56  ;;  %13479 = vst [vmem:[#allocation74_spill] sm:$0xff] %v9835_v7 }
 0x2a8   : > { %v3513_v38 = vpack.c.bf16 %v3486_v25, %v3485_v31  ;;  %v9802_v25 = vadd.f32 %v9335_v30, %v2817_v10  ;;  %v7009_v31 = vmul.f32 -1.442695, %v9773_v62  ;;  %v3175_v35 = vsel %vm3172_vm6, %v3174_v14, %v3170_v55  ;;  %4522 = vmatpush.bf16.msrb.mxu0 %v7394_v58  ;;  %v13481_v55 = vld [vmem:[#allocation40_spill] sm:$0xff] }
 0x2a9   : > { %7559 = vpow2.f32 %v7008_v12  ;;  %v2818_v45 = vadd.f32 %v2786_v27, %v2750_v3  ;;  %v3160_v49 = vsel %vm3157_vm7, %v3159_v28, %v3155_v41  ;;  %v3488_v43 = vmul.f32 %v3175_v35, %v9621_v57  ;;  %v9838_v57 = vpop.xlane.xlu1 %1734  ;;  %v9850_v28 = vpop.xlane.xlu0 %1732  ;;  %v13484_v35 = vld [vmem:[#allocation44_spill] sm:$0xff] }
 0x2aa   : > { %v7010_v54 = vmul.f32 -1.442695, %v9802_v25  ;;  %7561 = vpow2.f32 %v7009_v31  ;;  %v3178_v10 = vmul.f32 %v9815_v29, %v9754_v48  ;;  %v3487_v16 = vmul.f32 %v3160_v49, %v9630_v1  ;;  %13480 = vst [vmem:[#allocation38_spill] sm:$0xff] %v9838_v57  ;;  %v13482_v1 = vld [vmem:[#allocation42_spill] sm:$0xff] }
 0x2ab   : > { %v9831_v23 = vadd.f32 %v9335_v30, %v2818_v45  ;;  %v2787_v56 = vmul.f32 %v9310_v61, %v9804_v21  ;;  %v2446_v0 = vadd.f32 %v13481_v55, %v9470_v42  ;;  %v2751_v3 = vadd.f32 %v9442_v24, %v2444_v52  ;;  %13483 = vst [vmem:[#allocation40_spill] sm:$0xff] %v9850_v28 }
 0x2ac   : > { %7563 = vpow2.f32 %v7010_v54  ;;  %v3514_v5 = vpack.c.bf16 %v3488_v43, %v3487_v16  ;;  %v3179_v14 = vsub.f32 1.0, %v3178_v10  ;;  %v2449_v31 = vadd.f32 %v13482_v1, %v9508_v60  ;;  %v13485_v54 = vld [vmem:[#allocation46_spill] sm:$0xff]  ;;  %v13486_v16 = vld [vmem:[#allocation77_spill] sm:$0xff] }
 0x2ad   : > { %v9833_v12 = vpop.f32.mrf.mxu3  ;;  %v7011_v41 = vmul.f32 -1.442695, %v9831_v23  ;;  %v2451_v45 = vadd.f32 %v13484_v35, %v9561_v47  ;;  %v2454_v49 = vadd.f32 %v13485_v54, %v9632_v34  ;;  %v2819_v58 = vadd.f32 %v2787_v56, %v2751_v3  ;;  %v13487_v34 = vld [vmem:[#allocation50_spill] sm:$0xff] }
 0x2ae   : > { %v9820_v6 = vpop.f32.mrf.mxu1  ;;  %v2788_v24 = vmul.f32 %v9310_v61, %v9835_v7  ;;  %v2752_v60 = vadd.f32 %v9480_v44, %v2446_v0  ;;  %v2789_v52 = vmul.f32 %v9310_v61, %v9850_v28  ;;  %v3180_v47 = vmul.f32 %v9815_v29, %v3179_v14  ;;  %v9873_v55 = vpop.xlane.xlu2 %1736 }
 0x2af   : > { %7565 = vpow2.f32 %v7011_v41  ;;  %v2790_v56 = vmul.f32 %v9310_v61, %v9838_v57  ;;  %13488 = vst [vmem:[#allocation42_spill] sm:$0xff] %v9873_v55  ;;  %v2754_v44 = vadd.f32 %v9574_v18, %v2451_v45  ;;  %v2755_v0 = vadd.f32 %v9639_v17, %v2454_v49 }
 0x2b0   : > { %v9884_v1 = vadd.f32 %v9335_v30, %v2819_v58  ;;  %v3181_v17 = vadd.f32 %v9815_v29, %v3180_v47  ;;  %vm3183_vm3 = vweird.f32 %v9815_v29  ;;  %v3186_v58 = vand.u32 2147483647, %v9754_v48 }
 0x2b1   : > { %3621 = vmatmul.bf16.gmra.mxu3 %v3513_v38  ;;  %v9817_v38 = vpop.eup %7557  ;;  %v9889_v35 = vpop.xlane.xlu1 %1740  ;;  %v2822_v49 = vadd.f32 %v2790_v56, %v2754_v44  ;;  %vm9908_vm9 = vmor %vm3182_vm15, %vm3183_vm3 }
 0x2b2   : > { %v3193_v32 = vmul.f32 %v9817_v38, %v9760_v11  ;;  %v7560_v27 = vpop.eup %7559  ;;  %13490 = vst [vmem:[#allocation44_spill] sm:$0xff] %v9889_v35  ;;  %vm3198_vm8 = vweird.f32 %v9817_v38  ;;  %v2793_v56 = vmul.f32 %v9310_v61, %v9889_v35  ;;  %vm3187_vm12 = vcmp.eq.f32.partialorder %v3186_v58, 8.507059e+37 }
 0x2b3   : > { %v7562_v46 = vpop.eup %7561  ;;  %v9856_v43 = vadd.f32 1.0, %v7560_v27  ;;  %v2459_v27 = vadd.f32 %v13487_v34, %v9685_v33  ;;  %v13494_v34 = vld [vmem:[#allocation56_spill] sm:$0xff]  ;;  %vm9928_vm11 = vmor %vm3197_vm10, %vm3198_vm8 }
 0x2b4   : > { %v3194_v42 = vsub.f32 1.0, %v3193_v32  ;;  %v7564_v10 = vpop.eup %7563  ;;  %v9861_v20 = vadd.f32 1.0, %v7562_v46  ;;  %v13489_v46 = vld [vmem:[#allocation48_spill] sm:$0xff] }
 0x2b5   : > { %7567 = vrcp.f32 %v9856_v43  ;;  %v2456_v3 = vadd.f32 %v13489_v46, %v9656_v37  ;;  %v9881_v33 = vadd.f32 1.0, %v7564_v10  ;;  %v9886_v41 = vpop.f32.mrf.mxu3  ;;  %v2757_v45 = vadd.f32 %v9692_v13, %v2459_v27  ;;  %v13491_v37 = vld [vmem:[#allocation52_spill] sm:$0xff]  ;;  %v7566_v10 = vpop.eup %7565 }
 0x2b6   : > { %v9869_v32 = vpop.f32.mrf.mxu1  ;;  %v3195_v14 = vmul.f32 %v9817_v38, %v3194_v42  ;;  %7569 = vrcp.f32 %v9861_v20  ;;  %v2461_v54 = vadd.f32 %v13491_v37, %v9730_v4  ;;  %v3188_v42 = vand.u32 2147483648, %v9754_v48  ;;  %v9945_v37 = vpop.xlane.xlu2 %1742 }
 0x2b7   : > { %7571 = vrcp.f32 %v9881_v33  ;;  %v2791_v4 = vmul.f32 %v9310_v61, %v9873_v55  ;;  %v2466_v27 = vadd.f32 %v13494_v34, %v9820_v6  ;;  %v3203_v46 = vand.u32 2147483648, %v9760_v11  ;;  %13497 = vst [vmem:[#allocation46_spill] sm:$0xff] %v9945_v37 }
 0x2b8   : > { %v3189_v44 = vor.u32 1.1754944e-38, %v3188_v42  ;;  %vm3227_vm1 = vweird.f32 %v9861_v20  ;;  %vm3212_vm4 = vweird.f32 %v9856_v43  ;;  %vm3242_vm10 = vweird.f32 %v9881_v33 }
 0x2b9   : > { %v9958_v34 = vpop.xlane.xlu1 %1746 }
 0x2ba   : > { %13498 = vst [vmem:[#allocation77_spill] sm:$0xff] %v9958_v34 }
 0x2bb   : > { %v9912_v48 = vpop.eup %7567 }
 0x2bc   : > { %vm3213_vm0 = vweird.f32 %v9912_v48 }
 0x2bd   : > { %v9953_v58 = vpop.f32.mrf.mxu3  ;;  %vm10024_vm5 = vmor %vm3212_vm4, %vm3213_vm0 }
 0x2be   : > { %v9943_v6 = vpop.f32.mrf.mxu1 }
 0x2c1   : > { %3626 = vmatmul.bf16.gmra.mxu3 %v3514_v5  ;;  %v2753_v5 = vadd.f32 %v13486_v16, %v2449_v31  ;;  %v2820_v31 = vadd.f32 %v2788_v24, %v2752_v60  ;;  %v3196_v24 = vadd.f32 %v9817_v38, %v3195_v14  ;;  %v7012_v60 = vmul.f32 -1.442695, %v9884_v1  ;;  %v9974_v14 = vld [vmem:[%s13439_s6] ss:$0 sm:$0xff]  ;;  %s13836_s6 = sld [smem:[#allocation92_spill]] (!%p7187_p6) }
 0x2c2   : > { %v3185_v16 = vsel %vm9908_vm9, %v9815_v29, %v3181_v17  ;;  %v9933_v29 = vpop.eup %7569  ;;  %v2823_v17 = vadd.f32 %v2791_v4, %v2755_v0 }
 0x2c3   : > { %v2821_v18 = vadd.f32 %v2789_v52, %v2753_v5  ;;  %v9904_v13 = vadd.f32 %v9335_v30, %v2820_v31  ;;  %v3201_v5 = vand.u32 2147483647, %v9760_v11  ;;  %v9935_v31 = vadd.f32 1.0, %v7566_v10 }
 0x2c4   : > { %v3200_v61 = vsel %vm9928_vm11, %v9817_v38, %v3196_v24  ;;  %v3190_v42 = vsel %vm3187_vm12, %v3189_v44, %v3185_v16  ;;  %v3204_v52 = vor.u32 1.1754944e-38, %v3203_v46  ;;  %v3208_v11 = vmul.f32 %v9912_v48, %v9856_v43 }
 0x2c5   : > { %v9915_v47 = vadd.f32 %v9335_v30, %v2821_v18  ;;  %v9938_v18 = vadd.f32 %v9335_v30, %v2822_v49  ;;  %7573 = vpow2.f32 %v7012_v60  ;;  %v7013_v10 = vmul.f32 -1.442695, %v9904_v13  ;;  %v9951_v49 = vpop.eup %7571  ;;  %v9963_v60 = vld [vmem:[%s13434_s1] ss:$0 sm:$0xff] }
 0x2c6   : > { %vm3202_vm13 = vcmp.eq.f32.partialorder %v3201_v5, 8.507059e+37  ;;  %v2825_v38 = vadd.f32 %v2793_v56, %v2757_v45  ;;  %v3209_v0 = vsub.f32 1.0, %v3208_v11  ;;  %v3223_v4 = vmul.f32 %v9933_v29, %v9861_v20  ;;  %v9980_v11 = vpop.xlane.xlu0 %1738 }
 0x2c7   : > { %v7014_v30 = vmul.f32 -1.442695, %v9915_v47  ;;  %v3205_v24 = vsel %vm3202_vm13, %v3204_v52, %v3200_v61  ;;  %v7015_v16 = vmul.f32 -1.442695, %v9938_v18  ;;  %v2794_v5 = vmul.f32 %v9963_v60, %v9945_v37  ;;  %13499 = vst [vmem:[#allocation50_spill] sm:$0xff] %v9980_v11 }
 0x2c8   : > { %v3489_v44 = vmul.f32 %v3190_v42, %v9683_v63  ;;  %v3490_v45 = vmul.f32 %v3205_v24, %v9690_v26  ;;  %v2756_v56 = vadd.f32 %v9667_v36, %v2456_v3  ;;  %7575 = vrcp.f32 %v9935_v31 }
 0x2c9   : > { %v9977_v46 = vadd.f32 %v9974_v14, %v2823_v17  ;;  %v3224_v61 = vsub.f32 1.0, %v3223_v4  ;;  %v2758_v52 = vadd.f32 %v9741_v22, %v2461_v54  ;;  %7577 = vpow2.f32 %v7013_v10  ;;  %v13500_v4 = vld [vmem:[#allocation54_spill] sm:$0xff] }
 0x2ca   : > { %v3515_v63 = vpack.c.bf16 %v3490_v45, %v3489_v44  ;;  %v3210_v26 = vmul.f32 %v9912_v48, %v3209_v0  ;;  %7579 = vpow2.f32 %v7014_v30  ;;  %v9984_v36 = vadd.f32 %v9974_v14, %v2825_v38 }
 0x2cb   : > { %v2796_v3 = vmul.f32 %v9963_v60, %v9958_v34  ;;  %v3225_v42 = vmul.f32 %v9933_v29, %v3224_v61  ;;  %v7574_v17 = vpop.eup %7573  ;;  %v2760_v24 = vadd.f32 %v9833_v12, %v2466_v27  ;;  %7581 = vpow2.f32 %v7015_v16 }
 0x2cc   : > { %v2826_v22 = vadd.f32 %v2794_v5, %v2758_v52  ;;  %vm3228_vm14 = vweird.f32 %v9933_v29  ;;  %v7016_v54 = vmul.f32 -1.442695, %v9977_v46  ;;  %v2792_v10 = vmul.f32 %v9963_v60, %v9980_v11  ;;  %v2312_v5 = vpop.f32.mrf.mxu1  ;;  %v10041_v52 = vpop.xlane.xlu1 %1752 }
 0x2cd   : > { %v3226_v30 = vadd.f32 %v9933_v29, %v3225_v42  ;;  %v3233_v38 = vand.u32 2147483648, %v9861_v20  ;;  %v3211_v0 = vadd.f32 %v9912_v48, %v3210_v26  ;;  %v3231_v12 = vand.u32 2147483647, %v9861_v20  ;;  %vm10008_vm2 = vmor %vm3227_vm1, %vm3228_vm14  ;;  %v13503_v42 = vld [vmem:[#allocation58_spill] sm:$0xff]  ;;  %13506 = vst [vmem:[#allocation48_spill] sm:$0xff] %v10041_v52 }
 0x2ce   : > { %v10000_v27 = vpop.eup %7575  ;;  %v2464_v16 = vadd.f32 %v13500_v4, %v9767_v59  ;;  %v7018_v44 = vmul.f32 -1.442695, %v9984_v36  ;;  %v2828_v45 = vadd.f32 %v2796_v3, %v2760_v24  ;;  %v3218_v61 = vand.u32 2147483648, %v9856_v43  ;;  %v2728_v4 = vpop.f32.mrf.mxu3 }
 0x2cf   : > { %v10013_v20 = vadd.f32 %v9974_v14, %v2826_v22  ;;  %v3216_v59 = vand.u32 2147483647, %v9856_v43  ;;  %v3230_v26 = vsel %vm10008_vm2, %v9933_v29, %v3226_v30  ;;  %v2469_v24 = vadd.f32 %v13503_v42, %v9869_v32 }
 0x2d0   : > { %7583 = vpow2.f32 %v7016_v54  ;;  %v2824_v57 = vadd.f32 %v2792_v10, %v2756_v56  ;;  %v3234_v55 = vor.u32 1.1754944e-38, %v3233_v38  ;;  %v3215_v43 = vsel %vm10024_vm5, %v9912_v48, %v3211_v0 }
 0x2d1   : > { %3631 = vmatmul.bf16.gmra.mxu3 %v3515_v63  ;;  %v7578_v63 = vpop.eup %7577  ;;  %vm3232_vm6 = vcmp.eq.f32.partialorder %v3231_v12, 8.507059e+37  ;;  %v3238_v29 = vmul.f32 %v9951_v49, %v9881_v33  ;;  %v3253_v32 = vmul.f32 %v10000_v27, %v9935_v31  ;;  %7585 = vpow2.f32 %v7018_v44  ;;  %v13507_v12 = vld [vmem:[#allocation62_spill] sm:$0xff] }
 0x2d2   : > { %v7580_v3 = vpop.eup %7579  ;;  %v10035_v56 = vadd.f32 1.0, %v7578_v63  ;;  %v3219_v54 = vor.u32 1.1754944e-38, %v3218_v61  ;;  %v3235_v10 = vsel %vm3232_vm6, %v3234_v55, %v3230_v26  ;;  %v10038_v30 = vadd.f32 %v9974_v14, %v2828_v45  ;;  %v10052_v45 = vpop.xlane.xlu2 %1748 }
 0x2d3   : > { %v7582_v11 = vpop.eup %7581  ;;  %v7019_v38 = vmul.f32 -1.442695, %v10013_v20  ;;  %vm3217_vm7 = vcmp.eq.f32.partialorder %v3216_v59, 8.507059e+37  ;;  %v3254_v48 = vsub.f32 1.0, %v3253_v32  ;;  %v10043_v0 = vadd.f32 1.0, %v7574_v17  ;;  %13508 = vst [vmem:[#allocation52_spill] sm:$0xff] %v10052_v45 }
 0x2d4   : > { %v2474_v42 = vadd.f32 %v13507_v12, %v2312_v5  ;;  %v10047_v22 = vadd.f32 %v9974_v14, %v2824_v57  ;;  %v3220_v63 = vsel %vm3217_vm7, %v3219_v54, %v3215_v43  ;;  %v2759_v44 = vadd.f32 %v9778_v15, %v2464_v16  ;;  %v10062_v15 = vpop.xlane.xlu0 %1744  ;;  %v13511_v12 = vld [vmem:[#allocation65_spill] sm:$0xff] }
 0x2d5   : > { %v10050_v55 = vadd.f32 1.0, %v7580_v3  ;;  %v3492_v61 = vmul.f32 %v3235_v10, %v9773_v62  ;;  %v3239_v26 = vsub.f32 1.0, %v3238_v29  ;;  %7587 = vrcp.f32 %v10035_v56  ;;  %13509 = vst [vmem:[#allocation56_spill] sm:$0xff] %v10062_v15  ;;  %v2314_v29 = vpop.f32.mrf.mxu1 }
 0x2d6   : > { %v7584_v39 = vpop.eup %7583  ;;  %v2761_v17 = vadd.f32 %v9886_v41, %v2469_v24  ;;  %v10057_v59 = vadd.f32 1.0, %v7582_v11  ;;  %v2799_v57 = vmul.f32 %v9963_v60, %v10041_v52  ;;  %v7021_v5 = vmul.f32 -1.442695, %v10038_v30  ;;  %v13510_v24 = vld [vmem:[#allocation60_spill] sm:$0xff] }
 0x2d7   : > { %7589 = vpow2.f32 %v7019_v38  ;;  %v3491_v16 = vmul.f32 %v3220_v63, %v9763_v9  ;;  %v3255_v62 = vmul.f32 %v10000_v27, %v3254_v48  ;;  %v7586_v3 = vpop.eup %7585  ;;  %v2763_v43 = vadd.f32 %v2728_v4, %v2474_v42  ;;  %v2730_v4 = vpop.f32.mrf.mxu3 }
 0x2d8   : > { %7591 = vrcp.f32 %v10043_v0  ;;  %v7017_v41 = vmul.f32 -1.442695, %v10047_v22  ;;  %v2797_v11 = vmul.f32 %v9963_v60, %v10052_v45  ;;  %v10073_v32 = vadd.f32 %v13510_v24, %v9943_v6  ;;  %v10118_v24 = vld [vmem:[%s13515_s12] ss:$0 sm:$0xff] }
 0x2d9   : > { %7593 = vrcp.f32 %v10050_v55  ;;  %v3516_v54 = vpack.c.bf16 %v3492_v61, %v3491_v16  ;;  %v3240_v9 = vmul.f32 %v9951_v49, %v3239_v26  ;;  %v10077_v10 = vadd.f32 1.0, %v7584_v39 }
 0x2da   : > { %7595 = vrcp.f32 %v10057_v59  ;;  %v2831_v38 = vadd.f32 %v2799_v57, %v2763_v43  ;;  %v2795_v48 = vmul.f32 %v9963_v60, %v10062_v15  ;;  %v2476_v42 = vadd.f32 %v13511_v12, %v2314_v29 }
 0x2db   : > { %7597 = vpow2.f32 %v7021_v5  ;;  %v3256_v63 = vadd.f32 %v10000_v27, %v3255_v62  ;;  %vm3258_vm3 = vweird.f32 %v10000_v27  ;;  %v10084_v6 = vpop.eup %7587  ;;  %v10086_v61 = vadd.f32 1.0, %v7586_v3 }
 0x2dc   : > { %7599 = vpow2.f32 %v7017_v41  ;;  %v2829_v39 = vadd.f32 %v2797_v11, %v2761_v17  ;;  %v3263_v26 = vand.u32 2147483648, %v9935_v31  ;;  %v3241_v16 = vadd.f32 %v9951_v49, %v3240_v9  ;;  %v10108_v11 = vpop.xlane.xlu2 %1754  ;;  %v10136_v29 = vpop.xlane.xlu0 %1750 }
 0x2dd   : > { %v7590_v57 = vpop.eup %7589  ;;  %vm3243_vm15 = vweird.f32 %v9951_v49  ;;  %vm3257_vm8 = vweird.f32 %v9935_v31  ;;  %v3261_v5 = vand.u32 2147483647, %v9935_v31  ;;  %7601 = vrcp.f32 %v10077_v10  ;;  %13514 = vst [vmem:[#allocation54_spill] sm:$0xff] %v10108_v11 }
 0x2de   : > { %v10093_v62 = vpop.eup %7591  ;;  %v10097_v3 = vadd.f32 %v9974_v14, %v2831_v38  ;;  %v2827_v43 = vadd.f32 %v2795_v48, %v2759_v44  ;;  %v3248_v17 = vand.u32 2147483648, %v9881_v33  ;;  %vm10102_vm9 = vmor %vm3257_vm8, %vm3258_vm3  ;;  %v3246_v31 = vand.u32 2147483647, %v9881_v33  ;;  %13518 = vst [vmem:[#allocation58_spill] sm:$0xff] %v10136_v29 }
 0x2df   : > { %v10106_v41 = vpop.eup %7593  ;;  %v3260_v44 = vsel %vm10102_vm9, %v10000_v27, %v3256_v63  ;;  %7603 = vrcp.f32 %v10086_v61  ;;  %v2764_v38 = vadd.f32 %v2730_v4, %v2476_v42  ;;  %v10125_v48 = vadd.f32 1.0, %v7590_v57  ;;  %vm10129_vm11 = vmor %vm3242_vm10, %vm3243_vm15 }
 0x2e0   : > { %v10122_v9 = vpop.eup %7595  ;;  %v3264_v27 = vor.u32 1.1754944e-38, %v3263_v26  ;;  %v10134_v63 = vadd.f32 %v9974_v14, %v2829_v39  ;;  %v3245_v45 = vsel %vm10129_vm11, %v9951_v49, %v3241_v16  ;;  %vm3262_vm12 = vcmp.eq.f32.partialorder %v3261_v5, 8.507059e+37 }
 0x2e1   : > { %3636 = vmatmul.bf16.gmra.mxu3 %v3516_v54  ;;  %v3283_v54 = vmul.f32 %v10084_v6, %v10035_v56  ;;  %v7598_v12 = vpop.eup %7597  ;;  %v3268_v4 = vmul.f32 %v10093_v62, %v10043_v0  ;;  %v7024_v57 = vmul.f32 -1.442695, %v10097_v3  ;;  %v2800_v26 = vmul.f32 %v9963_v60, %v10108_v11 }
 0x2e2   : > { %v7600_v42 = vpop.eup %7599  ;;  %v3249_v52 = vor.u32 1.1754944e-38, %v3248_v17  ;;  %v3265_v7 = vsel %vm3262_vm12, %v3264_v27, %v3260_v44  ;;  %v10147_v21 = vadd.f32 %v9974_v14, %v2827_v43  ;;  %vm3247_vm13 = vcmp.eq.f32.partialorder %v3246_v31, 8.507059e+37 }
 0x2e3   : > { %v3284_v49 = vsub.f32 1.0, %v3283_v54  ;;  %v10152_v16 = vpop.eup %7601  ;;  %v10154_v5 = vadd.f32 1.0, %v7598_v12  ;;  %7605 = vrcp.f32 %v10125_v48  ;;  %v2798_v11 = vmul.f32 %v9963_v60, %v10136_v29  ;;  %v7393_v54 = vld [vmem:[%s13448_s13 + $0x10] sm:$0xff] }
 0x2e4   : > { %v3250_v17 = vsel %vm3247_vm13, %v3249_v52, %v3245_v45  ;;  %v7022_v44 = vmul.f32 -1.442695, %v10134_v63  ;;  %v3494_v43 = vmul.f32 %v3265_v7, %v9831_v23  ;;  %v3269_v27 = vsub.f32 1.0, %v3268_v4  ;;  %4523 = vmatpush.bf16.msrb.mxu0 %v7393_v54 }
 0x2e5   : > { %v2762_v12 = vadd.f32 %v9953_v58, %v10073_v32  ;;  %v10169_v35 = vadd.f32 1.0, %v7600_v42  ;;  %7607 = vpow2.f32 %v7024_v57  ;;  %v2832_v60 = vadd.f32 %v2800_v26, %v2764_v38 }
 0x2e6   : > { %v7020_v52 = vmul.f32 -1.442695, %v10147_v21  ;;  %v3493_v23 = vmul.f32 %v3250_v17, %v9802_v25  ;;  %v3285_v7 = vmul.f32 %v10084_v6, %v3284_v49  ;;  %v3270_v29 = vmul.f32 %v10093_v62, %v3269_v27 }
 0x2e7   : > { %v2830_v45 = vadd.f32 %v2798_v11, %v2762_v12  ;;  %v3298_v58 = vmul.f32 %v10106_v41, %v10050_v55  ;;  %v10182_v25 = vadd.f32 %v9974_v14, %v2832_v60  ;;  %vm3288_vm14 = vweird.f32 %v10084_v6 }
 0x2e8   : > { %v3517_v4 = vpack.c.bf16 %v3494_v43, %v3493_v23  ;;  %v3286_v11 = vadd.f32 %v10084_v6, %v3285_v7  ;;  %vm3273_vm0 = vweird.f32 %v10093_v62  ;;  %vm3287_vm1 = vweird.f32 %v10035_v56 }
 0x2e9   : > { %v10190_v26 = vadd.f32 %v9974_v14, %v2830_v45  ;;  %v3293_v49 = vand.u32 2147483648, %v10035_v56  ;;  %v3271_v43 = vadd.f32 %v10093_v62, %v3270_v29  ;;  %v3299_v54 = vsub.f32 1.0, %v3298_v58  ;;  %vm10206_vm2 = vmor %vm3287_vm1, %vm3288_vm14 }
 0x2ea   : > { %v7025_v12 = vmul.f32 -1.442695, %v10182_v25  ;;  %v3278_v60 = vand.u32 2147483648, %v10043_v0  ;;  %v3313_v29 = vmul.f32 %v10122_v9, %v10057_v59  ;;  %vm3272_vm4 = vweird.f32 %v10043_v0 }
 0x2eb   : > { %v3290_v7 = vsel %vm10206_vm2, %v10084_v6, %v3286_v11  ;;  %vm3274_vm5 = vmor %vm3272_vm4, %vm3273_vm0  ;;  %v3294_v58 = vor.u32 1.1754944e-38, %v3293_v49  ;;  %v3308_v34 = vand.u32 2147483648, %v10050_v55  ;;  %vm3303_vm3 = vweird.f32 %v10106_v41 }
 0x2ec   : > { %v3279_v6 = vor.u32 1.1754944e-38, %v3278_v60  ;;  %v3314_v15 = vsub.f32 1.0, %v3313_v29  ;;  %vm3302_vm15 = vweird.f32 %v10050_v55  ;;  %vm3318_vm9 = vweird.f32 %v10122_v9 }
 0x2ed   : > { %vm10248_vm8 = vmor %vm3302_vm15, %vm3303_vm3  ;;  %vm3317_vm11 = vweird.f32 %v10057_v59  ;;  %vm3333_vm0 = vweird.f32 %v10152_v16  ;;  %vm3332_vm2 = vweird.f32 %v10077_v10 }
 0x2ee   : > { %vm10276_vm12 = vmor %vm3317_vm11, %vm3318_vm9  ;;  %vm3362_vm9 = vweird.f32 %v10086_v61  ;;  %vm3347_vm11 = vweird.f32 %v10169_v35 }
 0x2f1   : > { %3641 = vmatmul.bf16.gmra.mxu3 %v3517_v4  ;;  %v7023_v4 = vmul.f32 -1.442695, %v10190_v26 }
 0x2f2   : > { %v3602_v39 = vpop.f32.mrf.mxu3 }
 0x2f3   : > { %v10150_v33 = vadd.f32 %v10118_v24, %v3602_v39  ;;  %v10165_v39 = vpop.eup %7603 }
 0x2f4   : > { %v10178_v32 = vpop.eup %7605  ;;  %v3358_v28 = vmul.f32 %v10165_v39, %v10086_v61 }
 0x2f5   : > { %v7058_v31 = vmul.f32 -1.442695, %v10150_v33  ;;  %v7608_v57 = vpop.eup %7607 }
 0x2f6   : > { %v3359_v50 = vsub.f32 1.0, %v3358_v28 }
 0x2f7   : > { %7609 = vpow2.f32 %v7058_v31  ;;  %v3291_v31 = vand.u32 2147483647, %v10035_v56  ;;  %v3276_v56 = vand.u32 2147483647, %v10043_v0  ;;  %v3300_v0 = vmul.f32 %v10106_v41, %v3299_v54 }
 0x2f8   : > { %7611 = vrcp.f32 %v10154_v5 }
 0x2f9   : > { %7613 = vpow2.f32 %v7022_v44  ;;  %vm3292_vm6 = vcmp.eq.f32.partialorder %v3291_v31, 8.507059e+37  ;;  %vm3277_vm7 = vcmp.eq.f32.partialorder %v3276_v56, 8.507059e+37  ;;  %v3309_v56 = vor.u32 1.1754944e-38, %v3308_v34 }
 0x2fa   : > { %7615 = vrcp.f32 %v10169_v35  ;;  %v3604_v38 = vpop.f32.mrf.mxu3  ;;  %v3295_v11 = vsel %vm3292_vm6, %v3294_v58, %v3290_v7  ;;  %v3321_v7 = vand.u32 2147483647, %v10057_v59  ;;  %v3328_v34 = vmul.f32 %v10152_v16, %v10077_v10 }
 0x2fb   : > { %7617 = vpow2.f32 %v7020_v52  ;;  %v10185_v42 = vadd.f32 %v10118_v24, %v3604_v38 }
 0x2fc   : > { %vm10280_vm13 = vcmp.eq.f32.partialorder %v3321_v7, 8.507059e+37 }
 0x2fd   : > { %v7610_v17 = vpop.eup %7609  ;;  %v7059_v44 = vmul.f32 -1.442695, %v10185_v42 }
 0x2fe   : > { %v10198_v27 = vpop.eup %7611  ;;  %v10201_v14 = vadd.f32 1.0, %v7610_v17  ;;  %v10223_v17 = vadd.f32 1.0, %v7608_v57  ;;  %v3496_v57 = vmul.f32 %v3295_v11, %v9904_v13  ;;  %v3306_v13 = vand.u32 2147483647, %v10050_v55 }
 0x2ff   : > { %v7614_v23 = vpop.eup %7613  ;;  %7619 = vpow2.f32 %v7059_v44  ;;  %v3275_v44 = vsel %vm3274_vm5, %v10093_v62, %v3271_v43  ;;  %v3301_v62 = vadd.f32 %v10106_v41, %v3300_v0 }
 0x300   : > { %v10217_v45 = vpop.eup %7615  ;;  %7621 = vrcp.f32 %v10201_v14  ;;  %v10227_v52 = vadd.f32 1.0, %v7614_v23  ;;  %v3280_v37 = vsel %vm3277_vm7, %v3279_v6, %v3275_v44  ;;  %vm3307_vm10 = vcmp.eq.f32.partialorder %v3306_v13, 8.507059e+37 }
 0x301   : > { %v7618_v38 = vpop.eup %7617  ;;  %7623 = vpow2.f32 %v7025_v12  ;;  %v3315_v12 = vmul.f32 %v10122_v9, %v3314_v15  ;;  %v3495_v29 = vmul.f32 %v3280_v37, %v9884_v1  ;;  %v3305_v1 = vsel %vm10248_vm8, %v10106_v41, %v3301_v62 }
 0x302   : > { %7625 = vpow2.f32 %v7023_v4  ;;  %v10237_v31 = vadd.f32 1.0, %v7618_v38  ;;  %v3323_v37 = vand.u32 2147483648, %v10057_v59  ;;  %v3329_v59 = vsub.f32 1.0, %v3328_v34 }
 0x303   : > { %7627 = vrcp.f32 %v10223_v17  ;;  %v3518_v58 = vpack.c.bf16 %v3496_v57, %v3495_v29  ;;  %v3316_v0 = vadd.f32 %v10122_v9, %v3315_v12  ;;  %v3310_v57 = vsel %vm3307_vm10, %v3309_v56, %v3305_v1  ;;  %vm10354_vm10 = vmor %vm3332_vm2, %vm3333_vm0 }
 0x304   : > { %7629 = vrcp.f32 %v10227_v52  ;;  %v3607_v38 = vpop.f32.mrf.mxu3  ;;  %v3324_v13 = vor.u32 1.1754944e-38, %v3323_v37  ;;  %v3343_v7 = vmul.f32 %v10217_v45, %v10169_v35  ;;  %vm3815_vm14 = vweird.f32 %v10201_v14 }
 0x305   : > { %v7620_v49 = vpop.eup %7619  ;;  %v10258_v44 = vadd.f32 %v10118_v24, %v3607_v38  ;;  %3646 = vmatmul.bf16.gmra.mxu3 %v3518_v58  ;;  %v3320_v56 = vsel %vm10276_vm12, %v10122_v9, %v3316_v0  ;;  %v3497_v58 = vmul.f32 %v3310_v57, %v9915_v47  ;;  %v3338_v38 = vand.u32 2147483648, %v10077_v10 }
 0x306   : > { %v10234_v43 = vpop.eup %7621  ;;  %v10239_v54 = vadd.f32 1.0, %v7620_v49  ;;  %v3819_v1 = vand.u32 2147483647, %v10201_v14  ;;  %v3821_v37 = vand.u32 2147483648, %v10201_v14  ;;  %v3325_v34 = vsel %vm10280_vm13, %v3324_v13, %v3320_v56 }
 0x307   : > { %v3811_v60 = vmul.f32 %v10234_v43, %v10201_v14  ;;  %v7624_v4 = vpop.eup %7623  ;;  %v7060_v49 = vmul.f32 -1.442695, %v10258_v44  ;;  %vm3816_vm1 = vweird.f32 %v10234_v43  ;;  %v3344_v19 = vsub.f32 1.0, %v3343_v7 }
 0x308   : > { %7631 = vrcp.f32 %v10239_v54  ;;  %v7626_v55 = vpop.eup %7625  ;;  %v10269_v11 = vadd.f32 1.0, %v7624_v4  ;;  %v3336_v4 = vand.u32 2147483647, %v10077_v10  ;;  %vm10314_vm5 = vmor %vm3815_vm14, %vm3816_vm1  ;;  %vm10318_vm6 = vcmp.eq.f32.partialorder %v3819_v1, 8.507059e+37 }
 0x309   : > { %v3812_v15 = vsub.f32 1.0, %v3811_v60  ;;  %v10264_v6 = vpop.eup %7627  ;;  %7633 = vrcp.f32 %v10237_v31  ;;  %v10273_v62 = vadd.f32 1.0, %v7626_v55  ;;  %v3330_v60 = vmul.f32 %v10152_v16, %v3329_v59 }
 0x30a   : > { %v10267_v41 = vpop.eup %7629  ;;  %7635 = vpow2.f32 %v7060_v49  ;;  %v3836_v49 = vand.u32 2147483648, %v10239_v54  ;;  %v3822_v56 = vor.u32 1.1754944e-38, %v3821_v37  ;;  %v3498_v7 = vmul.f32 %v3325_v34, %v9938_v18 }
 0x30b   : > { %v3813_v12 = vmul.f32 %v10234_v43, %v3812_v15  ;;  %vm3830_vm7 = vweird.f32 %v10239_v54  ;;  %v3331_v37 = vadd.f32 %v10152_v16, %v3330_v60  ;;  %v3345_v18 = vmul.f32 %v10217_v45, %v3344_v19 }
 0x30c   : > { %v3609_v0 = vpop.f32.mrf.mxu3  ;;  %v3837_v2 = vor.u32 1.1754944e-38, %v3836_v49  ;;  %vm10338_vm8 = vcmp.eq.f32.partialorder %v3336_v4, 8.507059e+37  ;;  %v3519_v28 = vpack.c.bf16 %v3498_v7, %v3497_v58  ;;  %v3339_v49 = vor.u32 1.1754944e-38, %v3338_v38 }
 0x30d   : > { %v3814_v55 = vadd.f32 %v10234_v43, %v3813_v12  ;;  %v10306_v57 = vadd.f32 %v10118_v24, %v3609_v0  ;;  %v3366_v19 = vand.u32 2147483647, %v10086_v61  ;;  %v3335_v58 = vsel %vm10354_vm10, %v10152_v16, %v3331_v37 }
 0x30e   : > { %v7632_v23 = vpop.eup %7631  ;;  %v3346_v38 = vadd.f32 %v10217_v45, %v3345_v18  ;;  %vm3348_vm12 = vweird.f32 %v10217_v45  ;;  %vm3363_vm13 = vweird.f32 %v10165_v39  ;;  %v3381_v16 = vand.u32 2147483647, %v10125_v48 }
 0x30f   : > { %v3826_v15 = vmul.f32 %v7632_v23, %v10239_v54  ;;  %v10297_v9 = vpop.eup %7633  ;;  %vm3831_vm4 = vweird.f32 %v7632_v23  ;;  %v7061_v59 = vmul.f32 -1.442695, %v10306_v57  ;;  %v3818_v14 = vsel %vm10314_vm5, %v10234_v43, %v3814_v55  ;;  %vm10382_vm14 = vmor %vm3347_vm11, %vm3348_vm12 }
 0x310   : > { %v7636_v40 = vpop.eup %7635  ;;  %vm3832_vm3 = vmor %vm3830_vm7, %vm3831_vm4  ;;  %v3823_v43 = vsel %vm10318_vm6, %v3822_v56, %v3818_v14  ;;  %vm10386_vm0 = vcmp.eq.f32.partialorder %v3366_v19, 8.507059e+37  ;;  %v3350_v18 = vsel %vm10382_vm14, %v10217_v45, %v3346_v38  ;;  %vm3377_vm2 = vweird.f32 %v10125_v48 }
 0x311   : > { %v3827_v47 = vsub.f32 1.0, %v3826_v15  ;;  %v3834_v15 = vand.u32 2147483647, %v10239_v54  ;;  %v10331_v1 = vadd.f32 1.0, %v7636_v40  ;;  %7637 = vpow2.f32 %v7061_v59  ;;  %vm10407_vm4 = vmor %vm3362_vm9, %vm3363_vm13 }
 0x312   : > { %v3373_v54 = vmul.f32 %v10178_v32, %v10125_v48  ;;  %v4290_v4 = vmul.f32 %v3823_v43, %v10150_v33  ;;  %vm3378_vm5 = vweird.f32 %v10178_v32  ;;  %vm10415_vm6 = vcmp.eq.f32.partialorder %v3381_v16, 8.507059e+37 }
 0x313   : > { %v3828_v12 = vmul.f32 %v7632_v23, %v3827_v47  ;;  %v7392_v47 = vld [vmem:[%s13448_s13 + $0x8] sm:$0xff]  ;;  %vm3835_vm15 = vcmp.eq.f32.partialorder %v3834_v15, 8.507059e+37  ;;  %7639 = vrcp.f32 %v10331_v1  ;;  %v3351_v15 = vand.u32 2147483647, %v10169_v35 }
 0x314   : > { %4524 = vmatpush.bf16.msrb.mxu0 %v7392_v47  ;;  %v3374_v29 = vsub.f32 1.0, %v3373_v54  ;;  %v3340_v47 = vsel %vm10338_vm8, %v3339_v49, %v3335_v58  ;;  %v4322_v37 = vpack.c.bf16 %v4290_v4, %v4290_v4  ;;  %v3388_v58 = vmul.f32 %v10297_v9, %v10237_v31 }
 0x315   : > { %v3829_v0 = vadd.f32 %v7632_v23, %v3828_v12  ;;  %3651 = vmatmul.bf16.gmra.mxu3 %v3519_v28  ;;  %vm3352_vm1 = vcmp.eq.f32.partialorder %v3351_v15, 8.507059e+37  ;;  %vm3393_vm11 = vweird.f32 %v10297_v9 }
 0x316   : > { %v3375_v54 = vmul.f32 %v10178_v32, %v3374_v29  ;;  %v3851_v29 = vand.u32 2147483648, %v10331_v1 }
 0x317   : > { %v3833_v53 = vsel %vm3832_vm3, %v7632_v23, %v3829_v0  ;;  %v3612_v23 = vpop.f32.mrf.mxu3  ;;  %v7638_v10 = vpop.eup %7637  ;;  %v3383_v0 = vand.u32 2147483648, %v10125_v48  ;;  %vm3845_vm3 = vweird.f32 %v10331_v1 }
 0x318   : > { %v3838_v55 = vsel %vm3835_vm15, %v3837_v2, %v3833_v53  ;;  %v10348_v60 = vadd.f32 %v10118_v24, %v3612_v23  ;;  %v3360_v2 = vmul.f32 %v10165_v39, %v3359_v50  ;;  %v3353_v50 = vand.u32 2147483648, %v10169_v35  ;;  %vm10441_vm15 = vmor %vm3377_vm2, %vm3378_vm5 }
 0x319   : > { %v4291_v34 = vmul.f32 %v3838_v55, %v10185_v42  ;;  %v3368_v42 = vand.u32 2147483648, %v10086_v61  ;;  %v10370_v13 = vpop.eup %7639  ;;  %v10372_v56 = vadd.f32 1.0, %v7638_v10  ;;  %v3499_v23 = vmul.f32 %v3340_v47, %v9977_v46 }
 0x31a   : > { %v7062_v12 = vmul.f32 -1.442695, %v10348_v60  ;;  %v3841_v59 = vmul.f32 %v10370_v13, %v10331_v1  ;;  %v3361_v43 = vadd.f32 %v10165_v39, %v3360_v2  ;;  %v3354_v55 = vor.u32 1.1754944e-38, %v3353_v50 }
 0x31b   : > { %v4323_v33 = vpack.c.bf16 %v4291_v34, %v4291_v34  ;;  %v3369_v40 = vor.u32 1.1754944e-38, %v3368_v42  ;;  %v4406_v2 = vunpack.c.l.b16 %v4322_v37  ;;  %v3384_v4 = vor.u32 1.1754944e-38, %v3383_v0 }
 0x31c   : > { %7641 = vpow2.f32 %v7062_v12  ;;  %v3842_v35 = vsub.f32 1.0, %v3841_v59  ;;  %v3355_v45 = vsel %vm3352_vm1, %v3354_v55, %v3350_v18  ;;  %v3365_v46 = vsel %vm10407_vm4, %v10165_v39, %v3361_v43  ;;  %v7391_v12 = vld [vmem:[%s13448_s13] sm:$0xff] }
 0x31d   : > { %7643 = vrcp.f32 %v10372_v56  ;;  %v4407_v34 = vunpack.c.l.b16 %v4323_v33  ;;  %vm3846_vm7 = vweird.f32 %v10370_v13  ;;  %v3376_v39 = vadd.f32 %v10178_v32, %v3375_v54  ;;  %4525 = vmatpush.bf16.msrb.mxu0 %v7391_v12 }
 0x31e   : > { %v3843_v49 = vmul.f32 %v10370_v13, %v3842_v35  ;;  %v3500_v16 = vmul.f32 %v3355_v45, %v10047_v22  ;;  %v3849_v59 = vand.u32 2147483647, %v10331_v1  ;;  %vm10447_vm8 = vmor %vm3845_vm3, %vm3846_vm7  ;;  %v3370_v1 = vsel %vm10386_vm0, %v3369_v40, %v3365_v46 }
 0x31f   : > { %v3614_v28 = vpop.f32.mrf.mxu3  ;;  %v10428_v50 = vpack.c.b16 %v4407_v34, %v4406_v2  ;;  %v3389_v0 = vsub.f32 1.0, %v3388_v58  ;;  %v3396_v37 = vand.u32 2147483647, %v10237_v31  ;;  %v3380_v43 = vsel %vm10441_vm15, %v10178_v32, %v3376_v39 }
 0x320   : > { %v10401_v19 = vadd.f32 %v10118_v24, %v3614_v28  ;;  %v3844_v38 = vadd.f32 %v10370_v13, %v3843_v49  ;;  %v3403_v35 = vmul.f32 %v10198_v27, %v10154_v5  ;;  %v3852_v55 = vor.u32 1.1754944e-38, %v3851_v29 }
 0x321   : > { %v3864_v54 = vand.u32 2147483647, %v10372_v56  ;;  %v3866_v14 = vand.u32 2147483648, %v10372_v56  ;;  %v3520_v40 = vpack.c.bf16 %v3500_v16, %v3499_v23  ;;  %4526 = vmatmul.bf16.vlgmr.msrb.gmra.mxu0 %v10428_v50  ;;  %vm3850_vm9 = vcmp.eq.f32.partialorder %v3849_v59, 8.507059e+37 }
 0x322   : > { %v7642_v61 = vpop.eup %7641  ;;  %v7063_v10 = vmul.f32 -1.442695, %v10401_v19  ;;  %v3848_v48 = vsel %vm10447_vm8, %v10370_v13, %v3844_v38  ;;  %v3390_v32 = vmul.f32 %v10297_v9, %v3389_v0  ;;  %v3398_v45 = vand.u32 2147483648, %v10237_v31 }
 0x323   : > { %v7644_v15 = vpop.eup %7643  ;;  %v10431_v33 = vadd.f32 1.0, %v7642_v61  ;;  %v3853_v49 = vsel %vm3850_vm9, %v3852_v55, %v3848_v48  ;;  %vm3860_vm12 = vweird.f32 %v10372_v56  ;;  %v3385_v46 = vsel %vm10415_vm6, %v3384_v4, %v3380_v43 }
 0x324   : > { %v3856_v47 = vmul.f32 %v7644_v15, %v10372_v56  ;;  %7645 = vpow2.f32 %v7063_v10  ;;  %vm3861_vm10 = vweird.f32 %v7644_v15  ;;  %vm3865_vm14 = vcmp.eq.f32.partialorder %v3864_v54, 8.507059e+37 }
 0x325   : > { %7647 = vrcp.f32 %v10431_v33  ;;  %3656 = vmatmul.bf16.gmra.mxu3 %v3520_v40  ;;  %vm3862_vm13 = vmor %vm3860_vm12, %vm3861_vm10  ;;  %v3867_v61 = vor.u32 1.1754944e-38, %v3866_v14  ;;  %v3404_v10 = vsub.f32 1.0, %v3403_v35  ;;  %v4292_v12 = vmul.f32 %v3853_v49, %v10258_v44 }
 0x326   : > { %v3857_v18 = vsub.f32 1.0, %v3856_v47  ;;  %v3502_v42 = vmul.f32 %v3385_v46, %v10013_v20  ;;  %v3391_v4 = vadd.f32 %v10297_v9, %v3390_v32  ;;  %vm3407_vm0 = vweird.f32 %v10154_v5 }
 0x327   : > { %v3617_v34 = vpop.f32.mrf.mxu3  ;;  %vm3392_vm1 = vweird.f32 %v10237_v31  ;;  %vm10491_vm2 = vcmp.eq.f32.partialorder %v3396_v37, 8.507059e+37  ;;  %v3405_v20 = vmul.f32 %v10198_v27, %v3404_v10  ;;  %v4324_v7 = vpack.c.bf16 %v4292_v12, %v4292_v12 }
 0x328   : > { %v3858_v28 = vmul.f32 %v7644_v15, %v3857_v18  ;;  %v10467_v13 = vadd.f32 %v10118_v24, %v3617_v34  ;;  %vm10502_vm4 = vmor %vm3392_vm1, %vm3393_vm11  ;;  %vm3408_vm5 = vweird.f32 %v10198_v27  ;;  %vm3875_vm7 = vweird.f32 %v10431_v33 }
 0x329   : > { %v3395_v31 = vsel %vm10502_vm4, %v10297_v9, %v3391_v4  ;;  %v3881_v54 = vand.u32 2147483648, %v10431_v33  ;;  %v3406_v9 = vadd.f32 %v10198_v27, %v3405_v20  ;;  %v4408_v34 = vunpack.c.l.b16 %v4324_v7  ;;  %vm10540_vm15 = vmor %vm3407_vm0, %vm3408_vm5 }
 0x32a   : > { %v7646_v53 = vpop.eup %7645  ;;  %v3859_v2 = vadd.f32 %v7644_v15, %v3858_v28  ;;  %v7064_v23 = vmul.f32 -1.442695, %v10467_v13  ;;  %v3879_v28 = vand.u32 2147483647, %v10431_v33  ;;  %v3418_v10 = vmul.f32 %v10267_v41, %v10227_v52 }
 0x32b   : > { %v10476_v58 = vpop.eup %7647  ;;  %v10478_v38 = vadd.f32 1.0, %v7646_v53  ;;  %v3411_v53 = vand.u32 2147483647, %v10154_v5  ;;  %v3882_v12 = vor.u32 1.1754944e-38, %v3881_v54  ;;  %vm3423_vm0 = vweird.f32 %v10267_v41 }
 0x32c   : > { %v3863_v39 = vsel %vm3862_vm13, %v7644_v15, %v3859_v2  ;;  %v3871_v29 = vmul.f32 %v10476_v58, %v10431_v33  ;;  %7649 = vpow2.f32 %v7064_v23  ;;  %v3501_v15 = vmul.f32 %v3370_v1, %v9984_v36 }
 0x32d   : > { %v3868_v56 = vsel %vm3865_vm14, %v3867_v61, %v3863_v39  ;;  %7651 = vrcp.f32 %v10478_v38  ;;  %v3399_v1 = vor.u32 1.1754944e-38, %v3398_v45  ;;  %vm3876_vm6 = vweird.f32 %v10476_v58 }
 0x32e   : > { %7653 = vrcp.f32 %v10273_v62  ;;  %v4293_v16 = vmul.f32 %v3868_v56, %v10306_v57  ;;  %v3872_v59 = vsub.f32 1.0, %v3871_v29  ;;  %v3521_v36 = vpack.c.bf16 %v3502_v42, %v3501_v15  ;;  %vm10522_vm3 = vmor %vm3875_vm7, %vm3876_vm6 }
 0x32f   : > { %v3619_v44 = vpop.f32.mrf.mxu3  ;;  %v3400_v45 = vsel %vm10491_vm2, %v3399_v1, %v3395_v31  ;;  %v3413_v2 = vand.u32 2147483648, %v10154_v5  ;;  %v3894_v39 = vand.u32 2147483647, %v10478_v38  ;;  %v3896_v29 = vand.u32 2147483648, %v10478_v38 }
 0x330   : > { %v4325_v22 = vpack.c.bf16 %v4293_v16, %v4293_v16  ;;  %v3873_v0 = vmul.f32 %v10476_v58, %v3872_v59  ;;  %v10498_v57 = vadd.f32 %v10118_v24, %v3619_v44  ;;  %v3410_v56 = vsel %vm10540_vm15, %v10198_v27, %v3406_v9 }
 0x331   : > { %vm3880_vm8 = vcmp.eq.f32.partialorder %v3879_v28, 8.507059e+37  ;;  %vm3412_vm10 = vcmp.eq.f32.partialorder %v3411_v53, 8.507059e+37  ;;  %v3414_v16 = vor.u32 1.1754944e-38, %v3413_v2  ;;  %vm3890_vm11 = vweird.f32 %v10478_v38 }
 0x332   : > { %v7650_v37 = vpop.eup %7649  ;;  %v4409_v18 = vunpack.c.l.b16 %v4325_v22  ;;  %v3874_v43 = vadd.f32 %v10476_v58, %v3873_v0  ;;  %v7065_v35 = vmul.f32 -1.442695, %v10498_v57  ;;  %v3419_v47 = vsub.f32 1.0, %v3418_v10 }
 0x333   : > { %v7652_v55 = vpop.eup %7651  ;;  %v10515_v14 = vadd.f32 1.0, %v7650_v37  ;;  %vm3895_vm13 = vcmp.eq.f32.partialorder %v3894_v39, 8.507059e+37  ;;  %v3897_v7 = vor.u32 1.1754944e-38, %v3896_v29  ;;  %v3415_v0 = vsel %vm3412_vm10, %v3414_v16, %v3410_v56 }
 0x334   : > { %v10518_v40 = vpop.eup %7653  ;;  %v3886_v49 = vmul.f32 %v7652_v55, %v10478_v38  ;;  %7655 = vpow2.f32 %v7065_v35  ;;  %v3878_v33 = vsel %vm10522_vm3, %v10476_v58, %v3874_v43  ;;  %v10534_v46 = vpack.c.b16 %v4409_v18, %v4408_v34 }
 0x335   : > { %7657 = vrcp.f32 %v10515_v14  ;;  %vm3891_vm9 = vweird.f32 %v7652_v55  ;;  %v3883_v4 = vsel %vm3880_vm8, %v3882_v12, %v3878_v33  ;;  %3661 = vmatmul.bf16.gmra.mxu3 %v3521_v36  ;;  %v3433_v59 = vmul.f32 %v10518_v40, %v10273_v62 }
 0x336   : > { %v3887_v23 = vsub.f32 1.0, %v3886_v49  ;;  %4531 = vmatmul.bf16.gmra.mxu0 %v10534_v46  ;;  %vm3892_vm12 = vmor %vm3890_vm11, %vm3891_vm9  ;;  %v4294_v48 = vmul.f32 %v3883_v4, %v10348_v60  ;;  %v3503_v38 = vmul.f32 %v3400_v45, %v10147_v21  ;;  %vm3422_vm14 = vweird.f32 %v10227_v52 }
 0x337   : > { %v3622_v58 = vpop.f32.mrf.mxu3  ;;  %v3434_v37 = vsub.f32 1.0, %v3433_v59  ;;  %v3504_v60 = vmul.f32 %v3415_v0, %v10038_v30  ;;  %v3426_v54 = vand.u32 2147483647, %v10227_v52  ;;  %v3428_v49 = vand.u32 2147483648, %v10227_v52  ;;  %vm10613_vm3 = vmor %vm3422_vm14, %vm3423_vm0 }
 0x338   : > { %v3888_v42 = vmul.f32 %v7652_v55, %v3887_v23  ;;  %v10553_v5 = vadd.f32 %v10118_v24, %v3622_v58  ;;  %v4326_v9 = vpack.c.bf16 %v4294_v48, %v4294_v48  ;;  %vm3437_vm1 = vweird.f32 %v10273_v62 }
 0x339   : > { %v3435_v32 = vmul.f32 %v10518_v40, %v3434_v37  ;;  %vm3905_vm4 = vweird.f32 %v10515_v14  ;;  %v3911_v23 = vand.u32 2147483648, %v10515_v14  ;;  %v3909_v29 = vand.u32 2147483647, %v10515_v14 }
 0x33a   : > { %v7656_v44 = vpop.eup %7655  ;;  %v3889_v15 = vadd.f32 %v7652_v55, %v3888_v42  ;;  %v7066_v27 = vmul.f32 -1.442695, %v10553_v5  ;;  %v4410_v39 = vunpack.c.l.b16 %v4326_v9  ;;  %vm10599_vm6 = vcmp.eq.f32.partialorder %v3426_v54, 8.507059e+37 }
 0x33b   : > { %v10559_v20 = vpop.eup %7657  ;;  %v10561_v22 = vadd.f32 1.0, %v7656_v44  ;;  %v3429_v4 = vor.u32 1.1754944e-38, %v3428_v49  ;;  %vm3438_vm7 = vweird.f32 %v10518_v40  ;;  %vm3910_vm15 = vcmp.eq.f32.partialorder %v3909_v29, 8.507059e+37 }
 0x33c   : > { %v3893_v36 = vsel %vm3892_vm12, %v7652_v55, %v3889_v15  ;;  %v3901_v31 = vmul.f32 %v10559_v20, %v10515_v14  ;;  %7659 = vpow2.f32 %v7066_v27  ;;  %v3420_v55 = vmul.f32 %v10267_v41, %v3419_v47  ;;  %vm10631_vm9 = vmor %vm3437_vm1, %vm3438_vm7 }
 0x33d   : > { %v3898_v1 = vsel %vm3895_vm13, %v3897_v7, %v3893_v36  ;;  %7661 = vrcp.f32 %v10561_v22  ;;  %vm3906_vm2 = vweird.f32 %v10559_v20  ;;  %v3436_v15 = vadd.f32 %v10518_v40, %v3435_v32 }
 0x33e   : > { %7663 = vrcp.f32 %v10269_v11  ;;  %v4295_v18 = vmul.f32 %v3898_v1, %v10401_v19  ;;  %v3902_v43 = vsub.f32 1.0, %v3901_v31  ;;  %v3522_v19 = vpack.c.bf16 %v3504_v60, %v3503_v38  ;;  %vm10594_vm5 = vmor %vm3905_vm4, %vm3906_vm2 }
 0x33f   : > { %v3624_v35 = vpop.f32.mrf.mxu3  ;;  %v3421_v10 = vadd.f32 %v10267_v41, %v3420_v55  ;;  %v3912_v27 = vor.u32 1.1754944e-38, %v3911_v23  ;;  %v3924_v47 = vand.u32 2147483647, %v10561_v22  ;;  %v3926_v7 = vand.u32 2147483648, %v10561_v22 }
 0x340   : > { %v4327_v34 = vpack.c.bf16 %v4295_v18, %v4295_v18  ;;  %v3903_v21 = vmul.f32 %v10559_v20, %v3902_v43  ;;  %v10577_v28 = vadd.f32 %v10118_v24, %v3624_v35  ;;  %v3443_v1 = vand.u32 2147483648, %v10273_v62 }
 0x341   : > { %v3448_v38 = vmul.f32 %v10264_v6, %v10223_v17  ;;  %vm3920_vm10 = vweird.f32 %v10561_v22  ;;  %v3440_v35 = vsel %vm10631_vm9, %v10518_v40, %v3436_v15  ;;  %vm3925_vm12 = vcmp.eq.f32.partialorder %v3924_v47, 8.507059e+37 }
 0x342   : > { %v7660_v30 = vpop.eup %7659  ;;  %v4411_v45 = vunpack.c.l.b16 %v4327_v34  ;;  %v3904_v53 = vadd.f32 %v10559_v20, %v3903_v21  ;;  %v7067_v2 = vmul.f32 -1.442695, %v10577_v28  ;;  %v3927_v55 = vor.u32 1.1754944e-38, %v3926_v7 }
 0x343   : > { %v7662_v33 = vpop.eup %7661  ;;  %v10587_v61 = vadd.f32 1.0, %v7660_v30  ;;  %v3449_v30 = vsub.f32 1.0, %v3448_v38  ;;  %vm3452_vm14 = vweird.f32 %v10223_v17  ;;  %vm3453_vm2 = vweird.f32 %v10264_v6 }
 0x344   : > { %v10590_v12 = vpop.eup %7663  ;;  %v3916_v58 = vmul.f32 %v7662_v33, %v10561_v22  ;;  %7665 = vpow2.f32 %v7067_v2  ;;  %v3908_v14 = vsel %vm10594_vm5, %v10559_v20, %v3904_v53  ;;  %v10607_v59 = vpack.c.b16 %v4411_v45, %v4410_v39 }
 0x345   : > { %7667 = vrcp.f32 %v10587_v61  ;;  %v3425_v20 = vsel %vm10613_vm3, %v10267_v41, %v3421_v10  ;;  %vm3921_vm8 = vweird.f32 %v7662_v33  ;;  %v3913_v36 = vsel %vm3910_vm15, %v3912_v27, %v3908_v14  ;;  %3666 = vmatmul.bf16.gmra.mxu3 %v3522_v19  ;;  %vm10697_vm3 = vmor %vm3452_vm14, %vm3453_vm2 }
 0x346   : > { %v3917_v16 = vsub.f32 1.0, %v3916_v58  ;;  %4536 = vmatmul.bf16.gmra.mxu0 %v10607_v59  ;;  %v3441_v41 = vand.u32 2147483647, %v10273_v62  ;;  %vm3922_vm11 = vmor %vm3920_vm10, %vm3921_vm8  ;;  %v3463_v54 = vmul.f32 %v10590_v12, %v10269_v11  ;;  %v4296_v9 = vmul.f32 %v3913_v36, %v10467_v13 }
 0x347   : > { %v3627_v0 = vpop.f32.mrf.mxu3  ;;  %v3430_v40 = vsel %vm10599_vm6, %v3429_v4, %v3425_v20  ;;  %v3444_v19 = vor.u32 1.1754944e-38, %v3443_v1  ;;  %v3450_v42 = vmul.f32 %v10264_v6, %v3449_v30  ;;  %v3941_v44 = vand.u32 2147483648, %v10587_v61 }
 0x348   : > { %v3918_v48 = vmul.f32 %v7662_v33, %v3917_v16  ;;  %v10625_v52 = vadd.f32 %v10118_v24, %v3627_v0  ;;  %vm3442_vm13 = vcmp.eq.f32.partialorder %v3441_v41, 8.507059e+37  ;;  %v3464_v13 = vsub.f32 1.0, %v3463_v54 }
 0x349   : > { %v3445_v53 = vsel %vm3442_vm13, %v3444_v19, %v3440_v35  ;;  %v4328_v2 = vpack.c.bf16 %v4296_v9, %v4296_v9  ;;  %v3505_v39 = vmul.f32 %v3430_v40, %v10134_v63  ;;  %vm3935_vm1 = vweird.f32 %v10587_v61 }
 0x34a   : > { %v7666_v37 = vpop.eup %7665  ;;  %v3919_v18 = vadd.f32 %v7662_v33, %v3918_v48  ;;  %v7068_v43 = vmul.f32 -1.442695, %v10625_v52  ;;  %v3506_v56 = vmul.f32 %v3445_v53, %v10190_v26  ;;  %v3939_v26 = vand.u32 2147483647, %v10587_v61 }
 0x34b   : > { %v10644_v60 = vpop.eup %7667  ;;  %v10647_v62 = vadd.f32 1.0, %v7666_v37  ;;  %v4412_v63 = vunpack.c.l.b16 %v4328_v2  ;;  %v3451_v20 = vadd.f32 %v10264_v6, %v3450_v42  ;;  %vm3468_vm5 = vweird.f32 %v10590_v12 }
 0x34c   : > { %v3923_v22 = vsel %vm3922_vm11, %v7662_v33, %v3919_v18  ;;  %v3931_v34 = vmul.f32 %v10644_v60, %v10587_v61  ;;  %7669 = vpow2.f32 %v7068_v43  ;;  %vm3936_vm0 = vweird.f32 %v10644_v60 }
 0x34d   : > { %v3928_v21 = vsel %vm3925_vm12, %v3927_v55, %v3923_v22  ;;  %7671 = vrcp.f32 %v10647_v62  ;;  %vm10678_vm4 = vmor %vm3935_vm1, %vm3936_vm0  ;;  %v3523_v7 = vpack.c.bf16 %v3506_v56, %v3505_v39  ;;  %v3956_v61 = vand.u32 2147483648, %v10647_v62 }
 0x34e   : > { %v4297_v49 = vmul.f32 %v3928_v21, %v10498_v57  ;;  %v3932_v32 = vsub.f32 1.0, %v3931_v34  ;;  %v3942_v31 = vor.u32 1.1754944e-38, %v3941_v44  ;;  %v3954_v1 = vand.u32 2147483647, %v10647_v62 }
 0x34f   : > { %v3629_v45 = vpop.f32.mrf.mxu3  ;;  %vm3940_vm7 = vcmp.eq.f32.partialorder %v3939_v26, 8.507059e+37  ;;  %v3456_v37 = vand.u32 2147483647, %v10223_v17  ;;  %vm3467_vm15 = vweird.f32 %v10269_v11  ;;  %v3473_v18 = vand.u32 2147483648, %v10269_v11 }
 0x350   : > { %v4329_v33 = vpack.c.bf16 %v4297_v49, %v4297_v49  ;;  %v3933_v23 = vmul.f32 %v10644_v60, %v3932_v32  ;;  %v10660_v10 = vadd.f32 %v10118_v24, %v3629_v45  ;;  %v3465_v24 = vmul.f32 %v10590_v12, %v3464_v13  ;;  %vm10707_vm9 = vmor %vm3467_vm15, %vm3468_vm5 }
 0x351   : > { %vm3950_vm8 = vweird.f32 %v10647_v62  ;;  %v3471_v54 = vand.u32 2147483647, %v10269_v11  ;;  %v3957_v22 = vor.u32 1.1754944e-38, %v3956_v61  ;;  %v3455_v21 = vsel %vm10697_vm3, %v10264_v6, %v3451_v20 }
 0x352   : > { %v7670_v29 = vpop.eup %7669  ;;  %v4413_v58 = vunpack.c.l.b16 %v4329_v33  ;;  %v7069_v57 = vmul.f32 -1.442695, %v10660_v10  ;;  %v3934_v14 = vadd.f32 %v10644_v60, %v3933_v23  ;;  %v3466_v36 = vadd.f32 %v10590_v12, %v3465_v24 }
 0x353   : > { %v7672_v4 = vpop.eup %7671  ;;  %v10669_v16 = vadd.f32 1.0, %v7670_v29  ;;  %vm3955_vm11 = vcmp.eq.f32.partialorder %v3954_v1, 8.507059e+37  ;;  %v3474_v45 = vor.u32 1.1754944e-38, %v3473_v18  ;;  %vm3472_vm12 = vcmp.eq.f32.partialorder %v3471_v54, 8.507059e+37 }
 0x354   : > { %v3946_v15 = vmul.f32 %v7672_v4, %v10647_v62  ;;  %7673 = vpow2.f32 %v7069_v57  ;;  %v10682_v0 = vpack.c.b16 %v4413_v58, %v4412_v63  ;;  %v3938_v48 = vsel %vm10678_vm4, %v10644_v60, %v3934_v14 }
 0x355   : > { %7675 = vrcp.f32 %v10669_v16  ;;  %vm3951_vm6 = vweird.f32 %v7672_v4  ;;  %3671 = vmatmul.bf16.gmra.mxu3 %v3523_v7  ;;  %v3943_v35 = vsel %vm3940_vm7, %v3942_v31, %v3938_v48  ;;  %v3458_v62 = vand.u32 2147483648, %v10223_v17  ;;  %v10729_v17 = vld [vmem:[%s13515_s12] ss:$0 sm:$0xff] }
 0x356   : > { %v3947_v47 = vsub.f32 1.0, %v3946_v15  ;;  %4541 = vmatmul.bf16.gmra.mxu0 %v10682_v0  ;;  %vm3952_vm10 = vmor %vm3950_vm8, %vm3951_vm6  ;;  %v3470_v11 = vsel %vm10707_vm9, %v10590_v12, %v3466_v36  ;;  %v4298_v32 = vmul.f32 %v3943_v35, %v10553_v5  ;;  %vm3457_vm13 = vcmp.eq.f32.partialorder %v3456_v37, 8.507059e+37 }
 0x357   : > { %v3632_v49 = vpop.f32.mrf.mxu3  ;;  %v3459_v2 = vor.u32 1.1754944e-38, %v3458_v62  ;;  %v3475_v12 = vsel %vm3472_vm12, %v3474_v45, %v3470_v11  ;;  %v3971_v42 = vand.u32 2147483648, %v10669_v16  ;;  %vm3965_vm0 = vweird.f32 %v10669_v16 }
 0x358   : > { %v3948_v41 = vmul.f32 %v7672_v4, %v3947_v47  ;;  %v10732_v13 = vadd.f32 %v10729_v17, %v3632_v49  ;;  %v4330_v39 = vpack.c.bf16 %v4298_v32, %v4298_v32  ;;  %v3969_v44 = vand.u32 2147483647, %v10669_v16 }
 0x359   : > { %v3460_v29 = vsel %vm3457_vm13, %v3459_v2, %v3455_v21 }
 0x35a   : > { %v7674_v43 = vpop.eup %7673  ;;  %v3949_v60 = vadd.f32 %v7672_v4, %v3948_v41  ;;  %v7070_v23 = vmul.f32 -1.442695, %v10732_v13  ;;  %v3507_v24 = vmul.f32 %v3460_v29, %v10097_v3  ;;  %v4414_v63 = vunpack.c.l.b16 %v4330_v39 }
 0x35b   : > { %v7676_v9 = vpop.eup %7675  ;;  %v10713_v34 = vadd.f32 1.0, %v7674_v43  ;;  %vm3970_vm4 = vcmp.eq.f32.partialorder %v3969_v44, 8.507059e+37 }
 0x35c   : > { %v3953_v40 = vsel %vm3952_vm10, %v7672_v4, %v3949_v60  ;;  %v3961_v19 = vmul.f32 %v7676_v9, %v10669_v16  ;;  %vm3966_vm14 = vweird.f32 %v7676_v9  ;;  %v3972_v16 = vor.u32 1.1754944e-38, %v3971_v42 }
 0x35d   : > { %v3958_v30 = vsel %vm3955_vm11, %v3957_v22, %v3953_v40  ;;  %7677 = vrcp.f32 %v10713_v34  ;;  %vm10744_vm1 = vmor %vm3965_vm0, %vm3966_vm14  ;;  %v3986_v7 = vand.u32 2147483648, %v10713_v34  ;;  %v3984_v36 = vand.u32 2147483647, %v10713_v34 }
 0x35e   : > { %v4299_v53 = vmul.f32 %v3958_v30, %v10577_v28  ;;  %v3962_v6 = vsub.f32 1.0, %v3961_v19  ;;  %7679 = vpow2.f32 %v7070_v23  ;;  %v3508_v28 = vmul.f32 %v3475_v12, %v10182_v25 }
 0x35f   : > { %v3634_v14 = vpop.f32.mrf.mxu3  ;;  %vm3980_vm5 = vweird.f32 %v10713_v34  ;;  %v3987_v38 = vor.u32 1.1754944e-38, %v3986_v7  ;;  %vm3985_vm7 = vcmp.eq.f32.partialorder %v3984_v36, 8.507059e+37 }
 0x360   : > { %v4331_v33 = vpack.c.bf16 %v4299_v53, %v4299_v53  ;;  %v3963_v5 = vmul.f32 %v7676_v9, %v3962_v6  ;;  %v10742_v15 = vadd.f32 %v10729_v17, %v3634_v14  ;;  %v3524_v27 = vpack.c.bf16 %v3508_v28, %v3507_v24 }
 0x362   : > { %v4415_v57 = vunpack.c.l.b16 %v4331_v33  ;;  %v3964_v56 = vadd.f32 %v7676_v9, %v3963_v5  ;;  %v7071_v3 = vmul.f32 -1.442695, %v10742_v15 }
 0x363   : > { %v7678_v58 = vpop.eup %7677 }
 0x364   : > { %v3976_v4 = vmul.f32 %v7678_v58, %v10713_v34  ;;  %v3968_v47 = vsel %vm10744_vm1, %v7676_v9, %v3964_v56  ;;  %v10752_v20 = vpack.c.b16 %v4415_v57, %v4414_v63  ;;  %v7680_v48 = vpop.eup %7679  ;;  %vm3981_vm2 = vweird.f32 %v7678_v58 }
 0x365   : > { %v3790_v31 = vadd.f32 1.0, %v7680_v48  ;;  %7681 = vpow2.f32 %v7071_v3  ;;  %3676 = vmatmul.bf16.gmra.mxu3 %v3524_v27  ;;  %v3973_v41 = vsel %vm3970_vm4, %v3972_v16, %v3968_v47  ;;  %vm3982_vm6 = vmor %vm3980_vm5, %vm3981_vm2 }
 0x366   : > { %v3977_v26 = vsub.f32 1.0, %v3976_v4  ;;  %4546 = vmatmul.bf16.gmra.mxu0 %v10752_v20  ;;  %v4300_v43 = vmul.f32 %v3973_v41, %v10625_v52 }
 0x367   : > { %7683 = vrcp.f32 %v3790_v31  ;;  %v3637_v18 = vpop.f32.mrf.mxu3  ;;  %v4001_v12 = vand.u32 2147483648, %v3790_v31  ;;  %vm3995_vm15 = vweird.f32 %v3790_v31  ;;  %v3999_v5 = vand.u32 2147483647, %v3790_v31 }
 0x368   : > { %v3978_v61 = vmul.f32 %v7678_v58, %v3977_v26  ;;  %v10759_v60 = vadd.f32 %v10729_v17, %v3637_v18  ;;  %v4332_v62 = vpack.c.bf16 %v4300_v43, %v4300_v43 }
 0x369   : > { %v4002_v28 = vor.u32 1.1754944e-38, %v4001_v12  ;;  %vm4000_vm9 = vcmp.eq.f32.partialorder %v3999_v5, 8.507059e+37 }
 0x36a   : > { %v3979_v1 = vadd.f32 %v7678_v58, %v3978_v61  ;;  %v7072_v9 = vmul.f32 -1.442695, %v10759_v60  ;;  %v4416_v52 = vunpack.c.l.b16 %v4332_v62 }
 0x36b   : > { %v7682_v54 = vpop.eup %7681 }
 0x36c   : > { %v3983_v37 = vsel %vm3982_vm6, %v7678_v58, %v3979_v1  ;;  %v3791_v21 = vadd.f32 1.0, %v7682_v54  ;;  %7685 = vpow2.f32 %v7072_v9 }
 0x36d   : > { %v3988_v35 = vsel %vm3985_vm7, %v3987_v38, %v3983_v37  ;;  %v7684_v34 = vpop.eup %7683 }
 0x36e   : > { %v4301_v55 = vmul.f32 %v3988_v35, %v10660_v10  ;;  %v3991_v40 = vmul.f32 %v7684_v34, %v3790_v31  ;;  %7687 = vrcp.f32 %v3791_v21  ;;  %vm3996_vm3 = vweird.f32 %v7684_v34 }
 0x36f   : > { %v3639_v11 = vpop.f32.mrf.mxu3  ;;  %vm3997_vm8 = vmor %vm3995_vm15, %vm3996_vm3  ;;  %v4014_v58 = vand.u32 2147483647, %v3791_v21  ;;  %v4016_v57 = vand.u32 2147483648, %v3791_v21  ;;  %vm4010_vm11 = vweird.f32 %v3791_v21 }
 0x370   : > { %v4333_v22 = vpack.c.bf16 %v4301_v55, %v4301_v55  ;;  %v3992_v49 = vsub.f32 1.0, %v3991_v40  ;;  %v10764_v32 = vadd.f32 %v10729_v17, %v3639_v11 }
 0x371   : > { %vm4015_vm13 = vcmp.eq.f32.partialorder %v4014_v58, 8.507059e+37  ;;  %v4017_v26 = vor.u32 1.1754944e-38, %v4016_v57 }
 0x372   : > { %v4417_v19 = vunpack.c.l.b16 %v4333_v22  ;;  %v3993_v30 = vmul.f32 %v7684_v34, %v3992_v49  ;;  %v7686_v45 = vpop.eup %7685  ;;  %v7073_v10 = vmul.f32 -1.442695, %v10764_v32 }
 0x373   : > { %v10769_v33 = vadd.f32 1.0, %v7686_v45 }
 0x374   : > { %v10767_v53 = vpack.c.b16 %v4417_v19, %v4416_v52  ;;  %v7688_v6 = vpop.eup %7687  ;;  %v3994_v2 = vadd.f32 %v7684_v34, %v3993_v30  ;;  %7689 = vpow2.f32 %v7073_v10 }
 0x375   : > { %v4006_v23 = vmul.f32 %v7688_v6, %v3791_v21  ;;  %7691 = vrcp.f32 %v10769_v33  ;;  %vm4011_vm10 = vweird.f32 %v7688_v6  ;;  %vm4025_vm0 = vweird.f32 %v10769_v33 }
 0x376   : > { %4551 = vmatmul.bf16.gmra.mxu0 %v10767_v53  ;;  %v3998_v39 = vsel %vm3997_vm8, %v7684_v34, %v3994_v2  ;;  %vm4012_vm12 = vmor %vm4010_vm11, %vm4011_vm10  ;;  %v4031_v55 = vand.u32 2147483648, %v10769_v33  ;;  %v4029_v9 = vand.u32 2147483647, %v10769_v33 }
 0x377   : > { %v4007_v29 = vsub.f32 1.0, %v4006_v23  ;;  %v3642_v56 = vpop.f32.mrf.mxu3  ;;  %v4003_v14 = vsel %vm4000_vm9, %v4002_v28, %v3998_v39 }
 0x378   : > { %v10774_v4 = vadd.f32 %v10729_v17, %v3642_v56  ;;  %v4302_v47 = vmul.f32 %v4003_v14, %v10732_v13  ;;  %v4032_v40 = vor.u32 1.1754944e-38, %v4031_v55  ;;  %vm4030_vm2 = vcmp.eq.f32.partialorder %v4029_v9, 8.507059e+37 }
 0x379   : > { %v4008_v42 = vmul.f32 %v7688_v6, %v4007_v29 }
 0x37a   : > { %v7690_v24 = vpop.eup %7689  ;;  %v7074_v44 = vmul.f32 -1.442695, %v10774_v4  ;;  %v4334_v31 = vpack.c.bf16 %v4302_v47, %v4302_v47 }
 0x37b   : > { %v4009_v63 = vadd.f32 %v7688_v6, %v4008_v42  ;;  %v7692_v25 = vpop.eup %7691  ;;  %v3793_v27 = vadd.f32 1.0, %v7690_v24 }
 0x37c   : > { %v4021_v3 = vmul.f32 %v7692_v25, %v10769_v33  ;;  %7693 = vpow2.f32 %v7074_v44  ;;  %vm4026_vm14 = vweird.f32 %v7692_v25  ;;  %v4418_v54 = vunpack.c.l.b16 %v4334_v31 }
 0x37d   : > { %v4013_v7 = vsel %vm4012_vm12, %v7688_v6, %v4009_v63  ;;  %7695 = vrcp.f32 %v3793_v27  ;;  %vm4027_vm1 = vmor %vm4025_vm0, %vm4026_vm14  ;;  %v4044_v19 = vand.u32 2147483647, %v3793_v27  ;;  %v4046_v49 = vand.u32 2147483648, %v3793_v27 }
 0x37e   : > { %v4018_v48 = vsel %vm4015_vm13, %v4017_v26, %v4013_v7  ;;  %v4022_v61 = vsub.f32 1.0, %v4021_v3  ;;  %vm4040_vm5 = vweird.f32 %v3793_v27 }
 0x37f   : > { %v4303_v16 = vmul.f32 %v4018_v48, %v10742_v15  ;;  %v3644_v36 = vpop.f32.mrf.mxu3  ;;  %vm4045_vm7 = vcmp.eq.f32.partialorder %v4044_v19, 8.507059e+37  ;;  %v4047_v33 = vor.u32 1.1754944e-38, %v4046_v49 }
 0x380   : > { %v4023_v1 = vmul.f32 %v7692_v25, %v4022_v61  ;;  %v10781_v38 = vadd.f32 %v10729_v17, %v3644_v36 }
 0x381   : > { %v4335_v41 = vpack.c.bf16 %v4303_v16, %v4303_v16 }
 0x382   : > { %v7694_v37 = vpop.eup %7693  ;;  %v4024_v43 = vadd.f32 %v7692_v25, %v4023_v1  ;;  %v7075_v13 = vmul.f32 -1.442695, %v10781_v38 }
 0x383   : > { %v4419_v18 = vunpack.c.l.b16 %v4335_v41  ;;  %v7696_v35 = vpop.eup %7695  ;;  %v10786_v15 = vadd.f32 1.0, %v7694_v37 }
 0x384   : > { %v4036_v22 = vmul.f32 %v7696_v35, %v3793_v27  ;;  %7697 = vpow2.f32 %v7075_v13  ;;  %v4028_v21 = vsel %vm4027_vm1, %v7692_v25, %v4024_v43  ;;  %vm4041_vm4 = vweird.f32 %v7696_v35 }
 0x385   : > { %7699 = vrcp.f32 %v10786_v15  ;;  %v10790_v62 = vpack.c.b16 %v4419_v18, %v4418_v54  ;;  %v4033_v45 = vsel %vm4030_vm2, %v4032_v40, %v4028_v21  ;;  %vm4042_vm6 = vmor %vm4040_vm5, %vm4041_vm4  ;;  %v4061_v47 = vand.u32 2147483648, %v10786_v15 }
 0x386   : > { %v4037_v34 = vsub.f32 1.0, %v4036_v22  ;;  %v4304_v23 = vmul.f32 %v4033_v45, %v10759_v60  ;;  %vm4055_vm15 = vweird.f32 %v10786_v15  ;;  %v4059_v48 = vand.u32 2147483647, %v10786_v15 }
 0x387   : > { %4556 = vmatmul.bf16.gmra.mxu0 %v10790_v62  ;;  %v4062_v41 = vor.u32 1.1754944e-38, %v4061_v47 }
 0x388   : > { %v3647_v11 = vpop.f32.mrf.mxu3  ;;  %v4038_v52 = vmul.f32 %v7696_v35, %v4037_v34  ;;  %v4336_v42 = vpack.c.bf16 %v4304_v23, %v4304_v23  ;;  %vm4060_vm10 = vcmp.eq.f32.partialorder %v4059_v48, 8.507059e+37 }
 0x389   : > { %v10794_v30 = vadd.f32 %v10729_v17, %v3647_v11 }
 0x38a   : > { %v7698_v10 = vpop.eup %7697  ;;  %v4039_v6 = vadd.f32 %v7696_v35, %v4038_v52 }
 0x38b   : > { %v7076_v2 = vmul.f32 -1.442695, %v10794_v30  ;;  %v7700_v12 = vpop.eup %7699  ;;  %v3795_v5 = vadd.f32 1.0, %v7698_v10 }
 0x38c   : > { %v4043_v39 = vsel %vm4042_vm6, %v7696_v35, %v4039_v6  ;;  %v4051_v29 = vmul.f32 %v7700_v12, %v10786_v15  ;;  %vm4056_vm3 = vweird.f32 %v7700_v12 }
 0x38d   : > { %7701 = vpow2.f32 %v7076_v2  ;;  %v4048_v28 = vsel %vm4045_vm7, %v4047_v33, %v4043_v39  ;;  %vm10810_vm8 = vmor %vm4055_vm15, %vm4056_vm3  ;;  %v4076_v1 = vand.u32 2147483648, %v3795_v5  ;;  %v4074_v43 = vand.u32 2147483647, %v3795_v5 }
 0x38e   : > { %7703 = vrcp.f32 %v3795_v5  ;;  %v4305_v58 = vmul.f32 %v4048_v28, %v10764_v32  ;;  %v4052_v57 = vsub.f32 1.0, %v4051_v29  ;;  %v4420_v32 = vunpack.c.l.b16 %v4336_v42 }
 0x38f   : > { %vm4070_vm11 = vweird.f32 %v3795_v5  ;;  %v4077_v22 = vor.u32 1.1754944e-38, %v4076_v1  ;;  %vm4075_vm13 = vcmp.eq.f32.partialorder %v4074_v43, 8.507059e+37 }
 0x390   : > { %v3649_v56 = vpop.f32.mrf.mxu3  ;;  %v4337_v14 = vpack.c.bf16 %v4305_v58, %v4305_v58  ;;  %v4053_v24 = vmul.f32 %v7700_v12, %v4052_v57 }
 0x391   : > { %v10801_v63 = vadd.f32 %v10729_v17, %v3649_v56 }
 0x392   : > { %v4421_v25 = vunpack.c.l.b16 %v4337_v14  ;;  %v4054_v27 = vadd.f32 %v7700_v12, %v4053_v24 }
 0x393   : > { %v7702_v44 = vpop.eup %7701  ;;  %v7077_v60 = vmul.f32 -1.442695, %v10801_v63 }
 0x394   : > { %v7704_v26 = vpop.eup %7703  ;;  %v10805_v7 = vadd.f32 1.0, %v7702_v44  ;;  %v4445_v36 = vpack.c.b16 %v4421_v25, %v4420_v32  ;;  %v4058_v31 = vsel %vm10810_vm8, %v7700_v12, %v4054_v27 }
 0x395   : > { %v4066_v3 = vmul.f32 %v7704_v26, %v3795_v5  ;;  %7705 = vpow2.f32 %v7077_v60  ;;  %vm4071_vm9 = vweird.f32 %v7704_v26  ;;  %v4063_v55 = vsel %vm4060_vm10, %v4062_v41, %v4058_v31 }
 0x396   : > { %7707 = vrcp.f32 %v10805_v7  ;;  %5558 = vmatpush.bf16.msra.mxu1 %v4445_v36  ;;  %vm4072_vm12 = vmor %vm4070_vm11, %vm4071_vm9  ;;  %v4306_v19 = vmul.f32 %v4063_v55, %v10774_v4  ;;  %v4091_v28 = vand.u32 2147483648, %v10805_v7  ;;  %vm4085_vm0 = vweird.f32 %v10805_v7 }
 0x397   : > { %v4067_v61 = vsub.f32 1.0, %v4066_v3  ;;  %4561 = vmatmul.bf16.gmra.mxu0 %v4445_v36  ;;  %v4089_v58 = vand.u32 2147483647, %v10805_v7 }
 0x398   : > { %v3652_v37 = vpop.f32.mrf.mxu3  ;;  %v4338_v12 = vpack.c.bf16 %v4306_v19, %v4306_v19  ;;  %v4092_v60 = vor.u32 1.1754944e-38, %v4091_v28 }
 0x399   : > { %v4068_v18 = vmul.f32 %v7704_v26, %v4067_v61  ;;  %v10817_v13 = vadd.f32 %v10729_v17, %v3652_v37  ;;  %vm4090_vm4 = vcmp.eq.f32.partialorder %v4089_v58, 8.507059e+37 }
 0x39a   : > { %5559 = vmatpush.bf16.msra.mxu1 %v10790_v62 }
 0x39b   : > { %v7706_v35 = vpop.eup %7705  ;;  %v4069_v15 = vadd.f32 %v7704_v26, %v4068_v18  ;;  %v7078_v54 = vmul.f32 -1.442695, %v10817_v13 }
 0x39c   : > { %v7708_v9 = vpop.eup %7707  ;;  %v3797_v21 = vadd.f32 1.0, %v7706_v35 }
 0x39d   : > { %v4073_v34 = vsel %vm4072_vm12, %v7704_v26, %v4069_v15  ;;  %v4081_v40 = vmul.f32 %v7708_v9, %v10805_v7  ;;  %7709 = vpow2.f32 %v7078_v54  ;;  %vm4086_vm14 = vweird.f32 %v7708_v9 }
 0x39e   : > { %v4078_v49 = vsel %vm4075_vm13, %v4077_v22, %v4073_v34  ;;  %7711 = vrcp.f32 %v3797_v21  ;;  %5560 = vmatpush.bf16.msra.mxu1 %v10767_v53  ;;  %v10829_v62 = vpop.f32.mrf.mxu0  ;;  %v4422_v53 = vunpack.c.l.b16 %v4338_v12  ;;  %vm10838_vm1 = vmor %vm4085_vm0, %vm4086_vm14  ;;  %v4106_v42 = vand.u32 2147483648, %v3797_v21 }
 0x39f   : > { %v4307_v11 = vmul.f32 %v4078_v49, %v10781_v38  ;;  %v4082_v52 = vsub.f32 1.0, %v4081_v40  ;;  %v4104_v25 = vand.u32 2147483647, %v3797_v21  ;;  %vm4100_vm5 = vweird.f32 %v3797_v21 }
 0x3a0   : > { %v3654_v45 = vpop.f32.mrf.mxu3  ;;  %v4107_v3 = vor.u32 1.1754944e-38, %v4106_v42 }
 0x3a1   : > { %v4339_v10 = vpack.c.bf16 %v4307_v11, %v4307_v11  ;;  %v4083_v6 = vmul.f32 %v7708_v9, %v4082_v52  ;;  %v10826_v2 = vadd.f32 %v10729_v17, %v3654_v45  ;;  %vm4105_vm7 = vcmp.eq.f32.partialorder %v4104_v25, 8.507059e+37 }
 0x3a2   : > { %5561 = vmatpush.bf16.msra.mxu1 %v10752_v20 }
 0x3a3   : > { %v7710_v33 = vpop.eup %7709  ;;  %v7079_v5 = vmul.f32 -1.442695, %v10826_v2  ;;  %v4423_v23 = vunpack.c.l.b16 %v4339_v10  ;;  %v4084_v38 = vadd.f32 %v7708_v9, %v4083_v6 }
 0x3a4   : > { %v7712_v4 = vpop.eup %7711  ;;  %v10831_v39 = vadd.f32 1.0, %v7710_v33 }
 0x3a5   : > { %v4096_v29 = vmul.f32 %v7712_v4, %v3797_v21  ;;  %7713 = vpow2.f32 %v7079_v5  ;;  %v10842_v14 = vpack.c.b16 %v4423_v23, %v4422_v53  ;;  %v4088_v20 = vsel %vm10838_vm1, %v7708_v9, %v4084_v38 }
 0x3a6   : > { %7715 = vrcp.f32 %v10831_v39  ;;  %vm4101_vm2 = vweird.f32 %v7712_v4  ;;  %5562 = vmatpush.bf16.msra.mxu1 %v10682_v0  ;;  %v4093_v32 = vsel %vm4090_vm4, %v4092_v60, %v4088_v20  ;;  %v10854_v36 = vpop.f32.mrf.mxu0  ;;  %vm4115_vm15 = vweird.f32 %v10831_v39 }
 0x3a7   : > { %v4097_v57 = vsub.f32 1.0, %v4096_v29  ;;  %4566 = vmatmul.bf16.gmra.mxu0 %v10842_v14  ;;  %vm4102_vm6 = vmor %vm4100_vm5, %vm4101_vm2  ;;  %v4308_v41 = vmul.f32 %v4093_v32, %v10794_v30  ;;  %v4119_v19 = vand.u32 2147483647, %v10831_v39 }
 0x3a8   : > { %v3657_v24 = vpop.f32.mrf.mxu3 }
 0x3a9   : > { %v4098_v44 = vmul.f32 %v7712_v4, %v4097_v57  ;;  %v10849_v26 = vadd.f32 %v10729_v17, %v3657_v24  ;;  %v4340_v15 = vpack.c.bf16 %v4308_v41, %v4308_v41  ;;  %vm4120_vm10 = vcmp.eq.f32.partialorder %v4119_v19, 8.507059e+37 }
 0x3aa   : > { %5563 = vmatpush.bf16.msra.mxu1 %v10607_v59 }
 0x3ab   : > { %v7714_v27 = vpop.eup %7713  ;;  %v4099_v47 = vadd.f32 %v7712_v4, %v4098_v44  ;;  %v7080_v16 = vmul.f32 -1.442695, %v10849_v26  ;;  %v4424_v40 = vunpack.c.l.b16 %v4340_v15 }
 0x3ac   : > { %v7716_v7 = vpop.eup %7715  ;;  %v3799_v48 = vadd.f32 1.0, %v7714_v27 }
 0x3ad   : > { %v4103_v61 = vsel %vm4102_vm6, %v7712_v4, %v4099_v47  ;;  %v4111_v0 = vmul.f32 %v7716_v7, %v10831_v39  ;;  %vm4116_vm3 = vweird.f32 %v7716_v7 }
 0x3ae   : > { %v4108_v31 = vsel %vm4105_vm7, %v4107_v3, %v4103_v61  ;;  %7717 = vrcp.f32 %v3799_v48  ;;  %5564 = vmatpush.bf16.msra.mxu1 %v10534_v46  ;;  %v4121_v46 = vand.u32 2147483648, %v10831_v39  ;;  %vm10869_vm8 = vmor %vm4115_vm15, %vm4116_vm3  ;;  %v4134_v52 = vand.u32 2147483647, %v3799_v48 }
 0x3af   : > { %v4309_v1 = vmul.f32 %v4108_v31, %v10801_v63  ;;  %v4112_v37 = vsub.f32 1.0, %v4111_v0  ;;  %7719 = vpow2.f32 %v7080_v16  ;;  %v4136_v45 = vand.u32 2147483648, %v3799_v48 }
 0x3b0   : > { %v3659_v18 = vpop.f32.mrf.mxu3  ;;  %v4122_v33 = vor.u32 1.1754944e-38, %v4121_v46  ;;  %vm4130_vm11 = vweird.f32 %v3799_v48  ;;  %vm4135_vm13 = vcmp.eq.f32.partialorder %v4134_v52, 8.507059e+37 }
 0x3b1   : > { %v4341_v43 = vpack.c.bf16 %v4309_v1, %v4309_v1  ;;  %v4113_v35 = vmul.f32 %v7716_v7, %v4112_v37  ;;  %v10860_v55 = vadd.f32 %v10729_v17, %v3659_v18  ;;  %v4137_v39 = vor.u32 1.1754944e-38, %v4136_v45 }
 0x3b2   : > { %5565 = vmatpush.bf16.msra.mxu1 %v10428_v50 }
 0x3b3   : > { %v7081_v59 = vmul.f32 -1.442695, %v10860_v55  ;;  %v4425_v22 = vunpack.c.l.b16 %v4341_v43  ;;  %v4114_v21 = vadd.f32 %v7716_v7, %v4113_v35  ;;  %v10864_v63 = vpop.f32.mrf.mxu0 }
 0x3b4   : > { %v7718_v54 = vpop.eup %7717 }
 0x3b5   : > { %v7720_v9 = vpop.eup %7719  ;;  %v4126_v30 = vmul.f32 %v7718_v54, %v3799_v48  ;;  %7721 = vpow2.f32 %v7081_v59  ;;  %v4118_v10 = vsel %vm10869_vm8, %v7716_v7, %v4114_v21  ;;  %vm4131_vm9 = vweird.f32 %v7718_v54 }
 0x3b6   : > { %v3800_v34 = vadd.f32 1.0, %v7720_v9  ;;  %v10875_v12 = vpack.c.b16 %v4425_v22, %v4424_v40  ;;  %v4123_v23 = vsel %vm4120_vm10, %v4122_v33, %v4118_v10  ;;  %vm4132_vm12 = vmor %vm4130_vm11, %vm4131_vm9 }
 0x3b7   : > { %v4127_v49 = vsub.f32 1.0, %v4126_v30  ;;  %v4310_v56 = vmul.f32 %v4123_v23, %v10817_v13 }
 0x3b8   : > { %7723 = vrcp.f32 %v3800_v34  ;;  %v3662_v50 = vpop.f32.mrf.mxu3  ;;  %4571 = vmatmul.bf16.gmra.mxu0 %v10875_v12  ;;  %v4151_v48 = vand.u32 2147483648, %v3800_v34  ;;  %vm4145_vm0 = vweird.f32 %v3800_v34  ;;  %v4149_v16 = vand.u32 2147483647, %v3800_v34 }
 0x3b9   : > { %v4128_v6 = vmul.f32 %v7718_v54, %v4127_v49  ;;  %v10878_v5 = vadd.f32 %v10729_v17, %v3662_v50  ;;  %v4342_v47 = vpack.c.bf16 %v4310_v56, %v4310_v56 }
 0x3ba   : > { %v4152_v43 = vor.u32 1.1754944e-38, %v4151_v48  ;;  %vm4150_vm2 = vcmp.eq.f32.partialorder %v4149_v16, 8.507059e+37 }
 0x3bb   : > { %v4129_v4 = vadd.f32 %v7718_v54, %v4128_v6  ;;  %v7722_v38 = vpop.eup %7721  ;;  %v7082_v53 = vmul.f32 -1.442695, %v10878_v5  ;;  %v10884_v20 = vpop.f32.mrf.mxu0  ;;  %v4426_v0 = vunpack.c.l.b16 %v4342_v47 }
 0x3bc   : > { %v3801_v57 = vadd.f32 1.0, %v7722_v38 }
 0x3bd   : > { %v4133_v29 = vsel %vm4132_vm12, %v7718_v54, %v4129_v4 }
 0x3be   : > { %v7724_v28 = vpop.eup %7723  ;;  %v4138_v58 = vsel %vm4135_vm13, %v4137_v39, %v4133_v29  ;;  %7725 = vrcp.f32 %v3801_v57  ;;  %v4164_v59 = vand.u32 2147483647, %v3801_v57  ;;  %v4166_v54 = vand.u32 2147483648, %v3801_v57 }
 0x3bf   : > { %v4311_v42 = vmul.f32 %v4138_v58, %v10826_v2  ;;  %v4141_v24 = vmul.f32 %v7724_v28, %v3800_v34  ;;  %7727 = vpow2.f32 %v7082_v53  ;;  %vm4146_vm14 = vweird.f32 %v7724_v28 }
 0x3c0   : > { %v3664_v44 = vpop.f32.mrf.mxu3  ;;  %vm4147_vm1 = vmor %vm4145_vm0, %vm4146_vm14  ;;  %vm4160_vm5 = vweird.f32 %v3801_v57  ;;  %v4167_v40 = vor.u32 1.1754944e-38, %v4166_v54  ;;  %vm4165_vm7 = vcmp.eq.f32.partialorder %v4164_v59, 8.507059e+37 }
 0x3c1   : > { %v4343_v25 = vpack.c.bf16 %v4311_v42, %v4311_v42  ;;  %v4142_v60 = vsub.f32 1.0, %v4141_v24  ;;  %v10887_v27 = vadd.f32 %v10729_v17, %v3664_v44 }
 0x3c3   : > { %v4143_v7 = vmul.f32 %v7724_v28, %v4142_v60  ;;  %v7083_v32 = vmul.f32 -1.442695, %v10887_v27  ;;  %v4427_v3 = vunpack.c.l.b16 %v4343_v25  ;;  %v10890_v41 = vpop.f32.mrf.mxu0 }
 0x3c4   : > { %v7726_v2 = vpop.eup %7725 }
 0x3c5   : > { %v4144_v13 = vadd.f32 %v7724_v28, %v4143_v7  ;;  %v7728_v61 = vpop.eup %7727  ;;  %v4156_v31 = vmul.f32 %v7726_v2, %v3801_v57  ;;  %7729 = vpow2.f32 %v7083_v32  ;;  %v10894_v15 = vpack.c.b16 %v4427_v3, %v4426_v0 }
 0x3c6   : > { %v10892_v37 = vadd.f32 1.0, %v7728_v61  ;;  %vm4161_vm4 = vweird.f32 %v7726_v2 }
 0x3c7   : > { %v4148_v1 = vsel %vm4147_vm1, %v7724_v28, %v4144_v13  ;;  %v4157_v35 = vsub.f32 1.0, %v4156_v31  ;;  %vm4162_vm6 = vmor %vm4160_vm5, %vm4161_vm4 }
 0x3c8   : > { %v3667_v18 = vpop.f32.mrf.mxu3  ;;  %7731 = vrcp.f32 %v10892_v37  ;;  %v4153_v9 = vsel %vm4150_vm2, %v4152_v43, %v4148_v1  ;;  %4576 = vmatmul.bf16.gmra.mxu0 %v10894_v15  ;;  %vm4175_vm3 = vweird.f32 %v10892_v37  ;;  %v4181_v7 = vand.u32 2147483648, %v10892_v37 }
 0x3c9   : > { %v4158_v22 = vmul.f32 %v7726_v2, %v4157_v35  ;;  %v10899_v21 = vadd.f32 %v10729_v17, %v3667_v18  ;;  %v4312_v34 = vmul.f32 %v4153_v9, %v10849_v26 }
 0x3ca   : > { %v4182_v61 = vor.u32 1.1754944e-38, %v4181_v7 }
 0x3cb   : > { %v7730_v30 = vpop.eup %7729  ;;  %v4159_v46 = vadd.f32 %v7726_v2, %v4158_v22  ;;  %v7084_v49 = vmul.f32 -1.442695, %v10899_v21  ;;  %v10903_v50 = vpop.f32.mrf.mxu0  ;;  %v4344_v4 = vpack.c.bf16 %v4312_v34, %v4312_v34 }
 0x3cc   : > { %v3803_v19 = vadd.f32 1.0, %v7730_v30 }
 0x3cd   : > { %v4163_v11 = vsel %vm4162_vm6, %v7726_v2, %v4159_v46  ;;  %v4428_v28 = vunpack.c.l.b16 %v4344_v4 }
 0x3ce   : > { %v7732_v52 = vpop.eup %7731  ;;  %v4168_v45 = vsel %vm4165_vm7, %v4167_v40, %v4163_v11  ;;  %7733 = vrcp.f32 %v3803_v19  ;;  %v4196_v32 = vand.u32 2147483648, %v3803_v19  ;;  %v4194_v48 = vand.u32 2147483647, %v3803_v19 }
 0x3cf   : > { %v4313_v6 = vmul.f32 %v4168_v45, %v10860_v55  ;;  %v4171_v33 = vmul.f32 %v7732_v52, %v10892_v37  ;;  %7735 = vpow2.f32 %v7084_v49  ;;  %v4179_v55 = vand.u32 2147483647, %v10892_v37  ;;  %v10940_v45 = vld [vmem:[%s13194_s14] ss:$0 sm:$0xff] }
 0x3d0   : > { %v3669_v10 = vpop.f32.mrf.mxu3  ;;  %vm4176_vm15 = vweird.f32 %v7732_v52  ;;  %vm4190_vm10 = vweird.f32 %v3803_v19  ;;  %v4197_v0 = vor.u32 1.1754944e-38, %v4196_v32  ;;  %vm4195_vm13 = vcmp.eq.f32.partialorder %v4194_v48, 8.507059e+37 }
 0x3d1   : > { %v4345_v26 = vpack.c.bf16 %v4313_v6, %v4313_v6  ;;  %v4172_v23 = vsub.f32 1.0, %v4171_v33  ;;  %v10908_v39 = vadd.f32 %v10729_v17, %v3669_v10  ;;  %vm4177_vm9 = vmor %vm4175_vm3, %vm4176_vm15  ;;  %vm4180_vm12 = vcmp.eq.f32.partialorder %v4179_v55, 8.507059e+37 }
 0x3d3   : > { %v4429_v38 = vunpack.c.l.b16 %v4345_v26  ;;  %v4173_v29 = vmul.f32 %v7732_v52, %v4172_v23  ;;  %v7085_v58 = vmul.f32 -1.442695, %v10908_v39  ;;  %v10913_v42 = vpop.f32.mrf.mxu0 }
 0x3d4   : > { %v7734_v53 = vpop.eup %7733 }
 0x3d5   : > { %v4186_v57 = vmul.f32 %v7734_v53, %v3803_v19  ;;  %v7736_v56 = vpop.eup %7735  ;;  %v10915_v24 = vpack.c.b16 %v4429_v38, %v4428_v28  ;;  %v4174_v25 = vadd.f32 %v7732_v52, %v4173_v29  ;;  %7737 = vpow2.f32 %v7085_v58 }
 0x3d6   : > { %v10917_v47 = vadd.f32 1.0, %v7736_v56  ;;  %vm4191_vm8 = vweird.f32 %v7734_v53 }
 0x3d7   : > { %v4187_v60 = vsub.f32 1.0, %v4186_v57  ;;  %v4178_v2 = vsel %vm4177_vm9, %v7732_v52, %v4174_v25  ;;  %vm4192_vm11 = vmor %vm4190_vm10, %vm4191_vm8 }
 0x3d8   : > { %v3672_v44 = vpop.f32.mrf.mxu3  ;;  %7739 = vrcp.f32 %v10917_v47  ;;  %4581 = vmatmul.bf16.gmra.mxu0 %v10915_v24  ;;  %v4183_v43 = vsel %vm4180_vm12, %v4182_v61, %v4178_v2  ;;  %v4211_v23 = vand.u32 2147483648, %v10917_v47  ;;  %vm4205_vm0 = vweird.f32 %v10917_v47 }
 0x3d9   : > { %v10921_v3 = vadd.f32 %v10729_v17, %v3672_v44  ;;  %v4188_v13 = vmul.f32 %v7734_v53, %v4187_v60  ;;  %v4314_v34 = vmul.f32 %v4183_v43, %v10878_v5  ;;  %v4209_v28 = vand.u32 2147483647, %v10917_v47 }
 0x3db   : > { %v4189_v16 = vadd.f32 %v7734_v53, %v4188_v13  ;;  %v7086_v31 = vmul.f32 -1.442695, %v10921_v3  ;;  %v7738_v18 = vpop.eup %7737  ;;  %v10928_v59 = vpop.f32.mrf.mxu0  ;;  %vm4210_vm4 = vcmp.eq.f32.partialorder %v4209_v28, 8.507059e+37 }
 0x3dc   : > { %v3805_v22 = vadd.f32 1.0, %v7738_v18 }
 0x3dd   : > { %v4193_v1 = vsel %vm4192_vm11, %v7734_v53, %v4189_v16  ;;  %7741 = vpow2.f32 %v7086_v31 }
 0x3de   : > { %v4198_v35 = vsel %vm4195_vm13, %v4197_v0, %v4193_v1  ;;  %v7740_v37 = vpop.eup %7739  ;;  %7743 = vrcp.f32 %v3805_v22  ;;  %v4226_v44 = vand.u32 2147483648, %v3805_v22  ;;  %v4224_v32 = vand.u32 2147483647, %v3805_v22 }
 0x3df   : > { %v4315_v9 = vmul.f32 %v4198_v35, %v10887_v27  ;;  %v4201_v30 = vmul.f32 %v7740_v37, %v10917_v47  ;;  %v4346_v27 = vpack.c.bf16 %v4314_v34, %v4314_v34  ;;  %vm4206_vm14 = vweird.f32 %v7740_v37 }
 0x3e0   : > { %v3674_v54 = vpop.f32.mrf.mxu3  ;;  %vm10952_vm1 = vmor %vm4205_vm0, %vm4206_vm14  ;;  %v4212_v47 = vor.u32 1.1754944e-38, %v4211_v23  ;;  %vm4220_vm5 = vweird.f32 %v3805_v22  ;;  %v4227_v0 = vor.u32 1.1754944e-38, %v4226_v44  ;;  %vm4225_vm7 = vcmp.eq.f32.partialorder %v4224_v32, 8.507059e+37 }
 0x3e1   : > { %v10933_v46 = vadd.f32 %v10729_v17, %v3674_v54  ;;  %v4202_v40 = vsub.f32 1.0, %v4201_v30  ;;  %v4347_v19 = vpack.c.bf16 %v4315_v9, %v4315_v9  ;;  %v4430_v53 = vunpack.c.l.b16 %v4346_v27 }
 0x3e3   : > { %v7087_v49 = vmul.f32 -1.442695, %v10933_v46  ;;  %v7742_v11 = vpop.eup %7741  ;;  %v4203_v52 = vmul.f32 %v7740_v37, %v4202_v40  ;;  %v4547_v6 = vpop.f32.mrf.mxu0  ;;  %v4431_v4 = vunpack.c.l.b16 %v4347_v19 }
 0x3e4   : > { %v10942_v10 = vadd.f32 1.0, %v7742_v11  ;;  %v7744_v33 = vpop.eup %7743  ;;  %v10945_v26 = vadd.f32 %v10940_v45, %v4547_v6 }
 0x3e5   : > { %v4204_v5 = vadd.f32 %v7740_v37, %v4203_v52  ;;  %7745 = vpow2.f32 %v7087_v49  ;;  %v4216_v38 = vmul.f32 %v7744_v33, %v3805_v22  ;;  %v10959_v25 = vpack.c.b16 %v4431_v4, %v4430_v53 }
 0x3e6   : > { %7747 = vrcp.f32 %v10942_v10  ;;  %v7130_v56 = vmul.f32 -1.442695, %v10945_v26  ;;  %vm4221_vm2 = vweird.f32 %v7744_v33  ;;  %v4241_v34 = vand.u32 2147483648, %v10942_v10 }
 0x3e7   : > { %v4217_v57 = vsub.f32 1.0, %v4216_v38  ;;  %v4208_v55 = vsel %vm10952_vm1, %v7740_v37, %v4204_v5  ;;  %vm4222_vm6 = vmor %vm4220_vm5, %vm4221_vm2  ;;  %v4239_v11 = vand.u32 2147483647, %v10942_v10  ;;  %vm4235_vm15 = vweird.f32 %v10942_v10 }
 0x3e8   : > { %v3677_v29 = vpop.f32.mrf.mxu3  ;;  %7749 = vpow2.f32 %v7130_v56  ;;  %4586 = vmatmul.bf16.gmra.mxu0 %v10959_v25  ;;  %v4213_v48 = vsel %vm4210_vm4, %v4212_v47, %v4208_v55 }
 0x3e9   : > { %v10962_v60 = vadd.f32 %v10729_v17, %v3677_v29  ;;  %v4218_v7 = vmul.f32 %v7744_v33, %v4217_v57  ;;  %v4316_v43 = vmul.f32 %v4213_v48, %v10899_v21  ;;  %vm4240_vm9 = vcmp.eq.f32.partialorder %v4239_v11, 8.507059e+37 }
 0x3eb   : > { %v7746_v13 = vpop.eup %7745  ;;  %v4219_v2 = vadd.f32 %v7744_v33, %v4218_v7  ;;  %v7088_v31 = vmul.f32 -1.442695, %v10962_v60  ;;  %v4549_v54 = vpop.f32.mrf.mxu0  ;;  %v4348_v52 = vpack.c.bf16 %v4316_v43, %v4316_v43 }
 0x3ec   : > { %v10965_v16 = vadd.f32 1.0, %v7746_v13  ;;  %v7748_v61 = vpop.eup %7747  ;;  %v10974_v40 = vadd.f32 %v10940_v45, %v4549_v54 }
 0x3ed   : > { %v4223_v1 = vsel %vm4222_vm6, %v7744_v33, %v4219_v2  ;;  %v4231_v18 = vmul.f32 %v7748_v61, %v10942_v10  ;;  %vm4236_vm3 = vweird.f32 %v7748_v61  ;;  %v4432_v53 = vunpack.c.l.b16 %v4348_v52 }
 0x3ee   : > { %v4228_v35 = vsel %vm4225_vm7, %v4227_v0, %v4223_v1  ;;  %7751 = vrcp.f32 %v10965_v16  ;;  %v7750_v30 = vpop.eup %7749  ;;  %vm4237_vm8 = vmor %vm4235_vm15, %vm4236_vm3  ;;  %v4254_v58 = vand.u32 2147483647, %v10965_v16  ;;  %v4256_v10 = vand.u32 2147483648, %v10965_v16 }
 0x3ef   : > { %v4317_v37 = vmul.f32 %v4228_v35, %v10908_v39  ;;  %v4232_v9 = vsub.f32 1.0, %v4231_v18  ;;  %7753 = vpow2.f32 %v7088_v31  ;;  %v10980_v27 = vadd.f32 1.0, %v7750_v30 }
 0x3f0   : > { %v3679_v22 = vpop.f32.mrf.mxu3  ;;  %v7131_v39 = vmul.f32 -1.442695, %v10974_v40  ;;  %vm4250_vm11 = vweird.f32 %v10965_v16  ;;  %vm4255_vm12 = vcmp.eq.f32.partialorder %v4254_v58, 8.507059e+37  ;;  %v4257_v0 = vor.u32 1.1754944e-38, %v4256_v10 }
 0x3f1   : > { %v10977_v19 = vadd.f32 %v10729_v17, %v3679_v22  ;;  %v4349_v49 = vpack.c.bf16 %v4317_v37, %v4317_v37  ;;  %v4233_v21 = vmul.f32 %v7748_v61, %v4232_v9  ;;  %v4242_v17 = vor.u32 1.1754944e-38, %v4241_v34 }
 0x3f2   : > { %7755 = vrcp.f32 %v10980_v27  ;;  %v4866_v18 = vand.u32 2147483648, %v10980_v27  ;;  %vm4860_vm0 = vweird.f32 %v10980_v27 }
 0x3f3   : > { %v7089_v6 = vmul.f32 -1.442695, %v10977_v19  ;;  %v4234_v33 = vadd.f32 %v7748_v61, %v4233_v21  ;;  %v4433_v5 = vunpack.c.l.b16 %v4349_v49  ;;  %7757 = vpow2.f32 %v7131_v39  ;;  %v4552_v57 = vpop.f32.mrf.mxu0 }
 0x3f4   : > { %v7752_v4 = vpop.eup %7751  ;;  %v10992_v44 = vadd.f32 %v10940_v45, %v4552_v57 }
 0x3f5   : > { %v4238_v23 = vsel %vm4237_vm8, %v7748_v61, %v4234_v33  ;;  %v4246_v38 = vmul.f32 %v7752_v4, %v10965_v16  ;;  %v7754_v29 = vpop.eup %7753  ;;  %7759 = vpow2.f32 %v7089_v6  ;;  %v10994_v47 = vpack.c.b16 %v4433_v5, %v4432_v53 }
 0x3f6   : > { %v4243_v28 = vsel %vm4240_vm9, %v4242_v17, %v4238_v23  ;;  %v10989_v55 = vadd.f32 1.0, %v7754_v29  ;;  %vm4251_vm10 = vweird.f32 %v7752_v4  ;;  %v7132_v48 = vmul.f32 -1.442695, %v10992_v44 }
 0x3f7   : > { %v4247_v56 = vsub.f32 1.0, %v4246_v38  ;;  %v4318_v7 = vmul.f32 %v4243_v28, %v10921_v3  ;;  %vm4252_vm13 = vmor %vm4250_vm11, %vm4251_vm10  ;;  %v4864_v3 = vand.u32 2147483647, %v10980_v27  ;;  %v4867_v6 = vor.u32 1.1754944e-38, %v4866_v18 }
 0x3f8   : > { %7761 = vrcp.f32 %v10989_v55  ;;  %v7756_v13 = vpop.eup %7755  ;;  %4591 = vmatmul.bf16.gmra.mxu0 %v10994_v47  ;;  %v4269_v22 = vand.u32 2147483647, %v10989_v55  ;;  %v4271_v30 = vand.u32 2147483648, %v10989_v55  ;;  %vm4265_vm2 = vweird.f32 %v10989_v55 }
 0x3f9   : > { %v4248_v32 = vmul.f32 %v7752_v4, %v4247_v56  ;;  %v7758_v2 = vpop.eup %7757  ;;  %v4856_v31 = vmul.f32 %v7756_v13, %v10980_v27  ;;  %7763 = vpow2.f32 %v7132_v48  ;;  %v4350_v16 = vpack.c.bf16 %v4318_v7, %v4318_v7 }
 0x3fa   : > { %v11004_v43 = vadd.f32 1.0, %v7758_v2  ;;  %vm4861_vm14 = vweird.f32 %v7756_v13  ;;  %vm4865_vm1 = vcmp.eq.f32.partialorder %v4864_v3, 8.507059e+37  ;;  %vm11019_vm5 = vcmp.eq.f32.partialorder %v4269_v22, 8.507059e+37 }
 0x3fb   : > { %v4249_v61 = vadd.f32 %v7752_v4, %v4248_v32  ;;  %v7760_v1 = vpop.eup %7759  ;;  %v4857_v54 = vsub.f32 1.0, %v4856_v31  ;;  %v4554_v34 = vpop.f32.mrf.mxu0  ;;  %vm4862_vm4 = vmor %vm4860_vm0, %vm4861_vm14  ;;  %v4272_v27 = vor.u32 1.1754944e-38, %v4271_v30  ;;  %v11035_v31 = vld [vmem:[%s13195_s15] ss:$0 sm:$0xff] }
 0x3fc   : > { %v11006_v37 = vadd.f32 1.0, %v7760_v1  ;;  %7765 = vrcp.f32 %v11004_v43  ;;  %v4879_v32 = vand.u32 2147483647, %v11004_v43  ;;  %v4881_v2 = vand.u32 2147483648, %v11004_v43 }
 0x3fd   : > { %v4253_v35 = vsel %vm4252_vm13, %v7752_v4, %v4249_v61  ;;  %v4858_v11 = vmul.f32 %v7756_v13, %v4857_v54  ;;  %v4434_v4 = vunpack.c.l.b16 %v4350_v16  ;;  %vm4875_vm3 = vweird.f32 %v11004_v43 }
 0x3fe   : > { %v4258_v9 = vsel %vm4255_vm12, %v4257_v0, %v4253_v35  ;;  %v7762_v49 = vpop.eup %7761  ;;  %7767 = vrcp.f32 %v11006_v37  ;;  %v4284_v1 = vand.u32 2147483647, %v11006_v37  ;;  %v4286_v3 = vand.u32 2147483648, %v11006_v37 }
 0x3ff   : > { %v4319_v21 = vmul.f32 %v4258_v9, %v10933_v46  ;;  %v4261_v52 = vmul.f32 %v7762_v49, %v10989_v55  ;;  %v4859_v39 = vadd.f32 %v7756_v13, %v4858_v11  ;;  %v7764_v33 = vpop.eup %7763  ;;  %v11017_v46 = vadd.f32 %v10940_v45, %v4554_v34 }
 0x400   : > { %v11023_v29 = vadd.f32 1.0, %v7764_v33  ;;  %vm4266_vm6 = vweird.f32 %v7762_v49  ;;  %vm4880_vm9 = vcmp.eq.f32.partialorder %v4879_v32, 8.507059e+37  ;;  %v4882_v11 = vor.u32 1.1754944e-38, %v4881_v2 }
 0x401   : > { %v4351_v5 = vpack.c.bf16 %v4319_v21, %v4319_v21  ;;  %v4262_v17 = vsub.f32 1.0, %v4261_v52  ;;  %v4863_v23 = vsel %vm4862_vm4, %v7756_v13, %v4859_v39  ;;  %v7133_v57 = vmul.f32 -1.442695, %v11017_v46  ;;  %vm4267_vm7 = vmor %vm4265_vm2, %vm4266_vm6 }
 0x402   : > { %v7766_v53 = vpop.eup %7765  ;;  %v4868_v28 = vsel %vm4865_vm1, %v4867_v6, %v4863_v23  ;;  %7769 = vrcp.f32 %v11023_v29  ;;  %vm4280_vm10 = vweird.f32 %v11006_v37  ;;  %vm11052_vm12 = vcmp.eq.f32.partialorder %v4284_v1, 8.507059e+37 }
 0x403   : > { %v4263_v58 = vmul.f32 %v7762_v49, %v4262_v17  ;;  %v5223_v10 = vmul.f32 %v4868_v28, %v10945_v26  ;;  %v4871_v7 = vmul.f32 %v7766_v53, %v11004_v43  ;;  %v4435_v13 = vunpack.c.l.b16 %v4351_v5 }
 0x404   : > { %v7768_v56 = vpop.eup %7767  ;;  %v4557_v0 = vpop.f32.mrf.mxu0  ;;  %7771 = vpow2.f32 %v7133_v57  ;;  %vm4876_vm15 = vweird.f32 %v7766_v53  ;;  %v4287_v39 = vor.u32 1.1754944e-38, %v4286_v3  ;;  %v4894_v17 = vand.u32 2147483647, %v11023_v29 }
 0x405   : > { %v4264_v48 = vadd.f32 %v7762_v49, %v4263_v58  ;;  %v4276_v61 = vmul.f32 %v7768_v56, %v11006_v37  ;;  %v4872_v26 = vsub.f32 1.0, %v4871_v7  ;;  %v11042_v35 = vadd.f32 %v10940_v45, %v4557_v0  ;;  %vm4877_vm11 = vmor %vm4875_vm3, %vm4876_vm15 }
 0x406   : > { %v5259_v54 = vmul.f32 %v11035_v31, %v5223_v10  ;;  %vm4281_vm8 = vweird.f32 %v7768_v56  ;;  %v11049_v34 = vpack.c.b16 %v4435_v13, %v4434_v4  ;;  %vm4890_vm0 = vweird.f32 %v11023_v29 }
 0x407   : > { %v4268_v18 = vsel %vm4267_vm7, %v7762_v49, %v4264_v48  ;;  %v4277_v16 = vsub.f32 1.0, %v4276_v61  ;;  %v4873_v9 = vmul.f32 %v7766_v53, %v4872_v26  ;;  %v7134_v30 = vmul.f32 -1.442695, %v11042_v35  ;;  %vm4282_vm13 = vmor %vm4280_vm10, %vm4281_vm8 }
 0x408   : > { %v4273_v55 = vsel %vm11019_vm5, %v4272_v27, %v4268_v18  ;;  %5299 = vadd.xlane.f32.xlu1 %v5259_v54  ;;  %v7770_v49 = vpop.eup %7769  ;;  %4596 = vmatmul.bf16.gmra.mxu0 %v11049_v34  ;;  %v4896_v27 = vand.u32 2147483648, %v11023_v29  ;;  %vm4895_vm2 = vcmp.eq.f32.partialorder %v4894_v17, 8.507059e+37 }
 0x409   : > { %v4278_v22 = vmul.f32 %v7768_v56, %v4277_v16  ;;  %v4874_v21 = vadd.f32 %v7766_v53, %v4873_v9  ;;  %v4886_v6 = vmul.f32 %v7770_v49, %v11023_v29  ;;  %v4320_v4 = vmul.f32 %v4273_v55, %v10962_v60 }
 0x40a   : > { %v7772_v33 = vpop.eup %7771  ;;  %7773 = vpow2.f32 %v7134_v30  ;;  %vm4891_vm14 = vweird.f32 %v7770_v49  ;;  %v4897_v61 = vor.u32 1.1754944e-38, %v4896_v27 }
 0x40b   : > { %v4279_v52 = vadd.f32 %v7768_v56, %v4278_v22  ;;  %v4878_v5 = vsel %vm4877_vm11, %v7766_v53, %v4874_v21  ;;  %v4887_v38 = vsub.f32 1.0, %v4886_v6  ;;  %v4714_v10 = vadd.f32 1.0, %v7772_v33  ;;  %vm4892_vm1 = vmor %vm4890_vm0, %vm4891_vm14 }
 0x40c   : > { %v4883_v37 = vsel %vm4880_vm9, %v4882_v11, %v4878_v5  ;;  %v4559_v28 = vpop.f32.mrf.mxu0  ;;  %v4352_v32 = vpack.c.bf16 %v4320_v4, %v4320_v4 }
 0x40d   : > { %v4283_v23 = vsel %vm4282_vm13, %v7768_v56, %v4279_v52  ;;  %v5224_v58 = vmul.f32 %v4883_v37, %v10974_v40  ;;  %v11066_v60 = vadd.f32 %v10940_v45, %v4559_v28  ;;  %v4888_v7 = vmul.f32 %v7770_v49, %v4887_v38 }
 0x40e   : > { %v4288_v57 = vsel %vm11052_vm12, %v4287_v39, %v4283_v23  ;;  %7775 = vrcp.f32 %v4714_v10  ;;  %v4911_v11 = vand.u32 2147483648, %v4714_v10  ;;  %v4909_v39 = vand.u32 2147483647, %v4714_v10 }
 0x40f   : > { %v4321_v53 = vmul.f32 %v4288_v57, %v10977_v19  ;;  %v4889_v13 = vadd.f32 %v7770_v49, %v4888_v7  ;;  %v7135_v48 = vmul.f32 -1.442695, %v11066_v60  ;;  %v5260_v40 = vmul.f32 %v11035_v31, %v5224_v58 }
 0x410   : > { %v7774_v2 = vpop.eup %7773  ;;  %v4436_v19 = vunpack.c.l.b16 %v4352_v32  ;;  %vm4905_vm5 = vweird.f32 %v4714_v10  ;;  %v4912_v5 = vor.u32 1.1754944e-38, %v4911_v11  ;;  %vm4910_vm7 = vcmp.eq.f32.partialorder %v4909_v39, 8.507059e+37 }
 0x411   : > { %v4353_v56 = vpack.c.bf16 %v4321_v53, %v4321_v53  ;;  %v4893_v26 = vsel %vm4892_vm1, %v7770_v49, %v4889_v13  ;;  %v4715_v1 = vadd.f32 1.0, %v7774_v2  ;;  %7777 = vpow2.f32 %v7135_v48  ;;  %5301 = vadd.xlane.f32.xlu2 %v5260_v40 }
 0x412   : > { %v4898_v3 = vsel %vm4895_vm2, %v4897_v61, %v4893_v26 }
 0x413   : > { %v4437_v0 = vunpack.c.l.b16 %v4353_v56  ;;  %v5225_v29 = vmul.f32 %v4898_v3, %v10992_v44  ;;  %7779 = vrcp.f32 %v4715_v1  ;;  %v4924_v38 = vand.u32 2147483647, %v4715_v1 }
 0x414   : > { %v4562_v18 = vpop.f32.mrf.mxu0  ;;  %v7776_v16 = vpop.eup %7775  ;;  %v4926_v27 = vand.u32 2147483648, %v4715_v1  ;;  %vm4920_vm15 = vweird.f32 %v4715_v1 }
 0x415   : > { %v11074_v54 = vadd.f32 %v10940_v45, %v4562_v18  ;;  %v4453_v9 = vpack.c.b16 %v4437_v0, %v4436_v19  ;;  %v4901_v55 = vmul.f32 %v7776_v16, %v4714_v10  ;;  %v5261_v22 = vmul.f32 %v11035_v31, %v5225_v29 }
 0x416   : > { %vm4906_vm4 = vweird.f32 %v7776_v16  ;;  %v4927_v56 = vor.u32 1.1754944e-38, %v4926_v27  ;;  %vm4925_vm9 = vcmp.eq.f32.partialorder %v4924_v38, 8.507059e+37 }
 0x417   : > { %v7136_v30 = vmul.f32 -1.442695, %v11074_v54  ;;  %5587 = vmatpush.bf16.msra.mxu2 %v4453_v9  ;;  %v7778_v49 = vpop.eup %7777  ;;  %v4902_v21 = vsub.f32 1.0, %v4901_v55  ;;  %5303 = vadd.xlane.f32.xlu0 %v5261_v22  ;;  %vm4907_vm6 = vmor %vm4905_vm5, %vm4906_vm4 }
 0x418   : > { %v11078_v52 = vadd.f32 1.0, %v7778_v49  ;;  %4601 = vmatmul.bf16.gmra.mxu0 %v4453_v9 }
 0x419   : > { %7781 = vpow2.f32 %v7136_v30  ;;  %v7780_v44 = vpop.eup %7779  ;;  %v4903_v43 = vmul.f32 %v7776_v16, %v4902_v21 }
 0x41a   : > { %v4916_v6 = vmul.f32 %v7780_v44, %v4715_v1  ;;  %7783 = vrcp.f32 %v11078_v52  ;;  %vm4921_vm3 = vweird.f32 %v7780_v44  ;;  %v4941_v0 = vand.u32 2147483648, %v11078_v52 }
 0x41b   : > { %5588 = vmatpush.bf16.msra.mxu2 %v11049_v34  ;;  %v4904_v33 = vadd.f32 %v7776_v16, %v4903_v43  ;;  %vm4922_vm8 = vmor %vm4920_vm15, %vm4921_vm3  ;;  %v4939_v1 = vand.u32 2147483647, %v11078_v52  ;;  %vm4935_vm11 = vweird.f32 %v11078_v52 }
 0x41c   : > { %v4564_v4 = vpop.f32.mrf.mxu0  ;;  %v4917_v17 = vsub.f32 1.0, %v4916_v6 }
 0x41d   : > { %v11083_v37 = vadd.f32 %v10940_v45, %v4564_v4  ;;  %v4908_v23 = vsel %vm4907_vm6, %v7776_v16, %v4904_v33  ;;  %v4942_v16 = vor.u32 1.1754944e-38, %v4941_v0  ;;  %vm4940_vm13 = vcmp.eq.f32.partialorder %v4939_v1, 8.507059e+37  ;;  %v13588_v0 = vld [vmem:[#allocation81_spill] sm:$0xff] }
 0x41e   : > { %v4913_v58 = vsel %vm4910_vm7, %v4912_v5, %v4908_v23  ;;  %v4918_v57 = vmul.f32 %v7780_v44, %v4917_v17 }
 0x41f   : > { %v7782_v28 = vpop.eup %7781  ;;  %v7137_v53 = vmul.f32 -1.442695, %v11083_v37  ;;  %5589 = vmatpush.bf16.msra.mxu2 %v10994_v47  ;;  %v5226_v34 = vmul.f32 %v4913_v58, %v11017_v46 }
 0x420   : > { %v4717_v10 = vadd.f32 1.0, %v7782_v28  ;;  %v7784_v7 = vpop.eup %7783  ;;  %v4919_v32 = vadd.f32 %v7780_v44, %v4918_v57 }
 0x421   : > { %7785 = vpow2.f32 %v7137_v53  ;;  %v4931_v13 = vmul.f32 %v7784_v7, %v11078_v52  ;;  %v5262_v40 = vmul.f32 %v11035_v31, %v5226_v34  ;;  %vm4936_vm10 = vweird.f32 %v7784_v7 }
 0x422   : > { %7787 = vrcp.f32 %v4717_v10  ;;  %v4923_v48 = vsel %vm4922_vm8, %v7780_v44, %v4919_v32  ;;  %vm4937_vm12 = vmor %vm4935_vm11, %vm4936_vm10  ;;  %v4956_v49 = vand.u32 2147483648, %v4717_v10  ;;  %v4954_v11 = vand.u32 2147483647, %v4717_v10 }
 0x423   : > { %5590 = vmatpush.bf16.msra.mxu2 %v10959_v25  ;;  %v4928_v2 = vsel %vm4925_vm9, %v4927_v56, %v4923_v48  ;;  %v4932_v47 = vsub.f32 1.0, %v4931_v13  ;;  %5305 = vadd.xlane.f32.xlu1 %v5262_v40  ;;  %vm4950_vm0 = vweird.f32 %v4717_v10  ;;  %v11121_v56 = vadd.f32 1e-30, %v9556_v51  ;;  %v13586_v40 = vld [vmem:[#allocation79_spill] sm:$0xff] }
 0x424   : > { %v11091_v61 = vpop.f32.mrf.mxu0  ;;  %v5227_v46 = vmul.f32 %v4928_v2, %v11042_v35  ;;  %v4957_v39 = vor.u32 1.1754944e-38, %v4956_v49  ;;  %vm4955_vm2 = vcmp.eq.f32.partialorder %v4954_v11, 8.507059e+37  ;;  %v11125_v13 = vadd.f32 1e-30, %v9543_v8 }
 0x425   : > { %v4933_v26 = vmul.f32 %v7784_v7, %v4932_v47  ;;  %v11132_v2 = vadd.f32 1e-30, %v13586_v40  ;;  %v13587_v47 = vld [vmem:[#allocation80_spill] sm:$0xff]  ;;  %v11142_v8 = vadd.f32 1e-30, %v13588_v0  ;;  %v11175_v49 = vadd.f32 %v10940_v45, %v10890_v41 }
 0x426   : > { %v5263_v3 = vmul.f32 %v11035_v31, %v5227_v46  ;;  %v11136_v46 = vadd.f32 1e-30, %v13587_v47  ;;  %vm1894_vm9 = vweird.f32 %v11121_v56  ;;  %vm1904_vm10 = vweird.f32 %v11125_v13 }
 0x427   : > { %v7786_v19 = vpop.eup %7785  ;;  %5591 = vmatpush.bf16.msra.mxu2 %v10915_v24  ;;  %v4934_v25 = vadd.f32 %v7784_v7, %v4933_v26  ;;  %13589 = vst [vmem:[#allocation62_spill] sm:$0xff] %v11175_v49 }
 0x428   : > { %v7788_v29 = vpop.eup %7787  ;;  %v4718_v18 = vadd.f32 1.0, %v7786_v19  ;;  %5307 = vadd.xlane.f32.xlu2 %v5263_v3 }
 0x429   : > { %v4946_v35 = vmul.f32 %v7788_v29, %v4717_v10  ;;  %v4938_v9 = vsel %vm4937_vm12, %v7784_v7, %v4934_v25  ;;  %vm4951_vm14 = vweird.f32 %v7788_v29  ;;  %v13584_v7 = vld [vmem:[#allocation75_spill] sm:$0xff] }
 0x42a   : > { %7789 = vrcp.f32 %v4718_v18  ;;  %v4943_v55 = vsel %vm4940_vm13, %v4942_v16, %v4938_v9  ;;  %vm4952_vm1 = vmor %vm4950_vm0, %vm4951_vm14  ;;  %v4971_v5 = vand.u32 2147483648, %v4718_v18  ;;  %v4969_v38 = vand.u32 2147483647, %v4718_v18 }
 0x42b   : > { %v4947_v22 = vsub.f32 1.0, %v4946_v35  ;;  %5592 = vmatpush.bf16.msra.mxu2 %v10894_v15  ;;  %v5228_v30 = vmul.f32 %v4943_v55, %v11066_v60  ;;  %vm4965_vm5 = vweird.f32 %v4718_v18  ;;  %v11118_v32 = vadd.f32 1e-30, %v13584_v7 }
 0x42c   : > { %v11101_v24 = vpop.f32.mrf.mxu0  ;;  %v4972_v28 = vor.u32 1.1754944e-38, %v4971_v5  ;;  %vm4970_vm7 = vcmp.eq.f32.partialorder %v4969_v38, 8.507059e+37  ;;  %v11201_v5 = vadd.f32 %v10940_v45, %v10864_v63  ;;  %vm1924_vm14 = vweird.f32 %v11132_v2 }
 0x42d   : > { %v4948_v21 = vmul.f32 %v7788_v29, %v4947_v22  ;;  %v5264_v52 = vmul.f32 %v11035_v31, %v5228_v30  ;;  %vm1884_vm8 = vweird.f32 %v11118_v32  ;;  %vm1934_vm0 = vweird.f32 %v11136_v46 }
 0x42e   : > { %13591 = vst [vmem:[#allocation65_spill] sm:$0xff] %v11201_v5  ;;  %v7124_v40 = vmul.f32 -1.442695, %v11201_v5 }
 0x42f   : > { %v4949_v44 = vadd.f32 %v7788_v29, %v4948_v21  ;;  %5593 = vmatpush.bf16.msra.mxu2 %v10875_v12  ;;  %5309 = vadd.xlane.f32.xlu0 %v5264_v52  ;;  %v11182_v52 = vadd.f32 %v10940_v45, %v10913_v42 }
 0x430   : > { %v7790_v43 = vpop.eup %7789 }
 0x431   : > { %v4953_v6 = vsel %vm4952_vm1, %v7788_v29, %v4949_v44  ;;  %v4961_v15 = vmul.f32 %v7790_v43, %v4718_v18  ;;  %vm4966_vm4 = vweird.f32 %v7790_v43 }
 0x432   : > { %v4958_v60 = vsel %vm4955_vm2, %v4957_v39, %v4953_v6  ;;  %vm4967_vm6 = vmor %vm4965_vm5, %vm4966_vm4  ;;  %vm1944_vm4 = vweird.f32 %v11142_v8 }
 0x433   : > { %v5229_v33 = vmul.f32 %v4958_v60, %v11074_v54  ;;  %v4962_v4 = vsub.f32 1.0, %v4961_v15  ;;  %5594 = vmatpush.bf16.msra.mxu2 %v10842_v14  ;;  %v13583_v14 = vld [vmem:[#allocation76_spill] sm:$0xff]  ;;  %v11194_v15 = vadd.f32 %v10940_v45, %v10829_v62  ;;  %v7126_v60 = vmul.f32 -1.442695, %v11175_v49 }
 0x434   : > { %v11114_v34 = vadd.f32 1e-30, %v13583_v14  ;;  %v11215_v14 = vadd.f32 %v10940_v45, %v10884_v20 }
 0x435   : > { %v11107_v17 = vpop.f32.mrf.mxu0  ;;  %v4963_v23 = vmul.f32 %v7790_v43, %v4962_v4  ;;  %v5265_v12 = vmul.f32 %v11035_v31, %v5229_v33  ;;  %13590 = vst [vmem:[#allocation60_spill] sm:$0xff] %v11194_v15  ;;  %v7122_v63 = vmul.f32 -1.442695, %v11194_v15 }
 0x436   : > { %7791 = vrsqrt.f32 %v11114_v34  ;;  %vm1874_vm3 = vweird.f32 %v11114_v34  ;;  %13592 = vst [vmem:[#allocation76_spill] sm:$0xff] %v11215_v14 }
 0x437   : > { %v4964_v27 = vadd.f32 %v7790_v43, %v4963_v23  ;;  %5311 = vadd.xlane.f32.xlu1 %v5265_v12  ;;  %7793 = vrsqrt.f32 %v11118_v32  ;;  %v7128_v23 = vmul.f32 -1.442695, %v11182_v52 }
 0x438   : > { %7795 = vrsqrt.f32 %v11121_v56 }
 0x439   : > { %v4968_v58 = vsel %vm4967_vm6, %v7790_v43, %v4964_v27  ;;  %7797 = vrsqrt.f32 %v11125_v13 }
 0x43a   : > { %v4973_v57 = vsel %vm4970_vm7, %v4972_v28, %v4968_v58 }
 0x43b   : > { %v5230_v54 = vmul.f32 %v4973_v57, %v11083_v37  ;;  %v13585_v37 = vld [vmem:[#allocation78_spill] sm:$0xff] }
 0x43c   : > { %v11128_v48 = vadd.f32 1e-30, %v13585_v37  ;;  %v11145_v26 = vpop.eup %7791 }
 0x43d   : > { %v11111_v53 = vpop.f32.mrf.mxu0  ;;  %v5266_v10 = vmul.f32 %v11035_v31, %v5230_v54  ;;  %v11149_v1 = vpop.eup %7793  ;;  %v1869_v3 = vmul.f32 %v11145_v26, %v11114_v34  ;;  %vm1875_vm15 = vweird.f32 %v11145_v26 }
 0x43e   : > { %7799 = vrsqrt.f32 %v11128_v48  ;;  %v11152_v19 = vpop.eup %7795  ;;  %v1879_v18 = vmul.f32 %v11149_v1, %v11118_v32  ;;  %vm1885_vm11 = vweird.f32 %v11149_v1  ;;  %vm1914_vm12 = vweird.f32 %v11128_v48  ;;  %vm11239_vm13 = vmor %vm1874_vm3, %vm1875_vm15 }
 0x43f   : > { %5313 = vadd.xlane.f32.xlu2 %v5266_v10  ;;  %7801 = vrsqrt.f32 %v11132_v2  ;;  %v11156_v29 = vpop.eup %7797  ;;  %v1870_v55 = vmul.f32 %v11145_v26, %v1869_v3  ;;  %v1889_v30 = vmul.f32 %v11152_v19, %v11121_v56  ;;  %vm11259_vm1 = vmor %vm1884_vm8, %vm1885_vm11  ;;  %vm1895_vm2 = vweird.f32 %v11152_v19 }
 0x440   : > { %7803 = vrsqrt.f32 %v11136_v46  ;;  %v1880_v21 = vmul.f32 %v11149_v1, %v1879_v18  ;;  %v1899_v11 = vmul.f32 %v11156_v29, %v11125_v13  ;;  %vm1905_vm5 = vweird.f32 %v11156_v29  ;;  %vm11296_vm6 = vmor %vm1894_vm9, %vm1895_vm2 }
 0x441   : > { %7805 = vrsqrt.f32 %v11142_v8  ;;  %v1871_v41 = vmul.f32 0.5, %v1870_v55  ;;  %v1890_v42 = vmul.f32 %v11152_v19, %v1889_v30  ;;  %v7125_v30 = vmul.f32 -1.442695, %v11215_v14  ;;  %vm11315_vm15 = vmor %vm1904_vm10, %vm1905_vm5 }
 0x442   : > { %v1881_v33 = vmul.f32 0.5, %v1880_v21  ;;  %v1900_v4 = vmul.f32 %v11156_v29, %v1899_v11  ;;  %7807 = vpow2.f32 %v7126_v60 }
 0x443   : > { %v1872_v58 = vsub.f32 1.5, %v1871_v41  ;;  %v1891_v54 = vmul.f32 0.5, %v1890_v42  ;;  %7809 = vpow2.f32 %v7128_v23  ;;  %v11248_v23 = vadd.f32 %v10940_v45, %v11091_v61 }
 0x444   : > { %v11158_v25 = vpop.eup %7799  ;;  %v1882_v7 = vsub.f32 1.5, %v1881_v33  ;;  %v1901_v37 = vmul.f32 0.5, %v1900_v4 }
 0x445   : > { %v11138_v51 = vpop.f32.mrf.mxu0  ;;  %v11164_v35 = vpop.eup %7801  ;;  %v1909_v44 = vmul.f32 %v11158_v25, %v11128_v48  ;;  %v1873_v55 = vmul.f32 %v11145_v26, %v1872_v58  ;;  %v1892_v20 = vsub.f32 1.5, %v1891_v54  ;;  %v13598_v54 = vld [vmem:[#allocation36_spill] sm:$0xff]  ;;  %vm1915_vm7 = vweird.f32 %v11158_v25 }
 0x446   : > { %v11166_v9 = vpop.eup %7803  ;;  %v1919_v43 = vmul.f32 %v11164_v35, %v11132_v2  ;;  %v1883_v11 = vmul.f32 %v11149_v1, %v1882_v7  ;;  %vm1925_vm3 = vweird.f32 %v11164_v35  ;;  %vm11335_vm9 = vmor %vm1914_vm12, %vm1915_vm7 }
 0x447   : > { %v11169_v22 = vpop.eup %7805  ;;  %v1929_v39 = vmul.f32 %v11166_v9, %v11136_v46  ;;  %v1910_v12 = vmul.f32 %v11158_v25, %v1909_v44  ;;  %v1893_v61 = vmul.f32 %v11152_v19, %v1892_v20  ;;  %vm1935_vm8 = vweird.f32 %v11166_v9  ;;  %vm11347_vm10 = vmor %vm1924_vm14, %vm1925_vm3 }
 0x448   : > { %v1939_v6 = vmul.f32 %v11169_v22, %v11142_v8  ;;  %v1920_v27 = vmul.f32 %v11164_v35, %v1919_v43  ;;  %v7808_v44 = vpop.eup %7807  ;;  %v1902_v43 = vsub.f32 1.5, %v1901_v37  ;;  %v1887_v32 = vsel %vm11259_vm1, %v11149_v1, %v1883_v11  ;;  %vm11362_vm12 = vmor %vm1934_vm0, %vm1935_vm8 }
 0x449   : > { %v1930_v62 = vmul.f32 %v11166_v9, %v1929_v39  ;;  %v1911_v47 = vmul.f32 0.5, %v1910_v12  ;;  %v7810_v60 = vpop.eup %7809  ;;  %v11269_v58 = vadd.f32 1.0, %v7808_v44  ;;  %v7138_v37 = vmul.f32 -1.442695, %v11248_v23 }
 0x44a   : > { %v1940_v57 = vmul.f32 %v11169_v22, %v1939_v6  ;;  %v1921_v0 = vmul.f32 0.5, %v1920_v27  ;;  %v1903_v7 = vmul.f32 %v11156_v29, %v1902_v43  ;;  %vm1945_vm11 = vweird.f32 %v11169_v22  ;;  %v13612_v27 = vld [vmem:[#allocation39_spill] sm:$0xff] }
 0x44b   : > { %v11219_v3 = vmul.f32 0.5, %v1930_v62  ;;  %v1912_v39 = vsub.f32 1.5, %v1911_v47  ;;  %v13600_v47 = vld [vmem:[#allocation37_spill] sm:$0xff] }
 0x44c   : > { %v11221_v18 = vmul.f32 0.5, %v1940_v57  ;;  %v1922_v41 = vsub.f32 1.5, %v1921_v0  ;;  %v11290_v0 = vmul.f32 %v1887_v32, %v13600_v47  ;;  %v1907_v13 = vsel %vm11315_vm15, %v11156_v29, %v1903_v7  ;;  %v13616_v7 = vld [vmem:[#allocation43_spill] sm:$0xff]  ;;  %v13617_v47 = vld [vmem:[#allocation45_spill] sm:$0xff] }
 0x44d   : > { %v11162_v16 = vpop.f32.mrf.mxu0  ;;  %v1932_v33 = vsub.f32 1.5, %v11219_v3 }
 0x44e   : > { %v1942_v4 = vsub.f32 1.5, %v11221_v18  ;;  %v1923_v20 = vmul.f32 %v11164_v35, %v1922_v41 }
 0x44f   : > { %v1933_v44 = vmul.f32 %v11166_v9, %v1932_v33 }
 0x450   : > { %v1943_v48 = vmul.f32 %v11169_v22, %v1942_v4 }
 0x455   : > { %v4582_v38 = vpop.f32.mrf.mxu0 }
 0x456   : > { %v11208_v28 = vadd.f32 %v10940_v45, %v4582_v38  ;;  %v1877_v38 = vsel %vm11239_vm13, %v11145_v26, %v1873_v55  ;;  %v11267_v26 = vadd.f32 %v10940_v45, %v10854_v36  ;;  %v1897_v55 = vsel %vm11296_vm6, %v11152_v19, %v1893_v61  ;;  %vm11388_vm13 = vmor %vm1944_vm4, %vm1945_vm11 }
 0x457   : > { %v11323_v19 = vadd.f32 %v10940_v45, %v10903_v50  ;;  %v11379_v61 = vmul.f32 %v1897_v55, %v13612_v27 }
 0x458   : > { %v7144_v10 = vmul.f32 -1.442695, %v11208_v28  ;;  %13597 = vst [vmem:[#allocation75_spill] sm:$0xff] %v11267_v26  ;;  %v7123_v18 = vmul.f32 -1.442695, %v11267_v26 }
 0x459   : > { %13605 = vst [vmem:[#allocation79_spill] sm:$0xff] %v11323_v19  ;;  %v7127_v46 = vmul.f32 -1.442695, %v11323_v19 }
 0x45a   : > { %7811 = vpow2.f32 %v7144_v10  ;;  %v11280_v10 = vmul.f32 %v1877_v38, %v13598_v54  ;;  %v1927_v38 = vsel %vm11347_vm10, %v11164_v35, %v1923_v20 }
 0x45b   : > { %7813 = vpow2.f32 %v7122_v63  ;;  %v11277_v63 = vadd.f32 1.0, %v7810_v60  ;;  %v11403_v3 = vmul.f32 %v1927_v38, %v13617_v47 }
 0x45c   : > { %7815 = vpow2.f32 %v7124_v40  ;;  %v1913_v40 = vmul.f32 %v11158_v25, %v1912_v39  ;;  %v11420_v39 = vld [vmem:[%s13194_s14] ss:$0 sm:$0xff] }
 0x45d   : > { %v4584_v21 = vpop.f32.mrf.mxu0  ;;  %7817 = vpow2.f32 %v7125_v30  ;;  %v11443_v38 = vadd.f32 %v11420_v39, %v11111_v53  ;;  %v11456_v53 = vadd.f32 %v11420_v39, %v11101_v24  ;;  %vm4830_vm15 = vweird.f32 %v11277_v63 }
 0x45e   : > { %v11233_v6 = vadd.f32 %v10940_v45, %v4584_v21  ;;  %v1917_v50 = vsel %vm11335_vm9, %v11158_v25, %v1913_v40 }
 0x45f   : > { %13623 = vst [vmem:[#allocation37_spill] sm:$0xff] %v11456_v53 }
 0x460   : > { %v7812_v34 = vpop.eup %7811  ;;  %v7145_v12 = vmul.f32 -1.442695, %v11233_v6 }
 0x461   : > { %v7814_v62 = vpop.eup %7813  ;;  %v11271_v57 = vadd.f32 1.0, %v7812_v34  ;;  %v1937_v34 = vsel %vm11362_vm12, %v11166_v9, %v1933_v44 }
 0x462   : > { %7819 = vpow2.f32 %v7145_v12  ;;  %v7816_v36 = vpop.eup %7815  ;;  %v11287_v1 = vadd.f32 1.0, %v7814_v62  ;;  %v13613_v62 = vld [vmem:[#allocation41_spill] sm:$0xff] }
 0x463   : > { %7821 = vrcp.f32 %v11271_v57  ;;  %v7818_v30 = vpop.eup %7817  ;;  %v11308_v56 = vadd.f32 1.0, %v7816_v36  ;;  %v11382_v32 = vmul.f32 %v1907_v13, %v13613_v62  ;;  %v11395_v36 = vmul.f32 %v1917_v50, %v13616_v7 }
 0x464   : > { %13599 = vst [vmem:[#allocation78_spill] sm:$0xff] %v11287_v1  ;;  %7823 = vrcp.f32 %v11269_v58  ;;  %v11353_v60 = vadd.f32 1.0, %v7818_v30  ;;  %v5076_v8 = vand.u32 2147483648, %v11271_v57  ;;  %v11412_v30 = vadd.f32 %v10940_v45, %v10928_v59  ;;  %v13621_v59 = vld [vmem:[#allocation49_spill] sm:$0xff] }
 0x465   : > { %7825 = vrcp.f32 %v11277_v63  ;;  %v4587_v21 = vpop.f32.mrf.mxu0  ;;  %vm5070_vm0 = vweird.f32 %v11271_v57 }
 0x466   : > { %7827 = vpow2.f32 %v7138_v37  ;;  %v11326_v43 = vadd.f32 %v10940_v45, %v4587_v21  ;;  %v1947_v37 = vsel %vm11388_vm13, %v11169_v22, %v1943_v48  ;;  %13620 = vst [vmem:[#allocation81_spill] sm:$0xff] %v11412_v30  ;;  %v5074_v22 = vand.u32 2147483647, %v11271_v57 }
 0x467   : > { %7829 = vrcp.f32 %v11287_v1  ;;  %v11426_v45 = vmul.f32 %v1947_v37, %v13621_v59  ;;  %v7129_v62 = vmul.f32 -1.442695, %v11412_v30 }
 0x468   : > { %v7820_v41 = vpop.eup %7819  ;;  %7831 = vpow2.f32 %v7123_v18  ;;  %v7146_v25 = vmul.f32 -1.442695, %v11326_v43  ;;  %v13618_v18 = vld [vmem:[#allocation47_spill] sm:$0xff]  ;;  %vm5075_vm2 = vcmp.eq.f32.partialorder %v5074_v22, 8.507059e+37 }
 0x469   : > { %v7822_v42 = vpop.eup %7821  ;;  %v11355_v33 = vadd.f32 1.0, %v7820_v41  ;;  %7833 = vrcp.f32 %v11308_v56  ;;  %v11406_v55 = vmul.f32 %v1937_v34, %v13618_v18  ;;  %v5077_v34 = vor.u32 1.1754944e-38, %v5076_v8 }
 0x46a   : > { %v5066_v4 = vmul.f32 %v7822_v42, %v11271_v57  ;;  %v11374_v12 = vpop.eup %7823  ;;  %vm5071_vm14 = vweird.f32 %v7822_v42  ;;  %v7141_v18 = vmul.f32 -1.442695, %v11443_v38 }
 0x46b   : > { %7835 = vrcp.f32 %v11355_v33  ;;  %v11392_v9 = vpop.eup %7825  ;;  %v11432_v29 = vmul.f32 %v11374_v12, %v11269_v58  ;;  %vm5072_vm1 = vmor %vm5070_vm0, %vm5071_vm14  ;;  %vm5085_vm5 = vweird.f32 %v11355_v33 }
 0x46c   : > { %v5067_v54 = vsub.f32 1.0, %v5066_v4  ;;  %7837 = vpow2.f32 %v7146_v25  ;;  %v7828_v40 = vpop.eup %7827  ;;  %v4826_v13 = vmul.f32 %v11392_v9, %v11277_v63  ;;  %v11439_v4 = vadd.f32 %v11420_v39, %v11107_v17 }
 0x46d   : > { %7839 = vrcp.f32 %v11353_v60  ;;  %v11408_v20 = vpop.eup %7829  ;;  %v4589_v11 = vpop.f32.mrf.mxu0  ;;  %v11434_v48 = vadd.f32 1.0, %v7828_v40  ;;  %vm4831_vm3 = vweird.f32 %v11392_v9 }
 0x46e   : > { %13619 = vst [vmem:[#allocation80_spill] sm:$0xff] %v11408_v20  ;;  %v5068_v21 = vmul.f32 %v7822_v42, %v5067_v54  ;;  %v7832_v44 = vpop.eup %7831  ;;  %7841 = vpow2.f32 %v7127_v46  ;;  %v11423_v41 = vadd.f32 %v11420_v39, %v4589_v11  ;;  %v4827_v17 = vsub.f32 1.0, %v4826_v13  ;;  %vm11507_vm9 = vmor %vm4830_vm15, %vm4831_vm3 }
 0x46f   : > { %v11428_v50 = vpop.eup %7833  ;;  %13622 = vst [vmem:[#allocation36_spill] sm:$0xff] %v11439_v4  ;;  %v7140_v47 = vmul.f32 -1.442695, %v11439_v4  ;;  %v5089_v11 = vand.u32 2147483647, %v11355_v33  ;;  %v11465_v59 = vadd.f32 1.0, %v7832_v44 }
 0x470   : > { %v5069_v25 = vadd.f32 %v7822_v42, %v5068_v21  ;;  %v7147_v46 = vmul.f32 -1.442695, %v11423_v41  ;;  %v5091_v21 = vand.u32 2147483648, %v11355_v33  ;;  %v7139_v44 = vmul.f32 -1.442695, %v11456_v53 }
 0x471   : > { %v7836_v2 = vpop.eup %7835  ;;  %vm5090_vm7 = vcmp.eq.f32.partialorder %v5089_v11, 8.507059e+37  ;;  %v4834_v11 = vand.u32 2147483647, %v11277_v63 }
 0x472   : > { %v7838_v27 = vpop.eup %7837  ;;  %v5073_v35 = vsel %vm5072_vm1, %v7822_v42, %v5069_v25  ;;  %v5081_v57 = vmul.f32 %v7836_v2, %v11355_v33  ;;  %7843 = vpow2.f32 %v7147_v46  ;;  %vm5086_vm4 = vweird.f32 %v7836_v2 }
 0x473   : > { %v11449_v54 = vpop.eup %7839  ;;  %v5078_v7 = vsel %vm5075_vm2, %v5077_v34, %v5073_v35  ;;  %v11451_v37 = vadd.f32 1.0, %v7838_v27  ;;  %7845 = vrcp.f32 %v11434_v48  ;;  %v4828_v34 = vmul.f32 %v11392_v9, %v4827_v17  ;;  %vm5087_vm6 = vmor %vm5085_vm5, %vm5086_vm4 }
 0x474   : > { %v5237_v40 = vmul.f32 %v5078_v7, %v11208_v28  ;;  %v5082_v8 = vsub.f32 1.0, %v5081_v57  ;;  %v7842_v42 = vpop.eup %7841  ;;  %v4797_v28 = vsub.f32 1.0, %v11432_v29  ;;  %v11474_v46 = vadd.f32 %v11420_v39, %v11138_v51 }
 0x475   : > { %7847 = vrcp.f32 %v11451_v37  ;;  %v4592_v13 = vpop.f32.mrf.mxu0  ;;  %v5092_v29 = vor.u32 1.1754944e-38, %v5091_v21  ;;  %vm11511_vm10 = vcmp.eq.f32.partialorder %v4834_v11, 8.507059e+37  ;;  %vm5100_vm11 = vweird.f32 %v11451_v37 }
 0x476   : > { %v5083_v22 = vmul.f32 %v7836_v2, %v5082_v8  ;;  %v5273_v24 = vmul.f32 %v11035_v31, %v5237_v40  ;;  %7849 = vpow2.f32 %v7129_v62  ;;  %v11469_v25 = vadd.f32 %v11420_v39, %v4592_v13 }
 0x477   : > { %7851 = vpow2.f32 %v7140_v47  ;;  %v11485_v40 = vadd.f32 1.0, %v7842_v42  ;;  %v7142_v47 = vmul.f32 -1.442695, %v11474_v46  ;;  %v4836_v13 = vand.u32 2147483648, %v11277_v63 }
 0x478   : > { %v5084_v27 = vadd.f32 %v7836_v2, %v5083_v22  ;;  %5327 = vadd.xlane.f32.xlu2 %v5273_v24  ;;  %v7844_v35 = vpop.eup %7843  ;;  %v7148_v62 = vmul.f32 -1.442695, %v11469_v25  ;;  %7853 = vpow2.f32 %v7141_v18  ;;  %v4829_v42 = vadd.f32 %v11392_v9, %v4828_v34 }
 0x479   : > { %v11480_v57 = vpop.eup %7845  ;;  %v11482_v51 = vadd.f32 1.0, %v7844_v35 }
 0x47a   : > { %v5088_v17 = vsel %vm5087_vm6, %v7836_v2, %v5084_v27  ;;  %7855 = vpow2.f32 %v7148_v62  ;;  %v4798_v2 = vmul.f32 %v11374_v12, %v4797_v28  ;;  %v5106_v28 = vand.u32 2147483648, %v11451_v37 }
 0x47b   : > { %v7848_v7 = vpop.eup %7847  ;;  %v5093_v8 = vsel %vm5090_vm7, %v5092_v29, %v5088_v17  ;;  %7857 = vrcp.f32 %v11482_v51  ;;  %v4976_v29 = vmul.f32 %v11480_v57, %v11434_v48  ;;  %v5104_v17 = vand.u32 2147483647, %v11451_v37 }
 0x47c   : > { %v5238_v21 = vmul.f32 %v5093_v8, %v11233_v6  ;;  %v5096_v22 = vmul.f32 %v7848_v7, %v11451_v37  ;;  %v7850_v18 = vpop.eup %7849  ;;  %7859 = vpow2.f32 %v7139_v44  ;;  %vm5101_vm8 = vweird.f32 %v7848_v7 }
 0x47d   : > { %v4594_v27 = vpop.f32.mrf.mxu0  ;;  %v7852_v35 = vpop.eup %7851  ;;  %7861 = vpow2.f32 %v7142_v47  ;;  %vm5102_vm12 = vmor %vm5100_vm11, %vm5101_vm8  ;;  %v4977_v5 = vsub.f32 1.0, %v4976_v29  ;;  %vm5105_vm13 = vcmp.eq.f32.partialorder %v5104_v17, 8.507059e+37  ;;  %v5121_v29 = vand.u32 2147483648, %v11482_v51 }
 0x47e   : > { %v5097_v24 = vsub.f32 1.0, %v5096_v22  ;;  %v5274_v6 = vmul.f32 %v11035_v31, %v5238_v21  ;;  %v11502_v62 = vadd.f32 %v11420_v39, %v4594_v27  ;;  %v7854_v44 = vpop.eup %7853  ;;  %v4837_v22 = vor.u32 1.1754944e-38, %v4836_v13 }
 0x47f   : > { %v11515_v27 = vadd.f32 1.0, %v7850_v18  ;;  %v11524_v11 = vadd.f32 1.0, %v7854_v44  ;;  %v5107_v13 = vor.u32 1.1754944e-38, %v5106_v28  ;;  %v11531_v37 = vadd.f32 1.0, %v7852_v35 }
 0x480   : > { %v5098_v34 = vmul.f32 %v7848_v7, %v5097_v24  ;;  %5329 = vadd.xlane.f32.xlu0 %v5274_v6  ;;  %v7856_v8 = vpop.eup %7855  ;;  %v7149_v47 = vmul.f32 -1.442695, %v11502_v62  ;;  %v4833_v6 = vsel %vm11507_vm9, %v11392_v9, %v4829_v42  ;;  %v11541_v35 = vadd.f32 %v11374_v12, %v4798_v2 }
 0x481   : > { %v7858_v24 = vpop.eup %7857  ;;  %v11522_v26 = vadd.f32 1.0, %v7856_v8  ;;  %v4838_v9 = vsel %vm11511_vm10, %v4837_v22, %v4833_v6  ;;  %vm5115_vm0 = vweird.f32 %v11482_v51  ;;  %v5122_v2 = vor.u32 1.1754944e-38, %v5121_v29 }
 0x482   : > { %v5099_v33 = vadd.f32 %v7848_v7, %v5098_v34  ;;  %v7860_v15 = vpop.eup %7859  ;;  %v5111_v18 = vmul.f32 %v7858_v24, %v11482_v51  ;;  %7863 = vpow2.f32 %v7149_v47  ;;  %vm5116_vm14 = vweird.f32 %v7858_v24  ;;  %13629 = vst [vmem:[#allocation41_spill] sm:$0xff] %v11541_v35 }
 0x483   : > { %7865 = vrcp.f32 %v11522_v26  ;;  %v7862_v44 = vpop.eup %7861  ;;  %v11534_v8 = vadd.f32 1.0, %v7860_v15  ;;  %v4978_v15 = vmul.f32 %v11480_v57, %v4977_v5  ;;  %vm5117_vm1 = vmor %vm5115_vm0, %vm5116_vm14  ;;  %vm4981_vm4 = vweird.f32 %v11480_v57 }
 0x484   : > { %v5103_v53 = vsel %vm5102_vm12, %v7848_v7, %v5099_v33  ;;  %v5112_v34 = vsub.f32 1.0, %v5111_v18  ;;  %7867 = vrcp.f32 %v11485_v40  ;;  %v5119_v33 = vand.u32 2147483647, %v11482_v51 }
 0x485   : > { %v5108_v42 = vsel %vm5105_vm13, %v5107_v13, %v5103_v53  ;;  %13628 = vst [vmem:[#allocation39_spill] sm:$0xff] %v11534_v8  ;;  %7869 = vrcp.f32 %v11524_v11  ;;  %v11544_v53 = vmul.f32 %v4838_v9, %v11182_v52  ;;  %v4597_v17 = vpop.f32.mrf.mxu0  ;;  %v11549_v63 = vadd.f32 1.0, %v7862_v44 }
 0x486   : > { %v5239_v28 = vmul.f32 %v5108_v42, %v11326_v43  ;;  %v5113_v7 = vmul.f32 %v7858_v24, %v5112_v34  ;;  %7871 = vrcp.f32 %v11515_v27  ;;  %v11555_v52 = vadd.f32 %v11420_v39, %v4597_v17 }
 0x487   : > { %7873 = vrcp.f32 %v11531_v37  ;;  %vm5120_vm2 = vcmp.eq.f32.partialorder %v5119_v33, 8.507059e+37  ;;  %v4984_v51 = vand.u32 2147483647, %v11434_v48  ;;  %v11565_v9 = vadd.f32 %v11420_v39, %v11162_v16 }
 0x488   : > { %v7864_v43 = vpop.eup %7863  ;;  %v5114_v21 = vadd.f32 %v7858_v24, %v5113_v7  ;;  %v5275_v6 = vmul.f32 %v11035_v31, %v5239_v28  ;;  %7875 = vrcp.f32 %v11534_v8  ;;  %v4986_v31 = vand.u32 2147483648, %v11434_v48 }
 0x489   : > { %v7866_v22 = vpop.eup %7865  ;;  %v11552_v47 = vadd.f32 1.0, %v7864_v43  ;;  %v4979_v29 = vadd.f32 %v11480_v57, %v4978_v15  ;;  %v5136_v16 = vand.u32 2147483648, %v11522_v26  ;;  %v7150_v7 = vmul.f32 -1.442695, %v11555_v52 }
 0x48a   : > { %v5118_v5 = vsel %vm5117_vm1, %v7858_v24, %v5114_v21  ;;  %v5126_v13 = vmul.f32 %v7866_v22, %v11522_v26  ;;  %v11560_v18 = vpop.eup %7867  ;;  %5331 = vadd.xlane.f32.xlu1 %v5275_v6  ;;  %vm5131_vm5 = vweird.f32 %v7866_v22  ;;  %v5134_v43 = vand.u32 2147483647, %v11522_v26 }
 0x48b   : > { %v5123_v42 = vsel %vm5120_vm2, %v5122_v2, %v5118_v5  ;;  %7877 = vrcp.f32 %v11552_v47  ;;  %v11568_v34 = vpop.eup %7869  ;;  %vm4980_vm6 = vweird.f32 %v11434_v48  ;;  %v7143_v2 = vmul.f32 -1.442695, %v11565_v9 }
 0x48c   : > { %v5240_v24 = vmul.f32 %v5123_v42, %v11423_v41  ;;  %v5127_v44 = vsub.f32 1.0, %v5126_v13  ;;  %v11573_v28 = vpop.eup %7871  ;;  %7879 = vrcp.f32 %v11549_v63  ;;  %v11585_v41 = vld [vmem:[%s13195_s15] ss:$0 sm:$0xff]  ;;  %v5021_v15 = vmul.f32 %v11568_v34, %v11524_v11  ;;  %vm11596_vm7 = vmor %vm4980_vm6, %vm4981_vm4 }
 0x48d   : > { %v11579_v33 = vpop.eup %7873  ;;  %7881 = vpow2.f32 %v7150_v7  ;;  %v4599_v6 = vpop.f32.mrf.mxu0  ;;  %vm11600_vm3 = vcmp.eq.f32.partialorder %v4984_v51, 8.507059e+37  ;;  %vm5130_vm15 = vweird.f32 %v11522_v26  ;;  %v4983_v19 = vsel %vm11596_vm7, %v11480_v57, %v4979_v29 }
 0x48e   : > { %v5128_v17 = vmul.f32 %v7866_v22, %v5127_v44  ;;  %v5276_v21 = vmul.f32 %v11585_v41, %v5240_v24  ;;  %v11592_v5 = vpop.eup %7875  ;;  %v5300_v24 = vpop.xlane.xlu1 %5299  ;;  %v11606_v44 = vadd.f32 %v11420_v39, %v4599_v6  ;;  %v4987_v49 = vor.u32 1.1754944e-38, %v4986_v31  ;;  %vm5132_vm8 = vmor %vm5130_vm15, %vm5131_vm5 }
 0x48f   : > { %13630 = vst [vmem:[#allocation43_spill] sm:$0xff] %v11592_v5  ;;  %v5006_v51 = vmul.f32 %v11579_v33, %v11531_v37  ;;  %v5137_v4 = vor.u32 1.1754944e-38, %v5136_v16  ;;  %vm5135_vm9 = vcmp.eq.f32.partialorder %v5134_v43, 8.507059e+37  ;;  %v5022_v57 = vsub.f32 1.0, %v5021_v15 }
 0x490   : > { %v5129_v48 = vadd.f32 %v7866_v22, %v5128_v17  ;;  %5333 = vadd.xlane.f32.xlu2 %v5276_v21  ;;  %v7151_v6 = vmul.f32 -1.442695, %v11606_v44  ;;  %v11620_v21 = vmul.f32 %v11592_v5, %v11534_v8  ;;  %7883 = vpow2.f32 %v7143_v2  ;;  %v5304_v5 = vpop.xlane.xlu0 %5303 }
 0x491   : > { %v7878_v7 = vpop.eup %7877  ;;  %v11624_v29 = vsel %vm11600_vm3, %v4987_v49, %v4983_v19  ;;  %v5007_v13 = vsub.f32 1.0, %v5006_v51  ;;  %v5151_v8 = vand.u32 2147483648, %v11552_v47  ;;  %vm5025_vm10 = vweird.f32 %v11524_v11  ;;  %v5302_v19 = vpop.xlane.xlu2 %5301 }
 0x492   : > { %v5133_v17 = vsel %vm5132_vm8, %v7866_v22, %v5129_v48  ;;  %v5141_v26 = vmul.f32 %v7878_v7, %v11552_v47  ;;  %v11616_v14 = vpop.eup %7879  ;;  %7885 = vpow2.f32 %v7151_v6  ;;  %v5031_v48 = vand.u32 2147483648, %v11524_v11 }
 0x493   : > { %v5138_v31 = vsel %vm5135_vm9, %v5137_v4, %v5133_v17  ;;  %v7882_v43 = vpop.eup %7881  ;;  %vm5146_vm11 = vweird.f32 %v7878_v7  ;;  %v5149_v49 = vand.u32 2147483647, %v11552_v47  ;;  %v5023_v2 = vmul.f32 %v11568_v34, %v5022_v57 }
 0x494   : > { %v5142_v16 = vsub.f32 1.0, %v5141_v26  ;;  %v5241_v35 = vmul.f32 %v5138_v31, %v11469_v25  ;;  %v11632_v15 = vadd.f32 1.0, %v7882_v43  ;;  %vm5026_vm12 = vweird.f32 %v11568_v34  ;;  %v13635_v25 = vld [vmem:[#allocation11_spill] sm:$0xff] }
 0x495   : > { %v5036_v42 = vmul.f32 %v11616_v14, %v11549_v63  ;;  %vm5347_vm13 = vcmp.eq.s32.totalorder %v13635_v25, 127  ;;  %v4602_v51 = vpop.f32.mrf.mxu0  ;;  %vm5145_vm14 = vweird.f32 %v11552_v47  ;;  %v5360_v26 = vmul.f32 %v5304_v5, %v11379_v61  ;;  %vm11673_vm2 = vmor %vm5025_vm10, %vm5026_vm12 }
 0x496   : > { %v5143_v4 = vmul.f32 %v7878_v7, %v5142_v16  ;;  %7887 = vrcp.f32 %v11632_v15  ;;  %v5306_v6 = vpop.xlane.xlu1 %5305  ;;  %v7884_v31 = vpop.eup %7883  ;;  %vm5147_vm0 = vmor %vm5145_vm14, %vm5146_vm11  ;;  %v5152_v57 = vor.u32 1.1754944e-38, %v5151_v8  ;;  %v11645_v43 = vadd.f32 %v11420_v39, %v4602_v51 }
 0x497   : > { %v5361_v16 = vmul.f32 %v5306_v6, %v11382_v32  ;;  %v5277_v25 = vmul.f32 %v11585_v41, %v5241_v35  ;;  %v5358_v47 = vmul.f32 %v5300_v24, %v11280_v10  ;;  %vm5150_vm1 = vcmp.eq.f32.partialorder %v5149_v49, 8.507059e+37 }
 0x498   : > { %v5144_v17 = vadd.f32 %v7878_v7, %v5143_v4  ;;  %v7886_v22 = vpop.eup %7885  ;;  %v13636_v4 = vmov 0.0   ;;  %v5359_v5 = vmul.f32 %v5302_v19, %v11290_v0  ;;  %v11657_v8 = vadd.f32 %v11568_v34, %v5023_v2 }
 0x499   : > { %v11649_v20 = vsel %vm5347_vm13, 1.0, %v13636_v4  ;;  %v11653_v30 = vadd.f32 1.0, %v7886_v22  ;;  %5335 = vadd.xlane.f32.xlu0 %v5277_v25  ;;  %v7152_v6 = vmul.f32 -1.442695, %v11645_v43  ;;  %v11663_v10 = vmul.f32 %v11579_v33, %v5007_v13 }
 0x49a   : > { %v5148_v1 = vsel %vm5147_vm0, %v7878_v7, %v5144_v17  ;;  %v5393_v32 = vadd.f32 %v11649_v20, %v5361_v16  ;;  %v5392_v51 = vadd.f32 %v11649_v20, %v5360_v26  ;;  %v11665_v24 = vadd.f32 1.0, %v7884_v31 }
 0x49b   : > { %v5153_v61 = vsel %vm5150_vm1, %v5152_v57, %v5148_v1  ;;  %v5037_v1 = vsub.f32 1.0, %v5036_v42  ;;  %7889 = vrcp.f32 %v11653_v30  ;;  %v5032_v7 = vor.u32 1.1754944e-38, %v5031_v48  ;;  %v5308_v49 = vpop.xlane.xlu2 %5307 }
 0x49c   : > { %v5242_v35 = vmul.f32 %v5153_v61, %v11502_v62  ;;  %v7888_v0 = vpop.eup %7887  ;;  %v5425_v22 = vpack.c.bf16 %v5393_v32, %v5393_v32  ;;  %7891 = vpow2.f32 %v7152_v6  ;;  %v5044_v13 = vand.u32 2147483647, %v11549_v63 }
 0x49d   : > { %v11679_v2 = vadd.f32 %v11649_v20, %v5358_v47  ;;  %v5391_v48 = vadd.f32 %v11649_v20, %v5359_v5  ;;  %v5156_v42 = vmul.f32 %v7888_v0, %v11632_v15  ;;  %v4604_v17 = vpop.f32.mrf.mxu0  ;;  %v5028_v26 = vsel %vm11673_vm2, %v11568_v34, %v11657_v8 }
 0x49e   : > { %v5278_v19 = vmul.f32 %v11585_v41, %v5242_v35  ;;  %v13639_v31 = vand.u32 2147483647, %v11524_v11  ;;  %v5046_v16 = vand.u32 2147483648, %v11549_v63  ;;  %v5424_v25 = vpack.c.bf16 %v5392_v51, %v5392_v51 }
 0x49f   : > { %v11695_v4 = vadd.f32 %v11420_v39, %v4604_v17  ;;  %v5038_v47 = vmul.f32 %v11616_v14, %v5037_v1  ;;  %7893 = vrcp.f32 %v11665_v24  ;;  %v5157_v61 = vsub.f32 1.0, %v5156_v42 }
 0x4a0   : > { %vm11689_vm4 = vcmp.eq.f32.partialorder %v13639_v31, 8.507059e+37  ;;  %5337 = vadd.xlane.f32.xlu1 %v5278_v19  ;;  %v5362_v34 = vmul.f32 %v5308_v49, %v11395_v36  ;;  %v5164_v11 = vand.u32 2147483647, %v11632_v15  ;;  %v5166_v5 = vand.u32 2147483648, %v11632_v15 }
 0x4a1   : > { %v11702_v32 = vunpack.c.l.b16 %v5425_v22  ;;  %v7153_v8 = vmul.f32 -1.442695, %v11695_v4  ;;  %v7890_v35 = vpop.eup %7889  ;;  %v5422_v39 = vpack.c.bf16 %v11679_v2, %v11679_v2  ;;  %v5423_v51 = vpack.c.bf16 %v5391_v48, %v5391_v48 }
 0x4a2   : > { %v5158_v6 = vmul.f32 %v7888_v0, %v5157_v61  ;;  %vm5161_vm5 = vweird.f32 %v7888_v0  ;;  %v5310_v1 = vpop.xlane.xlu0 %5309  ;;  %v7892_v19 = vpop.eup %7891  ;;  %vm5160_vm6 = vweird.f32 %v11632_v15  ;;  %v11708_v36 = vunpack.c.l.b16 %v5424_v25 }
 0x4a3   : > { %v5171_v49 = vmul.f32 %v7890_v35, %v11653_v30  ;;  %7895 = vpow2.f32 %v7153_v8  ;;  %vm5041_vm7 = vweird.f32 %v11616_v14  ;;  %v11712_v62 = vadd.f32 1.0, %v7892_v19  ;;  %vm5162_vm3 = vmor %vm5160_vm6, %vm5161_vm5 }
 0x4a4   : > { %v5159_v22 = vadd.f32 %v7888_v0, %v5158_v6  ;;  %v5394_v42 = vadd.f32 %v11649_v20, %v5362_v34  ;;  %v5363_v2 = vmul.f32 %v5310_v1, %v11403_v3  ;;  %vm5165_vm15 = vcmp.eq.f32.partialorder %v5164_v11, 8.507059e+37 }
 0x4a5   : > { %v5167_v48 = vor.u32 1.1754944e-38, %v5166_v5  ;;  %v5172_v17 = vsub.f32 1.0, %v5171_v49  ;;  %v5515_v15 = vpack.c.b16 %v11702_v32, %v11708_v36  ;;  %v11718_v31 = vpop.eup %7893  ;;  %vm5040_vm8 = vweird.f32 %v11549_v63 }
 0x4a6   : > { %v5163_v25 = vsel %vm5162_vm3, %v7888_v0, %v5159_v22  ;;  %v5179_v61 = vand.u32 2147483647, %v11653_v30  ;;  %v5181_v8 = vand.u32 2147483648, %v11653_v30  ;;  %7897 = vrcp.f32 %v11712_v62  ;;  %vm11765_vm14 = vmor %vm5040_vm8, %vm5041_vm7 }
 0x4a7   : > { %v5168_v34 = vsel %vm5165_vm15, %v5167_v48, %v5163_v25  ;;  %v5173_v3 = vmul.f32 %v7890_v35, %v5172_v17  ;;  %vm5176_vm9 = vweird.f32 %v7890_v35  ;;  %v5395_v11 = vadd.f32 %v11649_v20, %v5363_v2 }
 0x4a8   : > { %v5033_v5 = vsel %vm11689_vm4, %v5032_v7, %v5028_v26  ;;  %v5039_v6 = vadd.f32 %v11616_v14, %v5038_v47  ;;  %v5243_v1 = vmul.f32 %v5168_v34, %v11555_v52  ;;  %v5426_v19 = vpack.c.bf16 %v5394_v42, %v5394_v42 }
 0x4a9   : > { %v7896_v0 = vpop.eup %7895  ;;  %v5051_v49 = vmul.f32 %v11718_v31, %v11665_v24  ;;  %v5174_v22 = vadd.f32 %v7890_v35, %v5173_v3  ;;  %vm5175_vm10 = vweird.f32 %v11653_v30  ;;  %v5427_v48 = vpack.c.bf16 %v5395_v11, %v5395_v11 }
 0x4aa   : > { %v5312_v17 = vpop.xlane.xlu1 %5311  ;;  %vm11732_vm11 = vcmp.eq.f32.partialorder %v5044_v13, 8.507059e+37  ;;  %v11736_v57 = vunpack.c.l.b16 %v5423_v51  ;;  %vm5177_vm12 = vmor %vm5175_vm10, %vm5176_vm9  ;;  %v5182_v7 = vor.u32 1.1754944e-38, %v5181_v8  ;;  %v11738_v26 = vadd.f32 1.0, %v7896_v0 }
 0x4ab   : > { %v5279_v52 = vmul.f32 %v11585_v41, %v5243_v1  ;;  %v11741_v47 = vunpack.c.l.b16 %v5422_v39  ;;  %v5178_v42 = vsel %vm5177_vm12, %v7890_v35, %v5174_v22  ;;  %vm5180_vm13 = vcmp.eq.f32.partialorder %v5179_v61, 8.507059e+37 }
 0x4ac   : > { %v11743_v2 = vunpack.c.l.b16 %v5427_v48  ;;  %v7898_v30 = vpop.eup %7897  ;;  %v5183_v34 = vsel %vm5180_vm13, %v5182_v7, %v5178_v42  ;;  %v11745_v13 = vunpack.c.l.b16 %v5426_v19  ;;  %7899 = vrcp.f32 %v11738_v26 }
 0x4ad   : > { %5339 = vadd.xlane.f32.xlu2 %v5279_v52  ;;  %v5364_v51 = vmul.f32 %v5312_v17, %v11406_v55  ;;  %v5047_v8 = vor.u32 1.1754944e-38, %v5046_v16  ;;  %v5052_v3 = vsub.f32 1.0, %v5051_v49  ;;  %v5244_v39 = vmul.f32 %v5183_v34, %v11606_v44 }
 0x4ae   : > { %v5186_v35 = vmul.f32 %v7898_v30, %v11712_v62  ;;  %v5059_v61 = vand.u32 2147483647, %v11665_v24  ;;  %v5516_v11 = vpack.c.b16 %v11743_v2, %v11745_v13  ;;  %v4841_v1 = vmul.f32 %v11573_v28, %v11515_v27 }
 0x4af   : > { %v5234_v55 = vmul.f32 %v5033_v5, %v11443_v38  ;;  %v5061_v16 = vand.u32 2147483648, %v11665_v24  ;;  %v5280_v49 = vmul.f32 %v11585_v41, %v5244_v39  ;;  %v5043_v22 = vsel %vm11765_vm14, %v11616_v14, %v5039_v6 }
 0x4b0   : > { %v5187_v0 = vsub.f32 1.0, %v5186_v35  ;;  %vm5055_vm0 = vweird.f32 %v11665_v24  ;;  %v5196_v38 = vand.u32 2147483648, %v11712_v62  ;;  %v5396_v5 = vadd.f32 %v11649_v20, %v5364_v51 }
 0x4b1   : > { %v4781_v63 = vmul.f32 %v11449_v54, %v11353_v60  ;;  %v5053_v48 = vmul.f32 %v11718_v31, %v5052_v3  ;;  %vm5191_vm1 = vweird.f32 %v7898_v30  ;;  %v5194_v7 = vand.u32 2147483647, %v11712_v62  ;;  %5341 = vadd.xlane.f32.xlu0 %v5280_v49 }
 0x4b2   : > { %v5188_v17 = vmul.f32 %v7898_v30, %v5187_v0  ;;  %v5314_v52 = vpop.xlane.xlu2 %5313  ;;  %v7900_v42 = vpop.eup %7899  ;;  %vm5056_vm2 = vweird.f32 %v11718_v31  ;;  %v5257_v14 = vmul.f32 %v11585_v41, %v11544_v53  ;;  %v4842_v34 = vsub.f32 1.0, %v4841_v1 }
 0x4b3   : > { %v5365_v6 = vmul.f32 %v5314_v52, %v11426_v45  ;;  %v5048_v51 = vsel %vm11732_vm11, %v5047_v8, %v5043_v22  ;;  %vm5190_vm4 = vweird.f32 %v11712_v62  ;;  %v5201_v3 = vmul.f32 %v7900_v42, %v11738_v26  ;;  %vm11801_vm3 = vmor %vm5055_vm0, %vm5056_vm2 }
 0x4b4   : > { %v5189_v39 = vadd.f32 %v7898_v30, %v5188_v17  ;;  %vm5192_vm5 = vmor %vm5190_vm4, %vm5191_vm1  ;;  %v5197_v35 = vor.u32 1.1754944e-38, %v5196_v38  ;;  %v5428_v44 = vpack.c.bf16 %v5396_v5, %v5396_v5  ;;  %v4782_v49 = vsub.f32 1.0, %v4781_v63 }
 0x4b5   : > { %5295 = vadd.xlane.f32.xlu2 %v5257_v14  ;;  %v5397_v0 = vadd.f32 %v11649_v20, %v5365_v6  ;;  %v5054_v53 = vadd.f32 %v11718_v31, %v5053_v48  ;;  %vm5195_vm6 = vcmp.eq.f32.partialorder %v5194_v7, 8.507059e+37  ;;  %v5202_v45 = vsub.f32 1.0, %v5201_v3 }
 0x4b6   : > { %v5193_v19 = vsel %vm5192_vm5, %v7898_v30, %v5189_v39  ;;  %v5211_v25 = vand.u32 2147483648, %v11738_v26  ;;  %v4843_v62 = vmul.f32 %v11573_v28, %v4842_v34  ;;  %vm5206_vm7 = vweird.f32 %v7900_v42 }
 0x4b7   : > { %v5198_v1 = vsel %vm5195_vm6, %v5197_v35, %v5193_v19  ;;  %v5429_v8 = vpack.c.bf16 %v5397_v0, %v5397_v0  ;;  %v5203_v17 = vmul.f32 %v7900_v42, %v5202_v45  ;;  %v5209_v38 = vand.u32 2147483647, %v11738_v26 }
 0x4b8   : > { %v5245_v22 = vmul.f32 %v5198_v1, %v11645_v43  ;;  %v5235_v5 = vmul.f32 %v5048_v51, %v11474_v46  ;;  %v5492_v63 = vunpack.c.l.b16 %v5428_v44  ;;  %v4783_v30 = vmul.f32 %v11449_v54, %v4782_v49  ;;  %v13666_v49 = vld [vmem:[#allocation39_spill] sm:$0xff] }
 0x4b9   : > { %v5493_v52 = vunpack.c.l.b16 %v5429_v8  ;;  %v5204_v48 = vadd.f32 %v7900_v42, %v5203_v17  ;;  %vm5205_vm15 = vweird.f32 %v11738_v26  ;;  %v4791_v7 = vand.u32 2147483648, %v11353_v60 }
 0x4ba   : > { %v5281_v43 = vmul.f32 %v11585_v41, %v5245_v22  ;;  %vm4801_vm8 = vweird.f32 %v11374_v12  ;;  %v5058_v46 = vsel %vm11801_vm3, %v11718_v31, %v5054_v53  ;;  %vm5207_vm9 = vmor %vm5205_vm15, %vm5206_vm7  ;;  %v5212_v14 = vor.u32 1.1754944e-38, %v5211_v25 }
 0x4bb   : > { %v5517_v6 = vpack.c.b16 %v5493_v52, %v5492_v63  ;;  %v5270_v34 = vmul.f32 %v11585_v41, %v5234_v55  ;;  %vm5010_vm10 = vweird.f32 %v11531_v37  ;;  %v5208_v51 = vsel %vm5207_vm9, %v7900_v42, %v5204_v48  ;;  %v13658_v63 = vld [vmem:[#allocation80_spill] sm:$0xff] }
 0x4bc   : > { %vm5210_vm11 = vcmp.eq.f32.partialorder %v5209_v38, 8.507059e+37  ;;  %5343 = vadd.xlane.f32.xlu0 %v5281_v43  ;;  %v4844_v26 = vadd.f32 %v11573_v28, %v4843_v62  ;;  %vm4846_vm12 = vweird.f32 %v11573_v28  ;;  %v4851_v3 = vand.u32 2147483648, %v11515_v27 }
 0x4bd   : > { %v5213_v39 = vsel %vm5210_vm11, %v5212_v14, %v5208_v51  ;;  %5321 = vadd.xlane.f32.xlu2 %v5270_v34  ;;  %5616 = vmatpush.bf16.msrb.mxu1 %v5517_v6  ;;  %v4784_v31 = vadd.f32 %v11449_v54, %v4783_v30  ;;  %vm4786_vm13 = vweird.f32 %v11449_v54  ;;  %vm4845_vm14 = vweird.f32 %v11515_v27  ;;  %v13659_v30 = vld [vmem:[#allocation41_spill] sm:$0xff] }
 0x4be   : > { %v5246_v55 = vmul.f32 %v5213_v39, %v11695_v4  ;;  %v4849_v42 = vand.u32 2147483647, %v11515_v27  ;;  %v4811_v35 = vmul.f32 %v11560_v18, %v11485_v40  ;;  %v5231_v44 = vmul.f32 %v11624_v29, %v11248_v23  ;;  %vm11828_vm0 = vmor %vm4845_vm14, %vm4846_vm12 }
 0x4bf   : > { %v5062_v0 = vor.u32 1.1754944e-38, %v5061_v16  ;;  %vm4785_vm1 = vweird.f32 %v11353_v60  ;;  %v4789_v4 = vand.u32 2147483647, %v11353_v60  ;;  %vm5011_vm2 = vweird.f32 %v11579_v33 }
 0x4c0   : > { %vm5060_vm4 = vcmp.eq.f32.partialorder %v5059_v61, 8.507059e+37  ;;  %v5282_v27 = vmul.f32 %v11585_v41, %v5246_v55  ;;  %v4848_v23 = vsel %vm11828_vm0, %v11573_v28, %v4844_v26  ;;  %vm11841_vm5 = vmor %vm4785_vm1, %vm4786_vm13  ;;  %v5009_v16 = vadd.f32 %v11579_v33, %v11663_v10 }
 0x4c1   : > { %v5063_v53 = vsel %vm5060_vm4, %v5062_v0, %v5058_v46  ;;  %5617 = vmatpush.bf16.msrb.mxu1 %v5516_v11  ;;  %v4852_v60 = vor.u32 1.1754944e-38, %v4851_v3  ;;  %v4788_v24 = vsel %vm11841_vm5, %v11449_v54, %v4784_v31  ;;  %v5271_v28 = vmul.f32 %v11585_v41, %v5235_v5  ;;  %vm11868_vm15 = vmor %vm5010_vm10, %vm5011_vm2  ;;  %v13657_v5 = vld [vmem:[#allocation78_spill] sm:$0xff] }
 0x4c2   : > { %5345 = vadd.xlane.f32.xlu1 %v5282_v27  ;;  %vm4850_vm6 = vcmp.eq.f32.partialorder %v4849_v42, 8.507059e+37  ;;  %v4792_v61 = vor.u32 1.1754944e-38, %v4791_v7  ;;  %v4812_v45 = vsub.f32 1.0, %v4811_v35  ;;  %v5016_v1 = vand.u32 2147483648, %v11531_v37  ;;  %v13662_v7 = vld [vmem:[#allocation43_spill] sm:$0xff] }
 0x4c3   : > { %v5267_v10 = vmul.f32 %v11585_v41, %v5231_v44  ;;  %v4853_v25 = vsel %vm4850_vm6, %v4852_v60, %v4848_v23  ;;  %vm4790_vm7 = vcmp.eq.f32.partialorder %v4789_v4, 8.507059e+37  ;;  %v4992_v2 = vsub.f32 1.0, %v11620_v21  ;;  %v13665_v44 = vld [vmem:[#allocation62_spill] sm:$0xff] }
 0x4c4   : > { %v5014_v13 = vand.u32 2147483647, %v11531_v37  ;;  %v5236_v11 = vmul.f32 %v5063_v53, %v11565_v9  ;;  %5323 = vadd.xlane.f32.xlu0 %v5271_v28  ;;  %v4793_v54 = vsel %vm4790_vm7, %v4792_v61, %v4788_v24  ;;  %7901 = vrcp.f32 %v11465_v59  ;;  %v13656_v37 = vld [vmem:[#allocation81_spill] sm:$0xff] }
 0x4c5   : > { %v4766_v8 = vmul.f32 %v11428_v50, %v11308_v56  ;;  %vm4800_vm3 = vweird.f32 %v11269_v58  ;;  %v4804_v62 = vand.u32 2147483647, %v11269_v58  ;;  %5315 = vadd.xlane.f32.xlu2 %v5267_v10  ;;  %5618 = vmatpush.bf16.msrb.mxu1 %v5515_v15  ;;  %v5013_v22 = vsel %vm11868_vm15, %v11579_v33, %v5009_v16  ;;  %v13660_v15 = vld [vmem:[#allocation76_spill] sm:$0xff]  ;;  %v13670_v9 = vld [vmem:[#allocation37_spill] sm:$0xff] }
 0x4c6   : > { %vm11877_vm9 = vmor %vm4800_vm3, %vm4801_vm8  ;;  %v5222_v17 = vmul.f32 %v4853_v25, %v13656_v37  ;;  %v4813_v38 = vmul.f32 %v11560_v18, %v4812_v45  ;;  %v4736_v52 = vmul.f32 %v13658_v63, %v13657_v5  ;;  %v5017_v36 = vor.u32 1.1754944e-38, %v5016_v1 }
 0x4c7   : > { %v4803_v32 = vsel %vm11877_vm9, %v11374_v12, %v13659_v30  ;;  %v5218_v19 = vmul.f32 %v4793_v54, %v13660_v15  ;;  %v13661_v48 = vand.u32 2147483648, %v11269_v58  ;;  %v4993_v33 = vmul.f32 %v13662_v7, %v4992_v2  ;;  %v13671_v15 = vld [vmem:[#allocation65_spill] sm:$0xff] }
 0x4c8   : > { %vm5015_vm8 = vcmp.eq.f32.partialorder %v5014_v13, 8.507059e+37  ;;  %v5272_v46 = vmul.f32 %v11585_v41, %v5236_v11  ;;  %v4767_v14 = vsub.f32 1.0, %v4766_v8  ;;  %vm4805_vm10 = vcmp.eq.f32.partialorder %v4804_v62, 8.507059e+37  ;;  %v13669_v11 = vld [vmem:[#allocation79_spill] sm:$0xff] }
 0x4c9   : > { %v4807_v43 = vor.u32 1.1754944e-38, %v13661_v48  ;;  %v5018_v6 = vsel %vm5015_vm8, %v5017_v36, %v5013_v22  ;;  %v13663_v34 = vpack.c.b16 %v11736_v57, %v11741_v47  ;;  %v5258_v12 = vmul.f32 %v11585_v41, %v5222_v17  ;;  %v13664_v47 = vld [vmem:[#allocation36_spill] sm:$0xff] }
 0x4ca   : > { %5325 = vadd.xlane.f32.xlu1 %v5272_v46  ;;  %v4814_v26 = vadd.f32 %v11560_v18, %v4813_v38  ;;  %vm4816_vm11 = vweird.f32 %v11560_v18  ;;  %v11903_v58 = vpop.eup %7901  ;;  %v4737_v39 = vsub.f32 1.0, %v4736_v52  ;;  %vm4996_vm12 = vweird.f32 %v13662_v7  ;;  %v13672_v48 = vld [vmem:[#allocation60_spill] sm:$0xff] }
 0x4cb   : > { %5619 = vmatpush.bf16.msrb.mxu1 %v13663_v34  ;;  %v4808_v51 = vsel %vm4805_vm10, %v4807_v43, %v4803_v32  ;;  %v5254_v3 = vmul.f32 %v11585_v41, %v5218_v19  ;;  %v4821_v31 = vand.u32 2147483648, %v11485_v40  ;;  %v4994_v57 = vadd.f32 %v13662_v7, %v4993_v33  ;;  %v13673_v34 = vld [vmem:[#allocation75_spill] sm:$0xff] }
 0x4cc   : > { %v5233_v55 = vmul.f32 %v5018_v6, %v13664_v47  ;;  %5297 = vadd.xlane.f32.xlu0 %v5258_v12  ;;  %vm4815_vm13 = vweird.f32 %v11485_v40  ;;  %v4819_v42 = vand.u32 2147483647, %v11485_v40  ;;  %v4768_v35 = vmul.f32 %v11428_v50, %v4767_v14  ;;  %v13689_v40 = vld [vmem:[#allocation40_spill] sm:$0xff] }
 0x4cd   : > { %v5219_v0 = vmul.f32 %v4808_v51, %v13665_v44  ;;  %v5001_v4 = vand.u32 2147483648, %v13666_v49  ;;  %5289 = vadd.xlane.f32.xlu2 %v5254_v3  ;;  %vm4817_vm14 = vmor %vm4815_vm13, %vm4816_vm11  ;;  %vm4995_vm0 = vweird.f32 %v13666_v49  ;;  %v4999_v27 = vand.u32 2147483647, %v13666_v49  ;;  %v13685_v44 = vld [vmem:[#allocation72_spill] sm:$0xff] }
 0x4ce   : > { %v4818_v23 = vsel %vm4817_vm14, %v11560_v18, %v4814_v26  ;;  %v4751_v29 = vmul.f32 %v11903_v58, %v11465_v59  ;;  %vm11924_vm1 = vmor %vm4995_vm0, %vm4996_vm12  ;;  %v4822_v16 = vor.u32 1.1754944e-38, %v4821_v31  ;;  %v4738_v53 = vmul.f32 %v13658_v63, %v4737_v39  ;;  %v13676_v39 = vld [vmem:[#allocation71_spill] sm:$0xff] }
 0x4cf   : > { %v4998_v60 = vsel %vm11924_vm1, %v13662_v7, %v4994_v57  ;;  %v5269_v24 = vmul.f32 %v11585_v41, %v5233_v55  ;;  %vm4820_vm2 = vcmp.eq.f32.partialorder %v4819_v42, 8.507059e+37  ;;  %vm4771_vm4 = vweird.f32 %v11428_v50  ;;  %v13680_v57 = vld [vmem:[#allocation67_spill] sm:$0xff]  ;;  %v13682_v55 = vld [vmem:[#allocation69_spill] sm:$0xff] }
 0x4d0   : > { %v5002_v18 = vor.u32 1.1754944e-38, %v5001_v4  ;;  %v4823_v28 = vsel %vm4820_vm2, %v4822_v16, %v4818_v23  ;;  %v4769_v61 = vadd.f32 %v11428_v50, %v4768_v35  ;;  %vm5000_vm5 = vcmp.eq.f32.partialorder %v4999_v27, 8.507059e+37  ;;  %v13687_v4 = vld [vmem:[#allocation73_spill] sm:$0xff]  ;;  %v13688_v23 = vld [vmem:[#allocation82_spill] sm:$0xff] }
 0x4d1   : > { %v5255_v45 = vmul.f32 %v11585_v41, %v5219_v0  ;;  %v4752_v1 = vsub.f32 1.0, %v4751_v29  ;;  %vm4741_vm6 = vweird.f32 %v13658_v63  ;;  %v4776_v10 = vand.u32 2147483648, %v11308_v56 }
 0x4d2   : > { %5319 = vadd.xlane.f32.xlu1 %v5269_v24  ;;  %v5003_v25 = vsel %vm5000_vm5, %v5002_v18, %v4998_v60  ;;  %v4739_v2 = vadd.f32 %v13658_v63, %v4738_v53  ;;  %vm4770_vm7 = vweird.f32 %v11308_v56  ;;  %v4774_v13 = vand.u32 2147483647, %v11308_v56  ;;  %v13691_v24 = vld [vmem:[#allocation77_spill] sm:$0xff] }
 0x4d3   : > { %v5220_v54 = vmul.f32 %v4823_v28, %v13669_v11  ;;  %vm4740_vm3 = vweird.f32 %v13657_v5  ;;  %v4746_v8 = vand.u32 2147483648, %v13657_v5  ;;  %vm4772_vm15 = vmor %vm4770_vm7, %vm4771_vm4  ;;  %v4744_v62 = vand.u32 2147483647, %v13657_v5  ;;  %v13692_v28 = vld [vmem:[#allocation46_spill] sm:$0xff] }
 0x4d4   : > { %5291 = vadd.xlane.f32.xlu0 %v5255_v45  ;;  %v4773_v21 = vsel %vm4772_vm15, %v11428_v50, %v4769_v61  ;;  %v5232_v22 = vmul.f32 %v5003_v25, %v13670_v9  ;;  %v4753_v37 = vmul.f32 %v11903_v58, %v4752_v1  ;;  %vm4742_vm9 = vmor %vm4740_vm3, %vm4741_vm6  ;;  %v4777_v56 = vor.u32 1.1754944e-38, %v4776_v10  ;;  %v13694_v1 = vld [vmem:[#allocation56_spill] sm:$0xff] }
 0x4d5   : > { %v4743_v17 = vsel %vm4742_vm9, %v13658_v63, %v4739_v2  ;;  %vm4775_vm8 = vcmp.eq.f32.partialorder %v4774_v13, 8.507059e+37  ;;  %v5256_v38 = vmul.f32 %v11585_v41, %v5220_v54  ;;  %v4747_v52 = vor.u32 1.1754944e-38, %v4746_v8  ;;  %v13696_v13 = vld [vmem:[#allocation44_spill] sm:$0xff] }
 0x4d6   : > { %v4778_v30 = vsel %vm4775_vm8, %v4777_v56, %v4773_v21  ;;  %vm4745_vm10 = vcmp.eq.f32.partialorder %v4744_v62, 8.507059e+37  ;;  %v5268_v5 = vmul.f32 %v11585_v41, %v5232_v22  ;;  %v4754_v50 = vadd.f32 %v11903_v58, %v4753_v37  ;;  %v13699_v21 = vld [vmem:[#allocation84_spill] sm:$0xff]  ;;  %v13700_v37 = vld [vmem:[#allocation74_spill] sm:$0xff] }
 0x4d7   : > { %vm4756_vm11 = vweird.f32 %v11903_v58  ;;  %v4748_v32 = vsel %vm4745_vm10, %v4747_v52, %v4743_v17  ;;  %v4761_v36 = vand.u32 2147483648, %v11465_v59  ;;  %v5217_v19 = vmul.f32 %v4778_v30, %v13671_v15 }
 0x4d8   : > { %vm4755_vm12 = vweird.f32 %v11465_v59  ;;  %v4759_v63 = vand.u32 2147483647, %v11465_v59  ;;  %v5215_v43 = vmul.f32 %v4748_v32, %v13672_v48  ;;  %v13674_v59 = vld [vmem:[#allocation66_spill] sm:$0xff]  ;;  %v11971_v3 = vadd.f32 1e-30, %v13676_v39  ;;  %v13703_v32 = vld [vmem:[#allocation83_spill] sm:$0xff] }
 0x4d9   : > { %vm4757_vm13 = vmor %vm4755_vm12, %vm4756_vm11  ;;  %v4762_v33 = vor.u32 1.1754944e-38, %v4761_v36  ;;  %v5253_v46 = vmul.f32 %v11585_v41, %v5217_v19  ;;  %v11968_v26 = vadd.f32 1e-30, %v13674_v59  ;;  %v11978_v47 = vadd.f32 1e-30, %v13680_v57  ;;  %v13705_v19 = vld [vmem:[#allocation50_spill] sm:$0xff] }
 0x4da   : > { %5293 = vadd.xlane.f32.xlu1 %v5256_v38  ;;  %v4758_v7 = vsel %vm4757_vm13, %v11903_v58, %v4754_v50  ;;  %vm4760_vm14 = vcmp.eq.f32.partialorder %v4759_v63, 8.507059e+37  ;;  %v5251_v6 = vmul.f32 %v11585_v41, %v5215_v43  ;;  %13677 = vst [vmem:[#allocation47_spill] sm:$0xff] %v11971_v3  ;;  %v13678_v58 = vld [vmem:[#allocation63_spill] sm:$0xff]  ;;  %v11982_v42 = vadd.f32 1e-30, %v13682_v55 }
 0x4db   : > { %v4763_v14 = vsel %vm4760_vm14, %v4762_v33, %v4758_v7  ;;  %13675 = vst [vmem:[#allocation45_spill] sm:$0xff] %v11968_v26  ;;  %7903 = vrsqrt.f32 %v11968_v26  ;;  %v11975_v31 = vadd.f32 1e-30, %v13678_v58  ;;  %v11989_v0 = vadd.f32 1e-30, %v13685_v44  ;;  %v13706_v7 = vld [vmem:[#allocation42_spill] sm:$0xff] }
 0x4dc   : > { %5317 = vadd.xlane.f32.xlu0 %v5268_v5  ;;  %v5216_v51 = vmul.f32 %v4763_v14, %v13673_v34  ;;  %13681 = vst [vmem:[#allocation11_spill] sm:$0xff] %v11978_v47  ;;  %7905 = vrsqrt.f32 %v11971_v3  ;;  %v11995_v27 = vadd.f32 1e-30, %v13687_v4  ;;  %v11999_v29 = vadd.f32 1e-30, %v13688_v23 }
 0x4dd   : > { %13679 = vst [vmem:[#allocation49_spill] sm:$0xff] %v11975_v31  ;;  %7907 = vrsqrt.f32 %v11975_v31  ;;  %v12003_v16 = vadd.f32 1e-30, %v13689_v40  ;;  %v12011_v18 = vadd.f32 1e-30, %v13691_v24  ;;  %v13711_v24 = vld [vmem:[#allocation38_spill] sm:$0xff] }
 0x4de   : > { %v5252_v12 = vmul.f32 %v11585_v41, %v5216_v51  ;;  %v13683_v41 = vld [vmem:[#allocation70_spill] sm:$0xff]  ;;  %7909 = vrsqrt.f32 %v11978_v47  ;;  %v12015_v61 = vadd.f32 1e-30, %v13692_v28  ;;  %v12021_v10 = vadd.f32 1e-30, %v13694_v1 }
 0x4df   : > { %v11985_v35 = vadd.f32 1e-30, %v13683_v41  ;;  %7911 = vrsqrt.f32 %v11982_v42  ;;  %v12029_v11 = vadd.f32 1e-30, %v13696_v13  ;;  %v12038_v9 = vadd.f32 1e-30, %v13699_v21 }
 0x4e0   : > { %v12044_v56 = vadd.f32 1e-30, %v13700_v37  ;;  %v12060_v36 = vadd.f32 1e-30, %v13703_v32  ;;  %v12066_v63 = vadd.f32 1e-30, %v13705_v19  ;;  %vm2044_vm1 = vweird.f32 %v12015_v61 }
 0x4e1   : > { %13684 = vst [vmem:[#allocation81_spill] sm:$0xff] %v11985_v35  ;;  %v11991_v49 = vpop.eup %7903  ;;  %7913 = vrsqrt.f32 %v11985_v35  ;;  %v12074_v33 = vadd.f32 1e-30, %v13706_v7  ;;  %v12111_v28 = vadd.f32 1e-30, %v13711_v24  ;;  %v13713_v37 = vld [vmem:[#allocation48_spill] sm:$0xff]  ;;  %vm2064_vm4 = vweird.f32 %v12011_v18 }
 0x4e2   : > { %5287 = vadd.xlane.f32.xlu1 %v5253_v46  ;;  %13686 = vst [vmem:[#allocation78_spill] sm:$0xff] %v11991_v49  ;;  %v12005_v53 = vpop.eup %7905  ;;  %v1789_v60 = vmul.f32 %v11991_v49, %v11968_v26  ;;  %7915 = vrsqrt.f32 %v11989_v0  ;;  %v13716_v24 = vld [vmem:[#allocation52_spill] sm:$0xff]  ;;  %vm2054_vm3 = vweird.f32 %v12021_v10  ;;  %vm2034_vm9 = vweird.f32 %v12029_v11 }
 0x4e3   : > { %13690 = vst [vmem:[#allocation80_spill] sm:$0xff] %v12005_v53  ;;  %7917 = vrsqrt.f32 %v11995_v27  ;;  %v12017_v45 = vpop.eup %7907  ;;  %v1809_v2 = vmul.f32 %v12005_v53, %v11971_v3  ;;  %vm2014_vm8 = vweird.f32 %v12074_v33  ;;  %vm2024_vm11 = vweird.f32 %v12066_v63 }
 0x4e4   : > { %5283 = vadd.xlane.f32.xlu0 %v5251_v6  ;;  %13693 = vst [vmem:[#allocation41_spill] sm:$0xff] %v12017_v45  ;;  %7919 = vrsqrt.f32 %v11999_v29  ;;  %v12023_v25 = vpop.eup %7909  ;;  %v1790_v8 = vmul.f32 %v11991_v49, %v1789_v60  ;;  %v12099_v41 = vmul.f32 %v12017_v45, %v11975_v31 }
 0x4e5   : > { %13695 = vst [vmem:[#allocation76_spill] sm:$0xff] %v12023_v25  ;;  %7921 = vrsqrt.f32 %v12003_v16  ;;  %v12031_v54 = vpop.eup %7911  ;;  %v1810_v38 = vmul.f32 %v12005_v53, %v1809_v2  ;;  %v1819_v52 = vmul.f32 %v12023_v25, %v11978_v47 }
 0x4e6   : > { %13697 = vst [vmem:[#allocation43_spill] sm:$0xff] %v12031_v54  ;;  %7923 = vrsqrt.f32 %v12011_v18  ;;  %v12055_v5 = vmul.f32 0.5, %v1790_v8  ;;  %v1829_v50 = vmul.f32 %v12031_v54, %v11982_v42 }
 0x4e7   : > { %v12035_v62 = vpop.eup %7913  ;;  %7925 = vrsqrt.f32 %v12015_v61  ;;  %13704 = vst [vmem:[#allocation79_spill] sm:$0xff] %v12060_v36  ;;  %v12078_v14 = vmul.f32 0.5, %v1810_v38  ;;  %v1820_v6 = vmul.f32 %v12023_v25, %v1819_v52  ;;  %v12124_v38 = vadd.f32 1e-30, %v13713_v37 }
 0x4e8   : > { %13698 = vst [vmem:[#allocation36_spill] sm:$0xff] %v12035_v62  ;;  %v12041_v22 = vpop.eup %7915  ;;  %7927 = vrsqrt.f32 %v12021_v10  ;;  %v1839_v43 = vmul.f32 %v12035_v62, %v11985_v35  ;;  %v12138_v37 = vadd.f32 1e-30, %v13716_v24  ;;  %v13718_v24 = vld [vmem:[#allocation54_spill] sm:$0xff] }
 0x4e9   : > { %v12047_v17 = vpop.eup %7917  ;;  %7929 = vrsqrt.f32 %v12029_v11  ;;  %13702 = vst [vmem:[#allocation39_spill] sm:$0xff] %v12055_v5  ;;  %v1849_v59 = vmul.f32 %v12041_v22, %v11989_v0  ;;  %v12108_v60 = vmul.f32 0.5, %v1820_v6  ;;  %v12155_v31 = vadd.f32 1e-30, %v13718_v24 }
 0x4ea   : > { %5285 = vadd.xlane.f32.xlu1 %v5252_v12  ;;  %v12053_v30 = vpop.eup %7919  ;;  %7931 = vrsqrt.f32 %v12038_v9  ;;  %13707 = vst [vmem:[#allocation37_spill] sm:$0xff] %v12078_v14  ;;  %v1830_v12 = vmul.f32 %v12031_v54, %v1829_v50  ;;  %v1859_v58 = vmul.f32 %v12047_v17, %v11995_v27  ;;  %v1840_v44 = vmul.f32 %v12035_v62, %v1839_v43 }
 0x4eb   : > { %13701 = vst [vmem:[#allocation62_spill] sm:$0xff] %v12053_v30  ;;  %v12062_v15 = vpop.eup %7921  ;;  %7933 = vrsqrt.f32 %v12044_v56  ;;  %v1949_v57 = vmul.f32 %v12053_v30, %v11999_v29  ;;  %v1850_v52 = vmul.f32 %v12041_v22, %v1849_v59 }
 0x4ec   : > { %v12068_v48 = vpop.eup %7923  ;;  %7935 = vrsqrt.f32 %v12060_v36  ;;  %13708 = vst [vmem:[#allocation65_spill] sm:$0xff] %v12099_v41  ;;  %v12117_v13 = vmul.f32 0.5, %v1830_v12  ;;  %v1989_v8 = vmul.f32 %v12062_v15, %v12003_v16  ;;  %v1860_v50 = vmul.f32 %v12047_v17, %v1859_v58 }
 0x4ed   : > { %v12076_v46 = vpop.eup %7925  ;;  %v2059_v55 = vmul.f32 %v12068_v48, %v12011_v18  ;;  %7937 = vrsqrt.f32 %v12066_v63  ;;  %13710 = vst [vmem:[#allocation75_spill] sm:$0xff] %v12108_v60  ;;  %v1950_v32 = vmul.f32 %v12053_v30, %v1949_v57  ;;  %v12132_v7 = vmul.f32 0.5, %v1840_v44  ;;  %v13717_v57 = vld [vmem:[#allocation58_spill] sm:$0xff] }
 0x4ee   : > { %v12081_v34 = vpop.eup %7927  ;;  %7939 = vrsqrt.f32 %v12074_v33  ;;  %v2039_v4 = vmul.f32 %v12076_v46, %v12015_v61  ;;  %13712 = vst [vmem:[#allocation66_spill] sm:$0xff] %v12117_v13  ;;  %v1990_v40 = vmul.f32 %v12062_v15, %v1989_v8  ;;  %v12157_v26 = vmul.f32 0.5, %v1850_v52  ;;  %v13728_v61 = vld [vmem:[#allocation22_spill] sm:$0xff] }
 0x4ef   : > { %v12088_v39 = vpop.eup %7929  ;;  %v2049_v1 = vmul.f32 %v12081_v34, %v12021_v10  ;;  %v2060_v19 = vmul.f32 %v12068_v48, %v2059_v55  ;;  %13715 = vst [vmem:[#allocation63_spill] sm:$0xff] %v12132_v7  ;;  %7941 = vrsqrt.f32 %v12111_v28  ;;  %v12147_v55 = vadd.f32 1e-30, %v13717_v57 }
 0x4f0   : > { %v12105_v23 = vpop.eup %7931  ;;  %v2029_v21 = vmul.f32 %v12088_v39, %v12029_v11  ;;  %v2040_v12 = vmul.f32 %v12076_v46, %v2039_v4  ;;  %7943 = vrsqrt.f32 %v12124_v38  ;;  %v12159_v49 = vmul.f32 0.5, %v1860_v50 }
 0x4f1   : > { %13709 = vst [vmem:[#allocation60_spill] sm:$0xff] %v12105_v23  ;;  %v12115_v2 = vpop.eup %7933  ;;  %v1969_v6 = vmul.f32 %v12105_v23, %v12038_v9  ;;  %v2050_v58 = vmul.f32 %v12081_v34, %v2049_v1  ;;  %v12161_v5 = vmul.f32 0.5, %v1950_v32  ;;  %v2061_v1 = vmul.f32 0.5, %v2060_v19 }
 0x4f2   : > { %v12130_v43 = vpop.eup %7935  ;;  %v1979_v59 = vmul.f32 %v12115_v2, %v12044_v56  ;;  %v2030_v4 = vmul.f32 %v12088_v39, %v2029_v21  ;;  %v2041_v53 = vmul.f32 0.5, %v2040_v12  ;;  %7945 = vrsqrt.f32 %v12138_v37 }
 0x4f3   : > { %13714 = vst [vmem:[#allocation71_spill] sm:$0xff] %v12130_v43  ;;  %v12140_v51 = vpop.eup %7937  ;;  %v1959_v57 = vmul.f32 %v12130_v43, %v12060_v36  ;;  %v1970_v21 = vmul.f32 %v12105_v23, %v1969_v6  ;;  %v2051_v24 = vmul.f32 0.5, %v2050_v58  ;;  %7947 = vrsqrt.f32 %v12147_v55 }
 0x4f4   : > { %v12149_v44 = vpop.eup %7939  ;;  %v2019_v8 = vmul.f32 %v12140_v51, %v12066_v63  ;;  %v1980_v50 = vmul.f32 %v12115_v2, %v1979_v59  ;;  %v12173_v32 = vmul.f32 0.5, %v1990_v40  ;;  %v2031_v19 = vmul.f32 0.5, %v2030_v4 }
 0x4f5   : > { %v2009_v52 = vmul.f32 %v12149_v44, %v12074_v33  ;;  %7949 = vrsqrt.f32 %v12155_v31  ;;  %v12176_v12 = vpop.eup %7941  ;;  %v2062_v3 = vsub.f32 1.5, %v2061_v1  ;;  %v2042_v40 = vsub.f32 1.5, %v2041_v53 }
 0x4f6   : > { %v12181_v45 = vpop.eup %7943  ;;  %v2020_v4 = vmul.f32 %v12140_v51, %v2019_v8  ;;  %v12188_v47 = vmul.f32 %v12130_v43, %v1959_v57  ;;  %v2052_v36 = vsub.f32 1.5, %v2051_v24  ;;  %v12195_v6 = vmul.f32 0.5, %v1970_v21  ;;  %v12200_v8 = vpop.xlane.xlu2 %5327 }
 0x4f7   : > { %v2010_v14 = vmul.f32 %v12149_v44, %v2009_v52  ;;  %v12197_v58 = vmul.f32 0.5, %v1980_v50  ;;  %v2032_v59 = vsub.f32 1.5, %v2031_v19  ;;  %v1999_v57 = vmul.f32 %v12176_v12, %v12111_v28  ;;  %v12208_v24 = vpop.xlane.xlu0 %5329 }
 0x4f8   : > { %v12193_v1 = vpop.eup %7945  ;;  %v2089_v52 = vmul.f32 %v12181_v45, %v12124_v38  ;;  %v2063_v21 = vmul.f32 %v12068_v48, %v2062_v3  ;;  %vm2065_vm0 = vweird.f32 %v12068_v48  ;;  %v2021_v19 = vmul.f32 0.5, %v2020_v4 }
 0x4f9   : > { %v12202_v41 = vpop.eup %7947  ;;  %v2043_v53 = vmul.f32 %v12076_v46, %v2042_v40  ;;  %vm2045_vm2 = vweird.f32 %v12076_v46  ;;  %v2011_v43 = vmul.f32 0.5, %v2010_v14  ;;  %v2053_v7 = vmul.f32 %v12081_v34, %v2052_v36  ;;  %vm12226_vm7 = vmor %vm2064_vm4, %vm2065_vm0 }
 0x4fa   : > { %vm2055_vm5 = vweird.f32 %v12081_v34  ;;  %v2069_v3 = vmul.f32 %v12193_v1, %v12138_v37  ;;  %v2079_v25 = vmul.f32 %v12202_v41, %v12147_v55  ;;  %v2033_v60 = vmul.f32 %v12088_v39, %v2032_v59  ;;  %vm12236_vm15 = vmor %vm2044_vm1, %vm2045_vm2 }
 0x4fb   : > { %v12212_v50 = vpop.eup %7949  ;;  %vm2035_vm6 = vweird.f32 %v12088_v39  ;;  %v2090_v18 = vmul.f32 %v12181_v45, %v2089_v52  ;;  %v2067_v59 = vsel %vm12226_vm7, %v12068_v48, %v2063_v21  ;;  %v2022_v4 = vsub.f32 1.5, %v2021_v19  ;;  %vm12250_vm10 = vmor %vm2054_vm3, %vm2055_vm5  ;;  %v13727_v19 = vld [vmem:[#allocation25_spill] sm:$0xff] }
 0x4fc   : > { %v2099_v36 = vmul.f32 %v12212_v50, %v12155_v31  ;;  %v2047_v10 = vsel %vm12236_vm15, %v12076_v46, %v2043_v53  ;;  %v2000_v52 = vmul.f32 %v12176_v12, %v1999_v57  ;;  %v2012_v35 = vsub.f32 1.5, %v2011_v43  ;;  %vm12258_vm12 = vmor %vm2034_vm9, %vm2035_vm6 }
 0x4fd   : > { %v12191_v62 = vpop.xlane.xlu1 %5331  ;;  %v2057_v48 = vsel %vm12250_vm10, %v12081_v34, %v2053_v7  ;;  %v2070_v53 = vmul.f32 %v12193_v1, %v2069_v3  ;;  %v2080_v21 = vmul.f32 %v12202_v41, %v2079_v25  ;;  %v2037_v43 = vsel %vm12258_vm12, %v12088_v39, %v2033_v60  ;;  %v13729_v25 = vld [vmem:[#allocation23_spill] sm:$0xff]  ;;  %v13730_v60 = vld [vmem:[#allocation21_spill] sm:$0xff] }
 0x4fe   : > { %v2135_v40 = vmul.f32 %v2067_v59, %v13727_v19  ;;  %v2091_v14 = vmul.f32 0.5, %v2090_v18  ;;  %v2100_v54 = vmul.f32 %v12212_v50, %v2099_v36  ;;  %vm2015_vm13 = vweird.f32 %v12149_v44  ;;  %v1383_v36 = vld [vmem:[%s869_s26] sm:$0x3]  ;;  %s13835_s26 = sld [smem:[#allocation85_spill]] (!%p7187_p6) }
 0x4ff   : > { %v2133_v34 = vmul.f32 %v2047_v10, %v13728_v61  ;;  %v2023_v3 = vmul.f32 %v12140_v51, %v2022_v4  ;;  %vm2025_vm14 = vweird.f32 %v12140_v51  ;;  %v2134_v13 = vmul.f32 %v2057_v48, %v13729_v25  ;;  %vm12305_vm1 = vmor %vm2014_vm8, %vm2015_vm13 }
 0x500   : > { %v2013_v39 = vmul.f32 %v12149_v44, %v2012_v35  ;;  %v2132_v23 = vmul.f32 %v2037_v43, %v13730_v60  ;;  %v13731_v18 = vlaneseq  ;;  %v2071_v10 = vmul.f32 0.5, %v2070_v53  ;;  %vm12295_vm0 = vmor %vm2024_vm11, %vm2025_vm14 }
 0x501   : > { %v2081_v4 = vmul.f32 0.5, %v2080_v21  ;;  %v12287_v30 = vperm.slane %v1383_v36, 1  ;;  %v12289_v48 = vmul.f32 0.5, %v2000_v52  ;;  %vm2074_vm5 = vweird.f32 %v12138_v37 }
 0x502   : > { %v12280_v19 = vshrl.u32 %v13731_v18, 7  ;;  %v5374_v43 = vmul.f32 %v12191_v62, %v2132_v23  ;;  %v2092_v62 = vsub.f32 1.5, %v2091_v14  ;;  %v2017_v23 = vsel %vm12305_vm1, %v12149_v44, %v2013_v39  ;;  %v13739_v14 = vld [vmem:[#allocation68_spill] sm:$0xff] }
 0x503   : > { %v5334_v57 = vpop.xlane.xlu2 %5333  ;;  %v2072_v52 = vsub.f32 1.5, %v2071_v10  ;;  %v2082_v53 = vsub.f32 1.5, %v2081_v4  ;;  %vm2094_vm7 = vweird.f32 %v12124_v38  ;;  %v8116_v25 = vmov 1.0|1.0   ;;  %v5542_v38 = vld [vmem:[#allocation2 + $0x30] sm:$0xff] }
 0x504   : > { %v5375_v59 = vmul.f32 %v5334_v57, %v2133_v34  ;;  %v1376_v57 = vadd.s32 8, %v12280_v19  ;;  %vm1387_vm2 = vcmp.eq.s32.totalorder %v12280_v19, %v12287_v30  ;;  %vm1854_vm3 = vweird.f32 %v11989_v0 }
 0x505   : > { %vm2075_vm15 = vweird.f32 %v12193_v1  ;;  %vm2095_vm9 = vweird.f32 %v12181_v45  ;;  %v2093_v10 = vmul.f32 %v12181_v45, %v2092_v62  ;;  %v12343_v4 = vperm.slane %v1383_v36, 0 }
 0x506   : > { %v5407_v33 = vadd.f32 %v11649_v20, %v5375_v59  ;;  %vm1389_vm4 = vcmp.eq.s32.totalorder %v1376_v57, %v12287_v30  ;;  %vm1994_vm8 = vweird.f32 %v12003_v16  ;;  %v2083_v35 = vmul.f32 %v12202_v41, %v2082_v53  ;;  %vm12352_vm11 = vmor %vm2094_vm7, %vm2095_vm9 }
 0x507   : > { %vm12324_vm6 = vmpackc.low %vm1389_vm4, %vm1387_vm2  ;;  %vm2085_vm10 = vweird.f32 %v12202_v41  ;;  %vm1386_vm12 = vcmp.eq.s32.totalorder %v12280_v19, %v12343_v4  ;;  %vm1388_vm13 = vcmp.eq.s32.totalorder %v1376_v57, %v12343_v4  ;;  %vm2084_vm14 = vweird.f32 %v12147_v55 }
 0x508   : > { %7164 = vmatmul.msk.bf16.vlgmr.msra.gmra.mxu2 %vm12324_vm6, %v8116_v25  ;;  %v5439_v18 = vpack.c.bf16 %v5407_v33, %v5407_v33  ;;  %vm12368_vm1 = vmpackc.low %vm1388_vm13, %vm1386_vm12  ;;  %vm1995_vm4 = vweird.f32 %v12062_v15  ;;  %vm2105_vm7 = vweird.f32 %v12212_v50  ;;  %vm2104_vm9 = vweird.f32 %v12155_v31 }
 0x509   : > { %vm12379_vm2 = vmor %vm2074_vm5, %vm2075_vm15  ;;  %7156 = vmatmul.msk.bf16.vlgmr.msra.gmra.mxu1 %vm12368_vm1, %v8116_v25  ;;  %vm1984_vm15 = vweird.f32 %v12044_v56  ;;  %v2002_v0 = vsub.f32 1.5, %v12289_v48 }
 0x50a   : > { %v12373_v62 = vunpack.c.l.b16 %v5439_v18  ;;  %vm12397_vm5 = vmor %vm2084_vm14, %vm2085_vm10 }
 0x50b   : > { %vm12434_vm12 = vmor %vm2104_vm9, %vm2105_vm7  ;;  %vm1974_vm7 = vweird.f32 %v12038_v9  ;;  %v13807_v9 = vld [vmem:[#allocation65_spill] sm:$0xff] }
 0x50c   : > { %v5336_v7 = vpop.xlane.xlu0 %5335  ;;  %vm12449_vm14 = vmor %vm1994_vm8, %vm1995_vm4  ;;  %vm1985_vm8 = vweird.f32 %v12115_v2  ;;  %vm2005_vm4 = vweird.f32 %v12176_v12 }
 0x50d   : > { %v5376_v61 = vmul.f32 %v5336_v7, %v2134_v13  ;;  %v5406_v7 = vadd.f32 %v11649_v20, %v5374_v43  ;;  %vm12489_vm9 = vmor %vm1984_vm15, %vm1985_vm8 }
 0x50f   : > { %v5438_v13 = vpack.c.bf16 %v5406_v7, %v5406_v7 }
 0x511   : > { %v12407_v53 = vunpack.c.l.b16 %v5438_v13 }
 0x513   : > { %v5338_v46 = vpop.xlane.xlu1 %5337  ;;  %v5522_v18 = vpack.c.b16 %v12373_v62, %v12407_v53  ;;  %v13824_v62 = vld [vmem:[#allocation45_spill] sm:$0xff] }
 0x514   : > { %v5377_v11 = vmul.f32 %v5338_v46, %v2135_v40  ;;  %v12291_v46 = vmul.f32 0.5, %v2100_v54  ;;  %v2027_v54 = vsel %vm12295_vm0, %v12140_v51, %v2023_v3  ;;  %v5408_v51 = vadd.f32 %v11649_v20, %v5376_v61 }
 0x515   : > { %v2131_v34 = vmul.f32 %v2027_v54, %v13739_v14  ;;  %v13743_v54 = vsub.f32 1.5, %v12157_v26  ;;  %vm1855_vm0 = vweird.f32 %v12041_v22  ;;  %v2097_v26 = vsel %vm12352_vm11, %v12181_v45, %v2093_v10  ;;  %v13754_v10 = vld [vmem:[#allocation29_spill] sm:$0xff] }
 0x516   : > { %v5409_v63 = vadd.f32 %v11649_v20, %v5377_v11  ;;  %v2102_v44 = vsub.f32 1.5, %v12291_v46  ;;  %v13740_v11 = vld [vmem:[#allocation64_spill] sm:$0xff]  ;;  %v5440_v61 = vpack.c.bf16 %v5408_v51, %v5408_v51  ;;  %v2073_v46 = vmul.f32 %v12193_v1, %v2072_v52  ;;  %vm12424_vm10 = vmor %vm1854_vm3, %vm1855_vm0 }
 0x517   : > { %v2130_v39 = vmul.f32 %v2017_v23, %v13740_v11  ;;  %v5373_v59 = vmul.f32 %v12208_v24, %v2131_v34  ;;  %v13750_v45 = vsub.f32 1.5, %v12173_v32  ;;  %v13751_v34 = vld [vmem:[#allocation31_spill] sm:$0xff]  ;;  %v1377_v11 = vadd.s32 16, %v12280_v19 }
 0x518   : > { %v5441_v60 = vpack.c.bf16 %v5409_v63, %v5409_v63  ;;  %v12390_v57 = vunpack.c.l.b16 %v5440_v61  ;;  %v2077_v37 = vsel %vm12379_vm2, %v12193_v1, %v2073_v46  ;;  %v2087_v1 = vsel %vm12397_vm5, %v12202_v41, %v2083_v35  ;;  %v13757_v35 = vld [vmem:[#allocation27_spill] sm:$0xff] }
 0x519   : > { %v5372_v43 = vmul.f32 %v12200_v8, %v2130_v39  ;;  %v12365_v8 = vmul.f32 %v12041_v22, %v13743_v54  ;;  %v5405_v63 = vadd.f32 %v11649_v20, %v5373_v59  ;;  %v1993_v33 = vmul.f32 %v12062_v15, %v13750_v45  ;;  %v13764_v45 = vld [vmem:[#allocation59_spill] sm:$0xff] }
 0x51a   : > { %v12360_v36 = vunpack.c.l.b16 %v5441_v60  ;;  %v2103_v51 = vmul.f32 %v12212_v50, %v2102_v44  ;;  %v2138_v7 = vmul.f32 %v2097_v26, %v13751_v34  ;;  %v1378_v32 = vadd.s32 24, %v12280_v19 }
 0x51b   : > { %v5404_v52 = vadd.f32 %v11649_v20, %v5372_v43  ;;  %v1982_v60 = vsub.f32 1.5, %v12197_v58  ;;  %v5437_v59 = vpack.c.bf16 %v5405_v63, %v5405_v63  ;;  %vm1864_vm11 = vweird.f32 %v11995_v27  ;;  %v13777_v27 = vld [vmem:[#allocation66_spill] sm:$0xff] }
 0x51c   : > { %v5523_v39 = vpack.c.b16 %v12360_v36, %v12390_v57  ;;  %v2137_v61 = vmul.f32 %v2087_v1, %v13754_v10  ;;  %vm1391_vm3 = vcmp.eq.s32.totalorder %v1377_v11, %v12287_v30  ;;  %vm1393_vm13 = vcmp.eq.s32.totalorder %v1378_v32, %v12287_v30 }
 0x51d   : > { %v5436_v46 = vpack.c.bf16 %v5404_v52, %v5404_v52  ;;  %v2136_v43 = vmul.f32 %v2077_v37, %v13757_v35  ;;  %v2107_v13 = vsel %vm12434_vm12, %v12212_v50, %v2103_v51  ;;  %vm2004_vm0 = vweird.f32 %v12111_v28  ;;  %vm12462_vm2 = vmpackc.low %vm1393_vm13, %vm1391_vm3 }
 0x51e   : > { %v1857_v48 = vsel %vm12424_vm10, %v12041_v22, %v12365_v8  ;;  %v1997_v50 = vsel %vm12449_vm14, %v12062_v15, %v1993_v33  ;;  %v12466_v16 = vunpack.c.l.b16 %v5437_v59  ;;  %v13762_v26 = vsub.f32 1.5, %v12159_v49  ;;  %v13763_v8 = vld [vmem:[#allocation33_spill] sm:$0xff]  ;;  %7166 = vmatmul.msk.bf16.gmra.mxu2 %vm12462_vm2, %v8116_v25  ;;  %vm12503_vm15 = vmor %vm2004_vm0, %vm2005_vm4 }
 0x51f   : > { %v2139_v37 = vmul.f32 %v2107_v13, %v13763_v8  ;;  %vm1865_vm5 = vweird.f32 %v12047_v17  ;;  %v12478_v15 = vunpack.c.l.b16 %v5436_v46  ;;  %v2128_v33 = vmul.f32 %v1997_v50, %v13764_v45  ;;  %v13773_v46 = vld [vmem:[#allocation62_spill] sm:$0xff]  ;;  %v13779_v50 = vld [vmem:[#allocation43_spill] sm:$0xff]  ;;  %v13780_v8 = vld [vmem:[#allocation61_spill] sm:$0xff] }
 0x520   : > { %v12322_v21 = vpop.xlane.xlu2 %5339  ;;  %v1863_v22 = vmul.f32 %v12047_v17, %v13762_v26  ;;  %v2003_v49 = vmul.f32 %v12176_v12, %v2002_v0  ;;  %vm1390_vm10 = vcmp.eq.s32.totalorder %v1377_v11, %v12343_v4  ;;  %vm1392_vm12 = vcmp.eq.s32.totalorder %v1378_v32, %v12343_v4  ;;  %vm12533_vm8 = vmor %vm1864_vm11, %vm1865_vm5  ;;  %v13782_v45 = vld [vmem:[#allocation35_spill] sm:$0xff] }
 0x521   : > { %v5378_v55 = vmul.f32 %v12322_v21, %v2136_v43  ;;  %v1983_v21 = vmul.f32 %v12115_v2, %v1982_v60  ;;  %vm1834_vm3 = vweird.f32 %v11982_v42  ;;  %v1972_v34 = vsub.f32 1.5, %v12195_v6  ;;  %v13767_v60 = vld [vmem:[#allocation34_spill] sm:$0xff]  ;;  %vm12516_vm14 = vmpackc.low %vm1392_vm12, %vm1390_vm10 }
 0x522   : > { %v2114_v59 = vmul.f32 %v1857_v48, %v13767_v60  ;;  %v5521_v32 = vpack.c.b16 %v12466_v16, %v12478_v15  ;;  %vm1954_vm13 = vweird.f32 %v11999_v29  ;;  %v12511_v6 = vmul.f32 0.5, %v12188_v47  ;;  %7158 = vmatmul.msk.bf16.gmra.mxu1 %vm12516_vm14, %v8116_v25  ;;  %v13829_v16 = vld [vmem:[#allocation49_spill] sm:$0xff] }
 0x523   : > { %v13772_v0 = vsub.f32 1.5, %v12161_v5  ;;  %vm1955_vm0 = vweird.f32 %v13773_v46  ;;  %v2007_v47 = vsel %vm12503_vm15, %v12176_v12, %v2003_v49  ;;  %v1987_v5 = vsel %vm12489_vm9, %v12115_v2, %v1983_v21  ;;  %v13776_v12 = vld [vmem:[#allocation60_spill] sm:$0xff]  ;;  %v13783_v49 = vld [vmem:[#allocation81_spill] sm:$0xff] }
 0x524   : > { %v12332_v3 = vpop.xlane.xlu0 %5341  ;;  %v1867_v13 = vsel %vm12533_vm8, %v12047_v17, %v1863_v22  ;;  %v1973_v48 = vmul.f32 %v13776_v12, %v1972_v34  ;;  %vm1975_vm4 = vweird.f32 %v13776_v12  ;;  %v13781_v22 = vld [vmem:[#allocation57_spill] sm:$0xff]  ;;  %vm1835_vm11 = vweird.f32 %v13779_v50  ;;  %vm12586_vm12 = vmor %vm1954_vm13, %vm1955_vm0 }
 0x525   : > { %v5379_v54 = vmul.f32 %v12332_v3, %v2137_v61  ;;  %v12523_v35 = vmul.f32 %v13773_v46, %v13772_v0  ;;  %v2127_v21 = vmul.f32 %v1987_v5, %v13781_v22  ;;  %vm1844_vm5 = vweird.f32 %v13783_v49  ;;  %vm12562_vm9 = vmor %vm1974_vm7, %vm1975_vm4  ;;  %v13798_v22 = vld [vmem:[#allocation63_spill] sm:$0xff] }
 0x526   : > { %v1977_v56 = vsel %vm12562_vm9, %v13776_v12, %v1973_v48  ;;  %vm12576_vm7 = vmor %vm1834_vm3, %vm1835_vm11 }
 0x527   : > { %v5411_v52 = vadd.f32 %v11649_v20, %v5379_v54  ;;  %v13778_v54 = vsub.f32 1.5, %v13777_v27  ;;  %v1957_v48 = vsel %vm12586_vm12, %v13773_v46, %v12523_v35  ;;  %v13795_v27 = vld [vmem:[#allocation55_spill] sm:$0xff] }
 0x528   : > { %v5296_v14 = vpop.xlane.xlu2 %5295 }
 0x529   : > { %v5356_v31 = vmul.f32 %v5296_v14, %v2114_v59  ;;  %v5443_v14 = vpack.c.bf16 %v5411_v52, %v5411_v52 }
 0x52b   : > { %v5388_v17 = vadd.f32 %v11649_v20, %v5356_v31  ;;  %v5507_v52 = vunpack.c.l.b16 %v5443_v14  ;;  %v13792_v14 = vld [vmem:[#allocation76_spill] sm:$0xff] }
 0x52c   : > { %vm1825_vm13 = vweird.f32 %v13792_v14 }
 0x52f   : > { %v5344_v44 = vpop.xlane.xlu0 %5343 }
 0x530   : > { %v5380_v58 = vmul.f32 %v5344_v44, %v2138_v7  ;;  %v5410_v7 = vadd.f32 %v11649_v20, %v5378_v55  ;;  %v5322_v44 = vpop.xlane.xlu2 %5321  ;;  %v1833_v55 = vmul.f32 %v13779_v50, %v13778_v54  ;;  %v2126_v54 = vmul.f32 %v1977_v56, %v13795_v27 }
 0x531   : > { %v5369_v59 = vmul.f32 %v5322_v44, %v2127_v21  ;;  %v1962_v44 = vsub.f32 1.5, %v12511_v6  ;;  %v5420_v6 = vpack.c.bf16 %v5388_v17, %v5388_v17  ;;  %v13799_v21 = vsub.f32 1.5, %v13798_v22 }
 0x532   : > { %v5412_v3 = vadd.f32 %v11649_v20, %v5380_v58  ;;  %v5442_v24 = vpack.c.bf16 %v5410_v7, %v5410_v7  ;;  %v1379_v7 = vadd.s32 32, %v12280_v19  ;;  %v1837_v5 = vsel %vm12576_vm7, %v13779_v50, %v1833_v55  ;;  %v13796_v50 = vld [vmem:[#allocation36_spill] sm:$0xff] }
 0x533   : > { %vm1845_vm0 = vweird.f32 %v13796_v50  ;;  %v5401_v55 = vadd.f32 %v11649_v20, %v5369_v59  ;;  %v1843_v46 = vmul.f32 %v13796_v50, %v13799_v21  ;;  %v5484_v35 = vunpack.c.l.b16 %v5420_v6  ;;  %v13804_v59 = vld [vmem:[#allocation71_spill] sm:$0xff]  ;;  %v13815_v6 = vld [vmem:[#allocation37_spill] sm:$0xff] }
 0x534   : > { %v5444_v10 = vpack.c.bf16 %v5412_v3, %v5412_v3  ;;  %v5506_v60 = vunpack.c.l.b16 %v5442_v24  ;;  %vm1395_vm10 = vcmp.eq.s32.totalorder %v1379_v7, %v12287_v30  ;;  %vm1394_vm8 = vcmp.eq.s32.totalorder %v1379_v7, %v12343_v4  ;;  %vm12633_vm9 = vmor %vm1844_vm5, %vm1845_vm0  ;;  %v13820_v21 = vld [vmem:[#allocation39_spill] sm:$0xff] }
 0x535   : > { %v5346_v23 = vpop.xlane.xlu1 %5345  ;;  %vm1965_vm7 = vweird.f32 %v13804_v59  ;;  %v5433_v56 = vpack.c.bf16 %v5401_v55, %v5401_v55  ;;  %v1847_v57 = vsel %vm12633_vm9, %v13796_v50, %v1843_v46  ;;  %v13818_v55 = vld [vmem:[#allocation32_spill] sm:$0xff]  ;;  %v13821_v46 = vsub.f32 1.5, %v13820_v21 }
 0x536   : > { %v5381_v51 = vmul.f32 %v5346_v23, %v2139_v37  ;;  %v5508_v26 = vunpack.c.l.b16 %v5444_v10  ;;  %v2129_v37 = vmul.f32 %v2007_v47, %v13780_v8  ;;  %v1380_v10 = vadd.s32 40, %v12280_v19  ;;  %v13790_v47 = vld [vmem:[#allocation75_spill] sm:$0xff] }
 0x537   : > { %v5324_v41 = vpop.xlane.xlu0 %5323  ;;  %v13791_v11 = vsub.f32 1.5, %v13790_v47  ;;  %v5524_v24 = vpack.c.b16 %v5507_v52, %v5506_v60  ;;  %v13800_v52 = vld [vmem:[#allocation11_spill] sm:$0xff] }
 0x538   : > { %v5413_v61 = vadd.f32 %v11649_v20, %v5381_v51  ;;  %v5370_v58 = vmul.f32 %v5324_v41, %v2128_v33  ;;  %v2115_v33 = vmul.f32 %v1867_v13, %v13782_v45  ;;  %vm1397_vm3 = vcmp.eq.s32.totalorder %v1380_v10, %v12287_v30  ;;  %v13809_v47 = vld [vmem:[#allocation47_spill] sm:$0xff] }
 0x539   : > { %v12593_v42 = vmul.f32 %v13792_v14, %v13791_v11  ;;  %vm12600_vm15 = vmpackc.low %vm1397_vm3, %vm1395_vm10  ;;  %vm1396_vm4 = vcmp.eq.s32.totalorder %v1380_v10, %v12343_v4  ;;  %vm1824_vm11 = vweird.f32 %v13800_v52  ;;  %vm1814_vm10 = vweird.f32 %v13809_v47  ;;  %v13810_v11 = vld [vmem:[#allocation79_spill] sm:$0xff]  ;;  %v13823_v52 = vld [vmem:[#allocation53_spill] sm:$0xff] }
 0x53a   : > { %v5445_v43 = vpack.c.bf16 %v5413_v61, %v5413_v61  ;;  %v5402_v3 = vadd.f32 %v11649_v20, %v5370_v58  ;;  %7168 = vmatmul.msk.bf16.gmra.mxu2 %vm12600_vm15, %v8116_v25  ;;  %vm12647_vm5 = vmpackc.low %vm1396_vm4, %vm1394_vm8  ;;  %vm1964_vm12 = vweird.f32 %v13810_v11  ;;  %vm1794_vm4 = vweird.f32 %v13824_v62  ;;  %v5546_v62 = vld [vmem:[#allocation2 + $0x50] sm:$0xff] }
 0x53b   : > { %vm12659_vm3 = vmor %vm1824_vm11, %vm1825_vm13  ;;  %7160 = vmatmul.msk.bf16.gmra.mxu1 %vm12647_vm5, %v8116_v25 }
 0x53c   : > { %v5509_v2 = vunpack.c.l.b16 %v5445_v43  ;;  %v5434_v61 = vpack.c.bf16 %v5402_v3, %v5402_v3  ;;  %v5316_v43 = vpop.xlane.xlu2 %5315  ;;  %v1827_v7 = vsel %vm12659_vm3, %v13792_v14, %v12593_v42  ;;  %vm12672_vm0 = vmor %vm1964_vm12, %vm1965_vm7  ;;  %v1381_v14 = vadd.s32 48, %v12280_v19 }
 0x53d   : > { %v5326_v23 = vpop.xlane.xlu1 %5325  ;;  %v1382_v42 = vadd.s32 56, %v12280_v19  ;;  %vm1804_vm3 = vweird.f32 %v13829_v16  ;;  %v5552_v16 = vld [vmem:[#allocation2 + $0x10] sm:$0xff] }
 0x53e   : > { %v5525_v1 = vpack.c.b16 %v5509_v2, %v5508_v26  ;;  %v5371_v51 = vmul.f32 %v5326_v23, %v2129_v37  ;;  %v12612_v26 = vunpack.c.l.b16 %v5434_v61  ;;  %v13797_v37 = vld [vmem:[#allocation30_spill] sm:$0xff]  ;;  %vm1399_vm9 = vcmp.eq.s32.totalorder %v1381_v14, %v12287_v30 }
 0x53f   : > { %v5298_v41 = vpop.xlane.xlu0 %5297  ;;  %v2112_v17 = vmul.f32 %v1837_v5, %v13797_v37  ;;  %v13819_v37 = vld [vmem:[#allocation28_spill] sm:$0xff]  ;;  %vm1401_vm7 = vcmp.eq.s32.totalorder %v1382_v42, %v12287_v30 }
 0x540   : > { %v5403_v58 = vadd.f32 %v11649_v20, %v5371_v51  ;;  %v5357_v31 = vmul.f32 %v5298_v41, %v2115_v33  ;;  %5645 = vmatpush.bf16.msrb.mxu2 %v5525_v1  ;;  %v13801_v1 = vld [vmem:[#allocation51_spill] sm:$0xff]  ;;  %v1963_v41 = vmul.f32 %v13804_v59, %v1962_v44  ;;  %v13808_v44 = vld [vmem:[#allocation41_spill] sm:$0xff]  ;;  %vm12722_vm12 = vmpackc.low %vm1401_vm7, %vm1399_vm9 }
 0x541   : > { %v2124_v51 = vmul.f32 %v1957_v48, %v13801_v1  ;;  %v1800_v0 = vmul.f32 %v13808_v44, %v13807_v9  ;;  %v5497_v48 = vunpack.c.l.b16 %v5433_v56 }
 0x542   : > { %v5435_v13 = vpack.c.bf16 %v5403_v58, %v5403_v58  ;;  %v5389_v29 = vadd.f32 %v11649_v20, %v5357_v31 }
 0x544   : > { %v12614_v2 = vunpack.c.l.b16 %v5435_v13  ;;  %v5421_v3 = vpack.c.bf16 %v5389_v29, %v5389_v29  ;;  %5646 = vmatpush.bf16.msrb.mxu2 %v5524_v24  ;;  %v13816_v13 = vsub.f32 1.5, %v13815_v6  ;;  %v13817_v29 = vld [vmem:[#allocation80_spill] sm:$0xff]  ;;  %v5290_v27 = vpop.xlane.xlu2 %5289 }
 0x545   : > { %v5320_v8 = vpop.xlane.xlu1 %5319  ;;  %vm1815_vm13 = vweird.f32 %v13817_v29 }
 0x546   : > { %v5485_v23 = vunpack.c.l.b16 %v5421_v3  ;;  %v5368_v45 = vmul.f32 %v5320_v8, %v2126_v54  ;;  %v5520_v33 = vpack.c.b16 %v12614_v2, %v12612_v26  ;;  %v1813_v24 = vmul.f32 %v13817_v29, %v13816_v13  ;;  %vm12705_vm11 = vmor %vm1814_vm10, %vm1815_vm13 }
 0x547   : > { %v5292_v34 = vpop.xlane.xlu0 %5291  ;;  %v2113_v3 = vmul.f32 %v1847_v57, %v13818_v55  ;;  %v1801_v8 = vmul.f32 0.5, %v1800_v0  ;;  %vm1398_vm13 = vcmp.eq.s32.totalorder %v1381_v14, %v12343_v4  ;;  %v13834_v55 = vld [vmem:[#allocation24_spill] sm:$0xff] }
 0x548   : > { %v5400_v61 = vadd.f32 %v11649_v20, %v5368_v45  ;;  %v5354_v58 = vmul.f32 %v5292_v34, %v2112_v17  ;;  %v5513_v31 = vpack.c.b16 %v5485_v23, %v5484_v35  ;;  %5647 = vmatpush.bf16.msrb.mxu2 %v5523_v39  ;;  %v5366_v39 = vmul.f32 %v5316_v43, %v2124_v51  ;;  %v13822_v35 = vld [vmem:[#allocation78_spill] sm:$0xff] }
 0x549   : > { %v1967_v43 = vsel %vm12672_vm0, %v13804_v59, %v1963_v41  ;;  %v2111_v17 = vmul.f32 %v1827_v7, %v13819_v37  ;;  %v1793_v23 = vmul.f32 %v13822_v35, %v13821_v46  ;;  %vm1795_vm8 = vweird.f32 %v13822_v35  ;;  %v13831_v7 = vld [vmem:[#allocation20_spill] sm:$0xff] }
 0x54a   : > { %v5432_v10 = vpack.c.bf16 %v5400_v61, %v5400_v61  ;;  %5620 = vmatpush.bf16.msrb.mxu1 %v5513_v31  ;;  %v5386_v50 = vadd.f32 %v11649_v20, %v5354_v58  ;;  %v5398_v19 = vadd.f32 %v11649_v20, %v5366_v39  ;;  %v2125_v1 = vmul.f32 %v1967_v43, %v13823_v52  ;;  %vm1796_vm10 = vmor %vm1794_vm4, %vm1795_vm8 }
 0x54b   : > { %v5353_v53 = vmul.f32 %v5290_v27, %v2111_v17  ;;  %v1817_v56 = vsel %vm12705_vm11, %v13817_v29, %v1813_v24  ;;  %v1802_v61 = vsub.f32 1.5, %v1801_v8  ;;  %v1797_v9 = vsel %vm1796_vm10, %v13822_v35, %v1793_v23  ;;  %7170 = vmatmul.msk.bf16.gmra.mxu2 %vm12722_vm12, %v8116_v25  ;;  %v5545_v27 = vld [vmem:[#allocation2 + $0x18] sm:$0xff] }
 0x54c   : > { %v5496_v54 = vunpack.c.l.b16 %v5432_v10  ;;  %5648 = vmatpush.bf16.msrb.mxu2 %v5522_v18  ;;  %v5418_v60 = vpack.c.bf16 %v5386_v50, %v5386_v50  ;;  %v5430_v58 = vpack.c.bf16 %v5398_v19, %v5398_v19  ;;  %vm1805_vm0 = vweird.f32 %v13808_v44 }
 0x54d   : > { %v5294_v22 = vpop.xlane.xlu1 %5293  ;;  %v5385_v15 = vadd.f32 %v11649_v20, %v5353_v53  ;;  %v2108_v10 = vmul.f32 %v1797_v9, %v13831_v7  ;;  %v1803_v5 = vmul.f32 %v13808_v44, %v1802_v61  ;;  %vm1400_vm8 = vcmp.eq.s32.totalorder %v1382_v42, %v12343_v4  ;;  %vm1806_vm4 = vmor %vm1804_vm3, %vm1805_vm0 }
 0x54e   : > { %v5355_v45 = vmul.f32 %v5294_v22, %v2113_v3  ;;  %v5519_v51 = vpack.c.b16 %v5497_v48, %v5496_v54  ;;  %v5482_v11 = vunpack.c.l.b16 %v5418_v60  ;;  %v5494_v6 = vunpack.c.l.b16 %v5430_v58  ;;  %vm12743_vm11 = vmpackc.low %vm1400_vm8, %vm1398_vm13  ;;  %v5550_v58 = vld [vmem:[#allocation2 + $0x40] sm:$0xff] }
 0x54f   : > { %v5318_v18 = vpop.xlane.xlu0 %5317  ;;  %v5417_v2 = vpack.c.bf16 %v5385_v15, %v5385_v15  ;;  %v1807_v4 = vsel %vm1806_vm4, %v13808_v44, %v1803_v5  ;;  %7162 = vmatmul.msk.bf16.gmra.mxu1 %vm12743_vm11, %v8116_v25  ;;  %v5556_v5 = vld [vmem:[#allocation2 + $0x78] sm:$0xff] }
 0x550   : > { %v5387_v59 = vadd.f32 %v11649_v20, %v5355_v45  ;;  %v5367_v41 = vmul.f32 %v5318_v18, %v2125_v1  ;;  %5649 = vmatpush.bf16.msrb.mxu2 %v5521_v32  ;;  %v13830_v32 = vld [vmem:[#allocation26_spill] sm:$0xff]  ;;  %v2109_v3 = vmul.f32 %v1807_v4, %v13834_v55 }
 0x551   : > { %v2110_v47 = vmul.f32 %v1817_v56, %v13830_v32  ;;  %v5481_v42 = vunpack.c.l.b16 %v5417_v2  ;;  %v5544_v45 = vld [vmem:[#allocation2 + $0x58] sm:$0xff]  ;;  %v5543_v2 = vld [vmem:[#allocation2] sm:$0xff] }
 0x552   : > { %v5419_v31 = vpack.c.bf16 %v5387_v59, %v5387_v59  ;;  %v5399_v30 = vadd.f32 %v11649_v20, %v5367_v41 }
 0x554   : > { %v5483_v36 = vunpack.c.l.b16 %v5419_v31  ;;  %v5431_v57 = vpack.c.bf16 %v5399_v30, %v5399_v30  ;;  %5650 = vmatpush.bf16.msrb.mxu2 %v5520_v33 }
 0x555   : > { %v5288_v39 = vpop.xlane.xlu1 %5287 }
 0x556   : > { %v5495_v13 = vunpack.c.l.b16 %v5431_v57  ;;  %v5352_v29 = vmul.f32 %v5288_v39, %v2110_v47  ;;  %v5512_v26 = vpack.c.b16 %v5483_v36, %v5482_v11  ;;  %v5554_v36 = vld [vmem:[#allocation2 + $0x60] sm:$0xff] }
 0x557   : > { %v5284_v33 = vpop.xlane.xlu0 %5283 }
 0x558   : > { %v5384_v24 = vadd.f32 %v11649_v20, %v5352_v29  ;;  %v5350_v43 = vmul.f32 %v5284_v33, %v2108_v10  ;;  %5621 = vmatpush.bf16.msrb.mxu1 %v5512_v26  ;;  %5651 = vmatpush.bf16.msrb.mxu2 %v5519_v51  ;;  %v5518_v48 = vpack.c.b16 %v5495_v13, %v5494_v6 }
 0x55a   : > { %v5416_v14 = vpack.c.bf16 %v5384_v24, %v5384_v24  ;;  %v5382_v50 = vadd.f32 %v11649_v20, %v5350_v43 }
 0x55c   : > { %v5480_v54 = vunpack.c.l.b16 %v5416_v14  ;;  %5652 = vmatpush.bf16.msrb.mxu2 %v5518_v48  ;;  %v5414_v22 = vpack.c.bf16 %v5382_v50, %v5382_v50  ;;  %v5547_v50 = vld [vmem:[#allocation2 + $0x68] sm:$0xff] }
 0x55d   : > { %v5286_v8 = vpop.xlane.xlu1 %5285 }
 0x55e   : > { %v5351_v37 = vmul.f32 %v5286_v8, %v2109_v3  ;;  %v5511_v17 = vpack.c.b16 %v5481_v42, %v5480_v54  ;;  %v5478_v46 = vunpack.c.l.b16 %v5414_v22 }
 0x55f   : > { %7180 = vmatmul.msk.bf16.vlgmr.msrb.gmra.mxu2 %vm12324_vm6, %v8116_v25 }
 0x560   : > { %v5383_v21 = vadd.f32 %v11649_v20, %v5351_v37  ;;  %5622 = vmatpush.bf16.msrb.mxu1 %v5511_v17  ;;  %v5549_v17 = vld [vmem:[#allocation2 + $0x48] sm:$0xff] }
 0x562   : > { %v5415_v44 = vpack.c.bf16 %v5383_v21, %v5383_v21 }
 0x564   : > { %v5479_v35 = vunpack.c.l.b16 %v5415_v44 }
 0x566   : > { %v5510_v23 = vpack.c.b16 %v5479_v35, %v5478_v46  ;;  %v5551_v35 = vld [vmem:[#allocation2 + $0x20] sm:$0xff] }
 0x568   : > { %5623 = vmatpush.bf16.msrb.mxu1 %v5510_v23 }
 0x56b   : > { %7172 = vmatmul.msk.bf16.vlgmr.msrb.gmra.mxu1 %vm12368_vm1, %v8116_v25 }
 0x56f   : > { %7182 = vmatmul.msk.bf16.gmra.mxu2 %vm12462_vm2, %v8116_v25 }
 0x57b   : > { %7174 = vmatmul.msk.bf16.gmra.mxu1 %vm12516_vm14, %v8116_v25 }
 0x57f   : > { %7184 = vmatmul.msk.bf16.gmra.mxu2 %vm12600_vm15, %v8116_v25 }
 0x586   : > { %v5567_v40 = vpop.f32.mrf.mxu1 }
 0x58b   : > { %7176 = vmatmul.msk.bf16.gmra.mxu1 %vm12647_vm5, %v8116_v25  ;;  %v5596_v63 = vpop.f32.mrf.mxu2 }
 0x58c   : > { %v5597_v28 = vadd.f32 %v5596_v63, %v5567_v40 }
 0x58e   : > { %v5674_v19 = vadd.f32 %v5597_v28, %v5542_v38  ;;  %v5569_v12 = vpop.f32.mrf.mxu1  ;;  %v5553_v28 = vld [vmem:[#allocation2 + $0x38] sm:$0xff] }
 0x58f   : > { %7186 = vmatmul.msk.bf16.gmra.mxu2 %vm12722_vm12, %v8116_v25 }
 0x590   : > { %5690 = vst [vmem:[#allocation2 + $0x30] sm:$0xff] %v5674_v19 }
 0x593   : > { %v5598_v52 = vpop.f32.mrf.mxu2 }
 0x594   : > { %v5599_v1 = vadd.f32 %v5598_v52, %v5569_v12 }
 0x596   : > { %v5676_v49 = vadd.f32 %v5599_v1, %v5544_v45  ;;  %v5555_v1 = vld [vmem:[#allocation2 + $0x70] sm:$0xff] }
 0x598   : > { %5692 = vst [vmem:[#allocation2 + $0x58] sm:$0xff] %v5676_v49 }
 0x59b   : > { %7178 = vmatmul.msk.bf16.gmra.mxu1 %vm12743_vm11, %v8116_v25  ;;  %v5548_v25 = vld [vmem:[#allocation2 + $0x8] sm:$0xff] }
 0x59f   : > { %v5572_v51 = vpop.f32.mrf.mxu1 }
 0x5a1   : > { %v5601_v53 = vpop.f32.mrf.mxu2 }
 0x5a2   : > { %v5602_v18 = vadd.f32 %v5601_v53, %v5572_v51 }
 0x5a4   : > { %v5678_v34 = vadd.f32 %v5602_v18, %v5546_v62  ;;  %v5557_v18 = vld [vmem:[#allocation2 + $0x28] sm:$0xff] }
 0x5a6   : > { %5694 = vst [vmem:[#allocation2 + $0x50] sm:$0xff] %v5678_v34 }
 0x5a7   : > { %v5574_v60 = vpop.f32.mrf.mxu1 }
 0x5a9   : > { %v5603_v59 = vpop.f32.mrf.mxu2 }
 0x5aa   : > { %v5604_v41 = vadd.f32 %v5603_v59, %v5574_v60 }
 0x5ac   : > { %v5680_v56 = vadd.f32 %v5604_v41, %v5548_v25 }
 0x5ae   : > { %5696 = vst [vmem:[#allocation2 + $0x8] sm:$0xff] %v5680_v56 }
 0x5b8   : > { %v5577_v61 = vpop.f32.mrf.mxu1 }
 0x5bd   : > { %v5606_v31 = vpop.f32.mrf.mxu2 }
 0x5be   : > { %v5607_v30 = vadd.f32 %v5606_v31, %v5577_v61 }
 0x5c0   : > { %v5682_v9 = vadd.f32 %v5607_v30, %v5550_v58  ;;  %v5579_v0 = vpop.f32.mrf.mxu1 }
 0x5c2   : > { %5698 = vst [vmem:[#allocation2 + $0x40] sm:$0xff] %v5682_v9 }
 0x5c5   : > { %v5608_v15 = vpop.f32.mrf.mxu2 }
 0x5c6   : > { %v5609_v32 = vadd.f32 %v5608_v15, %v5579_v0 }
 0x5c8   : > { %v5684_v47 = vadd.f32 %v5609_v32, %v5552_v16 }
 0x5ca   : > { %5700 = vst [vmem:[#allocation2 + $0x10] sm:$0xff] %v5684_v47 }
 0x5cc   : > { %v5582_v11 = vpop.f32.mrf.mxu1 }
 0x5ce   : > { %v5611_v57 = vpop.f32.mrf.mxu2 }
 0x5cf   : > { %v5612_v39 = vadd.f32 %v5611_v57, %v5582_v11 }
 0x5d1   : > { %v5686_v7 = vadd.f32 %v5612_v39, %v5554_v36 }
 0x5d3   : > { %5702 = vst [vmem:[#allocation2 + $0x60] sm:$0xff] %v5686_v7 }
 0x5d4   : > { %v5584_v10 = vpop.f32.mrf.mxu1 }
 0x5d6   : > { %v5613_v6 = vpop.f32.mrf.mxu2 }
 0x5d7   : > { %v5614_v13 = vadd.f32 %v5613_v6, %v5584_v10 }
 0x5d9   : > { %v5688_v29 = vadd.f32 %v5614_v13, %v5556_v5 }
 0x5db   : > { %5704 = vst [vmem:[#allocation2 + $0x78] sm:$0xff] %v5688_v29 }
 0x5e2   : > { %v5654_v33 = vpop.f32.mrf.mxu2 }
 0x5e8   : > { %v5625_v26 = vpop.f32.mrf.mxu1 }
 0x5e9   : > { %v5655_v24 = vadd.f32 %v5654_v33, %v5625_v26 }
 0x5ea   : > { %v5656_v4 = vpop.f32.mrf.mxu2 }
 0x5eb   : > { %v5675_v43 = vadd.f32 %v5655_v24, %v5543_v2 }
 0x5ed   : > { %5691 = vst [vmem:[#allocation2] sm:$0xff] %v5675_v43 }
 0x5f0   : > { %v5627_v48 = vpop.f32.mrf.mxu1 }
 0x5f1   : > { %v5657_v14 = vadd.f32 %v5656_v4, %v5627_v48 }
 0x5f2   : > { %v5659_v55 = vpop.f32.mrf.mxu2 }
 0x5f3   : > { %v5677_v42 = vadd.f32 %v5657_v14, %v5545_v27 }
 0x5f5   : > { %5693 = vst [vmem:[#allocation2 + $0x18] sm:$0xff] %v5677_v42 }
 0x5f8   : > { %v5630_v54 = vpop.f32.mrf.mxu1 }
 0x5f9   : > { %v5660_v3 = vadd.f32 %v5659_v55, %v5630_v54 }
 0x5fa   : > { %v5661_v22 = vpop.f32.mrf.mxu2 }
 0x5fb   : > { %v5679_v8 = vadd.f32 %v5660_v3, %v5547_v50 }
 0x5fd   : > { %5695 = vst [vmem:[#allocation2 + $0x68] sm:$0xff] %v5679_v8 }
 0x600   : > { %v5632_v37 = vpop.f32.mrf.mxu1 }
 0x601   : > { %v5662_v21 = vadd.f32 %v5661_v22, %v5632_v37 }
 0x602   : > { %v5664_v23 = vpop.f32.mrf.mxu2 }
 0x603   : > { %v5681_v44 = vadd.f32 %v5662_v21, %v5549_v17 }
 0x605   : > { %5697 = vst [vmem:[#allocation2 + $0x48] sm:$0xff] %v5681_v44 }
 0x608   : > { %v5635_v46 = vpop.f32.mrf.mxu1 }
 0x609   : > { %v5665_v40 = vadd.f32 %v5664_v23, %v5635_v46 }
 0x60a   : > { %v5666_v19 = vpop.f32.mrf.mxu2 }
 0x60b   : > { %v5683_v38 = vadd.f32 %v5665_v40, %v5551_v35 }
 0x60d   : > { %5699 = vst [vmem:[#allocation2 + $0x20] sm:$0xff] %v5683_v38 }
 0x610   : > { %v5637_v63 = vpop.f32.mrf.mxu1 }
 0x611   : > { %v5667_v12 = vadd.f32 %v5666_v19, %v5637_v63 }
 0x612   : > { %v5669_v49 = vpop.f32.mrf.mxu2 }
 0x613   : > { %v5685_v45 = vadd.f32 %v5667_v12, %v5553_v28 }
 0x615   : > { %5701 = vst [vmem:[#allocation2 + $0x38] sm:$0xff] %v5685_v45 }
 0x618   : > { %v5640_v52 = vpop.f32.mrf.mxu1 }
 0x619   : > { %v5670_v51 = vadd.f32 %v5669_v49, %v5640_v52 }
 0x61a   : > { %v5671_v34 = vpop.f32.mrf.mxu2 }
 0x61b   : > { %v5687_v62 = vadd.f32 %v5670_v51, %v5555_v1 }
 0x61d   : > { %5703 = vst [vmem:[#allocation2 + $0x70] sm:$0xff] %v5687_v62 }
 0x620   : > { %v5642_v53 = vpop.f32.mrf.mxu1 }
 0x621   : > { %v5672_v60 = vadd.f32 %v5671_v34, %v5642_v53  ;;  %5709 = sbr.rel (%p7187_p6) target bundleno = 2304 (0x900), region = 132 }
 0x623   : > { %v5689_v25 = vadd.f32 %v5672_v60, %v5557_v18 }
 0x625   : > { %5705 = vst [vmem:[#allocation2 + $0x28] sm:$0xff] %v5689_v25 }
 0x626   : > { %v7411_v59 = vld [vmem:[%s13197_s17 + $0x38] sm:$0xff]  ;;  %vm6068_vm6 = vcmask 1043456   ;;  %v7410_v41 = vld [vmem:[%s13197_s17 + $0x30] sm:$0xff]  ;;  %v7403_v56 = vld [vmem:[%s13196_s16] sm:$0xff]  ;;  %vm6021_vm1 = vcmask 130048   ;;  %vm6064_vm2 = vcmask 64512  }
 0x627   : > { %5966 = vmatpush.bf16.msra.mxu0 %v7411_v59  ;;  %v6063_v61 = vld [vmem:[%s13198_s18] sm:$0xf]  ;;  %6041 = vmatpush.bf16.msra.mxu1 %v7403_v56  ;;  %v7409_v0 = vld [vmem:[%s13197_s17 + $0x28] sm:$0xff]  ;;  %v7407_v15 = vld [vmem:[%s13197_s17 + $0x18] sm:$0xff] }
 0x628   : > { %v6070_v58 = vsel %vm6068_vm6, %v6063_v61, 0  ;;  %v7399_v31 = vld [vmem:[%s13835_s26] sm:$0xff]  ;;  %v7406_v32 = vld [vmem:[%s13197_s17 + $0x10] sm:$0xff]  ;;  %v7400_v47 = vld [vmem:[%s13835_s26 + $0x8] sm:$0xff] }
 0x629   : > { %v5886_v30 = vld [vmem:[%s13836_s6] sm:$0x1]  ;;  %6079 = vmatpush.bf16.msra.mxu2 %v6070_v58  ;;  %v7405_v11 = vld [vmem:[%s13197_s17 + $0x8] sm:$0xff]  ;;  %v5710_v57 = vld [vmem:[#allocation2 + $0x30] sm:$0xff] }
 0x62a   : > { %v12798_v9 = vpack.c.bf16 %v5886_v30, %v5886_v30  ;;  %7240 = vmatmul.msk.bf16.vlgmr.msra.gmra.mxu1 %vm6021_vm1, %v7399_v31  ;;  %v7408_v16 = vld [vmem:[%s13197_s17 + $0x20] sm:$0xff]  ;;  %v5712_v39 = vld [vmem:[#allocation2 + $0x58] sm:$0xff]  ;;  %v7401_v10 = vld [vmem:[%s13835_s26 + $0x10] sm:$0xff] }
 0x62b   : > { %5967 = vmatpush.bf16.msra.mxu0 %v7410_v41  ;;  %v7404_v36 = vld [vmem:[%s13197_s17] sm:$0xff]  ;;  %v5898_v7 = vpack.c.bf16 %v5712_v39, %v5710_v57  ;;  %v5714_v5 = vld [vmem:[#allocation2 + $0x50] sm:$0xff]  ;;  %v5716_v6 = vld [vmem:[#allocation2 + $0x8] sm:$0xff] }
 0x62c   : > { %7244 = vmatmul.msk.bf16.vlgmr.msra.gmra.mxu2 %vm6064_vm2, %v12798_v9  ;;  %v5899_v13 = vpack.c.bf16 %v5716_v6, %v5714_v5  ;;  %v7402_v29 = vld [vmem:[%s13835_s26 + $0x18] sm:$0xff]  ;;  %v5718_v26 = vld [vmem:[#allocation2 + $0x40] sm:$0xff]  ;;  %v5720_v2 = vld [vmem:[#allocation2 + $0x10] sm:$0xff] }
 0x62d   : > { %v5900_v33 = vpack.c.bf16 %v5720_v2, %v5718_v26  ;;  %v5722_v24 = vld [vmem:[#allocation2 + $0x60] sm:$0xff]  ;;  %v5724_v43 = vld [vmem:[#allocation2 + $0x78] sm:$0xff]  ;;  %v7418_v42 = vld [vmem:[%s13200_s20 + $0x30] sm:$0xff] }
 0x62e   : > { %v5901_v48 = vpack.c.bf16 %v5724_v43, %v5722_v24  ;;  %v7419_v4 = vld [vmem:[%s13200_s20 + $0x38] sm:$0xff]  ;;  %v7417_v50 = vld [vmem:[%s13200_s20 + $0x28] sm:$0xff]  ;;  %v7416_v55 = vld [vmem:[%s13200_s20 + $0x20] sm:$0xff] }
 0x62f   : > { %5968 = vmatpush.bf16.msra.mxu0 %v7409_v0  ;;  %6338 = vmatpush.bf16.msra.mxu3 %v7419_v4  ;;  %v7415_v8 = vld [vmem:[%s13200_s20 + $0x18] sm:$0xff]  ;;  %v12853_v21 = vld [vmem:[%s13199_s19] ss:$0 sm:$0xff]  ;;  %v7414_v44 = vld [vmem:[%s13200_s20 + $0x10] sm:$0xff] }
 0x630   : > { %v7413_v40 = vld [vmem:[%s13200_s20 + $0x8] sm:$0xff]  ;;  %v7412_v19 = vld [vmem:[%s13200_s20] sm:$0xff] }
 0x633   : > { %5969 = vmatpush.bf16.msra.mxu0 %v7408_v16  ;;  %6339 = vmatpush.bf16.msra.mxu3 %v7418_v42 }
 0x637   : > { %5970 = vmatpush.bf16.msra.mxu0 %v7407_v15  ;;  %6340 = vmatpush.bf16.msra.mxu3 %v7417_v50 }
 0x63a   : > { %7241 = vmatmul.msk.bf16.gmra.mxu1 %vm6021_vm1, %v7400_v47 }
 0x63b   : > { %5971 = vmatpush.bf16.msra.mxu0 %v7406_v32  ;;  %6341 = vmatpush.bf16.msra.mxu3 %v7416_v55 }
 0x63f   : > { %5972 = vmatpush.bf16.msra.mxu0 %v7405_v11  ;;  %6342 = vmatpush.bf16.msra.mxu3 %v7415_v8 }
 0x643   : > { %5973 = vmatpush.bf16.msra.mxu0 %v7404_v36  ;;  %6343 = vmatpush.bf16.msra.mxu3 %v7414_v44 }
 0x646   : > { %5974 = vmatmul.bf16.vlgmr.msra.gmra.mxu0 %v5898_v7 }
 0x647   : > { %6344 = vmatpush.bf16.msra.mxu3 %v7413_v40 }
 0x64a   : > { %7242 = vmatmul.msk.bf16.gmra.mxu1 %vm6021_vm1, %v7401_v10 }
 0x64b   : > { %6345 = vmatpush.bf16.msra.mxu3 %v7412_v19 }
 0x656   : > { %5979 = vmatmul.bf16.gmra.mxu0 %v5899_v13 }
 0x65a   : > { %7243 = vmatmul.msk.bf16.gmra.mxu1 %vm6021_vm1, %v7402_v29 }
 0x666   : > { %5984 = vmatmul.bf16.gmra.mxu0 %v5900_v33 }
 0x676   : > { %5989 = vmatmul.bf16.gmra.mxu0 %v5901_v48 }
 0x6a7   : > { %v6043_v14 = vpop.f32.mrf.mxu1 }
 0x6af   : > { %v6081_v27 = vpop.f32.mrf.mxu2  ;;  %v6045_v3 = vpop.f32.mrf.mxu1 }
 0x6b0   : > { %v12848_v37 = vperm.slane %v6081_v27, 0 }
 0x6b7   : > { %v6083_v54 = vpop.f32.mrf.mxu2  ;;  %v6048_v23 = vpop.f32.mrf.mxu1 }
 0x6bf   : > { %v6050_v51 = vpop.f32.mrf.mxu1 }
 0x6c3   : > { %v5975_v17 = vpop.f32.mrf.mxu0 }
 0x6c4   : > { %v6044_v22 = vadd.f32 %v6043_v14, %v5975_v17 }
 0x6c6   : > { %v6086_v46 = vadd.f32 %v12848_v37, %v6044_v22 }
 0x6c7   : > { %v6053_v31 = vpop.f32.mrf.mxu1 }
 0x6c8   : > { %v12860_v35 = vadd.f32 %v12853_v21, %v6086_v46 }
 0x6ca   : > { %v7245_v38 = vmul.f32 -1.442695, %v12860_v35 }
 0x6cb   : > { %v5977_v63 = vpop.f32.mrf.mxu0 }
 0x6cc   : > { %v6046_v28 = vadd.f32 %v6045_v3, %v5977_v63  ;;  %7958 = vpow2.f32 %v7245_v38 }
 0x6ce   : > { %v6087_v12 = vadd.f32 %v12848_v37, %v6046_v28 }
 0x6cf   : > { %v6055_v26 = vpop.f32.mrf.mxu1 }
 0x6d0   : > { %v12871_v45 = vadd.f32 %v12853_v21, %v6087_v12 }
 0x6d2   : > { %v7959_v52 = vpop.eup %7958  ;;  %v7246_v1 = vmul.f32 -1.442695, %v12871_v45 }
 0x6d3   : > { %v5980_v49 = vpop.f32.mrf.mxu0  ;;  %v6130_v62 = vadd.f32 1.0, %v7959_v52 }
 0x6d4   : > { %7960 = vpow2.f32 %v7246_v1  ;;  %v6049_v53 = vadd.f32 %v6048_v23, %v5980_v49 }
 0x6d5   : > { %7962 = vrcp.f32 %v6130_v62  ;;  %v6149_v5 = vand.u32 2147483648, %v6130_v62  ;;  %vm6143_vm15 = vweird.f32 %v6130_v62  ;;  %v6147_v13 = vand.u32 2147483647, %v6130_v62 }
 0x6d6   : > { %v6088_v18 = vadd.f32 %v12848_v37, %v6049_v53 }
 0x6d7   : > { %v6150_v4 = vor.u32 1.1754944e-38, %v6149_v5  ;;  %vm6148_vm7 = vcmp.eq.f32.partialorder %v6147_v13, 8.507059e+37  ;;  %v6058_v1 = vpop.f32.mrf.mxu1 }
 0x6d8   : > { %v12876_v34 = vadd.f32 %v12853_v21, %v6088_v18 }
 0x6da   : > { %v7961_v60 = vpop.eup %7960  ;;  %v7247_v25 = vmul.f32 -1.442695, %v12876_v34 }
 0x6db   : > { %v7963_v59 = vpop.eup %7962  ;;  %v6131_v41 = vadd.f32 1.0, %v7961_v60  ;;  %v5982_v56 = vpop.f32.mrf.mxu0 }
 0x6dc   : > { %7964 = vpow2.f32 %v7247_v25  ;;  %v6051_v61 = vadd.f32 %v6050_v51, %v5982_v56  ;;  %v6139_v58 = vmul.f32 %v7963_v59, %v6130_v62  ;;  %vm6144_vm14 = vweird.f32 %v7963_v59 }
 0x6dd   : > { %7966 = vrcp.f32 %v6131_v41  ;;  %vm12888_vm5 = vmor %vm6143_vm15, %vm6144_vm14  ;;  %v6162_v33 = vand.u32 2147483647, %v6131_v41  ;;  %v6164_v24 = vand.u32 2147483648, %v6131_v41  ;;  %vm6158_vm10 = vweird.f32 %v6131_v41 }
 0x6de   : > { %v6089_v30 = vadd.f32 %v12848_v37, %v6051_v61  ;;  %v6140_v0 = vsub.f32 1.0, %v6139_v58 }
 0x6df   : > { %vm6163_vm3 = vcmp.eq.f32.partialorder %v6162_v33, 8.507059e+37  ;;  %v6165_v17 = vor.u32 1.1754944e-38, %v6164_v24 }
 0x6e0   : > { %v12881_v16 = vadd.f32 %v12853_v21, %v6089_v30  ;;  %v6141_v15 = vmul.f32 %v7963_v59, %v6140_v0 }
 0x6e2   : > { %v7965_v32 = vpop.eup %7964  ;;  %v7248_v47 = vmul.f32 -1.442695, %v12881_v16  ;;  %v6142_v7 = vadd.f32 %v7963_v59, %v6141_v15 }
 0x6e3   : > { %v7967_v11 = vpop.eup %7966  ;;  %v12884_v36 = vadd.f32 1.0, %v7965_v32  ;;  %v5985_v57 = vpop.f32.mrf.mxu0 }
 0x6e4   : > { %7968 = vpow2.f32 %v7248_v47  ;;  %v6054_v39 = vadd.f32 %v6053_v31, %v5985_v57  ;;  %v6154_v10 = vmul.f32 %v7967_v11, %v6131_v41  ;;  %v6146_v48 = vsel %vm12888_vm5, %v7963_v59, %v6142_v7  ;;  %v6060_v7 = vpop.f32.mrf.mxu1 }
 0x6e5   : > { %7970 = vrcp.f32 %v12884_v36  ;;  %vm6159_vm9 = vweird.f32 %v7967_v11  ;;  %v6151_v8 = vsel %vm6148_vm7, %v6150_v4, %v6146_v48  ;;  %v6179_v25 = vand.u32 2147483648, %v12884_v36 }
 0x6e6   : > { %v6090_v6 = vadd.f32 %v12848_v37, %v6054_v39  ;;  %v6155_v29 = vsub.f32 1.0, %v6154_v10  ;;  %vm6160_vm12 = vmor %vm6158_vm10, %vm6159_vm9  ;;  %v6258_v38 = vmul.f32 %v6151_v8, %v12860_v35  ;;  %vm6173_vm13 = vweird.f32 %v12884_v36 }
 0x6e7   : > { %v6177_v41 = vand.u32 2147483647, %v12884_v36  ;;  %v6180_v32 = vor.u32 1.1754944e-38, %v6179_v25 }
 0x6e8   : > { %v12893_v43 = vadd.f32 %v12853_v21, %v6090_v6  ;;  %v6156_v27 = vmul.f32 %v7967_v11, %v6155_v29 }
 0x6e9   : > { %vm6178_vm11 = vcmp.eq.f32.partialorder %v6177_v41, 8.507059e+37 }
 0x6ea   : > { %v7969_v14 = vpop.eup %7968  ;;  %v7249_v42 = vmul.f32 -1.442695, %v12893_v43  ;;  %v6157_v54 = vadd.f32 %v7967_v11, %v6156_v27 }
 0x6eb   : > { %v7971_v50 = vpop.eup %7970  ;;  %v6133_v55 = vadd.f32 1.0, %v7969_v14  ;;  %v5987_v3 = vpop.f32.mrf.mxu0 }
 0x6ec   : > { %7972 = vpow2.f32 %v7249_v42  ;;  %v6056_v22 = vadd.f32 %v6055_v26, %v5987_v3  ;;  %v6161_v44 = vsel %vm6160_vm12, %v7967_v11, %v6157_v54  ;;  %v6169_v46 = vmul.f32 %v7971_v50, %v12884_v36 }
 0x6ed   : > { %7974 = vrcp.f32 %v6133_v55  ;;  %v6166_v23 = vsel %vm6163_vm3, %v6165_v17, %v6161_v44  ;;  %vm6174_vm0 = vweird.f32 %v7971_v50  ;;  %v6192_v58 = vand.u32 2147483647, %v6133_v55 }
 0x6ee   : > { %v6091_v40 = vadd.f32 %v12848_v37, %v6056_v22  ;;  %v6259_v63 = vmul.f32 %v6166_v23, %v12871_v45  ;;  %v6170_v28 = vsub.f32 1.0, %v6169_v46  ;;  %vm12913_vm8 = vmor %vm6173_vm13, %vm6174_vm0  ;;  %v6194_v31 = vand.u32 2147483648, %v6133_v55 }
 0x6ef   : > { %vm6188_vm1 = vweird.f32 %v6133_v55  ;;  %vm6193_vm15 = vcmp.eq.f32.partialorder %v6192_v58, 8.507059e+37 }
 0x6f0   : > { %v12903_v19 = vadd.f32 %v12853_v21, %v6091_v40  ;;  %v6266_v12 = vpack.c.bf16 %v6259_v63, %v6258_v38  ;;  %v6171_v52 = vmul.f32 %v7971_v50, %v6170_v28  ;;  %v6195_v6 = vor.u32 1.1754944e-38, %v6194_v31 }
 0x6f2   : > { %v7973_v49 = vpop.eup %7972  ;;  %v7250_v51 = vmul.f32 -1.442695, %v12903_v19  ;;  %6346 = vmatmul.bf16.vlgmr.msra.gmra.mxu3 %v6266_v12  ;;  %v6172_v60 = vadd.f32 %v7971_v50, %v6171_v52 }
 0x6f3   : > { %v7975_v62 = vpop.eup %7974  ;;  %v12906_v53 = vadd.f32 1.0, %v7973_v49  ;;  %v5990_v18 = vpop.f32.mrf.mxu0 }
 0x6f4   : > { %7976 = vpow2.f32 %v7250_v51  ;;  %v6059_v35 = vadd.f32 %v6058_v1, %v5990_v18  ;;  %v6184_v45 = vmul.f32 %v7975_v62, %v6133_v55  ;;  %v6176_v0 = vsel %vm12913_vm8, %v7971_v50, %v6172_v60 }
 0x6f5   : > { %7978 = vrcp.f32 %v12906_v53  ;;  %vm6189_vm4 = vweird.f32 %v7975_v62  ;;  %v6181_v5 = vsel %vm6178_vm11, %v6180_v32, %v6176_v0  ;;  %vm6203_vm9 = vweird.f32 %v12906_v53 }
 0x6f6   : > { %v6092_v59 = vadd.f32 %v12848_v37, %v6059_v35  ;;  %v6185_v56 = vsub.f32 1.0, %v6184_v45  ;;  %vm6190_vm14 = vmor %vm6188_vm1, %vm6189_vm4  ;;  %v6260_v24 = vmul.f32 %v6181_v5, %v12876_v34  ;;  %v6209_v34 = vand.u32 2147483648, %v12906_v53 }
 0x6f8   : > { %v12918_v30 = vadd.f32 %v12853_v21, %v6092_v59  ;;  %v6186_v15 = vmul.f32 %v7975_v62, %v6185_v56  ;;  %v6210_v23 = vor.u32 1.1754944e-38, %v6209_v34 }
 0x6fa   : > { %v7977_v47 = vpop.eup %7976  ;;  %v7251_v11 = vmul.f32 -1.442695, %v12918_v30  ;;  %v6187_v36 = vadd.f32 %v7975_v62, %v6186_v15 }
 0x6fb   : > { %v7979_v57 = vpop.eup %7978  ;;  %v6135_v39 = vadd.f32 1.0, %v7977_v47  ;;  %v5992_v10 = vpop.f32.mrf.mxu0 }
 0x6fc   : > { %7980 = vpow2.f32 %v7251_v11  ;;  %v6061_v13 = vadd.f32 %v6060_v7, %v5992_v10  ;;  %v6191_v29 = vsel %vm6190_vm14, %v7975_v62, %v6187_v36  ;;  %v6199_v26 = vmul.f32 %v7979_v57, %v12906_v53  ;;  %v7957_v10 = vld [vmem:[%s13201_s21] ss:$0 sm:$0xff] }
 0x6fd   : > { %7982 = vrcp.f32 %v6135_v39  ;;  %v6196_v2 = vsel %vm6193_vm15, %v6195_v6, %v6191_v29  ;;  %vm6204_vm5 = vweird.f32 %v7979_v57  ;;  %v6224_v17 = vand.u32 2147483648, %v6135_v39 }
 0x6fe   : > { %v6093_v33 = vadd.f32 %v12848_v37, %v6061_v13  ;;  %v6261_v48 = vmul.f32 %v6196_v2, %v12881_v16  ;;  %v6200_v27 = vsub.f32 1.0, %v6199_v26  ;;  %vm6205_vm7 = vmor %vm6203_vm9, %vm6204_vm5  ;;  %v6222_v46 = vand.u32 2147483647, %v6135_v39  ;;  %v7427_v26 = vld [vmem:[%s13203_s23 + $0x38] sm:$0xff] }
 0x6ff   : > { %vm6218_vm3 = vweird.f32 %v6135_v39  ;;  %v6225_v52 = vor.u32 1.1754944e-38, %v6224_v17  ;;  %6478 = vmatpush.bf16.msrb.mxu2 %v7427_v26  ;;  %v13012_v26 = vld [vmem:[#allocation2 + $0x70] sm:$0xff] }
 0x700   : > { %v12928_v4 = vadd.f32 %v12853_v21, %v6093_v33  ;;  %v6267_v14 = vpack.c.bf16 %v6261_v48, %v6260_v24  ;;  %v6201_v42 = vmul.f32 %v7979_v57, %v6200_v27  ;;  %v6207_v21 = vand.u32 2147483647, %v12906_v53  ;;  %v7426_v33 = vld [vmem:[%s13203_s23 + $0x30] sm:$0xff]  ;;  %v7425_v24 = vld [vmem:[%s13203_s23 + $0x28] sm:$0xff] }
 0x701   : > { %vm6223_vm13 = vcmp.eq.f32.partialorder %v6222_v46, 8.507059e+37 }
 0x702   : > { %v7981_v54 = vpop.eup %7980  ;;  %v7252_v50 = vmul.f32 -1.442695, %v12928_v4  ;;  %6351 = vmatmul.bf16.gmra.mxu3 %v6267_v14  ;;  %v6202_v8 = vadd.f32 %v7979_v57, %v6201_v42  ;;  %vm6208_vm12 = vcmp.eq.f32.partialorder %v6207_v21, 8.507059e+37  ;;  %v7423_v14 = vld [vmem:[%s13203_s23 + $0x18] sm:$0xff] }
 0x703   : > { %v7983_v55 = vpop.eup %7982  ;;  %v6136_v3 = vadd.f32 1.0, %v7981_v54  ;;  %6479 = vmatpush.bf16.msrb.mxu2 %v7426_v33  ;;  %v5732_v33 = vmul.f32 %v11649_v20, %v13012_v26 }
 0x704   : > { %7984 = vpow2.f32 %v7252_v50  ;;  %v6214_v37 = vmul.f32 %v7983_v55, %v6135_v39  ;;  %v6206_v22 = vsel %vm6205_vm7, %v7979_v57, %v6202_v8  ;;  %vm6219_vm10 = vweird.f32 %v7983_v55  ;;  %v7422_v50 = vld [vmem:[%s13203_s23 + $0x10] sm:$0xff] }
 0x705   : > { %7986 = vrcp.f32 %v6136_v3  ;;  %v6211_v12 = vsel %vm6208_vm12, %v6210_v23, %v6206_v22  ;;  %vm6220_vm0 = vmor %vm6218_vm3, %vm6219_vm10  ;;  %v6239_v41 = vand.u32 2147483648, %v6136_v3  ;;  %vm6233_vm4 = vweird.f32 %v6136_v3 }
 0x706   : > { %v6215_v16 = vsub.f32 1.0, %v6214_v37  ;;  %v6262_v62 = vmul.f32 %v6211_v12, %v12893_v43  ;;  %v6237_v56 = vand.u32 2147483647, %v6136_v3  ;;  %v7420_v37 = vld [vmem:[%s13203_s23] sm:$0xff] }
 0x707   : > { %v6240_v15 = vor.u32 1.1754944e-38, %v6239_v41  ;;  %6480 = vmatpush.bf16.msrb.mxu2 %v7425_v24  ;;  %v7429_v24 = vld [vmem:[%s13205_s25 + $0x8] sm:$0xff] }
 0x708   : > { %v6216_v44 = vmul.f32 %v7983_v55, %v6215_v16  ;;  %vm6238_vm14 = vcmp.eq.f32.partialorder %v6237_v56, 8.507059e+37  ;;  %v8117_v16 = vmov 64.0  }
 0x70a   : > { %v7985_v40 = vpop.eup %7984  ;;  %v6217_v38 = vadd.f32 %v7983_v55, %v6216_v44 }
 0x70b   : > { %v7987_v63 = vpop.eup %7986  ;;  %v6137_v28 = vadd.f32 1.0, %v7985_v40 }
 0x70c   : > { %v6221_v1 = vsel %vm6220_vm0, %v7983_v55, %v6217_v38  ;;  %v6229_v49 = vmul.f32 %v7987_v63, %v6136_v3  ;;  %vm6234_vm8 = vweird.f32 %v7987_v63  ;;  %v7421_v55 = vld [vmem:[%s13203_s23 + $0x8] sm:$0xff]  ;;  %v6412_v3 = vld [vmem:[%s13202_s22] sm:$0xf] }
 0x70d   : > { %7988 = vrcp.f32 %v6137_v28  ;;  %v6226_v51 = vsel %vm6223_vm13, %v6225_v52, %v6221_v1  ;;  %vm6235_vm11 = vmor %vm6233_vm4, %vm6234_vm8  ;;  %v6254_v58 = vand.u32 2147483648, %v6137_v28  ;;  %v6252_v43 = vand.u32 2147483647, %v6137_v28 }
 0x70e   : > { %v6263_v53 = vmul.f32 %v6226_v51, %v12903_v19  ;;  %v6230_v18 = vsub.f32 1.0, %v6229_v49  ;;  %vm6248_vm15 = vweird.f32 %v6137_v28  ;;  %v6492_v21 = vsel %vm6068_vm6, %v6412_v3, 0 }
 0x70f   : > { %v6255_v47 = vor.u32 1.1754944e-38, %v6254_v58  ;;  %vm6253_vm9 = vcmp.eq.f32.partialorder %v6252_v43, 8.507059e+37  ;;  %7990 = vrcp.f32 %v8117_v16  ;;  %v7432_v43 = vld [vmem:[%s13205_s25 + $0x20] sm:$0xff] }
 0x710   : > { %v6268_v35 = vpack.c.bf16 %v6263_v53, %v6262_v62  ;;  %v6231_v60 = vmul.f32 %v7987_v63, %v6230_v18  ;;  %v7435_v53 = vld [vmem:[%s13205_s25 + $0x38] sm:$0xff] }
 0x711   : > { %6594 = vmatpush.bf16.msrb.mxu1 %v7435_v53 }
 0x712   : > { %6356 = vmatmul.bf16.gmra.mxu3 %v6268_v35  ;;  %v6232_v25 = vadd.f32 %v7987_v63, %v6231_v60  ;;  %v7434_v60 = vld [vmem:[%s13205_s25 + $0x30] sm:$0xff] }
 0x713   : > { %v7989_v45 = vpop.eup %7988 }
 0x714   : > { %v6244_v59 = vmul.f32 %v7989_v45, %v6137_v28  ;;  %v6236_v31 = vsel %vm6235_vm11, %v7987_v63, %v6232_v25  ;;  %vm6249_vm1 = vweird.f32 %v7989_v45 }
 0x715   : > { %v6241_v32 = vsel %vm6238_vm14, %v6240_v15, %v6236_v31  ;;  %vm6250_vm5 = vmor %vm6248_vm15, %vm6249_vm1  ;;  %v7991_v23 = vpop.eup %7990  ;;  %6595 = vmatpush.bf16.msrb.mxu1 %v7434_v60  ;;  %v12983_v15 = vld [vmem:[#allocation2 + $0x68] sm:$0xff] }
 0x716   : > { %v6245_v61 = vsub.f32 1.0, %v6244_v59  ;;  %v6264_v57 = vmul.f32 %v6241_v32, %v12918_v30  ;;  %v6405_v63 = vmul.f32 64.0, %v7991_v23  ;;  %vm6409_vm6 = vweird.f32 %v7991_v23 }
 0x717   : > { %v5728_v32 = vmul.f32 %v11649_v20, %v12983_v15 }
 0x718   : > { %v6246_v0 = vmul.f32 %v7989_v45, %v6245_v61  ;;  %v6406_v49 = vsub.f32 1.0, %v6405_v63 }
 0x719   : > { %5738 = vadd.xlane.f32.xlu1 %v5728_v32 }
 0x71a   : > { %v6247_v19 = vadd.f32 %v7989_v45, %v6246_v0  ;;  %v6407_v18 = vmul.f32 %v7991_v23, %v6406_v49  ;;  %v7433_v0 = vld [vmem:[%s13205_s25 + $0x28] sm:$0xff] }
 0x71b   : > { %6596 = vmatpush.bf16.msrb.mxu1 %v7433_v0 }
 0x71c   : > { %v6251_v11 = vsel %vm6250_vm5, %v7989_v45, %v6247_v19  ;;  %v6408_v25 = vadd.f32 %v7991_v23, %v6407_v18  ;;  %v12985_v19 = vld [vmem:[#allocation2] sm:$0xff] }
 0x71d   : > { %v6256_v36 = vsel %vm6253_vm9, %v6255_v47, %v6251_v11  ;;  %v12991_v47 = vld [vmem:[#allocation2 + $0x20] sm:$0xff]  ;;  %v12993_v11 = vld [vmem:[#allocation2 + $0x48] sm:$0xff] }
 0x71e   : > { %v6265_v39 = vmul.f32 %v6256_v36, %v12928_v4  ;;  %v7424_v4 = vld [vmem:[%s13203_s23 + $0x20] sm:$0xff]  ;;  %v6410_v56 = vsel %vm6409_vm6, %v7991_v23, %v6408_v25  ;;  %v12995_v36 = vld [vmem:[#allocation2 + $0x18] sm:$0xff] }
 0x71f   : > { %6481 = vmatpush.bf16.msrb.mxu2 %v7424_v4  ;;  %6597 = vmatpush.bf16.msrb.mxu1 %v7432_v43 }
 0x720   : > { %v6269_v7 = vpack.c.bf16 %v6265_v39, %v6264_v57  ;;  %v5730_v57 = vmul.f32 %v11649_v20, %v12991_v47  ;;  %v5729_v39 = vmul.f32 %v11649_v20, %v12993_v11 }
 0x722   : > { %6361 = vmatmul.bf16.gmra.mxu3 %v6269_v7  ;;  %v5727_v7 = vmul.f32 %v11649_v20, %v12995_v36  ;;  %5742 = vadd.xlane.f32.xlu2 %v5730_v57 }
 0x723   : > { %6482 = vmatpush.bf16.msrb.mxu2 %v7423_v14  ;;  %5740 = vadd.xlane.f32.xlu1 %v5729_v39 }
 0x727   : > { %6483 = vmatpush.bf16.msrb.mxu2 %v7422_v50 }
 0x72b   : > { %6484 = vmatpush.bf16.msrb.mxu2 %v7421_v55 }
 0x72f   : > { %6485 = vmatpush.bf16.msrb.mxu2 %v7420_v37 }
 0x733   : > { %6501 = vmatpush.bf16.msra.mxu2 %v6492_v21 }
 0x775   : > { %v6347_v5 = vpop.f32.mrf.mxu3 }
 0x776   : > { %v6348_v6 = vadd.f32 %v7957_v10, %v6347_v5  ;;  %v7431_v5 = vld [vmem:[%s13205_s25 + $0x18] sm:$0xff] }
 0x777   : > { %6598 = vmatpush.bf16.msrb.mxu1 %v7431_v5 }
 0x778   : > { %6367 = vst [vmem:[#allocation3] sm:$0xff] %v6348_v6 }
 0x77d   : > { %v6349_v13 = vpop.f32.mrf.mxu3 }
 0x77e   : > { %v6350_v29 = vadd.f32 %v7957_v10, %v6349_v13 }
 0x780   : > { %6368 = vst [vmem:[#allocation3 + $0x8] sm:$0xff] %v6350_v29  ;;  %v6391_v17 = vadd.f32 %v6350_v29, %v6348_v6  ;;  %v13006_v6 = vld [vmem:[#allocation2 + $0x38] sm:$0xff]  ;;  %v13010_v29 = vld [vmem:[#allocation2 + $0x28] sm:$0xff] }
 0x781   : > { %v5731_v13 = vmul.f32 %v11649_v20, %v13006_v6 }
 0x783   : > { %5744 = vadd.xlane.f32.xlu2 %v5731_v13 }
 0x785   : > { %v6352_v30 = vpop.f32.mrf.mxu3 }
 0x786   : > { %v6353_v2 = vadd.f32 %v7957_v10, %v6352_v30  ;;  %v7430_v30 = vld [vmem:[%s13205_s25 + $0x10] sm:$0xff] }
 0x787   : > { %6599 = vmatpush.bf16.msrb.mxu1 %v7430_v30 }
 0x788   : > { %6369 = vst [vmem:[#allocation3 + $0x10] sm:$0xff] %v6353_v2  ;;  %v6392_v44 = vadd.f32 %v6391_v17, %v6353_v2  ;;  %v5733_v2 = vmul.f32 %v11649_v20, %v13010_v29 }
 0x78a   : > { %5748 = vadd.xlane.f32.xlu1 %v5733_v2 }
 0x78b   : > { %6600 = vmatpush.bf16.msrb.mxu1 %v7429_v24 }
 0x78c   : > { %v5739_v63 = vpop.xlane.xlu1 %5738 }
 0x78d   : > { %v6354_v48 = vpop.f32.mrf.mxu3 }
 0x78e   : > { %v6355_v27 = vadd.f32 %v7957_v10, %v6354_v48 }
 0x790   : > { %6370 = vst [vmem:[#allocation3 + $0x18] sm:$0xff] %v6355_v27  ;;  %v6393_v40 = vadd.f32 %v6392_v44, %v6355_v27  ;;  %v7428_v27 = vld [vmem:[%s13205_s25] sm:$0xff] }
 0x791   : > { %6601 = vmatpush.bf16.msrb.mxu1 %v7428_v27 }
 0x795   : > { %v6357_v42 = vpop.f32.mrf.mxu3 }
 0x796   : > { %v6358_v54 = vadd.f32 %v7957_v10, %v6357_v42  ;;  %v5741_v49 = vpop.xlane.xlu1 %5740 }
 0x797   : > { %v13032_v53 = vmax.f32 %v5741_v49, 1.0 }
 0x798   : > { %6371 = vst [vmem:[#allocation3 + $0x20] sm:$0xff] %v6358_v54  ;;  %v6394_v38 = vadd.f32 %v6393_v40, %v6358_v54 }
 0x799   : > { %vm5808_vm5 = vweird.f32 %v13032_v53  ;;  %v5812_v2 = vand.u32 2147483647, %v13032_v53 }
 0x79d   : > { %v6359_v8 = vpop.f32.mrf.mxu3 }
 0x79e   : > { %v6360_v34 = vadd.f32 %v7957_v10, %v6359_v8 }
 0x7a0   : > { %6372 = vst [vmem:[#allocation3 + $0x28] sm:$0xff] %v6360_v34  ;;  %v6395_v28 = vadd.f32 %v6394_v38, %v6360_v34 }
 0x7a5   : > { %v6362_v22 = vpop.f32.mrf.mxu3 }
 0x7a6   : > { %v6363_v46 = vadd.f32 %v7957_v10, %v6362_v22 }
 0x7a8   : > { %6373 = vst [vmem:[#allocation3 + $0x30] sm:$0xff] %v6363_v46  ;;  %v6396_v52 = vadd.f32 %v6395_v28, %v6363_v46 }
 0x7ad   : > { %v6364_v12 = vpop.f32.mrf.mxu3 }
 0x7ae   : > { %v6365_v1 = vadd.f32 %v7957_v10, %v6364_v12  ;;  %v5752_v12 = vmax.f32 %v5739_v63, 1.0 }
 0x7b0   : > { %6374 = vst [vmem:[#allocation3 + $0x38] sm:$0xff] %v6365_v1  ;;  %v6397_v51 = vadd.f32 %v6396_v52, %v6365_v1  ;;  %v5743_v1 = vpop.xlane.xlu2 %5742  ;;  %v5799_v25 = vand.u32 2147483648, %v5752_v12  ;;  %vm5793_vm3 = vweird.f32 %v5752_v12 }
 0x7b2   : > { %v6398_v62 = vrot.slane %v6397_v51, 4 }
 0x7b4   : > { %v6399_v35 = vadd.f32 %v6398_v62, %v6397_v51  ;;  %v13030_v62 = vmax.f32 %v5743_v1, 1.0 }
 0x7b6   : > { %v6400_v45 = vrot.slane %v6399_v35, 2  ;;  %v5829_v0 = vand.u32 2147483648, %v13030_v62  ;;  %vm5823_vm14 = vweird.f32 %v13030_v62  ;;  %v5827_v30 = vand.u32 2147483647, %v13030_v62 }
 0x7b8   : > { %v6401_v59 = vadd.f32 %v6400_v45, %v6399_v35  ;;  %v5797_v45 = vand.u32 2147483647, %v5752_v12 }
 0x7ba   : > { %v6402_v41 = vrot.slane %v6401_v59, 1  ;;  %vm13039_vm4 = vcmp.eq.f32.partialorder %v5797_v45, 8.507059e+37 }
 0x7bc   : > { %v6403_v61 = vadd.f32 %v6402_v41, %v6401_v59 }
 0x7be   : > { %v6411_v58 = vmul.f32 %v6410_v56, %v6403_v61 }
 0x7c0   : > { %v6413_v31 = vpack.c.bf16 %v6411_v58, %v6411_v58 }
 0x7c2   : > { %6486 = vmatmul.bf16.vlgmr.msrb.gmra.mxu2 %v6413_v31 }
 0x7d2   : > { %7317 = vmatmul.msk.bf16.vlgmr.msra.gmra.mxu2 %vm6064_vm2, %v12798_v9  ;;  %v5726_v9 = vmul.f32 %v11649_v20, %v12985_v19  ;;  %v6507_v20 = vld [vmem:[%s13204_s24] sm:$0x1] }
 0x7d4   : > { %5734 = vadd.xlane.f32.xlu0 %v5726_v9  ;;  %v5800_v9 = vor.u32 1.1754944e-38, %v5799_v25 }
 0x7dc   : > { %5736 = vadd.xlane.f32.xlu0 %v5727_v7 }
 0x7e4   : > { %5746 = vadd.xlane.f32.xlu0 %v5732_v33 }
 0x7f6   : > { %v5745_v33 = vpop.xlane.xlu2 %5744 }
 0x7fd   : > { %v5749_v24 = vpop.xlane.xlu1 %5748 }
 0x845   : > { %v6487_v10 = vpop.f32.mrf.mxu2 }
 0x847   : > { %v5735_v28 = vpop.xlane.xlu0 %5734 }
 0x848   : > { %v5750_v52 = vmax.f32 %v5735_v28, 1.0 }
 0x84a   : > { %v5767_v56 = vand.u32 2147483647, %v5750_v52  ;;  %v5769_v61 = vand.u32 2147483648, %v5750_v52  ;;  %vm5763_vm13 = vweird.f32 %v5750_v52 }
 0x84c   : > { %vm13048_vm1 = vcmp.eq.f32.partialorder %v5767_v56, 8.507059e+37 }
 0x84d   : > { %v6489_v48 = vpop.f32.mrf.mxu2 }
 0x84f   : > { %v5737_v18 = vpop.xlane.xlu0 %5736 }
 0x850   : > { %v13034_v59 = vmax.f32 %v5737_v18, 1.0 }
 0x852   : > { %vm5778_vm9 = vweird.f32 %v13034_v59  ;;  %v5784_v28 = vand.u32 2147483648, %v13034_v59 }
 0x855   : > { %v6503_v4 = vpop.f32.mrf.mxu2 }
 0x856   : > { %v6504_v14 = vadd.f32 %v6503_v4, %v6487_v10  ;;  %v5770_v10 = vor.u32 1.1754944e-38, %v5769_v61  ;;  %v5830_v4 = vor.u32 1.1754944e-38, %v5829_v0 }
 0x857   : > { %v5747_v49 = vpop.xlane.xlu0 %5746 }
 0x858   : > { %v6508_v42 = vadd.f32 %v6507_v20, %v6504_v14  ;;  %v5814_v20 = vand.u32 2147483648, %v13032_v53  ;;  %v5756_v56 = vmax.f32 %v5747_v49, 1.0 }
 0x85a   : > { %v7318_v54 = vmul.f32 -1.442695, %v6508_v42 }
 0x85c   : > { %7992 = vpow2.f32 %v7318_v54 }
 0x85d   : > { %v6505_v50 = vpop.f32.mrf.mxu2 }
 0x85e   : > { %v5782_v50 = vand.u32 2147483647, %v13034_v59 }
 0x862   : > { %v7993_v55 = vpop.eup %7992 }
 0x863   : > { %v6512_v3 = vadd.f32 1.0, %v7993_v55  ;;  %v13066_v55 = vmax.f32 %v5745_v33, 1.0 }
 0x865   : > { %7994 = vrcp.f32 %v6512_v3  ;;  %v6524_v21 = vand.u32 2147483648, %v6512_v3  ;;  %v6522_v17 = vand.u32 2147483647, %v6512_v3  ;;  %vm6518_vm7 = vweird.f32 %v6512_v3 }
 0x866   : > { %7996 = vrcp.f32 %v5752_v12  ;;  %v5842_v32 = vand.u32 2147483647, %v13066_v55  ;;  %v5844_v7 = vand.u32 2147483648, %v13066_v55 }
 0x867   : > { %v6525_v44 = vor.u32 1.1754944e-38, %v6524_v21  ;;  %vm6523_vm12 = vcmp.eq.f32.partialorder %v6522_v17, 8.507059e+37  ;;  %7998 = vrcp.f32 %v5750_v52 }
 0x868   : > { %8000 = vrcp.f32 %v13030_v62 }
 0x869   : > { %8002 = vrcp.f32 %v13032_v53 }
 0x86a   : > { %8004 = vrcp.f32 %v13034_v59 }
 0x86b   : > { %v7995_v8 = vpop.eup %7994  ;;  %8006 = vrcp.f32 %v13066_v55 }
 0x86c   : > { %v6514_v37 = vmul.f32 %v7995_v8, %v6512_v3  ;;  %vm6519_vm2 = vweird.f32 %v7995_v8  ;;  %v7997_v51 = vpop.eup %7996 }
 0x86d   : > { %vm6520_vm10 = vmor %vm6518_vm7, %vm6519_vm2  ;;  %v7999_v35 = vpop.eup %7998  ;;  %v5789_v60 = vmul.f32 %v7997_v51, %v5752_v12  ;;  %vm5794_vm0 = vweird.f32 %v7997_v51  ;;  %v13850_v12 = vld [vmem:[#allocation19_spill] sm:$0xff] }
 0x86e   : > { %v6515_v34 = vsub.f32 1.0, %v6514_v37  ;;  %v5759_v41 = vmul.f32 %v7999_v35, %v5750_v52  ;;  %vm5764_vm8 = vweird.f32 %v7999_v35  ;;  %vm13044_vm11 = vmor %vm5793_vm3, %vm5794_vm0  ;;  %v8001_v48 = vpop.eup %8000  ;;  %vm5813_vm0 = vcmp.eq.f32.partialorder %v5812_v2, 8.507059e+37  ;;  %v13860_v2 = vld [vmem:[#allocation16_spill] sm:$0xff] }
 0x86f   : > { %v5790_v58 = vsub.f32 1.0, %v5789_v60  ;;  %vm13053_vm15 = vmor %vm5763_vm13, %vm5764_vm8  ;;  %v8003_v14 = vpop.eup %8002  ;;  %v5819_v54 = vmul.f32 %v8001_v48, %v13030_v62  ;;  %vm5824_vm6 = vweird.f32 %v8001_v48  ;;  %vm13106_vm8 = vcmp.eq.f32.partialorder %v5782_v50, 8.507059e+37 }
 0x870   : > { %v6516_v16 = vmul.f32 %v7995_v8, %v6515_v34  ;;  %v5760_v31 = vsub.f32 1.0, %v5759_v41  ;;  %v5804_v37 = vmul.f32 %v8003_v14, %v13032_v53  ;;  %v13073_v34 = vmax.f32 %v5749_v24, 1.0  ;;  %v8005_v21 = vpop.eup %8004  ;;  %vm13086_vm7 = vmor %vm5823_vm14, %vm5824_vm6 }
 0x871   : > { %v5791_v43 = vmul.f32 %v7997_v51, %v5790_v58  ;;  %vm5809_vm2 = vweird.f32 %v8003_v14  ;;  %v5785_v41 = vor.u32 1.1754944e-38, %v5784_v28  ;;  %v8007_v0 = vpop.eup %8006 }
 0x872   : > { %v6517_v22 = vadd.f32 %v7995_v8, %v6516_v16  ;;  %v5761_v39 = vmul.f32 %v7999_v35, %v5760_v31  ;;  %vm13093_vm3 = vmor %vm5808_vm5, %vm5809_vm2  ;;  %8008 = vrcp.f32 %v13073_v34  ;;  %vm13137_vm5 = vcmp.eq.f32.partialorder %v5842_v32, 8.507059e+37 }
 0x873   : > { %v5792_v5 = vadd.f32 %v7997_v51, %v5791_v43  ;;  %8010 = vrcp.f32 %v5756_v56  ;;  %vm5853_vm2 = vweird.f32 %v5756_v56 }
 0x874   : > { %v6521_v46 = vsel %vm6520_vm10, %v7995_v8, %v6517_v22  ;;  %v5762_v27 = vadd.f32 %v7999_v35, %v5761_v39  ;;  %v5820_v22 = vsub.f32 1.0, %v5819_v54  ;;  %vm5779_vm10 = vweird.f32 %v8005_v21 }
 0x875   : > { %v6526_v23 = vsel %vm6523_vm12, %v6525_v44, %v6521_v46  ;;  %v5805_v46 = vsub.f32 1.0, %v5804_v37  ;;  %vm5828_vm12 = vcmp.eq.f32.partialorder %v5827_v30, 8.507059e+37  ;;  %vm13102_vm13 = vmor %vm5778_vm9, %vm5779_vm10  ;;  %v5834_v39 = vmul.f32 %v8007_v0, %v13066_v55 }
 0x876   : > { %v6528_v40 = vmul.f32 %v6526_v23, %v6508_v42  ;;  %v5796_v42 = vsel %vm13044_vm11, %v7997_v51, %v5792_v5  ;;  %v5766_v8 = vsel %vm13053_vm15, %v7999_v35, %v5762_v27  ;;  %v5774_v23 = vmul.f32 %v8005_v21, %v13034_v59  ;;  %v13859_v5 = vld [vmem:[#allocation15_spill] sm:$0xff] }
 0x877   : > { %v5801_v3 = vsel %vm13039_vm4, %v5800_v9, %v5796_v42  ;;  %v5771_v17 = vsel %vm13048_vm1, %v5770_v10, %v5766_v8  ;;  %v5821_v63 = vmul.f32 %v8001_v48, %v5820_v22  ;;  %v5815_v35 = vor.u32 1.1754944e-38, %v5814_v20 }
 0x878   : > { %v6529_v38 = vpack.c.bf16 %v6528_v40, %v6528_v40  ;;  %v5880_v16 = vmul.f32 %v5801_v3, %v12983_v15  ;;  %v5878_v44 = vmul.f32 %v5771_v17, %v12985_v19  ;;  %v13849_v40 = vld [vmem:[#allocation17_spill] sm:$0xff]  ;;  %v5806_v19 = vmul.f32 %v8003_v14, %v5805_v46  ;;  %v8009_v10 = vpop.eup %8008 }
 0x879   : > { %v5775_v1 = vsub.f32 1.0, %v5774_v23  ;;  %v5822_v51 = vadd.f32 %v8001_v48, %v5821_v63  ;;  %vm5838_vm4 = vweird.f32 %v13066_v55  ;;  %vm5839_vm11 = vweird.f32 %v8007_v0  ;;  %v8011_v54 = vpop.eup %8010 }
 0x87a   : > { %6602 = vmatmul.bf16.vlgmr.msrb.gmra.mxu1 %v6529_v38  ;;  %v6377_v38 = vadd.f32 %v5880_v16, %v13849_v40  ;;  %v6375_v15 = vadd.f32 %v5878_v44, %v13850_v12  ;;  %v5807_v62 = vadd.f32 %v8003_v14, %v5806_v19  ;;  %v5835_v24 = vsub.f32 1.0, %v5834_v39  ;;  %vm13133_vm15 = vmor %vm5838_vm4, %vm5839_vm11  ;;  %v13866_v12 = vld [vmem:[#allocation14_spill] sm:$0xff] }
 0x87b   : > { %v5776_v60 = vmul.f32 %v8005_v21, %v5775_v1  ;;  %v5826_v45 = vsel %vm13086_vm7, %v8001_v48, %v5822_v51  ;;  %v5864_v48 = vmul.f32 %v8009_v10, %v13073_v34  ;;  %vm5868_vm1 = vweird.f32 %v13073_v34  ;;  %v13867_v1 = vld [vmem:[#allocation12_spill] sm:$0xff] }
 0x87c   : > { %6385 = vst [vmem:[#allocation5 + $0x10] sm:$0xff] %v6377_v38  ;;  %v5831_v61 = vsel %vm5828_vm12, %v5830_v4, %v5826_v45  ;;  %v5811_v58 = vsel %vm13093_vm3, %v8003_v14, %v5807_v62  ;;  %v5874_v27 = vand.u32 2147483648, %v13073_v34  ;;  %v13861_v4 = vld [vmem:[#allocation18_spill] sm:$0xff]  ;;  %v5836_v14 = vmul.f32 %v8007_v0, %v5835_v24 }
 0x87d   : > { %6383 = vst [vmem:[#allocation5] sm:$0xff] %v6375_v15  ;;  %v5777_v31 = vadd.f32 %v8005_v21, %v5776_v60  ;;  %v5882_v59 = vmul.f32 %v5831_v61, %v12991_v47  ;;  %v5816_v43 = vsel %vm5813_vm0, %v5815_v35, %v5811_v58  ;;  %v5872_v47 = vand.u32 2147483647, %v13073_v34 }
 0x87e   : > { %v5881_v9 = vmul.f32 %v5816_v43, %v12993_v11  ;;  %v5865_v42 = vsub.f32 1.0, %v5864_v48  ;;  %vm5869_vm14 = vweird.f32 %v8009_v10  ;;  %v5845_v3 = vor.u32 1.1754944e-38, %v5844_v7 }
 0x87f   : > { %v5781_v57 = vsel %vm13102_vm13, %v8005_v21, %v5777_v31  ;;  %v6379_v13 = vadd.f32 %v5882_v59, %v13859_v5  ;;  %v5837_v8 = vadd.f32 %v8007_v0, %v5836_v14  ;;  %vm5873_vm9 = vcmp.eq.f32.partialorder %v5872_v47, 8.507059e+37  ;;  %vm5870_vm6 = vmor %vm5868_vm1, %vm5869_vm14 }
 0x880   : > { %v5786_v30 = vsel %vm13106_vm8, %v5785_v41, %v5781_v57  ;;  %v6378_v33 = vadd.f32 %v5881_v9, %v13860_v2  ;;  %v5866_v37 = vmul.f32 %v8009_v10, %v5865_v42  ;;  %v5849_v21 = vmul.f32 %v8011_v54, %v5756_v56 }
 0x881   : > { %v5879_v11 = vmul.f32 %v5786_v30, %v12995_v36  ;;  %6387 = vst [vmem:[#allocation5 + $0x20] sm:$0xff] %v6379_v13  ;;  %v5875_v16 = vor.u32 1.1754944e-38, %v5874_v27  ;;  %v5857_v55 = vand.u32 2147483647, %v5756_v56  ;;  %v5859_v17 = vand.u32 2147483648, %v5756_v56 }
 0x882   : > { %6386 = vst [vmem:[#allocation5 + $0x18] sm:$0xff] %v6378_v33  ;;  %v5841_v22 = vsel %vm13133_vm15, %v8007_v0, %v5837_v8  ;;  %v5867_v44 = vadd.f32 %v8009_v10, %v5866_v37  ;;  %v5850_v46 = vsub.f32 1.0, %v5849_v21  ;;  %vm5854_vm7 = vweird.f32 %v8011_v54 }
 0x883   : > { %v6376_v20 = vadd.f32 %v5879_v11, %v13861_v4  ;;  %v5846_v23 = vsel %vm13137_vm5, %v5845_v3, %v5841_v22  ;;  %vm5855_vm10 = vmor %vm5853_vm2, %vm5854_vm7  ;;  %v5860_v34 = vor.u32 1.1754944e-38, %v5859_v17  ;;  %vm5858_vm12 = vcmp.eq.f32.partialorder %v5857_v55, 8.507059e+37 }
 0x884   : > { %v5883_v40 = vmul.f32 %v5846_v23, %v13006_v6  ;;  %v5871_v38 = vsel %vm5870_vm6, %v8009_v10, %v5867_v44  ;;  %v5851_v63 = vmul.f32 %v8011_v54, %v5850_v46  ;;  %v13868_v6 = vld [vmem:[#allocation13_spill] sm:$0xff] }
 0x885   : > { %6384 = vst [vmem:[#allocation5 + $0x8] sm:$0xff] %v6376_v20  ;;  %v5876_v28 = vsel %vm5873_vm9, %v5875_v16, %v5871_v38 }
 0x886   : > { %v6380_v15 = vadd.f32 %v5883_v40, %v13866_v12  ;;  %v5885_v52 = vmul.f32 %v5876_v28, %v13010_v29  ;;  %v5852_v19 = vadd.f32 %v8011_v54, %v5851_v63 }
 0x888   : > { %6388 = vst [vmem:[#allocation5 + $0x28] sm:$0xff] %v6380_v15  ;;  %v6382_v49 = vadd.f32 %v5885_v52, %v13867_v1  ;;  %v5856_v51 = vsel %vm5855_vm10, %v8011_v54, %v5852_v19 }
 0x889   : > { %v5861_v18 = vsel %vm5858_vm12, %v5860_v34, %v5856_v51 }
 0x88a   : > { %6390 = vst [vmem:[#allocation5 + $0x38] sm:$0xff] %v6382_v49  ;;  %v5884_v35 = vmul.f32 %v5861_v18, %v13012_v26 }
 0x88c   : > { %v6381_v62 = vadd.f32 %v5884_v35, %v13868_v6 }
 0x88e   : > { %6389 = vst [vmem:[#allocation5 + $0x30] sm:$0xff] %v6381_v62 }
 0x8f7   : > { %v6603_v60 = vpop.f32.mrf.mxu1 }
 0x8f8   : > { %6607 = vst [vmem:[#allocation7] sm:$0x1] %v6603_v60 }
 0x8ff   : > { %v6605_v45 = vpop.f32.mrf.mxu1 }
 0x900 PF: > { %p7457_p7 = scmp.eq.s32.totalorder %s8274_s5, 1  ;;  %s8118_s10 = smov [#allocation5]  }
 0x901   : > { %s6627_s29 = sshll.u32 %s8118_s10, 4  ;;  %s6629_s2 = sshll.u32 %s13207_s27, 4  ;;  %s6628_s29 = int_to_ptr.vmem [resolvable:$true] %s6627_s29  ;;  %s6630_s2 = int_to_ptr.hbm [resolvable:$true] %s6629_s2 }
 0x902   : > { %s8119_s1 = smov 128   ;;  %s8120_s3 = smov 8  }
 0x903   : > { %7448 = dma.vmem_to_hbm [thread:$0]  (%p7457_p7), %s6628_s29, 1024, %s6630_s2, [#allocation6], %s8119_s1, %s8119_s1, %s8120_s3  }
 0x904   : > { %s13869_s28 = sld [smem:[#allocation99_spill]]  ;;  %s8121_s7 = smov [#allocation3]  }
 0x905   : > { %s6613_s9 = sshll.u32 %s8121_s7, 4  ;;  %s8122_s10 = smov [#allocation7]   ;;  %s6614_s9 = int_to_ptr.vmem [resolvable:$true] %s6613_s9 }
 0x906   : > { %s6642_s30 = sshll.u32 %s8122_s10, 4  ;;  %s13870_s12 = sld [smem:[#allocation100_spill]]  ;;  %s6643_s30 = int_to_ptr.vmem [resolvable:$true] %s6642_s30 }
 0x90a   : > { %s6615_s8 = sshll.u32 %s13869_s28, 4  ;;  %s6616_s8 = int_to_ptr.hbm [resolvable:$true] %s6615_s8 }
 0x90b   : > { %7446 = dma.vmem_to_hbm [thread:$0]  (%p7457_p7), %s6614_s9, 1024, %s6616_s8, [#allocation4], %s8119_s1, %s8119_s1, %s8120_s3  }
 0x90c   : > { %s6644_s13 = sshll.u32 %s13870_s12, 4  ;;  %s6645_s13 = int_to_ptr.hbm [resolvable:$true] %s6644_s13 }
 0x90d   : > { %7450 = dma.vmem_to_hbm [thread:$0]  (%p7457_p7), %s6643_s30, 16, %s6645_s13, [#allocation6]  }
 0x90e   : > { %8101 = dma.done.wait (%p7457_p7), [#allocation4], 1024  }
 0x90f   : > { %8103 = vsyncadd (%p7457_p7), [#allocation4], 4294966272 }
 0x910   : > { %8105 = dma.done.wait (%p7457_p7), [#allocation6], 1040  }
 0x911   : > { %8107 = vsyncadd (%p7457_p7), [#allocation6], 4294966256 }
 0x912 PF: > { %s13871_s9 = sld [smem:[#allocation10_spill]] }
 0x918   : > { %s41_s8 = sadd.s32 1, %s13871_s9  }
 0x919   : > { %p38_p8 = scmp.ge.s32.totalorder %s41_s8, 4  }
 0x91b   :  { %40 = sbr.rel (!%p38_p8) target bundleno = 19 (0x13), region = 181 }
 0x920   :  { %6668 = vsyncpa [#allocation4], 1 }
 0x921   :  { %6670 = vsyncpa [#allocation4 + $0x1], 1 }
 0x922   :  { %6671 = vsyncpa [#allocation6], 1 }

</bundles_post_ra>
